<compile_context>
chip_gen: v7x
topology: tpu7x:2x2x1
jax: 0.10.0
libtpu: 0.0.40
codegen_flags: <defaults>
</compile_context>

<pallas_src>
import jax
import jax.numpy as jnp
from jax.experimental import pallas as pl
from jax.experimental.pallas import tpu as pltpu

LANE = 128


# ------------------------------ small helpers -------------------------------

def _round_up(x, m):
    return ((x + m - 1) // m) * m


def _pad_last(x, size):
    c = x.shape[-1]
    if c == size:
        return x
    pad = [(0, 0)] * (x.ndim - 1) + [(0, size - c)]
    return jnp.pad(x, pad)


def _prep_weight(w, cin_p, cout_p):
    """(3,3,Cin,Cout) -> (9*cin_p, cout_p), zero padded, tap-major layout."""
    kh, kw, cin, cout = w.shape
    wp = jnp.zeros((kh, kw, cin_p, cout_p), w.dtype)
    wp = wp.at[:, :, :cin, :cout].set(w)
    return wp.reshape(kh * kw * cin_p, cout_p)


def _prep_bias(b, cout_p):
    bp = jnp.zeros((1, cout_p), b.dtype)
    return bp.at[0, :b.shape[0]].set(b)


def _pick_tile_h(H, W, max_rows=128):
    """Largest divisor of H with TH*W <= max_rows (>=128-row matmul tiles)."""
    best = 1
    for th in range(1, H + 1):
        if H % th == 0 and th * W <= max(max_rows, W):
            best = th
    return best


# ------------------------------ Pallas kernels ------------------------------

def _make_conv_kernel(n_in, has_prologue, want_stats, TH, H, W, cps, coutp):
    """3x3 'same' conv over one (N, H, W, Cp) image per batch element.

    The full image is resident in VMEM; a spatially zero-padded (and optionally
    BN+ReLU-prologue-transformed) copy is built once per batch element in
    scratch, then each row-tile does one folded-K matmul.
    """

    def kernel(*refs):
        i = 0
        x_refs = refs[i:i + n_in]; i += n_in
        if has_prologue:
            scale_ref, shift_ref = refs[i], refs[i + 1]; i += 2
        w_refs = refs[i:i + n_in]; i += n_in
        b_ref = refs[i]; i += 1
        o_ref = refs[i]; i += 1
        st_ref = None
        if want_stats:
            st_ref = refs[i]; i += 1
        pads = refs[i:i + n_in]

        t = pl.program_id(1)

        # Fill the spatially zero-padded copies of each full input image once
        # per batch element; they stay resident in VMEM scratch for all row
        # tiles (row-tile axis is marked "arbitrary" so this ordering holds).
        @pl.when(t == 0)
        def _fill():
            for k in range(n_in):
                v = x_refs[k][0].astype(jnp.float32)              # (H, W, Cp)
                if has_prologue:                                   # BN + ReLU of
                    v = jnp.maximum(v * scale_ref[...] + shift_ref[...], 0.0)
                pads[k][...] = jnp.zeros_like(pads[k])
                pads[k][1:1 + H, 1:1 + W, :] = v

        r0 = pl.multiple_of(t * TH, TH)
        acc = None
        for k in range(n_in):
            win = pads[k][pl.ds(r0, TH + 2)]                       # (TH+2, W+2, Cp)
            taps = [win[dh:dh + TH, dw:dw + W, :].reshape(TH * W, cps[k])
                    for dh in range(3) for dw in range(3)]
            xt = jnp.concatenate(taps, axis=-1)                    # (TH*W, 9*Cp)
            d = jnp.dot(xt, w_refs[k][...],
                        preferred_element_type=jnp.float32)
            acc = d if acc is None else acc + d
        acc = acc + b_ref[...]                                     # broadcast bias

        o_ref[0] = acc.reshape(TH, W, coutp).astype(o_ref.dtype)

        if want_stats:
            s1 = jnp.sum(acc, axis=0, keepdims=True)               # (1, Coutp)
            s2 = jnp.sum(acc * acc, axis=0, keepdims=True)
            st_ref[0, 0] = jnp.concatenate(
                [s1, s2, jnp.zeros((6, coutp), jnp.float32)], axis=0)

    return kernel


def _conv3x3_pallas(inputs, weights, bias, *, prologue=None, want_stats=False,
                    tile_h=None):
    """Fused 3x3 'same' conv.

    inputs   : list of (N,H,W,Cp) arrays, channels padded to a multiple of 128.
    weights  : list of (9*Cp_i, Coutp) tap-major padded weights.
    bias     : (1, Coutp).
    prologue : None or (scale, shift), each (1, Cp) -- affine+ReLU applied to
               the (single) input in-kernel (fuses the previous BN+ReLU).
    want_stats: also return (N, T, 8, Coutp) with sublane 0 = channel sums and
               sublane 1 = channel sums-of-squares of the raw conv output.
    """
    n_in = len(inputs)
    N, H, W, _ = inputs[0].shape
    cps = tuple(int(a.shape[-1]) for a in inputs)
    coutp = int(bias.shape[-1])
    TH = tile_h or _pick_tile_h(H, W)
    T = H // TH
    has_prologue = prologue is not None
    assert not (has_prologue and n_in != 1), "prologue only for single input"

    kernel = _make_conv_kernel(n_in, has_prologue, want_stats, TH, H, W,
                               cps, coutp)

    in_specs, call_args = [], []
    for k in range(n_in):
        in_specs.append(pl.BlockSpec((1, H, W, cps[k]),
                                     lambda n, t: (n, 0, 0, 0)))
        call_args.append(inputs[k])
    if has_prologue:
        scale, shift = prologue
        in_specs += [pl.BlockSpec((1, cps[0]), lambda n, t: (0, 0)),
                     pl.BlockSpec((1, cps[0]), lambda n, t: (0, 0))]
        call_args += [scale, shift]
    for k in range(n_in):
        in_specs.append(pl.BlockSpec((9 * cps[k], coutp),
                                     lambda n, t: (0, 0)))
        call_args.append(weights[k])
    in_specs.append(pl.BlockSpec((1, coutp), lambda n, t: (0, 0)))
    call_args.append(bias)

    out_shapes = [jax.ShapeDtypeStruct((N, H, W, coutp), inputs[0].dtype)]
    out_specs = [pl.BlockSpec((1, TH, W, coutp), lambda n, t: (n, t, 0, 0))]
    if want_stats:
        out_shapes.append(jax.ShapeDtypeStruct((N, T, 8, coutp), jnp.float32))
        out_specs.append(pl.BlockSpec((1, 1, 8, coutp),
                                      lambda n, t: (n, t, 0, 0)))

    scratch = [pltpu.VMEM((H + 2, W + 2, cps[k]), jnp.float32)
               for k in range(n_in)]

    flops = 2 * N * H * W * coutp * 9 * sum(cps)
    bytes_accessed = 4 * (N * H * W * (sum(cps) + coutp)
                          + 9 * sum(cps) * coutp)
    cost = pl.CostEstimate(flops=flops, transcendentals=0,
                           bytes_accessed=bytes_accessed)

    return pl.pallas_call(
        kernel,
        grid=(N, T),
        in_specs=in_specs,
        out_specs=out_specs if want_stats else out_specs[0],
        out_shape=out_shapes if want_stats else out_shapes[0],
        scratch_shapes=scratch,
        compiler_params=pltpu.CompilerParams(
            dimension_semantics=("parallel", "arbitrary")),
        cost_estimate=cost,
    )(*call_args)


def _bn_relu_kernel(x_ref, s_ref, b_ref, o_ref):
    y = x_ref[...].astype(jnp.float32) * s_ref[...] + b_ref[...]
    o_ref[...] = jnp.maximum(y, 0.0).astype(o_ref.dtype)


def _bn_relu_pallas(x, scale, shift, tile_h=None):
    N, H, W, C = x.shape
    TH = tile_h or _pick_tile_h(H, W)
    T = H // TH
    return pl.pallas_call(
        _bn_relu_kernel,
        grid=(N, T),
        in_specs=[pl.BlockSpec((1, TH, W, C), lambda n, t: (n, t, 0, 0)),
                  pl.BlockSpec((1, C), lambda n, t: (0, 0)),
                  pl.BlockSpec((1, C), lambda n, t: (0, 0))],
        out_specs=pl.BlockSpec((1, TH, W, C), lambda n, t: (n, t, 0, 0)),
        out_shape=jax.ShapeDtypeStruct((N, H, W, C), x.dtype),
        compiler_params=pltpu.CompilerParams(
            dimension_semantics=("parallel", "parallel")),
    )(x, scale, shift)


def _bn_scale_shift(stats, gamma_p, beta_p, count, eps):
    """Reduce per-block (sum, sum-of-squares) to BN scale/shift (biased var)."""
    s1 = jnp.sum(stats[:, :, 0, :], axis=(0, 1))
    s2 = jnp.sum(stats[:, :, 1, :], axis=(0, 1))
    mean = s1 / count
    var = jnp.maximum(s2 / count - mean * mean, 0.0)
    scale = gamma_p / jnp.sqrt(var + eps)
    shift = beta_p - mean * scale
    return scale.reshape(1, -1), shift.reshape(1, -1)


# --------------------------------- forward ----------------------------------

def upconv2d_forward(x_nchw, skip_nchw, params, eps=1e-5):
    """UpConv2D.forward (transpose=False, dropout_p=0.0, norm='bn').

    BatchNorm uses training-mode biased batch statistics (fresh torch module in
    train()); eval()/running-stats behavior is not modeled.
    """
    out_ch = params["up_w"].shape[-1]
    cin = x_nchw.shape[1]
    cp_in = _round_up(cin, LANE)
    cp_out = _round_up(out_ch, LANE)

    # NCHW -> NHWC, channels zero-padded to the 128-lane width (lane-dense).
    x = _pad_last(jnp.transpose(x_nchw, (0, 2, 3, 1)), cp_in)
    skip = _pad_last(jnp.transpose(skip_nchw, (0, 2, 3, 1)), cp_out)

    # nearest 2x upsample (wrapper side).
    # TODO(synk): fold into the up-conv kernel's tap generation.
    x = jnp.repeat(jnp.repeat(x, 2, axis=1), 2, axis=2)

    # upconv = Conv2d(in_ch, out_ch, 3, padding=1) on the upsampled input.
    up = _conv3x3_pallas(
        [x], [_prep_weight(params["up_w"], cp_in, cp_out)],
        _prep_bias(params["up_b"], cp_out))

    # Pad `up` spatially to skip size if smaller (per-dim, robust version of
    # the module's tuple comparison -- identical for the standard UNet case).
    uh, uw = up.shape[1], up.shape[2]
    sh, sw = skip.shape[1], skip.shape[2]
    y_diff, x_diff = max(sh - uh, 0), max(sw - uw, 0)
    if y_diff or x_diff:
        up = jnp.pad(up, ((0, 0),
                          (y_diff // 2, y_diff // 2 + y_diff % 2),
                          (x_diff // 2, x_diff // 2 + x_diff % 2),
                          (0, 0)))

    N, Ho, Wo = up.shape[0], up.shape[1], up.shape[2]
    count = N * Ho * Wo

    gamma1 = _pad_last(params["bn1_g"], cp_out)
    beta1 = _pad_last(params["bn1_b"], cp_out)
    gamma2 = _pad_last(params["bn2_g"], cp_out)
    beta2 = _pad_last(params["bn2_b"], cp_out)

    # double_conv stage 1: conv(cat(up, skip)) as a dual-input conv (the
    # concatenated tensor is never materialized); also emits BN1 statistics.
    w1 = params["c1_w"]
    w1_up = _prep_weight(w1[:, :, :out_ch, :], cp_out, cp_out)
    w1_sk = _prep_weight(w1[:, :, out_ch:, :], cp_out, cp_out)
    h1, st1 = _conv3x3_pallas([up, skip], [w1_up, w1_sk],
                              _prep_bias(params["c1_b"], cp_out),
                              want_stats=True)
    scale1, shift1 = _bn_scale_shift(st1, gamma1, beta1, count, eps)

    # stage 2: BN1 + ReLU fused as this conv's input prologue; emits BN2 stats.
    h2, st2 = _conv3x3_pallas([h1],
                              [_prep_weight(params["c2_w"], cp_out, cp_out)],
                              _prep_bias(params["c2_b"], cp_out),
                              prologue=(scale1, shift1), want_stats=True)
    scale2, shift2 = _bn_scale_shift(st2, gamma2, beta2, count, eps)

    # final BN2 + ReLU (small elementwise Pallas pass).
    out = _bn_relu_pallas(h2, scale2, shift2)

    # drop channel padding, NHWC -> NCHW.
    return jnp.transpose(out[..., :out_ch], (0, 3, 1, 2))


# ------------------------- reference & parameter init -----------------------

def reference_forward(x_nchw, skip_nchw, params, eps=1e-5):
    """Plain-JAX reference of the same forward pass (for correctness check)."""
    def conv3x3(v, w, b):
        return jax.lax.conv_general_dilated(
            v, w, window_strides=(1, 1), padding="SAME",
            dimension_numbers=("NHWC", "HWIO", "NHWC")) + b

    def bn_relu(v, g, b):
        m = jnp.mean(v, axis=(0, 1, 2))
        var = jnp.mean((v - m) ** 2, axis=(0, 1, 2))
        return jnp.maximum((v - m) / jnp.sqrt(var + eps) * g + b, 0.0)

    x = jnp.transpose(x_nchw, (0, 2, 3, 1))
    skip = jnp.transpose(skip_nchw, (0, 2, 3, 1))
    x = jnp.repeat(jnp.repeat(x, 2, axis=1), 2, axis=2)
    up = conv3x3(x, params["up_w"], params["up_b"])
    uh, uw = up.shape[1], up.shape[2]
    sh, sw = skip.shape[1], skip.shape[2]
    yd, xd = max(sh - uh, 0), max(sw - uw, 0)
    if yd or xd:
        up = jnp.pad(up, ((0, 0), (yd // 2, yd // 2 + yd % 2),
                          (xd // 2, xd // 2 + xd % 2), (0, 0)))
    h = jnp.concatenate([up, skip], axis=-1)
    h = bn_relu(conv3x3(h, params["c1_w"], params["c1_b"]),
                params["bn1_g"], params["bn1_b"])
    h = bn_relu(conv3x3(h, params["c2_w"], params["c2_b"]),
                params["bn2_g"], params["bn2_b"])
    return jnp.transpose(h, (0, 3, 1, 2))


def init_params(key, in_ch, out_ch):
    """Deterministic synthetic parameters (shapes match the torch module)."""
    ks = jax.random.split(key, 6)

    def conv_w(k, cin, cout):
        bound = 1.0 / (cin * 9.0) ** 0.5
        return jax.random.uniform(k, (3, 3, cin, cout), jnp.float32,
                                  -bound, bound)

    def conv_b(k, cin, cout):
        bound = 1.0 / (cin * 9.0) ** 0.5
        return jax.random.uniform(k, (cout,), jnp.float32, -bound, bound)

    return {
        "up_w": conv_w(ks[0], in_ch, out_ch),
        "up_b": conv_b(ks[1], in_ch, out_ch),
        "c1_w": conv_w(ks[2], 2 * out_ch, out_ch),
        "c1_b": conv_b(ks[3], 2 * out_ch, out_ch),
        "c2_w": conv_w(ks[4], out_ch, out_ch),
        "c2_b": conv_b(ks[5], out_ch, out_ch),
        "bn1_g": jnp.ones((out_ch,), jnp.float32),
        "bn1_b": jnp.zeros((out_ch,), jnp.float32),
        "bn2_g": jnp.ones((out_ch,), jnp.float32),
        "bn2_b": jnp.zeros((out_ch,), jnp.float32),
    }


if __name__ == "__main__":
    key = jax.random.PRNGKey(0)
    N, in_ch, out_ch = 2, 4, 4
    H, W = 8, 8                       # low-res input; skip is 2x spatial
    k_x, k_s, k_p = jax.random.split(key, 3)
    x = jax.random.normal(k_x, (N, in_ch, H, W), jnp.float32)
    skip_x = jax.random.normal(k_s, (N, out_ch, 2 * H, 2 * W), jnp.float32)
    params = init_params(k_p, in_ch, out_ch)

    fwd = jax.jit(lambda a, b: upconv2d_forward(a, b, params))
    y = fwd(x, skip_x)
    jax.block_until_ready(y)

    assert y.shape == (N, out_ch, 2 * H, 2 * W), y.shape
    assert bool(jnp.all(y >= 0.0))    # ends with ReLU

    # Correctness vs plain-JAX reference.  Loose tolerance: both paths use the
    # TPU's default (bf16-pass) matmul precision and BN amplifies by 1/std.
    y_ref = jax.jit(lambda a, b: reference_forward(a, b, params))(x, skip_x)
    err = float(jnp.max(jnp.abs(y - y_ref)))
    assert err < 0.1, f"max abs error vs reference: {err}"

    print("KERNEL_OK")
</pallas_src>

<mosaic_0001>
module attributes {stable_mosaic.version = 11 : i64} {
  func.func @kernel(%arg0: i32, %arg1: i32, %arg2: memref<1x16x16x128xf32, #tpu.memory_space<vmem>>, %arg3: memref<1152x128xf32, #tpu.memory_space<vmem>>, %arg4: memref<1x128xf32, #tpu.memory_space<vmem>>, %arg5: memref<1x8x16x128xf32, #tpu.memory_space<vmem>>, %arg6: memref<18x18x128xf32, #tpu.memory_space<vmem>>) attributes {dimension_semantics = [#tpu.dimension_semantics<parallel>, #tpu.dimension_semantics<arbitrary>], iteration_bounds = array<i64: 2, 2>, scalar_prefetch = 0 : i64, scratch_operands = 1 : i64, tpu.core_type = #tpu.core_type<tc>, window_params = [{transform_indices = @transform_0, window_bounds = array<i64: 1, 16, 16, 128>}, {pipeline_mode = #tpu.pipeline_mode<synchronous>, transform_indices = @transform_1, window_bounds = array<i64: 1152, 128>}, {pipeline_mode = #tpu.pipeline_mode<synchronous>, transform_indices = @transform_2, window_bounds = array<i64: 1, 128>}, {transform_indices = @transform_3, window_bounds = array<i64: 1, 8, 16, 128>}]} {
    %c0_i32 = arith.constant 0 : i32
    %0 = arith.cmpi eq, %arg1, %c0_i32 : i32
    %1 = arith.extui %0 : i1 to i32
    %c0_i32_0 = arith.constant 0 : i32
    %2 = arith.cmpi ne, %1, %c0_i32_0 : i32
    scf.if %2 {
      %c0_10 = arith.constant 0 : index
      %c0_11 = arith.constant 0 : index
      %c0_12 = arith.constant 0 : index
      %c0_13 = arith.constant 0 : index
      %35 = vector.load %arg2[%c0_10, %c0_11, %c0_12, %c0_13] : memref<1x16x16x128xf32, #tpu.memory_space<vmem>>, vector<1x16x16x128xf32>
      %36 = vector.shape_cast %35 : vector<1x16x16x128xf32> to vector<16x16x128xf32>
      %cst_14 = arith.constant 0.000000e+00 : f32
      %37 = vector.broadcast %cst_14 : f32 to vector<18x18x128xf32>
      %c0_15 = arith.constant 0 : index
      %c0_16 = arith.constant 0 : index
      %c0_17 = arith.constant 0 : index
      %38 = vector.load %arg6[%c0_15, %c0_16, %c0_17] : memref<18x18x128xf32, #tpu.memory_space<vmem>>, vector<18x18x128xf32>
      tpu.vector_store %arg6[%c0_15, %c0_16, %c0_17], %37 {strides = array<i32>} : memref<18x18x128xf32, #tpu.memory_space<vmem>>, vector<18x18x128xf32>,
      %c1 = arith.constant 1 : index
      %c1_18 = arith.constant 1 : index
      %c0_19 = arith.constant 0 : index
      %39 = vector.load %arg6[%c1, %c1_18, %c0_19] : memref<18x18x128xf32, #tpu.memory_space<vmem>>, vector<16x16x128xf32>
      tpu.vector_store %arg6[%c1, %c1_18, %c0_19], %36 {strides = array<i32>} : memref<18x18x128xf32, #tpu.memory_space<vmem>>, vector<16x16x128xf32>,
    } else {
    }
    %c8_i32 = arith.constant 8 : i32
    %3 = arith.muli %arg1, %c8_i32 : i32
    %4 = tpu.assume_multiple %3, 8 : i32
    %5 = arith.index_cast %4 : i32 to index
    %c0 = arith.constant 0 : index
    %c0_1 = arith.constant 0 : index
    %6 = vector.load %arg6[%5, %c0, %c0_1] : memref<18x18x128xf32, #tpu.memory_space<vmem>>, vector<10x18x128xf32>
    %7 = vector.extract_strided_slice %6 {offsets = [0, 0, 0], sizes = [8, 16, 128], strides = [1, 1, 1]} : vector<10x18x128xf32> to vector<8x16x128xf32>
    %8 = vector.shape_cast %7 : vector<8x16x128xf32> to vector<128x128xf32>
    %9 = vector.extract_strided_slice %6 {offsets = [0, 1, 0], sizes = [8, 16, 128], strides = [1, 1, 1]} : vector<10x18x128xf32> to vector<8x16x128xf32>
    %10 = vector.shape_cast %9 : vector<8x16x128xf32> to vector<128x128xf32>
    %11 = vector.extract_strided_slice %6 {offsets = [0, 2, 0], sizes = [8, 16, 128], strides = [1, 1, 1]} : vector<10x18x128xf32> to vector<8x16x128xf32>
    %12 = vector.shape_cast %11 : vector<8x16x128xf32> to vector<128x128xf32>
    %13 = vector.extract_strided_slice %6 {offsets = [1, 0, 0], sizes = [8, 16, 128], strides = [1, 1, 1]} : vector<10x18x128xf32> to vector<8x16x128xf32>
    %14 = vector.shape_cast %13 : vector<8x16x128xf32> to vector<128x128xf32>
    %15 = vector.extract_strided_slice %6 {offsets = [1, 1, 0], sizes = [8, 16, 128], strides = [1, 1, 1]} : vector<10x18x128xf32> to vector<8x16x128xf32>
    %16 = vector.shape_cast %15 : vector<8x16x128xf32> to vector<128x128xf32>
    %17 = vector.extract_strided_slice %6 {offsets = [1, 2, 0], sizes = [8, 16, 128], strides = [1, 1, 1]} : vector<10x18x128xf32> to vector<8x16x128xf32>
    %18 = vector.shape_cast %17 : vector<8x16x128xf32> to vector<128x128xf32>
    %19 = vector.extract_strided_slice %6 {offsets = [2, 0, 0], sizes = [8, 16, 128], strides = [1, 1, 1]} : vector<10x18x128xf32> to vector<8x16x128xf32>
    %20 = vector.shape_cast %19 : vector<8x16x128xf32> to vector<128x128xf32>
    %21 = vector.extract_strided_slice %6 {offsets = [2, 1, 0], sizes = [8, 16, 128], strides = [1, 1, 1]} : vector<10x18x128xf32> to vector<8x16x128xf32>
    %22 = vector.shape_cast %21 : vector<8x16x128xf32> to vector<128x128xf32>
    %23 = vector.extract_strided_slice %6 {offsets = [2, 2, 0], sizes = [8, 16, 128], strides = [1, 1, 1]} : vector<10x18x128xf32> to vector<8x16x128xf32>
    %24 = vector.shape_cast %23 : vector<8x16x128xf32> to vector<128x128xf32>
    %25 = tpu.concatenate %8, %10, %12, %14, %16, %18, %20, %22, %24 in 1 : vector<128x128xf32>, vector<128x128xf32>, vector<128x128xf32>, vector<128x128xf32>, vector<128x128xf32>, vector<128x128xf32>, vector<128x128xf32>, vector<128x128xf32>, vector<128x128xf32> -> vector<128x1152xf32>
    %c0_2 = arith.constant 0 : index
    %c0_3 = arith.constant 0 : index
    %26 = vector.load %arg3[%c0_2, %c0_3] : memref<1152x128xf32, #tpu.memory_space<vmem>>, vector<1152x128xf32>
    %cst = arith.constant dense<0.000000e+00> : vector<128x128xf32>
    %27 = tpu.matmul %25, %26, %cst {dimension_numbers = #tpu.dot_dimension_numbers<[1], [0], [0], [1], [0, 0, 1, 1], [], []>} : vector<128x1152xf32>, vector<1152x128xf32>, vector<128x128xf32> -> vector<128x128xf32>
    %c0_4 = arith.constant 0 : index
    %c0_5 = arith.constant 0 : index
    %28 = vector.load %arg4[%c0_4, %c0_5] : memref<1x128xf32, #tpu.memory_space<vmem>>, vector<1x128xf32>
    %29 = vector.broadcast %28 : vector<1x128xf32> to vector<128x128xf32>
    %30 = arith.addf %27, %29 : vector<128x128xf32>
    %31 = vector.shape_cast %30 : vector<128x128xf32> to vector<8x16x128xf32>
    %c0_6 = arith.constant 0 : index
    %c0_7 = arith.constant 0 : index
    %c0_8 = arith.constant 0 : index
    %c0_9 = arith.constant 0 : index
    %32 = vector.load %arg5[%c0_6, %c0_7, %c0_8, %c0_9] : memref<1x8x16x128xf32, #tpu.memory_space<vmem>>, vector<1x8x16x128xf32>
    %33 = vector.shape_cast %32 : vector<1x8x16x128xf32> to vector<8x16x128xf32>
    %34 = vector.shape_cast %31 : vector<8x16x128xf32> to vector<1x8x16x128xf32>
    tpu.vector_store %arg5[%c0_6, %c0_7, %c0_8, %c0_9], %34 {strides = array<i32>} : memref<1x8x16x128xf32, #tpu.memory_space<vmem>>, vector<1x8x16x128xf32>,
    return
  }
  func.func @transform_0(%arg0: i32, %arg1: i32) -> (i32, i32, i32, i32) {
    %c0_i32 = arith.constant 0 : i32
    %c0_i32_0 = arith.constant 0 : i32
    %c0_i32_1 = arith.constant 0 : i32
    %c0_i32_2 = arith.constant 0 : i32
    return %arg0, %c0_i32, %c0_i32_0, %c0_i32_1 : i32, i32, i32, i32
  }
  func.func @transform_1(%arg0: i32, %arg1: i32) -> (i32, i32) {
    %c0_i32 = arith.constant 0 : i32
    %c0_i32_0 = arith.constant 0 : i32
    %c0_i32_1 = arith.constant 0 : i32
    return %c0_i32, %c0_i32_0 : i32, i32
  }
  func.func @transform_2(%arg0: i32, %arg1: i32) -> (i32, i32) {
    %c0_i32 = arith.constant 0 : i32
    %c0_i32_0 = arith.constant 0 : i32
    %c0_i32_1 = arith.constant 0 : i32
    return %c0_i32, %c0_i32_0 : i32, i32
  }
  func.func @transform_3(%arg0: i32, %arg1: i32) -> (i32, i32, i32, i32) {
    %c0_i32 = arith.constant 0 : i32
    %c0_i32_0 = arith.constant 0 : i32
    %c0_i32_1 = arith.constant 0 : i32
    return %arg0, %arg1, %c0_i32, %c0_i32_0 : i32, i32, i32, i32
  }
}

module attributes {stable_mosaic.version = 11 : i64} {
  func.func @kernel(%arg0: i32, %arg1: i32, %arg2: memref<1x16x16x128xf32, #tpu.memory_space<vmem>>, %arg3: memref<1x16x16x128xf32, #tpu.memory_space<vmem>>, %arg4: memref<1152x128xf32, #tpu.memory_space<vmem>>, %arg5: memref<1152x128xf32, #tpu.memory_space<vmem>>, %arg6: memref<1x128xf32, #tpu.memory_space<vmem>>, %arg7: memref<1x8x16x128xf32, #tpu.memory_space<vmem>>, %arg8: memref<1x1x8x128xf32, #tpu.memory_space<vmem>>, %arg9: memref<18x18x128xf32, #tpu.memory_space<vmem>>, %arg10: memref<18x18x128xf32, #tpu.memory_space<vmem>>) attributes {dimension_semantics = [#tpu.dimension_semantics<parallel>, #tpu.dimension_semantics<arbitrary>], iteration_bounds = array<i64: 2, 2>, scalar_prefetch = 0 : i64, scratch_operands = 2 : i64, tpu.core_type = #tpu.core_type<tc>, window_params = [{transform_indices = @transform_0, window_bounds = array<i64: 1, 16, 16, 128>}, {transform_indices = @transform_1, window_bounds = array<i64: 1, 16, 16, 128>}, {pipeline_mode = #tpu.pipeline_mode<synchronous>, transform_indices = @transform_2, window_bounds = array<i64: 1152, 128>}, {pipeline_mode = #tpu.pipeline_mode<synchronous>, transform_indices = @transform_3, window_bounds = array<i64: 1152, 128>}, {pipeline_mode = #tpu.pipeline_mode<synchronous>, transform_indices = @transform_4, window_bounds = array<i64: 1, 128>}, {transform_indices = @transform_5, window_bounds = array<i64: 1, 8, 16, 128>}, {transform_indices = @transform_6, window_bounds = array<i64: 1, 1, 8, 128>}]} {
    %c0_i32 = arith.constant 0 : i32
    %0 = arith.cmpi eq, %arg1, %c0_i32 : i32
    %1 = arith.extui %0 : i1 to i32
    %c0_i32_0 = arith.constant 0 : i32
    %2 = arith.cmpi ne, %1, %c0_i32_0 : i32
    scf.if %2 {
      %c0_22 = arith.constant 0 : index
      %c0_23 = arith.constant 0 : index
      %c0_24 = arith.constant 0 : index
      %c0_25 = arith.constant 0 : index
      %69 = vector.load %arg2[%c0_22, %c0_23, %c0_24, %c0_25] : memref<1x16x16x128xf32, #tpu.memory_space<vmem>>, vector<1x16x16x128xf32>
      %70 = vector.shape_cast %69 : vector<1x16x16x128xf32> to vector<16x16x128xf32>
      %cst_26 = arith.constant 0.000000e+00 : f32
      %71 = vector.broadcast %cst_26 : f32 to vector<18x18x128xf32>
      %c0_27 = arith.constant 0 : index
      %c0_28 = arith.constant 0 : index
      %c0_29 = arith.constant 0 : index
      %72 = vector.load %arg9[%c0_27, %c0_28, %c0_29] : memref<18x18x128xf32, #tpu.memory_space<vmem>>, vector<18x18x128xf32>
      tpu.vector_store %arg9[%c0_27, %c0_28, %c0_29], %71 {strides = array<i32>} : memref<18x18x128xf32, #tpu.memory_space<vmem>>, vector<18x18x128xf32>,
      %c1 = arith.constant 1 : index
      %c1_30 = arith.constant 1 : index
      %c0_31 = arith.constant 0 : index
      %73 = vector.load %arg9[%c1, %c1_30, %c0_31] : memref<18x18x128xf32, #tpu.memory_space<vmem>>, vector<16x16x128xf32>
      tpu.vector_store %arg9[%c1, %c1_30, %c0_31], %70 {strides = array<i32>} : memref<18x18x128xf32, #tpu.memory_space<vmem>>, vector<16x16x128xf32>,
      %c0_32 = arith.constant 0 : index
      %c0_33 = arith.constant 0 : index
      %c0_34 = arith.constant 0 : index
      %c0_35 = arith.constant 0 : index
      %74 = vector.load %arg3[%c0_32, %c0_33, %c0_34, %c0_35] : memref<1x16x16x128xf32, #tpu.memory_space<vmem>>, vector<1x16x16x128xf32>
      %75 = vector.shape_cast %74 : vector<1x16x16x128xf32> to vector<16x16x128xf32>
      %cst_36 = arith.constant 0.000000e+00 : f32
      %76 = vector.broadcast %cst_36 : f32 to vector<18x18x128xf32>
      %c0_37 = arith.constant 0 : index
      %c0_38 = arith.constant 0 : index
      %c0_39 = arith.constant 0 : index
      %77 = vector.load %arg10[%c0_37, %c0_38, %c0_39] : memref<18x18x128xf32, #tpu.memory_space<vmem>>, vector<18x18x128xf32>
      tpu.vector_store %arg10[%c0_37, %c0_38, %c0_39], %76 {strides = array<i32>} : memref<18x18x128xf32, #tpu.memory_space<vmem>>, vector<18x18x128xf32>,
      %c1_40 = arith.constant 1 : index
      %c1_41 = arith.constant 1 : index
      %c0_42 = arith.constant 0 : index
      %78 = vector.load %arg10[%c1_40, %c1_41, %c0_42] : memref<18x18x128xf32, #tpu.memory_space<vmem>>, vector<16x16x128xf32>
      tpu.vector_store %arg10[%c1_40, %c1_41, %c0_42], %75 {strides = array<i32>} : memref<18x18x128xf32, #tpu.memory_space<vmem>>, vector<16x16x128xf32>,
    } else {
    }
    %c8_i32 = arith.constant 8 : i32
    %3 = arith.muli %arg1, %c8_i32 : i32
    %4 = tpu.assume_multiple %3, 8 : i32
    %5 = arith.index_cast %4 : i32 to index
    %c0 = arith.constant 0 : index
    %c0_1 = arith.constant 0 : index
    %6 = vector.load %arg9[%5, %c0, %c0_1] : memref<18x18x128xf32, #tpu.memory_space<vmem>>, vector<10x18x128xf32>
    %7 = vector.extract_strided_slice %6 {offsets = [0, 0, 0], sizes = [8, 16, 128], strides = [1, 1, 1]} : vector<10x18x128xf32> to vector<8x16x128xf32>
    %8 = vector.shape_cast %7 : vector<8x16x128xf32> to vector<128x128xf32>
    %9 = vector.extract_strided_slice %6 {offsets = [0, 1, 0], sizes = [8, 16, 128], strides = [1, 1, 1]} : vector<10x18x128xf32> to vector<8x16x128xf32>
    %10 = vector.shape_cast %9 : vector<8x16x128xf32> to vector<128x128xf32>
    %11 = vector.extract_strided_slice %6 {offsets = [0, 2, 0], sizes = [8, 16, 128], strides = [1, 1, 1]} : vector<10x18x128xf32> to vector<8x16x128xf32>
    %12 = vector.shape_cast %11 : vector<8x16x128xf32> to vector<128x128xf32>
    %13 = vector.extract_strided_slice %6 {offsets = [1, 0, 0], sizes = [8, 16, 128], strides = [1, 1, 1]} : vector<10x18x128xf32> to vector<8x16x128xf32>
    %14 = vector.shape_cast %13 : vector<8x16x128xf32> to vector<128x128xf32>
    %15 = vector.extract_strided_slice %6 {offsets = [1, 1, 0], sizes = [8, 16, 128], strides = [1, 1, 1]} : vector<10x18x128xf32> to vector<8x16x128xf32>
    %16 = vector.shape_cast %15 : vector<8x16x128xf32> to vector<128x128xf32>
    %17 = vector.extract_strided_slice %6 {offsets = [1, 2, 0], sizes = [8, 16, 128], strides = [1, 1, 1]} : vector<10x18x128xf32> to vector<8x16x128xf32>
    %18 = vector.shape_cast %17 : vector<8x16x128xf32> to vector<128x128xf32>
    %19 = vector.extract_strided_slice %6 {offsets = [2, 0, 0], sizes = [8, 16, 128], strides = [1, 1, 1]} : vector<10x18x128xf32> to vector<8x16x128xf32>
    %20 = vector.shape_cast %19 : vector<8x16x128xf32> to vector<128x128xf32>
    %21 = vector.extract_strided_slice %6 {offsets = [2, 1, 0], sizes = [8, 16, 128], strides = [1, 1, 1]} : vector<10x18x128xf32> to vector<8x16x128xf32>
    %22 = vector.shape_cast %21 : vector<8x16x128xf32> to vector<128x128xf32>
    %23 = vector.extract_strided_slice %6 {offsets = [2, 2, 0], sizes = [8, 16, 128], strides = [1, 1, 1]} : vector<10x18x128xf32> to vector<8x16x128xf32>
    %24 = vector.shape_cast %23 : vector<8x16x128xf32> to vector<128x128xf32>
    %25 = tpu.concatenate %8, %10, %12, %14, %16, %18, %20, %22, %24 in 1 : vector<128x128xf32>, vector<128x128xf32>, vector<128x128xf32>, vector<128x128xf32>, vector<128x128xf32>, vector<128x128xf32>, vector<128x128xf32>, vector<128x128xf32>, vector<128x128xf32> -> vector<128x1152xf32>
    %c0_2 = arith.constant 0 : index
    %c0_3 = arith.constant 0 : index
    %26 = vector.load %arg4[%c0_2, %c0_3] : memref<1152x128xf32, #tpu.memory_space<vmem>>, vector<1152x128xf32>
    %cst = arith.constant dense<0.000000e+00> : vector<128x128xf32>
    %27 = tpu.matmul %25, %26, %cst {dimension_numbers = #tpu.dot_dimension_numbers<[1], [0], [0], [1], [0, 0, 1, 1], [], []>} : vector<128x1152xf32>, vector<1152x128xf32>, vector<128x128xf32> -> vector<128x128xf32>
    %28 = arith.index_cast %4 : i32 to index
    %c0_4 = arith.constant 0 : index
    %c0_5 = arith.constant 0 : index
    %29 = vector.load %arg10[%28, %c0_4, %c0_5] : memref<18x18x128xf32, #tpu.memory_space<vmem>>, vector<10x18x128xf32>
    %30 = vector.extract_strided_slice %29 {offsets = [0, 0, 0], sizes = [8, 16, 128], strides = [1, 1, 1]} : vector<10x18x128xf32> to vector<8x16x128xf32>
    %31 = vector.shape_cast %30 : vector<8x16x128xf32> to vector<128x128xf32>
    %32 = vector.extract_strided_slice %29 {offsets = [0, 1, 0], sizes = [8, 16, 128], strides = [1, 1, 1]} : vector<10x18x128xf32> to vector<8x16x128xf32>
    %33 = vector.shape_cast %32 : vector<8x16x128xf32> to vector<128x128xf32>
    %34 = vector.extract_strided_slice %29 {offsets = [0, 2, 0], sizes = [8, 16, 128], strides = [1, 1, 1]} : vector<10x18x128xf32> to vector<8x16x128xf32>
    %35 = vector.shape_cast %34 : vector<8x16x128xf32> to vector<128x128xf32>
    %36 = vector.extract_strided_slice %29 {offsets = [1, 0, 0], sizes = [8, 16, 128], strides = [1, 1, 1]} : vector<10x18x128xf32> to vector<8x16x128xf32>
    %37 = vector.shape_cast %36 : vector<8x16x128xf32> to vector<128x128xf32>
    %38 = vector.extract_strided_slice %29 {offsets = [1, 1, 0], sizes = [8, 16, 128], strides = [1, 1, 1]} : vector<10x18x128xf32> to vector<8x16x128xf32>
    %39 = vector.shape_cast %38 : vector<8x16x128xf32> to vector<128x128xf32>
    %40 = vector.extract_strided_slice %29 {offsets = [1, 2, 0], sizes = [8, 16, 128], strides = [1, 1, 1]} : vector<10x18x128xf32> to vector<8x16x128xf32>
    %41 = vector.shape_cast %40 : vector<8x16x128xf32> to vector<128x128xf32>
    %42 = vector.extract_strided_slice %29 {offsets = [2, 0, 0], sizes = [8, 16, 128], strides = [1, 1, 1]} : vector<10x18x128xf32> to vector<8x16x128xf32>
    %43 = vector.shape_cast %42 : vector<8x16x128xf32> to vector<128x128xf32>
    %44 = vector.extract_strided_slice %29 {offsets = [2, 1, 0], sizes = [8, 16, 128], strides = [1, 1, 1]} : vector<10x18x128xf32> to vector<8x16x128xf32>
    %45 = vector.shape_cast %44 : vector<8x16x128xf32> to vector<128x128xf32>
    %46 = vector.extract_strided_slice %29 {offsets = [2, 2, 0], sizes = [8, 16, 128], strides = [1, 1, 1]} : vector<10x18x128xf32> to vector<8x16x128xf32>
    %47 = vector.shape_cast %46 : vector<8x16x128xf32> to vector<128x128xf32>
    %48 = tpu.concatenate %31, %33, %35, %37, %39, %41, %43, %45, %47 in 1 : vector<128x128xf32>, vector<128x128xf32>, vector<128x128xf32>, vector<128x128xf32>, vector<128x128xf32>, vector<128x128xf32>, vector<128x128xf32>, vector<128x128xf32>, vector<128x128xf32> -> vector<128x1152xf32>
    %c0_6 = arith.constant 0 : index
    %c0_7 = arith.constant 0 : index
    %49 = vector.load %arg5[%c0_6, %c0_7] : memref<1152x128xf32, #tpu.memory_space<vmem>>, vector<1152x128xf32>
    %cst_8 = arith.constant dense<0.000000e+00> : vector<128x128xf32>
    %50 = tpu.matmul %48, %49, %cst_8 {dimension_numbers = #tpu.dot_dimension_numbers<[1], [0], [0], [1], [0, 0, 1, 1], [], []>} : vector<128x1152xf32>, vector<1152x128xf32>, vector<128x128xf32> -> vector<128x128xf32>
    %51 = arith.addf %27, %50 : vector<128x128xf32>
    %c0_9 = arith.constant 0 : index
    %c0_10 = arith.constant 0 : index
    %52 = vector.load %arg6[%c0_9, %c0_10] : memref<1x128xf32, #tpu.memory_space<vmem>>, vector<1x128xf32>
    %53 = vector.broadcast %52 : vector<1x128xf32> to vector<128x128xf32>
    %54 = arith.addf %51, %53 : vector<128x128xf32>
    %55 = vector.shape_cast %54 : vector<128x128xf32> to vector<8x16x128xf32>
    %c0_11 = arith.constant 0 : index
    %c0_12 = arith.constant 0 : index
    %c0_13 = arith.constant 0 : index
    %c0_14 = arith.constant 0 : index
    %56 = vector.load %arg7[%c0_11, %c0_12, %c0_13, %c0_14] : memref<1x8x16x128xf32, #tpu.memory_space<vmem>>, vector<1x8x16x128xf32>
    %57 = vector.shape_cast %56 : vector<1x8x16x128xf32> to vector<8x16x128xf32>
    %58 = vector.shape_cast %55 : vector<8x16x128xf32> to vector<1x8x16x128xf32>
    tpu.vector_store %arg7[%c0_11, %c0_12, %c0_13, %c0_14], %58 {strides = array<i32>} : memref<1x8x16x128xf32, #tpu.memory_space<vmem>>, vector<1x8x16x128xf32>,
    %cst_15 = arith.constant dense<0.000000e+00> : vector<128xf32>
    %59 = vector.multi_reduction <add>, %54, %cst_15 [0] : vector<128x128xf32> to vector<128xf32>
    %60 = vector.shape_cast %59 : vector<128xf32> to vector<1x128xf32>
    %61 = arith.mulf %54, %54 : vector<128x128xf32>
    %cst_16 = arith.constant dense<0.000000e+00> : vector<128xf32>
    %62 = vector.multi_reduction <add>, %61, %cst_16 [0] : vector<128x128xf32> to vector<128xf32>
    %63 = vector.shape_cast %62 : vector<128xf32> to vector<1x128xf32>
    %cst_17 = arith.constant 0.000000e+00 : f32
    %64 = vector.broadcast %cst_17 : f32 to vector<6x128xf32>
    %65 = tpu.concatenate %60, %63, %64 in 0 : vector<1x128xf32>, vector<1x128xf32>, vector<6x128xf32> -> vector<8x128xf32>
    %c0_18 = arith.constant 0 : index
    %c0_19 = arith.constant 0 : index
    %c0_20 = arith.constant 0 : index
    %c0_21 = arith.constant 0 : index
    %66 = vector.load %arg8[%c0_18, %c0_19, %c0_20, %c0_21] : memref<1x1x8x128xf32, #tpu.memory_space<vmem>>, vector<1x1x8x128xf32>
    %67 = vector.shape_cast %66 : vector<1x1x8x128xf32> to vector<8x128xf32>
    %68 = vector.shape_cast %65 : vector<8x128xf32> to vector<1x1x8x128xf32>
    tpu.vector_store %arg8[%c0_18, %c0_19, %c0_20, %c0_21], %68 {strides = array<i32>} : memref<1x1x8x128xf32, #tpu.memory_space<vmem>>, vector<1x1x8x128xf32>,
    return
  }
  func.func @transform_0(%arg0: i32, %arg1: i32) -> (i32, i32, i32, i32) {
    %c0_i32 = arith.constant 0 : i32
    %c0_i32_0 = arith.constant 0 : i32
    %c0_i32_1 = arith.constant 0 : i32
    %c0_i32_2 = arith.constant 0 : i32
    return %arg0, %c0_i32, %c0_i32_0, %c0_i32_1 : i32, i32, i32, i32
  }
  func.func @transform_1(%arg0: i32, %arg1: i32) -> (i32, i32, i32, i32) {
    %c0_i32 = arith.constant 0 : i32
    %c0_i32_0 = arith.constant 0 : i32
    %c0_i32_1 = arith.constant 0 : i32
    %c0_i32_2 = arith.constant 0 : i32
    return %arg0, %c0_i32, %c0_i32_0, %c0_i32_1 : i32, i32, i32, i32
  }
  func.func @transform_2(%arg0: i32, %arg1: i32) -> (i32, i32) {
    %c0_i32 = arith.constant 0 : i32
    %c0_i32_0 = arith.constant 0 : i32
    %c0_i32_1 = arith.constant 0 : i32
    return %c0_i32, %c0_i32_0 : i32, i32
  }
  func.func @transform_3(%arg0: i32, %arg1: i32) -> (i32, i32) {
    %c0_i32 = arith.constant 0 : i32
    %c0_i32_0 = arith.constant 0 : i32
    %c0_i32_1 = arith.constant 0 : i32
    return %c0_i32, %c0_i32_0 : i32, i32
  }
  func.func @transform_4(%arg0: i32, %arg1: i32) -> (i32, i32) {
    %c0_i32 = arith.constant 0 : i32
    %c0_i32_0 = arith.constant 0 : i32
    %c0_i32_1 = arith.constant 0 : i32
    return %c0_i32, %c0_i32_0 : i32, i32
  }
  func.func @transform_5(%arg0: i32, %arg1: i32) -> (i32, i32, i32, i32) {
    %c0_i32 = arith.constant 0 : i32
    %c0_i32_0 = arith.constant 0 : i32
    %c0_i32_1 = arith.constant 0 : i32
    return %arg0, %arg1, %c0_i32, %c0_i32_0 : i32, i32, i32, i32
  }
  func.func @transform_6(%arg0: i32, %arg1: i32) -> (i32, i32, i32, i32) {
    %c0_i32 = arith.constant 0 : i32
    %c0_i32_0 = arith.constant 0 : i32
    %c0_i32_1 = arith.constant 0 : i32
    return %arg0, %arg1, %c0_i32, %c0_i32_0 : i32, i32, i32, i32
  }
}

module attributes {stable_mosaic.version = 11 : i64} {
  func.func @kernel(%arg0: i32, %arg1: i32, %arg2: memref<1x16x16x128xf32, #tpu.memory_space<vmem>>, %arg3: memref<1x128xf32, #tpu.memory_space<vmem>>, %arg4: memref<1x128xf32, #tpu.memory_space<vmem>>, %arg5: memref<1152x128xf32, #tpu.memory_space<vmem>>, %arg6: memref<1x128xf32, #tpu.memory_space<vmem>>, %arg7: memref<1x8x16x128xf32, #tpu.memory_space<vmem>>, %arg8: memref<1x1x8x128xf32, #tpu.memory_space<vmem>>, %arg9: memref<18x18x128xf32, #tpu.memory_space<vmem>>) attributes {dimension_semantics = [#tpu.dimension_semantics<parallel>, #tpu.dimension_semantics<arbitrary>], iteration_bounds = array<i64: 2, 2>, scalar_prefetch = 0 : i64, scratch_operands = 1 : i64, tpu.core_type = #tpu.core_type<tc>, window_params = [{transform_indices = @transform_0, window_bounds = array<i64: 1, 16, 16, 128>}, {pipeline_mode = #tpu.pipeline_mode<synchronous>, transform_indices = @transform_1, window_bounds = array<i64: 1, 128>}, {pipeline_mode = #tpu.pipeline_mode<synchronous>, transform_indices = @transform_2, window_bounds = array<i64: 1, 128>}, {pipeline_mode = #tpu.pipeline_mode<synchronous>, transform_indices = @transform_3, window_bounds = array<i64: 1152, 128>}, {pipeline_mode = #tpu.pipeline_mode<synchronous>, transform_indices = @transform_4, window_bounds = array<i64: 1, 128>}, {transform_indices = @transform_5, window_bounds = array<i64: 1, 8, 16, 128>}, {transform_indices = @transform_6, window_bounds = array<i64: 1, 1, 8, 128>}]} {
    %c0_i32 = arith.constant 0 : i32
    %0 = arith.cmpi eq, %arg1, %c0_i32 : i32
    %1 = arith.extui %0 : i1 to i32
    %c0_i32_0 = arith.constant 0 : i32
    %2 = arith.cmpi ne, %1, %c0_i32_0 : i32
    scf.if %2 {
      %c0_17 = arith.constant 0 : index
      %c0_18 = arith.constant 0 : index
      %c0_19 = arith.constant 0 : index
      %c0_20 = arith.constant 0 : index
      %45 = vector.load %arg2[%c0_17, %c0_18, %c0_19, %c0_20] : memref<1x16x16x128xf32, #tpu.memory_space<vmem>>, vector<1x16x16x128xf32>
      %46 = vector.shape_cast %45 : vector<1x16x16x128xf32> to vector<16x16x128xf32>
      %c0_21 = arith.constant 0 : index
      %c0_22 = arith.constant 0 : index
      %47 = vector.load %arg3[%c0_21, %c0_22] : memref<1x128xf32, #tpu.memory_space<vmem>>, vector<1x128xf32>
      %48 = vector.shape_cast %47 : vector<1x128xf32> to vector<1x1x128xf32>
      %49 = vector.broadcast %48 : vector<1x1x128xf32> to vector<16x16x128xf32>
      %50 = arith.mulf %46, %49 : vector<16x16x128xf32>
      %c0_23 = arith.constant 0 : index
      %c0_24 = arith.constant 0 : index
      %51 = vector.load %arg4[%c0_23, %c0_24] : memref<1x128xf32, #tpu.memory_space<vmem>>, vector<1x128xf32>
      %52 = vector.shape_cast %51 : vector<1x128xf32> to vector<1x1x128xf32>
      %53 = vector.broadcast %52 : vector<1x1x128xf32> to vector<16x16x128xf32>
      %54 = arith.addf %50, %53 : vector<16x16x128xf32>
      %cst_25 = arith.constant 0.000000e+00 : f32
      %55 = vector.broadcast %cst_25 : f32 to vector<16x16x128xf32>
      %56 = arith.maximumf %54, %55 : vector<16x16x128xf32>
      %cst_26 = arith.constant 0.000000e+00 : f32
      %57 = vector.broadcast %cst_26 : f32 to vector<18x18x128xf32>
      %c0_27 = arith.constant 0 : index
      %c0_28 = arith.constant 0 : index
      %c0_29 = arith.constant 0 : index
      %58 = vector.load %arg9[%c0_27, %c0_28, %c0_29] : memref<18x18x128xf32, #tpu.memory_space<vmem>>, vector<18x18x128xf32>
      tpu.vector_store %arg9[%c0_27, %c0_28, %c0_29], %57 {strides = array<i32>} : memref<18x18x128xf32, #tpu.memory_space<vmem>>, vector<18x18x128xf32>,
      %c1 = arith.constant 1 : index
      %c1_30 = arith.constant 1 : index
      %c0_31 = arith.constant 0 : index
      %59 = vector.load %arg9[%c1, %c1_30, %c0_31] : memref<18x18x128xf32, #tpu.memory_space<vmem>>, vector<16x16x128xf32>
      tpu.vector_store %arg9[%c1, %c1_30, %c0_31], %56 {strides = array<i32>} : memref<18x18x128xf32, #tpu.memory_space<vmem>>, vector<16x16x128xf32>,
    } else {
    }
    %c8_i32 = arith.constant 8 : i32
    %3 = arith.muli %arg1, %c8_i32 : i32
    %4 = tpu.assume_multiple %3, 8 : i32
    %5 = arith.index_cast %4 : i32 to index
    %c0 = arith.constant 0 : index
    %c0_1 = arith.constant 0 : index
    %6 = vector.load %arg9[%5, %c0, %c0_1] : memref<18x18x128xf32, #tpu.memory_space<vmem>>, vector<10x18x128xf32>
    %7 = vector.extract_strided_slice %6 {offsets = [0, 0, 0], sizes = [8, 16, 128], strides = [1, 1, 1]} : vector<10x18x128xf32> to vector<8x16x128xf32>
    %8 = vector.shape_cast %7 : vector<8x16x128xf32> to vector<128x128xf32>
    %9 = vector.extract_strided_slice %6 {offsets = [0, 1, 0], sizes = [8, 16, 128], strides = [1, 1, 1]} : vector<10x18x128xf32> to vector<8x16x128xf32>
    %10 = vector.shape_cast %9 : vector<8x16x128xf32> to vector<128x128xf32>
    %11 = vector.extract_strided_slice %6 {offsets = [0, 2, 0], sizes = [8, 16, 128], strides = [1, 1, 1]} : vector<10x18x128xf32> to vector<8x16x128xf32>
    %12 = vector.shape_cast %11 : vector<8x16x128xf32> to vector<128x128xf32>
    %13 = vector.extract_strided_slice %6 {offsets = [1, 0, 0], sizes = [8, 16, 128], strides = [1, 1, 1]} : vector<10x18x128xf32> to vector<8x16x128xf32>
    %14 = vector.shape_cast %13 : vector<8x16x128xf32> to vector<128x128xf32>
    %15 = vector.extract_strided_slice %6 {offsets = [1, 1, 0], sizes = [8, 16, 128], strides = [1, 1, 1]} : vector<10x18x128xf32> to vector<8x16x128xf32>
    %16 = vector.shape_cast %15 : vector<8x16x128xf32> to vector<128x128xf32>
    %17 = vector.extract_strided_slice %6 {offsets = [1, 2, 0], sizes = [8, 16, 128], strides = [1, 1, 1]} : vector<10x18x128xf32> to vector<8x16x128xf32>
    %18 = vector.shape_cast %17 : vector<8x16x128xf32> to vector<128x128xf32>
    %19 = vector.extract_strided_slice %6 {offsets = [2, 0, 0], sizes = [8, 16, 128], strides = [1, 1, 1]} : vector<10x18x128xf32> to vector<8x16x128xf32>
    %20 = vector.shape_cast %19 : vector<8x16x128xf32> to vector<128x128xf32>
    %21 = vector.extract_strided_slice %6 {offsets = [2, 1, 0], sizes = [8, 16, 128], strides = [1, 1, 1]} : vector<10x18x128xf32> to vector<8x16x128xf32>
    %22 = vector.shape_cast %21 : vector<8x16x128xf32> to vector<128x128xf32>
    %23 = vector.extract_strided_slice %6 {offsets = [2, 2, 0], sizes = [8, 16, 128], strides = [1, 1, 1]} : vector<10x18x128xf32> to vector<8x16x128xf32>
    %24 = vector.shape_cast %23 : vector<8x16x128xf32> to vector<128x128xf32>
    %25 = tpu.concatenate %8, %10, %12, %14, %16, %18, %20, %22, %24 in 1 : vector<128x128xf32>, vector<128x128xf32>, vector<128x128xf32>, vector<128x128xf32>, vector<128x128xf32>, vector<128x128xf32>, vector<128x128xf32>, vector<128x128xf32>, vector<128x128xf32> -> vector<128x1152xf32>
    %c0_2 = arith.constant 0 : index
    %c0_3 = arith.constant 0 : index
    %26 = vector.load %arg5[%c0_2, %c0_3] : memref<1152x128xf32, #tpu.memory_space<vmem>>, vector<1152x128xf32>
    %cst = arith.constant dense<0.000000e+00> : vector<128x128xf32>
    %27 = tpu.matmul %25, %26, %cst {dimension_numbers = #tpu.dot_dimension_numbers<[1], [0], [0], [1], [0, 0, 1, 1], [], []>} : vector<128x1152xf32>, vector<1152x128xf32>, vector<128x128xf32> -> vector<128x128xf32>
    %c0_4 = arith.constant 0 : index
    %c0_5 = arith.constant 0 : index
    %28 = vector.load %arg6[%c0_4, %c0_5] : memref<1x128xf32, #tpu.memory_space<vmem>>, vector<1x128xf32>
    %29 = vector.broadcast %28 : vector<1x128xf32> to vector<128x128xf32>
    %30 = arith.addf %27, %29 : vector<128x128xf32>
    %31 = vector.shape_cast %30 : vector<128x128xf32> to vector<8x16x128xf32>
    %c0_6 = arith.constant 0 : index
    %c0_7 = arith.constant 0 : index
    %c0_8 = arith.constant 0 : index
    %c0_9 = arith.constant 0 : index
    %32 = vector.load %arg7[%c0_6, %c0_7, %c0_8, %c0_9] : memref<1x8x16x128xf32, #tpu.memory_space<vmem>>, vector<1x8x16x128xf32>
    %33 = vector.shape_cast %32 : vector<1x8x16x128xf32> to vector<8x16x128xf32>
    %34 = vector.shape_cast %31 : vector<8x16x128xf32> to vector<1x8x16x128xf32>
    tpu.vector_store %arg7[%c0_6, %c0_7, %c0_8, %c0_9], %34 {strides = array<i32>} : memref<1x8x16x128xf32, #tpu.memory_space<vmem>>, vector<1x8x16x128xf32>,
    %cst_10 = arith.constant dense<0.000000e+00> : vector<128xf32>
    %35 = vector.multi_reduction <add>, %30, %cst_10 [0] : vector<128x128xf32> to vector<128xf32>
    %36 = vector.shape_cast %35 : vector<128xf32> to vector<1x128xf32>
    %37 = arith.mulf %30, %30 : vector<128x128xf32>
    %cst_11 = arith.constant dense<0.000000e+00> : vector<128xf32>
    %38 = vector.multi_reduction <add>, %37, %cst_11 [0] : vector<128x128xf32> to vector<128xf32>
    %39 = vector.shape_cast %38 : vector<128xf32> to vector<1x128xf32>
    %cst_12 = arith.constant 0.000000e+00 : f32
    %40 = vector.broadcast %cst_12 : f32 to vector<6x128xf32>
    %41 = tpu.concatenate %36, %39, %40 in 0 : vector<1x128xf32>, vector<1x128xf32>, vector<6x128xf32> -> vector<8x128xf32>
    %c0_13 = arith.constant 0 : index
    %c0_14 = arith.constant 0 : index
    %c0_15 = arith.constant 0 : index
    %c0_16 = arith.constant 0 : index
    %42 = vector.load %arg8[%c0_13, %c0_14, %c0_15, %c0_16] : memref<1x1x8x128xf32, #tpu.memory_space<vmem>>, vector<1x1x8x128xf32>
    %43 = vector.shape_cast %42 : vector<1x1x8x128xf32> to vector<8x128xf32>
    %44 = vector.shape_cast %41 : vector<8x128xf32> to vector<1x1x8x128xf32>
    tpu.vector_store %arg8[%c0_13, %c0_14, %c0_15, %c0_16], %44 {strides = array<i32>} : memref<1x1x8x128xf32, #tpu.memory_space<vmem>>, vector<1x1x8x128xf32>,
    return
  }
  func.func @transform_0(%arg0: i32, %arg1: i32) -> (i32, i32, i32, i32) {
    %c0_i32 = arith.constant 0 : i32
    %c0_i32_0 = arith.constant 0 : i32
    %c0_i32_1 = arith.constant 0 : i32
    %c0_i32_2 = arith.constant 0 : i32
    return %arg0, %c0_i32, %c0_i32_0, %c0_i32_1 : i32, i32, i32, i32
  }
  func.func @transform_1(%arg0: i32, %arg1: i32) -> (i32, i32) {
    %c0_i32 = arith.constant 0 : i32
    %c0_i32_0 = arith.constant 0 : i32
    %c0_i32_1 = arith.constant 0 : i32
    return %c0_i32, %c0_i32_0 : i32, i32
  }
  func.func @transform_2(%arg0: i32, %arg1: i32) -> (i32, i32) {
    %c0_i32 = arith.constant 0 : i32
    %c0_i32_0 = arith.constant 0 : i32
    %c0_i32_1 = arith.constant 0 : i32
    return %c0_i32, %c0_i32_0 : i32, i32
  }
  func.func @transform_3(%arg0: i32, %arg1: i32) -> (i32, i32) {
    %c0_i32 = arith.constant 0 : i32
    %c0_i32_0 = arith.constant 0 : i32
    %c0_i32_1 = arith.constant 0 : i32
    return %c0_i32, %c0_i32_0 : i32, i32
  }
  func.func @transform_4(%arg0: i32, %arg1: i32) -> (i32, i32) {
    %c0_i32 = arith.constant 0 : i32
    %c0_i32_0 = arith.constant 0 : i32
    %c0_i32_1 = arith.constant 0 : i32
    return %c0_i32, %c0_i32_0 : i32, i32
  }
  func.func @transform_5(%arg0: i32, %arg1: i32) -> (i32, i32, i32, i32) {
    %c0_i32 = arith.constant 0 : i32
    %c0_i32_0 = arith.constant 0 : i32
    %c0_i32_1 = arith.constant 0 : i32
    return %arg0, %arg1, %c0_i32, %c0_i32_0 : i32, i32, i32, i32
  }
  func.func @transform_6(%arg0: i32, %arg1: i32) -> (i32, i32, i32, i32) {
    %c0_i32 = arith.constant 0 : i32
    %c0_i32_0 = arith.constant 0 : i32
    %c0_i32_1 = arith.constant 0 : i32
    return %arg0, %arg1, %c0_i32, %c0_i32_0 : i32, i32, i32, i32
  }
}

module attributes {stable_mosaic.version = 11 : i64} {
  func.func @_bn_relu_kernel(%arg0: i32, %arg1: i32, %arg2: memref<1x8x16x128xf32, #tpu.memory_space<vmem>>, %arg3: memref<1x128xf32, #tpu.memory_space<vmem>>, %arg4: memref<1x128xf32, #tpu.memory_space<vmem>>, %arg5: memref<1x8x16x128xf32, #tpu.memory_space<vmem>>) attributes {dimension_semantics = [#tpu.dimension_semantics<parallel>, #tpu.dimension_semantics<parallel>], iteration_bounds = array<i64: 2, 2>, scalar_prefetch = 0 : i64, scratch_operands = 0 : i64, tpu.core_type = #tpu.core_type<tc>, window_params = [{transform_indices = @transform_0, window_bounds = array<i64: 1, 8, 16, 128>}, {pipeline_mode = #tpu.pipeline_mode<synchronous>, transform_indices = @transform_1, window_bounds = array<i64: 1, 128>}, {pipeline_mode = #tpu.pipeline_mode<synchronous>, transform_indices = @transform_2, window_bounds = array<i64: 1, 128>}, {transform_indices = @transform_3, window_bounds = array<i64: 1, 8, 16, 128>}]} {
    %c0 = arith.constant 0 : index
    %c0_0 = arith.constant 0 : index
    %c0_1 = arith.constant 0 : index
    %c0_2 = arith.constant 0 : index
    %0 = vector.load %arg2[%c0, %c0_0, %c0_1, %c0_2] : memref<1x8x16x128xf32, #tpu.memory_space<vmem>>, vector<1x8x16x128xf32>
    %c0_3 = arith.constant 0 : index
    %c0_4 = arith.constant 0 : index
    %1 = vector.load %arg3[%c0_3, %c0_4] : memref<1x128xf32, #tpu.memory_space<vmem>>, vector<1x128xf32>
    %2 = vector.shape_cast %1 : vector<1x128xf32> to vector<1x1x1x128xf32>
    %3 = vector.broadcast %2 : vector<1x1x1x128xf32> to vector<1x8x16x128xf32>
    %4 = arith.mulf %0, %3 : vector<1x8x16x128xf32>
    %c0_5 = arith.constant 0 : index
    %c0_6 = arith.constant 0 : index
    %5 = vector.load %arg4[%c0_5, %c0_6] : memref<1x128xf32, #tpu.memory_space<vmem>>, vector<1x128xf32>
    %6 = vector.shape_cast %5 : vector<1x128xf32> to vector<1x1x1x128xf32>
    %7 = vector.broadcast %6 : vector<1x1x1x128xf32> to vector<1x8x16x128xf32>
    %8 = arith.addf %4, %7 : vector<1x8x16x128xf32>
    %cst = arith.constant 0.000000e+00 : f32
    %9 = vector.broadcast %cst : f32 to vector<1x8x16x128xf32>
    %10 = arith.maximumf %8, %9 : vector<1x8x16x128xf32>
    %c0_7 = arith.constant 0 : index
    %c0_8 = arith.constant 0 : index
    %c0_9 = arith.constant 0 : index
    %c0_10 = arith.constant 0 : index
    %11 = vector.load %arg5[%c0_7, %c0_8, %c0_9, %c0_10] : memref<1x8x16x128xf32, #tpu.memory_space<vmem>>, vector<1x8x16x128xf32>
    tpu.vector_store %arg5[%c0_7, %c0_8, %c0_9, %c0_10], %10 {strides = array<i32>} : memref<1x8x16x128xf32, #tpu.memory_space<vmem>>, vector<1x8x16x128xf32>,
    return
  }
  func.func @transform_0(%arg0: i32, %arg1: i32) -> (i32, i32, i32, i32) {
    %c0_i32 = arith.constant 0 : i32
    %c0_i32_0 = arith.constant 0 : i32
    %c0_i32_1 = arith.constant 0 : i32
    return %arg0, %arg1, %c0_i32, %c0_i32_0 : i32, i32, i32, i32
  }
  func.func @transform_1(%arg0: i32, %arg1: i32) -> (i32, i32) {
    %c0_i32 = arith.constant 0 : i32
    %c0_i32_0 = arith.constant 0 : i32
    %c0_i32_1 = arith.constant 0 : i32
    return %c0_i32, %c0_i32_0 : i32, i32
  }
  func.func @transform_2(%arg0: i32, %arg1: i32) -> (i32, i32) {
    %c0_i32 = arith.constant 0 : i32
    %c0_i32_0 = arith.constant 0 : i32
    %c0_i32_1 = arith.constant 0 : i32
    return %c0_i32, %c0_i32_0 : i32, i32
  }
  func.func @transform_3(%arg0: i32, %arg1: i32) -> (i32, i32, i32, i32) {
    %c0_i32 = arith.constant 0 : i32
    %c0_i32_0 = arith.constant 0 : i32
    %c0_i32_1 = arith.constant 0 : i32
    return %arg0, %arg1, %c0_i32, %c0_i32_0 : i32, i32, i32, i32
  }
}

</mosaic_0001>

<bundles_post_ra>
// kernel: _lambda_.4
= control target key start
LH: loop header
LB: loop body
LE: loop exit
PB: predicated region body
PF: predicated region fallthrough
CT: control target
= control target key end

     0   :  { %s2212_s12 = smov 0   ;;  %s2214_s13 = smov 0   ;;  %s3280_s0 = inlined_call_operand.vmem [shape: f32[2,16,16,128], index: 0, kind: input, shape index: {}]   ;;  %s3281_s1 = inlined_call_operand.vmem [shape: f32[1152,128], index: 1, kind: input, shape index: {}]   ;;  %s3282_s2 = inlined_call_operand.vmem [shape: f32[1,128], index: 2, kind: input, shape index: {}]   ;;  %s3283_s3 = inlined_call_operand.vmem [shape: f32[2,16,16,128], index: 3, kind: output, shape index: {}]  }
   0x1   :  { %s2216_s14 = smov 0   ;;  %s2218_s15 = smov 0  }
   0x2   :  { %s2220_s16 = smov 0  }
   0x3 LB: > { %s22_s17 = sadd.s32 1, %s2181_s14  ;;  %s25_s18 = sadd.s32 1, %s2185_s15  ;;  %s2189_s16 = sphi %s2220_s16, %s13_s16   ;;  %s2185_s15 = sphi %s2218_s15, %s3287_s15   ;;  %s2181_s14 = sphi %s2216_s14, %s3286_s14   ;;  %s2177_s13 = sphi %s2214_s13, %s3285_s13   ;;  %s2173_s12 = sphi %s2212_s12, %s3284_s12  }
   0x4   : > { %p23_p0 = scmp.ge.s32.totalorder %s22_s17, 2  ;;  %p1512_p1 = scmp.ge.s32.totalorder %s2189_s16, 1 }
   0x5   : > { %p151_p2 = scmp.lt.s32.totalorder %s2189_s16, 5 }
   0x6   : > { %s3289_s17 = smov (%p23_p0, %s22_s17), 0  ;;  %s3291_s18 = smov (!%p23_p0, %s25_s18), %s2185_s15 }
   0x7   : > { %p152_p3 = pnand %p1512_p1, %p151_p2  ;;  %p27_p4 = scmp.ge.s32.totalorder %s3291_s18, 2 }
   0x8   : > { %p180_p5 = scmp.lt.s32.totalorder (!%p152_p3), %s2177_s13, 1  ;;  %s1515_s19 = sshll.u32 (!%p152_p3), %s2173_s12, 3 }
   0x9   : > { %s3293_s18 = smov (%p27_p4, %s3291_s18), 0  ;;  %155 = sbr.rel (%p152_p3) target bundleno = 455 (0x1c7), region = 32 }
   0xa   : > { %p188_p6 = scmp.lt.s32.totalorder (!%p152_p3), %s1515_s19, 15  ;;  %p1519_p7 = scmp.ne.s32.totalorder (!%p152_p3), %s2173_s12, 0 }
  0x10   : > { %s3295_s13 = smov (!%p180_p5, %s2177_s13), 1  ;;  %s3297_s19 = smov (!%p188_p6, %s1515_s19), 15 }
  0x11   : > { %s1525_s20 = sshll.u32 %s3295_s13, 8  ;;  %s1517_s21 = sshll.u32 %s3295_s13, 5  ;;  %v2191_v3 = vmov (!%p1519_p7), 0.0  }
  0x12   : > { %s2248_s24 = scalar_lea.vmem %s3280_s0, %s1525_s20  ;;  %s1516_s25 = sshll.u32 %s3297_s19, 1  ;;  %235 = vst [vmem:[#allocation2 + $0x18] sm:$0xff] (!%p1519_p7), %v2191_v3  ;;  %232 = vst [vmem:[#allocation2] sm:$0xff] (!%p1519_p7), %v2191_v3 }
  0x13   : > { %s192_s26 = sadd.s32 %s1517_s21, %s1516_s25  ;;  %199 = sbr.rel (%p1519_p7) target bundleno = 62 (0x3e), region = 36  ;;  %v200_v0 = vld [vmem:[%s2248_s24] sm:$0xff] (!%p1519_p7)  ;;  %v201_v1 = vld [vmem:[%s2248_s24 + $0x8] sm:$0xff] (!%p1519_p7)  ;;  %v202_v2 = vld [vmem:[%s2248_s24 + $0x10] sm:$0xff] (!%p1519_p7)  ;;  %233 = vst [vmem:[#allocation2 + $0x8] sm:$0xff] (!%p1519_p7), %v2191_v3 }
  0x14   : > { %s1518_s27 = sshll.u32 %s192_s26, 3  ;;  %234 = vst [vmem:[#allocation2 + $0x10] sm:$0x3] (!%p1519_p7), %v2191_v3  ;;  %236 = vst [vmem:[#allocation2 + $0x20] sm:$0xff] (!%p1519_p7), %v2191_v3  ;;  %v203_v4 = vld [vmem:[%s2248_s24 + $0x18] sm:$0xff] (!%p1519_p7)  ;;  %v204_v5 = vld [vmem:[%s2248_s24 + $0x20] sm:$0xff] (!%p1519_p7) }
  0x15   : > { %s2253_s30 = scalar_lea.vmem %s3283_s3, %s1518_s27  ;;  %237 = vst [vmem:[#allocation2 + $0x28] sm:$0x3] (!%p1519_p7), %v2191_v3  ;;  %238 = vst [vmem:[#allocation2 + $0x30] sm:$0xff] (!%p1519_p7), %v2191_v3  ;;  %v205_v6 = vld [vmem:[%s2248_s24 + $0x28] sm:$0xff] (!%p1519_p7)  ;;  %v206_v7 = vld [vmem:[%s2248_s24 + $0x30] sm:$0xff] (!%p1519_p7) }
  0x16   : > { %239 = vst [vmem:[#allocation2 + $0x38] sm:$0xff] (!%p1519_p7), %v2191_v3  ;;  %240 = vst [vmem:[#allocation2 + $0x40] sm:$0x3] (!%p1519_p7), %v2191_v3  ;;  %v207_v8 = vld [vmem:[%s2248_s24 + $0x38] sm:$0xff] (!%p1519_p7)  ;;  %v208_v9 = vld [vmem:[%s2248_s24 + $0x40] sm:$0xff] (!%p1519_p7) }
  0x17   : > { %241 = vst [vmem:[#allocation2 + $0x48] sm:$0xff] (!%p1519_p7), %v2191_v3  ;;  %242 = vst [vmem:[#allocation2 + $0x50] sm:$0xff] (!%p1519_p7), %v2191_v3  ;;  %v209_v10 = vld [vmem:[%s2248_s24 + $0x48] sm:$0xff] (!%p1519_p7)  ;;  %v210_v11 = vld [vmem:[%s2248_s24 + $0x50] sm:$0xff] (!%p1519_p7) }
  0x18   : > { %243 = vst [vmem:[#allocation2 + $0x58] sm:$0x3] (!%p1519_p7), %v2191_v3  ;;  %244 = vst [vmem:[#allocation2 + $0x60] sm:$0xff] (!%p1519_p7), %v2191_v3  ;;  %v211_v12 = vld [vmem:[%s2248_s24 + $0x58] sm:$0xff] (!%p1519_p7)  ;;  %v212_v13 = vld [vmem:[%s2248_s24 + $0x60] sm:$0xff] (!%p1519_p7) }
  0x19   : > { %245 = vst [vmem:[#allocation2 + $0x68] sm:$0xff] (!%p1519_p7), %v2191_v3  ;;  %246 = vst [vmem:[#allocation2 + $0x70] sm:$0x3] (!%p1519_p7), %v2191_v3  ;;  %v213_v14 = vld [vmem:[%s2248_s24 + $0x68] sm:$0xff] (!%p1519_p7)  ;;  %v214_v15 = vld [vmem:[%s2248_s24 + $0x70] sm:$0xff] (!%p1519_p7) }
  0x1a   : > { %247 = vst [vmem:[#allocation2 + $0x78] sm:$0xff] %v2191_v3  ;;  %248 = vst [vmem:[#allocation2 + $0x80] sm:$0xff] %v2191_v3  ;;  %v215_v16 = vld [vmem:[%s2248_s24 + $0x78] sm:$0xff]  ;;  %v216_v17 = vld [vmem:[%s2248_s24 + $0x80] sm:$0xff] }
  0x1b   : > { %249 = vst [vmem:[#allocation2 + $0x88] sm:$0x3] %v2191_v3  ;;  %250 = vst [vmem:[#allocation2 + $0x90] sm:$0xff] %v2191_v3  ;;  %v217_v18 = vld [vmem:[%s2248_s24 + $0x88] sm:$0xff]  ;;  %v218_v19 = vld [vmem:[%s2248_s24 + $0x90] sm:$0xff] }
  0x1c   : > { %251 = vst [vmem:[#allocation2 + $0x98] sm:$0xff] %v2191_v3  ;;  %252 = vst [vmem:[#allocation2 + $0xa0] sm:$0x3] %v2191_v3  ;;  %v219_v20 = vld [vmem:[%s2248_s24 + $0x98] sm:$0xff]  ;;  %v220_v21 = vld [vmem:[%s2248_s24 + $0xa0] sm:$0xff] }
  0x1d   : > { %253 = vst [vmem:[#allocation2 + $0xa8] sm:$0xff] %v2191_v3  ;;  %254 = vst [vmem:[#allocation2 + $0xb0] sm:$0xff] %v2191_v3  ;;  %v221_v22 = vld [vmem:[%s2248_s24 + $0xa8] sm:$0xff]  ;;  %v222_v23 = vld [vmem:[%s2248_s24 + $0xb0] sm:$0xff] }
  0x1e   : > { %255 = vst [vmem:[#allocation2 + $0xb8] sm:$0x3] %v2191_v3  ;;  %256 = vst [vmem:[#allocation2 + $0xc0] sm:$0xff] %v2191_v3  ;;  %v223_v24 = vld [vmem:[%s2248_s24 + $0xb8] sm:$0xff]  ;;  %v224_v25 = vld [vmem:[%s2248_s24 + $0xc0] sm:$0xff] }
  0x1f   : > { %257 = vst [vmem:[#allocation2 + $0xc8] sm:$0xff] %v2191_v3  ;;  %258 = vst [vmem:[#allocation2 + $0xd0] sm:$0x3] %v2191_v3  ;;  %v225_v26 = vld [vmem:[%s2248_s24 + $0xc8] sm:$0xff]  ;;  %v226_v27 = vld [vmem:[%s2248_s24 + $0xd0] sm:$0xff] }
  0x20   : > { %259 = vst [vmem:[#allocation2 + $0xd8] sm:$0xff] %v2191_v3  ;;  %260 = vst [vmem:[#allocation2 + $0xe0] sm:$0xff] %v2191_v3  ;;  %v227_v28 = vld [vmem:[%s2248_s24 + $0xd8] sm:$0xff]  ;;  %v228_v29 = vld [vmem:[%s2248_s24 + $0xe0] sm:$0xff] }
  0x21   : > { %261 = vst [vmem:[#allocation2 + $0xe8] sm:$0x3] %v2191_v3  ;;  %262 = vst [vmem:[#allocation2 + $0xf0] sm:$0xff] %v2191_v3  ;;  %v229_v30 = vld [vmem:[%s2248_s24 + $0xe8] sm:$0xff]  ;;  %v230_v31 = vld [vmem:[%s2248_s24 + $0xf0] sm:$0xff] }
  0x22   : > { %263 = vst [vmem:[#allocation2 + $0xf8] sm:$0xff] %v2191_v3  ;;  %264 = vst [vmem:[#allocation2 + $0x100] sm:$0x3] %v2191_v3  ;;  %v231_v32 = vld [vmem:[%s2248_s24 + $0xf8] sm:$0xff] }
  0x23   : > { %265 = vst [vmem:[#allocation2 + $0x108] sm:$0xff] %v2191_v3  ;;  %266 = vst [vmem:[#allocation2 + $0x110] sm:$0xff] %v2191_v3 }
  0x24   : > { %267 = vst [vmem:[#allocation2 + $0x118] sm:$0x3] %v2191_v3  ;;  %268 = vst [vmem:[#allocation2 + $0x120] sm:$0xff] %v2191_v3 }
  0x25   : > { %269 = vst [vmem:[#allocation2 + $0x128] sm:$0xff] %v2191_v3  ;;  %270 = vst [vmem:[#allocation2 + $0x130] sm:$0x3] %v2191_v3 }
  0x26   : > { %271 = vst [vmem:[#allocation2 + $0x138] sm:$0xff] %v2191_v3  ;;  %272 = vst [vmem:[#allocation2 + $0x140] sm:$0xff] %v2191_v3 }
  0x27   : > { %273 = vst [vmem:[#allocation2 + $0x148] sm:$0x3] %v2191_v3  ;;  %274 = vst [vmem:[#allocation2 + $0x150] sm:$0xff] %v2191_v3 }
  0x28   : > { %275 = vst [vmem:[#allocation2 + $0x158] sm:$0xff] %v2191_v3  ;;  %276 = vst [vmem:[#allocation2 + $0x160] sm:$0x3] %v2191_v3 }
  0x29   : > { %277 = vst [vmem:[#allocation2 + $0x168] sm:$0xff] %v2191_v3  ;;  %278 = vst [vmem:[#allocation2 + $0x170] sm:$0xff] %v2191_v3 }
  0x2a   : > { %279 = vst [vmem:[#allocation2 + $0x178] sm:$0x3] %v2191_v3  ;;  %280 = vst [vmem:[#allocation2 + $0x180] sm:$0xff] %v2191_v3 }
  0x2b   : > { %281 = vst [vmem:[#allocation2 + $0x188] sm:$0xff] %v2191_v3  ;;  %282 = vst [vmem:[#allocation2 + $0x190] sm:$0x3] %v2191_v3 }
  0x2c   : > { %283 = vst [vmem:[#allocation2 + $0x198] sm:$0xff] %v2191_v3  ;;  %284 = vst [vmem:[#allocation2 + $0x1a0] sm:$0xff] %v2191_v3 }
  0x2d   : > { %285 = vst [vmem:[#allocation2 + $0x1a8] sm:$0x3] %v2191_v3  ;;  %287 = vst [vmem:[#allocation2 + $0x19] sm:$0xff] %v200_v0 }
  0x2e   : > { %288 = vst [vmem:[#allocation2 + $0x21] sm:$0xff] %v201_v1  ;;  %289 = vst [vmem:[#allocation2 + $0x31] sm:$0xff] %v202_v2 }
  0x2f   : > { %290 = vst [vmem:[#allocation2 + $0x39] sm:$0xff] %v203_v4  ;;  %291 = vst [vmem:[#allocation2 + $0x49] sm:$0xff] %v204_v5 }
  0x30   : > { %292 = vst [vmem:[#allocation2 + $0x51] sm:$0xff] %v205_v6  ;;  %293 = vst [vmem:[#allocation2 + $0x61] sm:$0xff] %v206_v7 }
  0x31   : > { %294 = vst [vmem:[#allocation2 + $0x69] sm:$0xff] %v207_v8  ;;  %295 = vst [vmem:[#allocation2 + $0x79] sm:$0xff] %v208_v9 }
  0x32   : > { %296 = vst [vmem:[#allocation2 + $0x81] sm:$0xff] %v209_v10  ;;  %297 = vst [vmem:[#allocation2 + $0x91] sm:$0xff] %v210_v11 }
  0x33   : > { %298 = vst [vmem:[#allocation2 + $0x99] sm:$0xff] %v211_v12  ;;  %299 = vst [vmem:[#allocation2 + $0xa9] sm:$0xff] %v212_v13 }
  0x34   : > { %300 = vst [vmem:[#allocation2 + $0xb1] sm:$0xff] %v213_v14  ;;  %301 = vst [vmem:[#allocation2 + $0xc1] sm:$0xff] %v214_v15 }
  0x35   : > { %302 = vst [vmem:[#allocation2 + $0xc9] sm:$0xff] %v215_v16  ;;  %303 = vst [vmem:[#allocation2 + $0xd9] sm:$0xff] %v216_v17 }
  0x36   : > { %304 = vst [vmem:[#allocation2 + $0xe1] sm:$0xff] %v217_v18  ;;  %305 = vst [vmem:[#allocation2 + $0xf1] sm:$0xff] %v218_v19 }
  0x37   : > { %306 = vst [vmem:[#allocation2 + $0xf9] sm:$0xff] %v219_v20  ;;  %307 = vst [vmem:[#allocation2 + $0x109] sm:$0xff] %v220_v21 }
  0x38   : > { %308 = vst [vmem:[#allocation2 + $0x111] sm:$0xff] %v221_v22  ;;  %309 = vst [vmem:[#allocation2 + $0x121] sm:$0xff] %v222_v23 }
  0x39   : > { %310 = vst [vmem:[#allocation2 + $0x129] sm:$0xff] %v223_v24  ;;  %311 = vst [vmem:[#allocation2 + $0x139] sm:$0xff] %v224_v25 }
  0x3a   : > { %312 = vst [vmem:[#allocation2 + $0x141] sm:$0xff] %v225_v26  ;;  %313 = vst [vmem:[#allocation2 + $0x151] sm:$0xff] %v226_v27 }
  0x3b   : > { %314 = vst [vmem:[#allocation2 + $0x159] sm:$0xff] %v227_v28  ;;  %315 = vst [vmem:[#allocation2 + $0x169] sm:$0xff] %v228_v29 }
  0x3c   : > { %316 = vst [vmem:[#allocation2 + $0x171] sm:$0xff] %v229_v30  ;;  %317 = vst [vmem:[#allocation2 + $0x181] sm:$0xff] %v230_v31 }
  0x3d   : > { %318 = vst [vmem:[#allocation2 + $0x189] sm:$0xff] %v231_v32 }
  0x3e PF: > { %v540_v33 = vld [vmem:[%s3281_s1 + $0x80] sm:$0xff]  ;;  %v541_v34 = vld [vmem:[%s3281_s1 + $0x88] sm:$0xff]  ;;  %v542_v44 = vld [vmem:[%s3281_s1 + $0x90] sm:$0xff]  ;;  %s1521_s8 = smul.u32 192, %s2173_s12  ;;  %vm376_vm0 = vcmask 1046528   ;;  %vm433_vm1 = vcmask 1045504  }
  0x3f   : > { %v572_v35 = vld [vmem:[%s3281_s1 + $0x180] sm:$0xff]  ;;  %v1934_v36 = vpack.c.bf16 %v541_v34, %v540_v33  ;;  %v573_v37 = vld [vmem:[%s3281_s1 + $0x188] sm:$0xff]  ;;  %v543_v46 = vld [vmem:[%s3281_s1 + $0x98] sm:$0xff] }
  0x40   : > { %v524_v38 = vld [vmem:[%s3281_s1] sm:$0xff]  ;;  %v525_v39 = vld [vmem:[%s3281_s1 + $0x8] sm:$0xff]  ;;  %v1966_v40 = vpack.c.bf16 %v573_v37, %v572_v35  ;;  %v574_v47 = vld [vmem:[%s3281_s1 + $0x190] sm:$0xff]  ;;  %v1938_v49 = vpack.c.bf16 %v543_v46, %v542_v44  ;;  %s2457_s22 = scalar_lea.vmem [#allocation2], %s1521_s8 }
  0x41   : > { %v1936_v41 = vpack.c.bf16 %v525_v39, %v524_v38  ;;  %v556_v42 = vld [vmem:[%s3281_s1 + $0x100] sm:$0xff]  ;;  %v557_v43 = vld [vmem:[%s3281_s1 + $0x108] sm:$0xff]  ;;  %1935 = vmatprep.subr.bf16.mxu0 %v1934_v36  ;;  %v575_v48 = vld [vmem:[%s3281_s1 + $0x198] sm:$0xff] }
  0x42   : > { %v1968_v45 = vpack.c.bf16 %v557_v43, %v556_v42  ;;  %1967 = vmatprep.subr.bf16.mxu1 %v1966_v40  ;;  %v1970_v50 = vpack.c.bf16 %v575_v48, %v574_v47  ;;  %v526_v51 = vld [vmem:[%s3281_s1 + $0x10] sm:$0xff]  ;;  %v527_v52 = vld [vmem:[%s3281_s1 + $0x18] sm:$0xff]  ;;  %v544_v56 = vld [vmem:[%s3281_s1 + $0xa0] sm:$0xff] }
  0x43   : > { %1937 = vmatpush3.bf16.msra.mxu0 %v1936_v41  ;;  %v558_v53 = vld [vmem:[%s3281_s1 + $0x110] sm:$0xff]  ;;  %v1940_v54 = vpack.c.bf16 %v527_v52, %v526_v51  ;;  %v559_v55 = vld [vmem:[%s3281_s1 + $0x118] sm:$0xff]  ;;  %v545_v57 = vld [vmem:[%s3281_s1 + $0xa8] sm:$0xff] }
  0x44   : > { %1969 = vmatpush3.bf16.msra.mxu1 %v1968_v45  ;;  %1939 = vmatprep.subr.bf16.mxu0 %v1938_v49  ;;  %v1972_v58 = vpack.c.bf16 %v559_v55, %v558_v53  ;;  %v1942_v59 = vpack.c.bf16 %v545_v57, %v544_v56  ;;  %v576_v60 = vld [vmem:[%s3281_s1 + $0x1a0] sm:$0xff]  ;;  %v577_v61 = vld [vmem:[%s3281_s1 + $0x1a8] sm:$0xff]  ;;  %v546_v4 = vld [vmem:[%s3281_s1 + $0xb0] sm:$0xff] }
  0x45   : > { %1971 = vmatprep.subr.bf16.mxu1 %v1970_v50  ;;  %v528_v62 = vld [vmem:[%s3281_s1 + $0x20] sm:$0xff]  ;;  %v1974_v63 = vpack.c.bf16 %v577_v61, %v576_v60  ;;  %v529_v0 = vld [vmem:[%s3281_s1 + $0x28] sm:$0xff]  ;;  %v547_v5 = vld [vmem:[%s3281_s1 + $0xb8] sm:$0xff] }
  0x46   : > { %v560_v1 = vld [vmem:[%s3281_s1 + $0x120] sm:$0xff]  ;;  %v561_v2 = vld [vmem:[%s3281_s1 + $0x128] sm:$0xff]  ;;  %v1944_v3 = vpack.c.bf16 %v529_v0, %v528_v62  ;;  %v578_v6 = vld [vmem:[%s3281_s1 + $0x1b0] sm:$0xff]  ;;  %v1946_v8 = vpack.c.bf16 %v547_v5, %v546_v4 }
  0x47   : > { %1941 = vmatpush3.bf16.msra.mxu0 %v1940_v54  ;;  %v1976_v7 = vpack.c.bf16 %v561_v2, %v560_v1  ;;  %v579_v9 = vld [vmem:[%s3281_s1 + $0x1b8] sm:$0xff]  ;;  %v530_v10 = vld [vmem:[%s3281_s1 + $0x30] sm:$0xff]  ;;  %v548_v15 = vld [vmem:[%s3281_s1 + $0xc0] sm:$0xff] }
  0x48   : > { %1973 = vmatpush3.bf16.msra.mxu1 %v1972_v58  ;;  %1943 = vmatprep.subr.bf16.mxu0 %v1942_v59  ;;  %v531_v11 = vld [vmem:[%s3281_s1 + $0x38] sm:$0xff]  ;;  %v1978_v12 = vpack.c.bf16 %v579_v9, %v578_v6  ;;  %v562_v13 = vld [vmem:[%s3281_s1 + $0x130] sm:$0xff]  ;;  %v549_v16 = vld [vmem:[%s3281_s1 + $0xc8] sm:$0xff] }
  0x49   : > { %1975 = vmatprep.subr.bf16.mxu1 %v1974_v63  ;;  %v563_v14 = vld [vmem:[%s3281_s1 + $0x138] sm:$0xff]  ;;  %v580_v17 = vld [vmem:[%s3281_s1 + $0x1c0] sm:$0xff]  ;;  %v581_v18 = vld [vmem:[%s3281_s1 + $0x1c8] sm:$0xff]  ;;  %v1948_v19 = vpack.c.bf16 %v531_v11, %v530_v10  ;;  %v1950_v21 = vpack.c.bf16 %v549_v16, %v548_v15 }
  0x4a   : > { %v1980_v20 = vpack.c.bf16 %v563_v14, %v562_v13  ;;  %v532_v22 = vld [vmem:[%s3281_s1 + $0x40] sm:$0xff]  ;;  %v533_v23 = vld [vmem:[%s3281_s1 + $0x48] sm:$0xff]  ;;  %v1982_v25 = vpack.c.bf16 %v581_v18, %v580_v17  ;;  %v550_v27 = vld [vmem:[%s3281_s1 + $0xd0] sm:$0xff] }
  0x4b   : > { %1945 = vmatpush3.bf16.msra.mxu0 %v1944_v3  ;;  %v564_v24 = vld [vmem:[%s3281_s1 + $0x140] sm:$0xff]  ;;  %v565_v26 = vld [vmem:[%s3281_s1 + $0x148] sm:$0xff]  ;;  %v551_v28 = vld [vmem:[%s3281_s1 + $0xd8] sm:$0xff]  ;;  %v1952_v31 = vpack.c.bf16 %v533_v23, %v532_v22 }
  0x4c   : > { %1977 = vmatpush3.bf16.msra.mxu1 %v1976_v7  ;;  %1947 = vmatprep.subr.bf16.mxu0 %v1946_v8  ;;  %v582_v29 = vld [vmem:[%s3281_s1 + $0x1d0] sm:$0xff]  ;;  %v583_v30 = vld [vmem:[%s3281_s1 + $0x1d8] sm:$0xff]  ;;  %v1984_v32 = vpack.c.bf16 %v565_v26, %v564_v24  ;;  %v1954_v33 = vpack.c.bf16 %v551_v28, %v550_v27  ;;  %v552_v39 = vld [vmem:[%s3281_s1 + $0xe0] sm:$0xff] }
  0x4d   : > { %1979 = vmatprep.subr.bf16.mxu1 %v1978_v12  ;;  %v534_v34 = vld [vmem:[%s3281_s1 + $0x50] sm:$0xff]  ;;  %v535_v35 = vld [vmem:[%s3281_s1 + $0x58] sm:$0xff]  ;;  %v1986_v37 = vpack.c.bf16 %v583_v30, %v582_v29  ;;  %v553_v40 = vld [vmem:[%s3281_s1 + $0xe8] sm:$0xff] }
  0x4e   : > { %v566_v36 = vld [vmem:[%s3281_s1 + $0x150] sm:$0xff]  ;;  %v567_v38 = vld [vmem:[%s3281_s1 + $0x158] sm:$0xff]  ;;  %v584_v41 = vld [vmem:[%s3281_s1 + $0x1e0] sm:$0xff]  ;;  %v1956_v43 = vpack.c.bf16 %v535_v35, %v534_v34  ;;  %v1958_v48 = vpack.c.bf16 %v553_v40, %v552_v39 }
  0x4f   : > { %1949 = vmatpush3.bf16.msra.mxu0 %v1948_v19  ;;  %v585_v42 = vld [vmem:[%s3281_s1 + $0x1e8] sm:$0xff]  ;;  %v536_v44 = vld [vmem:[%s3281_s1 + $0x60] sm:$0xff]  ;;  %v1988_v47 = vpack.c.bf16 %v567_v38, %v566_v36  ;;  %v554_v53 = vld [vmem:[%s3281_s1 + $0xf0] sm:$0xff] }
  0x50   : > { %1981 = vmatpush3.bf16.msra.mxu1 %v1980_v20  ;;  %1951 = vmatprep.subr.bf16.mxu0 %v1950_v21  ;;  %v537_v45 = vld [vmem:[%s3281_s1 + $0x68] sm:$0xff]  ;;  %v568_v46 = vld [vmem:[%s3281_s1 + $0x160] sm:$0xff]  ;;  %v1990_v52 = vpack.c.bf16 %v585_v42, %v584_v41  ;;  %v555_v54 = vld [vmem:[%s3281_s1 + $0xf8] sm:$0xff] }
  0x51   : > { %1983 = vmatprep.subr.bf16.mxu1 %v1982_v25  ;;  %v569_v49 = vld [vmem:[%s3281_s1 + $0x168] sm:$0xff]  ;;  %v2460_v50 = vld [vmem:[%s2457_s22] sm:$0xff]  ;;  %v2474_v57 = vld [vmem:[%s2457_s22 + $0x18] sm:$0xff]  ;;  %v1960_v60 = vpack.c.bf16 %v537_v45, %v536_v44  ;;  %v1962_v63 = vpack.c.bf16 %v555_v54, %v554_v53 }
  0x52   : > { %v2463_v51 = vld [vmem:[%s2457_s22 + $0x8] sm:$0xff]  ;;  %v377_v55 = vrot.slane %v2460_v50, 1  ;;  %v586_v58 = vld [vmem:[%s3281_s1 + $0x1f0] sm:$0xff]  ;;  %v587_v59 = vld [vmem:[%s3281_s1 + $0x1f8] sm:$0xff]  ;;  %884 = vmatprep.mubr.f32.mxu1 %v2474_v57  ;;  %v1992_v62 = vpack.c.bf16 %v569_v49, %v568_v46  ;;  %v434_v12 = vrot.slane %v2460_v50, 2  ;;  %v382_v25 = vrot.slane %v2474_v57, 1 }
  0x53   : > { %1953 = vmatpush3.bf16.msra.mxu0 %v1952_v31  ;;  %v378_v56 = vrot.slane %v2463_v51, 1  ;;  %v538_v0 = vld [vmem:[%s3281_s1 + $0x70] sm:$0xff]  ;;  %v539_v1 = vld [vmem:[%s3281_s1 + $0x78] sm:$0xff]  ;;  %v1994_v3 = vpack.c.bf16 %v587_v59, %v586_v58  ;;  %v604_v5 = vld [vmem:[%s3281_s1 + $0x280] sm:$0xff]  ;;  %v435_v13 = vrot.slane %v2463_v51, 2  ;;  %v439_v42 = vrot.slane %v2474_v57, 2 }
  0x54   : > { %1985 = vmatpush3.bf16.msra.mxu1 %v1984_v32  ;;  %1955 = vmatprep.subr.bf16.mxu0 %v1954_v33  ;;  %v570_v2 = vld [vmem:[%s3281_s1 + $0x170] sm:$0xff]  ;;  %v571_v4 = vld [vmem:[%s3281_s1 + $0x178] sm:$0xff]  ;;  %v605_v6 = vld [vmem:[%s3281_s1 + $0x288] sm:$0xff]  ;;  %v1964_v10 = vpack.c.bf16 %v539_v1, %v538_v0 }
  0x55   : > { %1987 = vmatprep.subr.bf16.mxu1 %v1986_v37  ;;  %v379_v61 = vsel %vm376_vm0, %v377_v55, %v378_v56  ;;  %v636_v7 = vld [vmem:[%s3281_s1 + $0x380] sm:$0xff]  ;;  %v637_v8 = vld [vmem:[%s3281_s1 + $0x388] sm:$0xff]  ;;  %v324_v9 = vld [vmem:[%s2457_s22 + $0x10] sm:$0x3]  ;;  %v1996_v11 = vpack.c.bf16 %v571_v4, %v570_v2  ;;  %v1998_v14 = vpack.c.bf16 %v605_v6, %v604_v5  ;;  %v436_v28 = vsel %vm433_vm1, %v434_v12, %v435_v13 }
  0x56   : > { %739 = vmatprep.mubr.f32.mxu0 %v379_v61  ;;  %v588_v15 = vld [vmem:[%s3281_s1 + $0x200] sm:$0xff]  ;;  %v589_v16 = vld [vmem:[%s3281_s1 + $0x208] sm:$0xff]  ;;  %v2030_v17 = vpack.c.bf16 %v637_v8, %v636_v7  ;;  %v380_v20 = vrot.slane %v324_v9, 1  ;;  %v606_v22 = vld [vmem:[%s3281_s1 + $0x290] sm:$0xff]  ;;  %v437_v30 = vrot.slane %v324_v9, 2 }
  0x57   : > { %1957 = vmatpush3.bf16.msra.mxu0 %v1956_v43  ;;  %v620_v18 = vld [vmem:[%s3281_s1 + $0x300] sm:$0xff]  ;;  %v621_v19 = vld [vmem:[%s3281_s1 + $0x308] sm:$0xff]  ;;  %v607_v23 = vld [vmem:[%s3281_s1 + $0x298] sm:$0xff]  ;;  %v2000_v24 = vpack.c.bf16 %v589_v16, %v588_v15 }
  0x58   : > { %1989 = vmatpush3.bf16.msra.mxu1 %v1988_v47  ;;  %1959 = vmatprep.subr.bf16.mxu0 %v1958_v48  ;;  %v2524_v21 = vld [vmem:[%s2457_s22 + $0x20] sm:$0xff]  ;;  %v638_v26 = vld [vmem:[%s3281_s1 + $0x390] sm:$0xff]  ;;  %v639_v27 = vld [vmem:[%s3281_s1 + $0x398] sm:$0xff]  ;;  %v2032_v29 = vpack.c.bf16 %v621_v19, %v620_v18  ;;  %v381_v33 = vsel %vm376_vm0, %v378_v56, %v380_v20  ;;  %v2002_v34 = vpack.c.bf16 %v607_v23, %v606_v22 }
  0x59   : > { %1991 = vmatprep.subr.bf16.mxu1 %v1990_v52  ;;  %v383_v31 = vrot.slane %v2524_v21, 1  ;;  %v590_v32 = vld [vmem:[%s3281_s1 + $0x210] sm:$0xff]  ;;  %v591_v35 = vld [vmem:[%s3281_s1 + $0x218] sm:$0xff]  ;;  %v2552_v37 = vld [vmem:[%s2457_s22 + $0x28] sm:$0x3]  ;;  %v2034_v38 = vpack.c.bf16 %v639_v27, %v638_v26  ;;  %v440_v43 = vrot.slane %v2524_v21, 2  ;;  %v438_v46 = vsel %vm433_vm1, %v435_v13, %v437_v30 }
  0x5a   : > { %v622_v36 = vld [vmem:[%s3281_s1 + $0x310] sm:$0xff]  ;;  %v623_v39 = vld [vmem:[%s3281_s1 + $0x318] sm:$0xff]  ;;  %v608_v40 = vld [vmem:[%s3281_s1 + $0x2a0] sm:$0xff]  ;;  %v2004_v49 = vpack.c.bf16 %v591_v35, %v590_v32 }
  0x5b   : > { %1961 = vmatpush3.bf16.msra.mxu0 %v1960_v60  ;;  %v609_v41 = vld [vmem:[%s3281_s1 + $0x2a8] sm:$0xff]  ;;  %v640_v44 = vld [vmem:[%s3281_s1 + $0x3a0] sm:$0xff]  ;;  %v2574_v47 = vsel %vm376_vm0, %v382_v25, %v383_v31  ;;  %v2577_v48 = vld [vmem:[%s2457_s22 + $0x30] sm:$0xff]  ;;  %v2036_v53 = vpack.c.bf16 %v623_v39, %v622_v36 }
  0x5c   : > { %1993 = vmatpush3.bf16.msra.mxu1 %v1992_v62  ;;  %1963 = vmatprep.subr.bf16.mxu0 %v1962_v63  ;;  %v641_v45 = vld [vmem:[%s3281_s1 + $0x3a8] sm:$0xff]  ;;  %v2581_v52 = vld [vmem:[%s2457_s22 + $0x38] sm:$0xff]  ;;  %v2006_v54 = vpack.c.bf16 %v609_v41, %v608_v40  ;;  %v592_v55 = vld [vmem:[%s3281_s1 + $0x220] sm:$0xff]  ;;  %v387_v63 = vrot.slane %v2577_v48, 1 }
  0x5d   : > { %1995 = vmatprep.subr.bf16.mxu1 %v1994_v3  ;;  %v593_v56 = vld [vmem:[%s3281_s1 + $0x228] sm:$0xff]  ;;  %v624_v58 = vld [vmem:[%s3281_s1 + $0x320] sm:$0xff]  ;;  %v2038_v59 = vpack.c.bf16 %v641_v45, %v640_v44  ;;  %v610_v61 = vld [vmem:[%s3281_s1 + $0x2b0] sm:$0xff]  ;;  %v442_v3 = vrot.slane %v2552_v37, 2  ;;  %v388_v4 = vrot.slane %v2581_v52, 1  ;;  %v445_v16 = vrot.slane %v2581_v52, 2 }
  0x5e   : > { %v625_v60 = vld [vmem:[%s3281_s1 + $0x328] sm:$0xff]  ;;  %v611_v62 = vld [vmem:[%s3281_s1 + $0x2b8] sm:$0xff]  ;;  %v642_v0 = vld [vmem:[%s3281_s1 + $0x3b0] sm:$0xff]  ;;  %v2008_v5 = vpack.c.bf16 %v593_v56, %v592_v55 }
  0x5f   : > { %1965 = vmatpush3.bf16.msra.mxu0 %v1964_v10  ;;  %v643_v1 = vld [vmem:[%s3281_s1 + $0x3b8] sm:$0xff]  ;;  %v2621_v6 = vld [vmem:[%s2457_s22 + $0x40] sm:$0x3]  ;;  %v2040_v7 = vpack.c.bf16 %v625_v60, %v624_v58  ;;  %v2010_v8 = vpack.c.bf16 %v611_v62, %v610_v61  ;;  %v594_v9 = vld [vmem:[%s3281_s1 + $0x230] sm:$0xff]  ;;  %v2654_v19 = vsel %vm433_vm1, %v440_v43, %v442_v3  ;;  %v2657_v20 = vsel %vm376_vm0, %v387_v63, %v388_v4 }
  0x60   : > { %1997 = vmatpush3.bf16.msra.mxu1 %v1996_v11  ;;  %1999 = vmatprep.subr.bf16.mxu0 %v1998_v14  ;;  %v595_v10 = vld [vmem:[%s3281_s1 + $0x238] sm:$0xff]  ;;  %v626_v11 = vld [vmem:[%s3281_s1 + $0x330] sm:$0xff]  ;;  %v2042_v12 = vpack.c.bf16 %v643_v1, %v642_v0  ;;  %v612_v14 = vld [vmem:[%s3281_s1 + $0x2c0] sm:$0xff]  ;;  %v390_v23 = vrot.slane %v2621_v6, 1 }
  0x61   : > { %2031 = vmatprep.subr.bf16.mxu1 %v2030_v17  ;;  %v627_v13 = vld [vmem:[%s3281_s1 + $0x338] sm:$0xff]  ;;  %v613_v15 = vld [vmem:[%s3281_s1 + $0x2c8] sm:$0xff]  ;;  %v644_v17 = vld [vmem:[%s3281_s1 + $0x3c0] sm:$0xff]  ;;  %v2012_v25 = vpack.c.bf16 %v595_v10, %v594_v9 }
  0x62   : > { %740 = vmatmul.mubr.f32.vlgmr.msra.gmra.mrb[0].mxu0 %v2460_v50  ;;  %v385_v50 = vrot.slane %v2552_v37, 1  ;;  %v645_v18 = vld [vmem:[%s3281_s1 + $0x3c8] sm:$0xff]  ;;  %v2044_v26 = vpack.c.bf16 %v627_v13, %v626_v11  ;;  %v2667_v27 = vld [vmem:[%s2457_s22 + $0x58] sm:$0x3]  ;;  %v2680_v32 = vld [vmem:[%s2457_s22 + $0x60] sm:$0xff] }
  0x63   : > { %885 = vmatmul.mubr.f32.vlgmr.msra.gmra.mrb[0].mxu1 %v436_v28  ;;  %2001 = vmatpush3.bf16.msra.mxu0 %v2000_v24  ;;  %v2660_v22 = vld [vmem:[%s2457_s22 + $0x48] sm:$0xff]  ;;  %v2664_v24 = vld [vmem:[%s2457_s22 + $0x50] sm:$0xff]  ;;  %v2014_v28 = vpack.c.bf16 %v613_v15, %v612_v14  ;;  %v615_v36 = vld [vmem:[%s3281_s1 + $0x2d8] sm:$0xff]  ;;  %v397_v55 = vrot.slane %v2680_v32, 1  ;;  %v395_v62 = vrot.slane %v2667_v27, 1  ;;  %v452_v63 = vrot.slane %v2667_v27, 2 }
  0x64   : > { %2033 = vmatpush3.bf16.msra.mxu1 %v2032_v29  ;;  %744 = vmatprep.mubr.f32.mxu0 %v381_v33  ;;  %v2616_v2 = vsel %vm376_vm0, %v383_v31, %v385_v50  ;;  %v596_v29 = vld [vmem:[%s3281_s1 + $0x240] sm:$0xff]  ;;  %v597_v30 = vld [vmem:[%s3281_s1 + $0x248] sm:$0xff]  ;;  %v2046_v33 = vpack.c.bf16 %v645_v18, %v644_v17  ;;  %v614_v35 = vld [vmem:[%s3281_s1 + $0x2d0] sm:$0xff]  ;;  %v392_v37 = vrot.slane %v2660_v22, 1  ;;  %v393_v44 = vrot.slane %v2664_v24, 1 }
  0x65   : > { %889 = vmatprep.mubr.f32.mxu1 %v2524_v21  ;;  %2003 = vmatprep.subr.bf16.mxu0 %v2002_v34  ;;  %v628_v31 = vld [vmem:[%s3281_s1 + $0x340] sm:$0xff]  ;;  %v629_v34 = vld [vmem:[%s3281_s1 + $0x348] sm:$0xff]  ;;  %v646_v39 = vld [vmem:[%s3281_s1 + $0x3d0] sm:$0xff]  ;;  %v2016_v45 = vpack.c.bf16 %v597_v30, %v596_v29  ;;  %v2018_v58 = vpack.c.bf16 %v615_v36, %v614_v35  ;;  %v454_v36 = vrot.slane %v2680_v32, 2 }
  0x66   : > { %745 = vmatmul.mubr.f32.gmra.mrb[2].mxu0 %v2463_v51  ;;  %2035 = vmatprep.subr.bf16.mxu1 %v2034_v38  ;;  %v2605_v51 = vsel %vm433_vm1, %v439_v42, %v440_v43  ;;  %v449_v38 = vrot.slane %v2660_v22, 2  ;;  %v647_v40 = vld [vmem:[%s3281_s1 + $0x3d8] sm:$0xff]  ;;  %v2709_v41 = vld [vmem:[%s3281_s1 + $0x250] sm:$0xff]  ;;  %v2713_v42 = vsel %vm376_vm0, %v388_v4, %v390_v23  ;;  %v447_v43 = vrot.slane %v2621_v6, 2  ;;  %v2743_v60 = vld [vmem:[%s3281_s1 + $0x2e0] sm:$0xff] }
  0x67   : > { %890 = vmatmul.mubr.f32.gmra.mrb[2].mxu1 %v438_v46  ;;  %749 = vmatprep.mubr.f32.mxu0 %v2574_v47  ;;  %v2720_v46 = vld [vmem:[%s3281_s1 + $0x258] sm:$0xff]  ;;  %v2728_v50 = vld [vmem:[%s2457_s22 + $0xb0] sm:$0xff]  ;;  %v2048_v56 = vpack.c.bf16 %v629_v34, %v628_v31  ;;  %v617_v61 = vld [vmem:[%s3281_s1 + $0x2e8] sm:$0xff]  ;;  %v2050_v0 = vpack.c.bf16 %v647_v40, %v646_v39  ;;  %v2824_v30 = vsel %vm376_vm0, %v393_v44, %v395_v62 }
  0x68   : > { %894 = vmatprep.mubr.f32.mxu1 %v2577_v48  ;;  %2005 = vmatpush3.bf16.msra.mxu0 %v2004_v49  ;;  %v2725_v49 = vld [vmem:[%s3281_s1 + $0x350] sm:$0xff]  ;;  %v2754_v1 = vld [vmem:[%s3281_s1 + $0x3e0] sm:$0xff]  ;;  %v2760_v4 = vld [vmem:[%s2457_s22 + $0xb8] sm:$0x3]  ;;  %v413_v6 = vrot.slane %v2728_v50, 1  ;;  %v2778_v11 = vsel %vm433_vm1, %v445_v16, %v447_v43  ;;  %v2020_v13 = vpack.c.bf16 %v2720_v46, %v2709_v41  ;;  %v2022_v18 = vpack.c.bf16 %v617_v61, %v2743_v60 }
  0x69   : > { %2037 = vmatpush3.bf16.msra.mxu1 %v2036_v53  ;;  %2007 = vmatprep.subr.bf16.mxu0 %v2006_v54  ;;  %v450_v53 = vrot.slane %v2664_v24, 2  ;;  %v2732_v54 = vld [vmem:[%s2457_s22 + $0x68] sm:$0xff]  ;;  %v2757_v3 = vld [vmem:[%s2457_s22 + $0xc0] sm:$0xff]  ;;  %v650_v34 = vld [vmem:[%s3281_s1 + $0x3f0] sm:$0xff] }
  0x6a   : > { %750 = vmatmul.mubr.f32.gmra.mrb[4].mxu0 %v2474_v57  ;;  %2039 = vmatprep.subr.bf16.mxu1 %v2038_v59  ;;  %v444_v57 = vrot.slane %v2577_v48, 2  ;;  %v2738_v59 = vld [vmem:[%s3281_s1 + $0x358] sm:$0xff]  ;;  %v493_v9 = vrot.slane %v2757_v3, 1  ;;  %v500_v10 = vrot.slane %v2757_v3, 2  ;;  %v2788_v14 = vld [vmem:[%s3281_s1 + $0x260] sm:$0xff]  ;;  %v2793_v15 = vld [vmem:[%s3281_s1 + $0x268] sm:$0xff] }
  0x6b   : > { %895 = vmatmul.mubr.f32.gmra.mrb[4].mxu1 %v2605_v51  ;;  %754 = vmatprep.mubr.f32.mxu0 %v2616_v2  ;;  %v2052_v17 = vpack.c.bf16 %v2738_v59, %v2725_v49  ;;  %v633_v23 = vld [vmem:[%s3281_s1 + $0x368] sm:$0xff]  ;;  %v2821_v29 = vsel %vm433_vm1, %v449_v38, %v450_v53  ;;  %v398_v31 = vrot.slane %v2732_v54, 1  ;;  %v2834_v35 = vsel %vm433_vm1, %v450_v53, %v452_v63  ;;  %v651_v38 = vld [vmem:[%s3281_s1 + $0x3f8] sm:$0xff]  ;;  %v602_v39 = vld [vmem:[%s3281_s1 + $0x270] sm:$0xff] }
  0x6c   : > { %899 = vmatprep.mubr.f32.mxu1 %v2581_v52  ;;  %2009 = vmatpush3.bf16.msra.mxu0 %v2008_v5  ;;  %v649_v5 = vld [vmem:[%s3281_s1 + $0x3e8] sm:$0xff]  ;;  %v603_v40 = vld [vmem:[%s3281_s1 + $0x278] sm:$0xff]  ;;  %v348_v53 = vld [vmem:[%s2457_s22 + $0xd0] sm:$0x3] }
  0x6d   : > { %2041 = vmatpush3.bf16.msra.mxu1 %v2040_v7  ;;  %2011 = vmatprep.subr.bf16.mxu0 %v2010_v8  ;;  %v415_v7 = vrot.slane %v2760_v4, 1  ;;  %v2770_v8 = vld [vmem:[%s2457_s22 + $0xc8] sm:$0xff]  ;;  %v634_v59 = vld [vmem:[%s3281_s1 + $0x370] sm:$0xff]  ;;  %v635_v60 = vld [vmem:[%s3281_s1 + $0x378] sm:$0xff]  ;;  %v496_v61 = vrot.slane %v348_v53, 1 }
  0x6e   : > { %755 = vmatmul.mubr.f32.gmra.mrb[6].mxu0 %v2524_v21  ;;  %2043 = vmatprep.subr.bf16.mxu1 %v2042_v12  ;;  %v2696_v21 = vsel %vm433_vm1, %v444_v57, %v445_v16  ;;  %v2781_v12 = vsel %vm376_vm0, %v392_v37, %v393_v44  ;;  %v2798_v57 = vld [vmem:[%s3281_s1 + $0x360] sm:$0xff]  ;;  %v494_v16 = vrot.slane %v2770_v8, 1  ;;  %v2838_v37 = vld [vmem:[%s2457_s22 + $0x70] sm:$0x3]  ;;  %v455_v44 = vrot.slane %v2732_v54, 2 }
  0x6f   : > { %900 = vmatmul.mubr.f32.gmra.mrb[6].mxu1 %v2654_v19  ;;  %759 = vmatprep.mubr.f32.mxu0 %v2657_v20  ;;  %v2816_v27 = vsel %vm376_vm0, %v413_v6, %v415_v7  ;;  %v2056_v46 = vpack.c.bf16 %v633_v23, %v2798_v57  ;;  %v652_v7 = vld [vmem:[%s3281_s1 + $0x400] sm:$0xff]  ;;  %v2028_v23 = vpack.c.bf16 %v603_v40, %v602_v39 }
  0x70   : > { %904 = vmatprep.mubr.f32.mxu1 %v2660_v22  ;;  %2013 = vmatpush3.bf16.msra.mxu0 %v2012_v25  ;;  %v618_v25 = vld [vmem:[%s3281_s1 + $0x2f0] sm:$0xff]  ;;  %v2850_v41 = vsel %vm376_vm0, %v493_v9, %v494_v16  ;;  %v653_v9 = vld [vmem:[%s3281_s1 + $0x408] sm:$0xff] }
  0x71   : > { %2045 = vmatpush3.bf16.msra.mxu1 %v2044_v26  ;;  %2015 = vmatprep.subr.bf16.mxu0 %v2014_v28  ;;  %v619_v26 = vld [vmem:[%s3281_s1 + $0x2f8] sm:$0xff]  ;;  %v501_v28 = vrot.slane %v2770_v8, 2 }
  0x72   : > { %760 = vmatmul.mubr.f32.gmra.mrb[8].mxu0 %v2577_v48  ;;  %2047 = vmatprep.subr.bf16.mxu1 %v2046_v33  ;;  %v2054_v33 = vpack.c.bf16 %v649_v5, %v2754_v1  ;;  %v2026_v49 = vpack.c.bf16 %v619_v26, %v618_v25  ;;  %v2881_v1 = vsel %vm376_vm0, %v397_v55, %v398_v31 }
  0x73   : > { %905 = vmatmul.mubr.f32.gmra.mrb[8].mxu1 %v2696_v21  ;;  %764 = vmatprep.mubr.f32.mxu0 %v2713_v42  ;;  %v2853_v43 = vsel %vm433_vm1, %v500_v10, %v501_v28  ;;  %v2058_v5 = vpack.c.bf16 %v651_v38, %v650_v34  ;;  %v351_v10 = vld [vmem:[%s2457_s22 + $0xe8] sm:$0x3]  ;;  %v2895_v55 = vsel %vm376_vm0, %v494_v16, %v496_v61  ;;  %v2912_v16 = vld [vmem:[%s2457_s22 + $0x80] sm:$0xff] }
  0x74   : > { %909 = vmatprep.mubr.f32.mxu1 %v2664_v24  ;;  %2017 = vmatpush3.bf16.msra.mxu0 %v2016_v45  ;;  %v2024_v45 = vpack.c.bf16 %v2793_v15, %v2788_v14  ;;  %v520_v26 = vrot.slane %v351_v10, 2  ;;  %v2914_v34 = vpack.c.bf16 %v653_v9, %v652_v7 }
  0x75   : > { %2049 = vmatpush3.bf16.msra.mxu1 %v2048_v56  ;;  %2019 = vmatprep.subr.bf16.mxu0 %v2018_v58  ;;  %v2862_v56 = vld [vmem:[%s2457_s22 + $0xd8] sm:$0xff]  ;;  %v2865_v58 = vld [vmem:[%s2457_s22 + $0xe0] sm:$0xff] }
  0x76   : > { %765 = vmatmul.mubr.f32.gmra.mrb[10].mxu0 %v2581_v52  ;;  %2051 = vmatprep.subr.bf16.mxu1 %v2050_v0  ;;  %v510_v62 = vrot.slane %v2862_v56, 1  ;;  %v511_v63 = vrot.slane %v2865_v58, 1  ;;  %v503_v0 = vrot.slane %v348_v53, 2  ;;  %v518_v14 = vrot.slane %v2865_v58, 2 }
  0x77   : > { %910 = vmatmul.mubr.f32.gmra.mrb[10].mxu1 %v2778_v11  ;;  %769 = vmatprep.mubr.f32.mxu0 %v2781_v12  ;;  %v403_v53 = vrot.slane %v2912_v16, 1 }
  0x78   : > { %914 = vmatprep.mubr.f32.mxu1 %v2680_v32  ;;  %2021 = vmatpush3.bf16.msra.mxu0 %v2020_v13  ;;  %v517_v13 = vrot.slane %v2862_v56, 2  ;;  %v2898_v15 = vsel %vm376_vm0, %v510_v62, %v511_v63  ;;  %v2901_v57 = vsel %vm433_vm1, %v501_v28, %v503_v0  ;;  %v2060_v28 = vpack.c.bf16 %v635_v60, %v634_v59  ;;  %v339_v59 = vld [vmem:[%s2457_s22 + $0x88] sm:$0x3]  ;;  %v2957_v62 = vld [vmem:[%s2457_s22 + $0x90] sm:$0xff] }
  0x79   : > { %2053 = vmatpush3.bf16.msra.mxu1 %v2052_v17  ;;  %2023 = vmatprep.subr.bf16.mxu0 %v2022_v18  ;;  %v513_v17 = vrot.slane %v351_v10, 1  ;;  %v400_v18 = vrot.slane %v2838_v37, 1  ;;  %v2921_v39 = vsel %vm433_vm1, %v518_v14, %v520_v26  ;;  %v460_v60 = vrot.slane %v2912_v16, 2  ;;  %v342_v10 = vld [vmem:[%s2457_s22 + $0xa0] sm:$0x3]  ;;  %v2988_v26 = vld [vmem:[%s2457_s22 + $0xa8] sm:$0xff] }
  0x7a   : > { %770 = vmatmul.mubr.f32.gmra.mrb[12].mxu0 %v2660_v22  ;;  %2055 = vmatprep.subr.bf16.mxu1 %v2054_v33  ;;  %v2906_v25 = vsel %vm433_vm1, %v517_v13, %v518_v14  ;;  %v2909_v33 = vld [vmem:[%s2457_s22 + $0x78] sm:$0xff]  ;;  %v405_v61 = vrot.slane %v339_v59, 1  ;;  %v407_v0 = vrot.slane %v2957_v62, 1  ;;  %v462_v7 = vrot.slane %v339_v59, 2 }
  0x7b   : > { %915 = vmatmul.mubr.f32.gmra.mrb[12].mxu1 %v2821_v29  ;;  %774 = vmatprep.mubr.f32.mxu0 %v2824_v30  ;;  %v2917_v38 = vsel %vm376_vm0, %v511_v63, %v513_v17  ;;  %v402_v40 = vrot.slane %v2909_v33, 1  ;;  %v2960_v63 = vld [vmem:[%s2457_s22 + $0x98] sm:$0xff]  ;;  %v464_v13 = vrot.slane %v2957_v62, 2 }
  0x7c   : > { %919 = vmatprep.mubr.f32.mxu1 %v2732_v54  ;;  %2025 = vmatpush3.bf16.msra.mxu0 %v2024_v45  ;;  %v2930_v45 = vsel %vm433_vm1, %v454_v36, %v455_v44  ;;  %v408_v9 = vrot.slane %v2960_v63, 1  ;;  %v2981_v14 = vsel %vm433_vm1, %v460_v60, %v462_v7  ;;  %v472_v7 = vrot.slane %v2760_v4, 2  ;;  %v655_v4 = vld [vmem:[%s3281_s1 + $0x418] sm:$0xff] }
  0x7d   : > { %2057 = vmatpush3.bf16.msra.mxu1 %v2056_v46  ;;  %2027 = vmatprep.subr.bf16.mxu0 %v2026_v49  ;;  %v2935_v46 = vsel %vm376_vm0, %v398_v31, %v400_v18  ;;  %v457_v49 = vrot.slane %v2838_v37, 2  ;;  %v459_v31 = vrot.slane %v2909_v33, 2  ;;  %v2953_v37 = vsel %vm376_vm0, %v402_v40, %v403_v53 }
  0x7e   : > { %775 = vmatmul.mubr.f32.gmra.mrb[14].mxu0 %v2664_v24  ;;  %2059 = vmatprep.subr.bf16.mxu1 %v2058_v5  ;;  %v2971_v5 = vsel %vm376_vm0, %v403_v53, %v405_v61  ;;  %v2984_v17 = vsel %vm376_vm0, %v407_v0, %v408_v9  ;;  %v465_v18 = vrot.slane %v2960_v63, 2  ;;  %v412_v53 = vrot.slane %v2988_v26, 1 }
  0x7f   : > { %920 = vmatmul.mubr.f32.gmra.mrb[14].mxu1 %v2834_v35  ;;  %779 = vmatprep.mubr.f32.mxu0 %v2881_v1  ;;  %v2950_v36 = vsel %vm433_vm1, %v455_v44, %v457_v49  ;;  %v2968_v44 = vsel %vm433_vm1, %v459_v31, %v460_v60  ;;  %v467_v49 = vrot.slane %v342_v10, 2  ;;  %v469_v60 = vrot.slane %v2988_v26, 2 }
  0x80   : > { %924 = vmatprep.mubr.f32.mxu1 %v2909_v33  ;;  %2029 = vmatpush3.bf16.msra.mxu0 %v2028_v23  ;;  %v410_v23 = vrot.slane %v342_v10, 1  ;;  %v3011_v31 = vsel %vm376_vm0, %v412_v53, %v413_v6  ;;  %v470_v61 = vrot.slane %v2728_v50, 2  ;;  %v667_v53 = vld [vmem:[%s3281_s1 + $0x478] sm:$0xff] }
  0x81   : > { %2061 = vmatpush3.bf16.msra.mxu1 %v2060_v28  ;;  %2063 = vmatprep.subr.bf16.mxu0 %v2914_v34  ;;  %v2995_v28 = vsel %vm433_vm1, %v464_v13, %v465_v18  ;;  %v3006_v59 = vsel %vm433_vm1, %v465_v18, %v467_v49  ;;  %v656_v13 = vld [vmem:[%s3281_s1 + $0x420] sm:$0xff]  ;;  %v657_v18 = vld [vmem:[%s3281_s1 + $0x428] sm:$0xff] }
  0x82   : > { %780 = vmatmul.mubr.f32.gmra.mrb[16].mxu0 %v2680_v32  ;;  %2094 = vmatprep.subr.bf16.mxu1 %v2914_v34  ;;  %v2998_v40 = vsel %vm376_vm0, %v408_v9, %v410_v23  ;;  %v3020_v0 = vsel %vm433_vm1, %v469_v60, %v470_v61  ;;  %v3028_v6 = vsel %vm433_vm1, %v470_v61, %v472_v7  ;;  %v654_v9 = vld [vmem:[%s3281_s1 + $0x410] sm:$0xff]  ;;  %v663_v23 = vld [vmem:[%s3281_s1 + $0x458] sm:$0xff]  ;;  %v665_v49 = vld [vmem:[%s3281_s1 + $0x468] sm:$0xff] }
  0x83   : > { %925 = vmatmul.mubr.f32.gmra.mrb[16].mxu1 %v2930_v45  ;;  %784 = vmatprep.mubr.f32.mxu0 %v2935_v46  ;;  %v2066_v10 = vpack.c.bf16 %v655_v4, %v654_v9 }
  0x84   : > { %929 = vmatprep.mubr.f32.mxu1 %v2912_v16 }
  0x86   : > { %785 = vmatmul.mubr.f32.gmra.mrb[18].mxu0 %v2732_v54 }
  0x87   : > { %930 = vmatmul.mubr.f32.gmra.mrb[18].mxu1 %v2950_v36  ;;  %789 = vmatprep.mubr.f32.mxu0 %v2953_v37 }
  0x88   : > { %934 = vmatprep.mubr.f32.mxu1 %v2957_v62 }
  0x8a   : > { %790 = vmatmul.mubr.f32.gmra.mrb[20].mxu0 %v2909_v33 }
  0x8b   : > { %935 = vmatmul.mubr.f32.gmra.mrb[20].mxu1 %v2968_v44  ;;  %794 = vmatprep.mubr.f32.mxu0 %v2971_v5 }
  0x8c   : > { %939 = vmatprep.mubr.f32.mxu1 %v2960_v63 }
  0x8e   : > { %795 = vmatmul.mubr.f32.gmra.mrb[22].mxu0 %v2912_v16 }
  0x8f   : > { %940 = vmatmul.mubr.f32.gmra.mrb[22].mxu1 %v2981_v14  ;;  %799 = vmatprep.mubr.f32.mxu0 %v2984_v17 }
  0x90   : > { %944 = vmatprep.mubr.f32.mxu1 %v2988_v26 }
  0x92   : > { %800 = vmatmul.mubr.f32.gmra.mrb[24].mxu0 %v2957_v62 }
  0x93   : > { %945 = vmatmul.mubr.f32.gmra.mrb[24].mxu1 %v2995_v28  ;;  %804 = vmatprep.mubr.f32.mxu0 %v2998_v40 }
  0x94   : > { %949 = vmatprep.mubr.f32.mxu1 %v2728_v50 }
  0x96   : > { %805 = vmatmul.mubr.f32.gmra.mrb[26].mxu0 %v2960_v63 }
  0x97   : > { %950 = vmatmul.mubr.f32.gmra.mrb[26].mxu1 %v3006_v59  ;;  %809 = vmatprep.mubr.f32.mxu0 %v3011_v31 }
  0x98   : > { %954 = vmatprep.mubr.f32.mxu1 %v2757_v3 }
  0x9a   : > { %810 = vmatmul.mubr.f32.gmra.mrb[28].mxu0 %v2988_v26 }
  0x9b   : > { %955 = vmatmul.mubr.f32.gmra.mrb[28].mxu1 %v3020_v0  ;;  %814 = vmatprep.mubr.f32.mxu0 %v2816_v27 }
  0x9c   : > { %959 = vmatprep.mubr.f32.mxu1 %v2770_v8 }
  0x9e   : > { %815 = vmatmul.mubr.f32.gmra.mrb[30].mxu0 %v2728_v50 }
  0x9f   : > { %960 = vmatmul.mubr.f32.gmra.mrb[30].mxu1 %v3028_v6  ;;  %1029 = vmatprep.mubr.f32.mxu0 %v2605_v51  ;;  %v658_v51 = vld [vmem:[%s3281_s1 + $0x430] sm:$0xff] }
  0xa0   : > { %1174 = vmatprep.mubr.f32.mxu1 %v2657_v20 }
  0xa2   : > { %1030 = vmatmul.mubr.f32.vlgmr.msra.gmra.mrb[32].mxu0 %v2574_v47  ;;  %v2070_v47 = vpack.c.bf16 %v657_v18, %v656_v13 }
  0xa3   : > { %1175 = vmatmul.mubr.f32.vlgmr.msra.gmra.mrb[32].mxu1 %v2577_v48  ;;  %2065 = vmatpush3.bf16.msra.mxu0 %v2914_v34  ;;  %v659_v48 = vld [vmem:[%s3281_s1 + $0x438] sm:$0xff] }
  0xa4   : > { %2102 = vmatpush3.bf16.msra.mxu1 %v2914_v34  ;;  %1034 = vmatprep.mubr.f32.mxu0 %v2654_v19  ;;  %v2074_v19 = vpack.c.bf16 %v659_v48, %v658_v51  ;;  %v661_v34 = vld [vmem:[%s3281_s1 + $0x448] sm:$0xff] }
  0xa5   : > { %1179 = vmatprep.mubr.f32.mxu1 %v2713_v42  ;;  %2067 = vmatprep.subr.bf16.mxu0 %v2066_v10 }
  0xa6   : > { %1035 = vmatmul.mubr.f32.gmra.mrb[34].mxu0 %v2616_v2  ;;  %2095 = vmatprep.subr.bf16.mxu1 %v2066_v10  ;;  %v660_v2 = vld [vmem:[%s3281_s1 + $0x440] sm:$0xff] }
  0xa7   : > { %1180 = vmatmul.mubr.f32.gmra.mrb[34].mxu1 %v2581_v52  ;;  %1039 = vmatprep.mubr.f32.mxu0 %v2696_v21  ;;  %v2078_v52 = vpack.c.bf16 %v661_v34, %v660_v2 }
  0xa8   : > { %1184 = vmatprep.mubr.f32.mxu1 %v2781_v12  ;;  %2069 = vmatpush3.bf16.msra.mxu0 %v2066_v10 }
  0xa9   : > { %2103 = vmatpush3.bf16.msra.mxu1 %v2066_v10  ;;  %2071 = vmatprep.subr.bf16.mxu0 %v2070_v47 }
  0xaa   : > { %1040 = vmatmul.mubr.f32.gmra.mrb[36].mxu0 %v2657_v20  ;;  %2096 = vmatprep.subr.bf16.mxu1 %v2070_v47  ;;  %v662_v20 = vld [vmem:[%s3281_s1 + $0x450] sm:$0xff] }
  0xab   : > { %1185 = vmatmul.mubr.f32.gmra.mrb[36].mxu1 %v2660_v22  ;;  %1044 = vmatprep.mubr.f32.mxu0 %v2778_v11  ;;  %v2082_v22 = vpack.c.bf16 %v663_v23, %v662_v20 }
  0xac   : > { %1189 = vmatprep.mubr.f32.mxu1 %v2824_v30  ;;  %2073 = vmatpush3.bf16.msra.mxu0 %v2070_v47 }
  0xad   : > { %2104 = vmatpush3.bf16.msra.mxu1 %v2070_v47  ;;  %2075 = vmatprep.subr.bf16.mxu0 %v2074_v19 }
  0xae   : > { %1045 = vmatmul.mubr.f32.gmra.mrb[38].mxu0 %v2713_v42  ;;  %2097 = vmatprep.subr.bf16.mxu1 %v2074_v19  ;;  %v664_v42 = vld [vmem:[%s3281_s1 + $0x460] sm:$0xff] }
  0xaf   : > { %1190 = vmatmul.mubr.f32.gmra.mrb[38].mxu1 %v2664_v24  ;;  %1049 = vmatprep.mubr.f32.mxu0 %v2821_v29  ;;  %v2086_v24 = vpack.c.bf16 %v665_v49, %v664_v42 }
  0xb0   : > { %1194 = vmatprep.mubr.f32.mxu1 %v2881_v1  ;;  %2077 = vmatpush3.bf16.msra.mxu0 %v2074_v19 }
  0xb1   : > { %2105 = vmatpush3.bf16.msra.mxu1 %v2074_v19  ;;  %2079 = vmatprep.subr.bf16.mxu0 %v2078_v52 }
  0xb2   : > { %1050 = vmatmul.mubr.f32.gmra.mrb[40].mxu0 %v2781_v12  ;;  %2098 = vmatprep.subr.bf16.mxu1 %v2078_v52  ;;  %v666_v12 = vld [vmem:[%s3281_s1 + $0x470] sm:$0xff] }
  0xb3   : > { %1195 = vmatmul.mubr.f32.gmra.mrb[40].mxu1 %v2680_v32  ;;  %1054 = vmatprep.mubr.f32.mxu0 %v2834_v35  ;;  %v2090_v32 = vpack.c.bf16 %v667_v53, %v666_v12 }
  0xb4   : > { %1199 = vmatprep.mubr.f32.mxu1 %v2935_v46  ;;  %2081 = vmatpush3.bf16.msra.mxu0 %v2078_v52 }
  0xb5   : > { %2106 = vmatpush3.bf16.msra.mxu1 %v2078_v52  ;;  %2083 = vmatprep.subr.bf16.mxu0 %v2082_v22 }
  0xb6   : > { %1055 = vmatmul.mubr.f32.gmra.mrb[42].mxu0 %v2824_v30  ;;  %2099 = vmatprep.subr.bf16.mxu1 %v2082_v22 }
  0xb7   : > { %1200 = vmatmul.mubr.f32.gmra.mrb[42].mxu1 %v2732_v54  ;;  %1059 = vmatprep.mubr.f32.mxu0 %v2930_v45  ;;  %v3159_v54 = vld [vmem:[%s3282_s2] ss:$0 sm:$0xff] }
  0xb8   : > { %1204 = vmatprep.mubr.f32.mxu1 %v2953_v37  ;;  %2085 = vmatpush3.bf16.msra.mxu0 %v2082_v22 }
  0xb9   : > { %2107 = vmatpush3.bf16.msra.mxu1 %v2082_v22  ;;  %2087 = vmatprep.subr.bf16.mxu0 %v2086_v24 }
  0xba   : > { %1060 = vmatmul.mubr.f32.gmra.mrb[44].mxu0 %v2881_v1  ;;  %2100 = vmatprep.subr.bf16.mxu1 %v2086_v24 }
  0xbb   : > { %1205 = vmatmul.mubr.f32.gmra.mrb[44].mxu1 %v2909_v33  ;;  %1064 = vmatprep.mubr.f32.mxu0 %v2950_v36 }
  0xbc   : > { %1209 = vmatprep.mubr.f32.mxu1 %v2971_v5  ;;  %2089 = vmatpush3.bf16.msra.mxu0 %v2086_v24 }
  0xbd   : > { %2108 = vmatpush3.bf16.msra.mxu1 %v2086_v24  ;;  %2091 = vmatprep.subr.bf16.mxu0 %v2090_v32 }
  0xbe   : > { %1065 = vmatmul.mubr.f32.gmra.mrb[46].mxu0 %v2935_v46  ;;  %2101 = vmatprep.subr.bf16.mxu1 %v2090_v32 }
  0xbf   : > { %1210 = vmatmul.mubr.f32.gmra.mrb[46].mxu1 %v2912_v16  ;;  %1069 = vmatprep.mubr.f32.mxu0 %v2968_v44 }
  0xc0   : > { %1214 = vmatprep.mubr.f32.mxu1 %v2984_v17  ;;  %2093 = vmatpush3.bf16.msra.mxu0 %v2090_v32 }
  0xc1   : > { %2109 = vmatpush3.bf16.msra.mxu1 %v2090_v32 }
  0xc2   : > { %1070 = vmatmul.mubr.f32.gmra.mrb[48].mxu0 %v2953_v37 }
  0xc3   : > { %1215 = vmatmul.mubr.f32.gmra.mrb[48].mxu1 %v2957_v62  ;;  %1074 = vmatprep.mubr.f32.mxu0 %v2981_v14 }
  0xc4   : > { %1219 = vmatprep.mubr.f32.mxu1 %v2998_v40 }
  0xc6   : > { %1075 = vmatmul.mubr.f32.gmra.mrb[50].mxu0 %v2971_v5 }
  0xc7   : > { %1220 = vmatmul.mubr.f32.gmra.mrb[50].mxu1 %v2960_v63  ;;  %1079 = vmatprep.mubr.f32.mxu0 %v2995_v28 }
  0xc8   : > { %1224 = vmatprep.mubr.f32.mxu1 %v3011_v31 }
  0xca   : > { %1080 = vmatmul.mubr.f32.gmra.mrb[52].mxu0 %v2984_v17 }
  0xcb   : > { %1225 = vmatmul.mubr.f32.gmra.mrb[52].mxu1 %v2988_v26  ;;  %1084 = vmatprep.mubr.f32.mxu0 %v3006_v59 }
  0xcc   : > { %1229 = vmatprep.mubr.f32.mxu1 %v2816_v27 }
  0xce   : > { %1085 = vmatmul.mubr.f32.gmra.mrb[54].mxu0 %v2998_v40 }
  0xcf   : > { %1230 = vmatmul.mubr.f32.gmra.mrb[54].mxu1 %v2728_v50  ;;  %1089 = vmatprep.mubr.f32.mxu0 %v3020_v0 }
  0xd0   : > { %1234 = vmatprep.mubr.f32.mxu1 %v2850_v41 }
  0xd2   : > { %1090 = vmatmul.mubr.f32.gmra.mrb[56].mxu0 %v3011_v31 }
  0xd3   : > { %1235 = vmatmul.mubr.f32.gmra.mrb[56].mxu1 %v2757_v3  ;;  %1094 = vmatprep.mubr.f32.mxu0 %v3028_v6 }
  0xd4   : > { %1239 = vmatprep.mubr.f32.mxu1 %v2895_v55 }
  0xd6   : > { %1095 = vmatmul.mubr.f32.gmra.mrb[58].mxu0 %v2816_v27 }
  0xd7   : > { %1240 = vmatmul.mubr.f32.gmra.mrb[58].mxu1 %v2770_v8  ;;  %1099 = vmatprep.mubr.f32.mxu0 %v2853_v43 }
  0xd8   : > { %1244 = vmatprep.mubr.f32.mxu1 %v2898_v15 }
  0xda   : > { %1100 = vmatmul.mubr.f32.gmra.mrb[60].mxu0 %v2850_v41 }
  0xdb   : > { %1245 = vmatmul.mubr.f32.gmra.mrb[60].mxu1 %v2862_v56  ;;  %1104 = vmatprep.mubr.f32.mxu0 %v2901_v57 }
  0xdc   : > { %1249 = vmatprep.mubr.f32.mxu1 %v2917_v38 }
  0xde   : > { %1105 = vmatmul.mubr.f32.gmra.mrb[62].mxu0 %v2895_v55 }
  0xdf   : > { %1250 = vmatmul.mubr.f32.gmra.mrb[62].mxu1 %v2865_v58  ;;  %1910 = vmatprep.mubr.f32.mxu0 %v2696_v21 }
  0xe0   : > { %1922 = vmatprep.mubr.f32.mxu1 %v2995_v28 }
  0xe2   : > { %1911 = vmatmul.mubr.f32.vlgmr.msra.gmra.mrb[64].mxu0 %v2778_v11 }
  0xe3   : > { %1923 = vmatmul.mubr.f32.vlgmr.msra.gmra.mrb[64].mxu1 %v3006_v59  ;;  %1913 = vmatprep.mubr.f32.mxu0 %v2821_v29 }
  0xe4   : > { %1925 = vmatprep.mubr.f32.mxu1 %v3020_v0 }
  0xe6   : > { %1914 = vmatmul.mubr.f32.gmra.mrb[66].mxu0 %v2834_v35 }
  0xe7   : > { %1926 = vmatmul.mubr.f32.gmra.mrb[66].mxu1 %v3028_v6  ;;  %1916 = vmatprep.mubr.f32.mxu0 %v2930_v45 }
  0xe8   : > { %1928 = vmatprep.mubr.f32.mxu1 %v2853_v43 }
  0xea   : > { %1917 = vmatmul.mubr.f32.gmra.mrb[68].mxu0 %v2950_v36 }
  0xeb   : > { %1929 = vmatmul.mubr.f32.gmra.mrb[68].mxu1 %v2901_v57  ;;  %1919 = vmatprep.mubr.f32.mxu0 %v2968_v44 }
  0xec   : > { %1931 = vmatprep.mubr.f32.mxu1 %v2906_v25 }
  0xee   : > { %1920 = vmatmul.mubr.f32.gmra.mrb[70].mxu0 %v2981_v14 }
  0xef   : > { %1932 = vmatmul.mubr.f32.gmra.mrb[70].mxu1 %v2921_v39 }
 0x135   : > { %v1558_v21 = vpop.f32.mrb[0].mxu0 }
 0x136   : > { %v1638_v50 = vpop.f32.mrb[0].mxu1  ;;  %v1559_v3 = vpop.f32.mrb[1].mxu0 }
 0x137   : > { %v1560_v8 = vadd.f32 %v1559_v3, %v1558_v21  ;;  %v1639_v11 = vpop.f32.mrb[1].mxu1 }
 0x138   : > { %v1640_v27 = vadd.f32 %v1639_v11, %v1638_v50 }
 0x139   : > { %v742_v29 = vadd.f32 %v1560_v8, %v3159_v54  ;;  %v1561_v30 = vpop.f32.mrb[2].mxu0 }
 0x13a   : > { %v1641_v35 = vpop.f32.mrb[2].mxu1  ;;  %v1562_v41 = vpop.f32.mrb[3].mxu0 }
 0x13b   : > { %v3162_v43 = vadd.f32 %v1640_v27, %v742_v29  ;;  %v1563_v56 = vadd.f32 %v1562_v41, %v1561_v30  ;;  %v1642_v58 = vpop.f32.mrb[3].mxu1 }
 0x13c   : > { %v1643_v1 = vadd.f32 %v1642_v58, %v1641_v35 }
 0x13d   : > { %v747_v55 = vadd.f32 %v1563_v56, %v3159_v54  ;;  %v1564_v15 = vpop.f32.mrb[4].mxu0 }
 0x13e   : > { %v1644_v57 = vpop.f32.mrb[4].mxu1  ;;  %v1565_v25 = vpop.f32.mrb[5].mxu0 }
 0x13f   : > { %v3165_v33 = vadd.f32 %v1643_v1, %v747_v55  ;;  %v1566_v16 = vadd.f32 %v1565_v25, %v1564_v15  ;;  %v1645_v38 = vpop.f32.mrb[5].mxu1 }
 0x140   : > { %v1646_v39 = vadd.f32 %v1645_v38, %v1644_v57 }
 0x141   : > { %v752_v45 = vadd.f32 %v1566_v16, %v3159_v54  ;;  %v1567_v46 = vpop.f32.mrb[6].mxu0 }
 0x142   : > { %v1647_v36 = vpop.f32.mrb[6].mxu1  ;;  %v1568_v37 = vpop.f32.mrb[7].mxu0 }
 0x143   : > { %v3168_v62 = vadd.f32 %v1646_v39, %v752_v45  ;;  %v1569_v63 = vadd.f32 %v1568_v37, %v1567_v46  ;;  %v1648_v44 = vpop.f32.mrb[7].mxu1 }
 0x144   : > { %v1649_v5 = vadd.f32 %v1648_v44, %v1647_v36 }
 0x145   : > { %v757_v14 = vadd.f32 %v1569_v63, %v3159_v54  ;;  %v1570_v17 = vpop.f32.mrb[8].mxu0 }
 0x146   : > { %v1650_v26 = vpop.f32.mrb[8].mxu1  ;;  %v1571_v28 = vpop.f32.mrb[9].mxu0 }
 0x147   : > { %v3171_v40 = vadd.f32 %v1649_v5, %v757_v14  ;;  %v1572_v59 = vadd.f32 %v1571_v28, %v1570_v17  ;;  %v1651_v31 = vpop.f32.mrb[9].mxu1 }
 0x148   : > { %v1652_v60 = vadd.f32 %v1651_v31, %v1650_v26 }
 0x149   : > { %v762_v61 = vadd.f32 %v1572_v59, %v3159_v54  ;;  %v1573_v0 = vpop.f32.mrb[10].mxu0 }
 0x14a   : > { %v1653_v7 = vpop.f32.mrb[10].mxu1  ;;  %v1574_v6 = vpop.f32.mrb[11].mxu0 }
 0x14b   : > { %v3174_v9 = vadd.f32 %v1652_v60, %v762_v61  ;;  %v1575_v4 = vadd.f32 %v1574_v6, %v1573_v0  ;;  %v1654_v10 = vpop.f32.mrb[11].mxu1 }
 0x14c   : > { %v1655_v13 = vadd.f32 %v1654_v10, %v1653_v7 }
 0x14d   : > { %v767_v18 = vadd.f32 %v1575_v4, %v3159_v54  ;;  %v1576_v47 = vpop.f32.mrb[12].mxu0 }
 0x14e   : > { %v1656_v51 = vpop.f32.mrb[12].mxu1  ;;  %v1577_v48 = vpop.f32.mrb[13].mxu0 }
 0x14f   : > { %v3177_v19 = vadd.f32 %v1655_v13, %v767_v18  ;;  %v1578_v2 = vadd.f32 %v1577_v48, %v1576_v47  ;;  %v1657_v34 = vpop.f32.mrb[13].mxu1 }
 0x150   : > { %v1658_v52 = vadd.f32 %v1657_v34, %v1656_v51 }
 0x151   : > { %v772_v20 = vadd.f32 %v1578_v2, %v3159_v54  ;;  %v1579_v23 = vpop.f32.mrb[14].mxu0 }
 0x152   : > { %v1659_v22 = vpop.f32.mrb[14].mxu1  ;;  %v1580_v42 = vpop.f32.mrb[15].mxu0 }
 0x153   : > { %v3180_v49 = vadd.f32 %v1658_v52, %v772_v20  ;;  %v1581_v24 = vadd.f32 %v1580_v42, %v1579_v23  ;;  %v1660_v12 = vpop.f32.mrb[15].mxu1 }
 0x154   : > { %v1661_v53 = vadd.f32 %v1660_v12, %v1659_v22 }
 0x155   : > { %v777_v32 = vadd.f32 %v1581_v24, %v3159_v54  ;;  %v1582_v21 = vpop.f32.mrb[16].mxu0 }
 0x156   : > { %v1662_v50 = vpop.f32.mrb[16].mxu1  ;;  %v1583_v3 = vpop.f32.mrb[17].mxu0 }
 0x157   : > { %v3183_v8 = vadd.f32 %v1661_v53, %v777_v32  ;;  %v1584_v11 = vadd.f32 %v1583_v3, %v1582_v21  ;;  %v1663_v27 = vpop.f32.mrb[17].mxu1 }
 0x158   : > { %v1664_v29 = vadd.f32 %v1663_v27, %v1662_v50 }
 0x159   : > { %v782_v30 = vadd.f32 %v1584_v11, %v3159_v54  ;;  %v1585_v35 = vpop.f32.mrb[18].mxu0 }
 0x15a   : > { %v1665_v41 = vpop.f32.mrb[18].mxu1  ;;  %v1586_v56 = vpop.f32.mrb[19].mxu0 }
 0x15b   : > { %v3186_v58 = vadd.f32 %v1664_v29, %v782_v30  ;;  %v1587_v1 = vadd.f32 %v1586_v56, %v1585_v35  ;;  %v1666_v55 = vpop.f32.mrb[19].mxu1 }
 0x15c   : > { %v1667_v15 = vadd.f32 %v1666_v55, %v1665_v41 }
 0x15d   : > { %v787_v57 = vadd.f32 %v1587_v1, %v3159_v54  ;;  %v1588_v25 = vpop.f32.mrb[20].mxu0 }
 0x15e   : > { %v1668_v16 = vpop.f32.mrb[20].mxu1  ;;  %v1589_v38 = vpop.f32.mrb[21].mxu0 }
 0x15f   : > { %v3189_v39 = vadd.f32 %v1667_v15, %v787_v57  ;;  %v1590_v45 = vadd.f32 %v1589_v38, %v1588_v25  ;;  %v1669_v46 = vpop.f32.mrb[21].mxu1 }
 0x160   : > { %v1670_v36 = vadd.f32 %v1669_v46, %v1668_v16 }
 0x161   : > { %v792_v37 = vadd.f32 %v1590_v45, %v3159_v54  ;;  %v1591_v63 = vpop.f32.mrb[22].mxu0 }
 0x162   : > { %v1671_v44 = vpop.f32.mrb[22].mxu1  ;;  %v1592_v5 = vpop.f32.mrb[23].mxu0 }
 0x163   : > { %v3192_v14 = vadd.f32 %v1670_v36, %v792_v37  ;;  %v1593_v17 = vadd.f32 %v1592_v5, %v1591_v63  ;;  %v1672_v26 = vpop.f32.mrb[23].mxu1 }
 0x164   : > { %v1673_v28 = vadd.f32 %v1672_v26, %v1671_v44 }
 0x165   : > { %v797_v59 = vadd.f32 %v1593_v17, %v3159_v54  ;;  %v1594_v31 = vpop.f32.mrb[24].mxu0 }
 0x166   : > { %v1674_v60 = vpop.f32.mrb[24].mxu1  ;;  %v1595_v61 = vpop.f32.mrb[25].mxu0 }
 0x167   : > { %v3195_v0 = vadd.f32 %v1673_v28, %v797_v59  ;;  %v1596_v7 = vadd.f32 %v1595_v61, %v1594_v31  ;;  %v1675_v6 = vpop.f32.mrb[25].mxu1 }
 0x168   : > { %v1676_v4 = vadd.f32 %v1675_v6, %v1674_v60 }
 0x169   : > { %v802_v10 = vadd.f32 %v1596_v7, %v3159_v54  ;;  %v1597_v13 = vpop.f32.mrb[26].mxu0 }
 0x16a   : > { %v1677_v18 = vpop.f32.mrb[26].mxu1  ;;  %v1598_v47 = vpop.f32.mrb[27].mxu0 }
 0x16b   : > { %v3198_v51 = vadd.f32 %v1676_v4, %v802_v10  ;;  %v1599_v48 = vadd.f32 %v1598_v47, %v1597_v13  ;;  %v1678_v2 = vpop.f32.mrb[27].mxu1 }
 0x16c   : > { %v1679_v34 = vadd.f32 %v1678_v2, %v1677_v18 }
 0x16d   : > { %v807_v52 = vadd.f32 %v1599_v48, %v3159_v54  ;;  %v1600_v20 = vpop.f32.mrb[28].mxu0 }
 0x16e   : > { %v1680_v23 = vpop.f32.mrb[28].mxu1  ;;  %v1601_v22 = vpop.f32.mrb[29].mxu0 }
 0x16f   : > { %v3201_v42 = vadd.f32 %v1679_v34, %v807_v52  ;;  %v1602_v24 = vadd.f32 %v1601_v22, %v1600_v20  ;;  %v1681_v12 = vpop.f32.mrb[29].mxu1 }
 0x170   : > { %v1682_v53 = vadd.f32 %v1681_v12, %v1680_v23 }
 0x171   : > { %v812_v32 = vadd.f32 %v1602_v24, %v3159_v54  ;;  %v1603_v21 = vpop.f32.mrb[30].mxu0 }
 0x172   : > { %v1683_v50 = vpop.f32.mrb[30].mxu1  ;;  %v1604_v3 = vpop.f32.mrb[31].mxu0 }
 0x173   : > { %v3204_v11 = vadd.f32 %v1682_v53, %v812_v32  ;;  %v1605_v27 = vadd.f32 %v1604_v3, %v1603_v21  ;;  %v1684_v29 = vpop.f32.mrb[31].mxu1 }
 0x174   : > { %v1685_v30 = vadd.f32 %v1684_v29, %v1683_v50 }
 0x175   : > { %v817_v35 = vadd.f32 %v1605_v27, %v3159_v54  ;;  %v1718_v41 = vpop.f32.mrb[32].mxu0 }
 0x176   : > { %v1798_v56 = vpop.f32.mrb[32].mxu1  ;;  %v1719_v1 = vpop.f32.mrb[33].mxu0 }
 0x177   : > { %v3207_v55 = vadd.f32 %v1685_v30, %v817_v35  ;;  %v1720_v15 = vadd.f32 %v1719_v1, %v1718_v41  ;;  %v1799_v57 = vpop.f32.mrb[33].mxu1 }
 0x178   : > { %v1800_v25 = vadd.f32 %v1799_v57, %v1798_v56 }
 0x179   : > { %v1032_v16 = vadd.f32 %v1720_v15, %v3162_v43  ;;  %v1721_v38 = vpop.f32.mrb[34].mxu0 }
 0x17a   : > { %v1801_v45 = vpop.f32.mrb[34].mxu1  ;;  %v1722_v46 = vpop.f32.mrb[35].mxu0 }
 0x17b   : > { %v1723_v36 = vadd.f32 %v1722_v46, %v1721_v38  ;;  %v1802_v37 = vpop.f32.mrb[35].mxu1  ;;  %v3210_v63 = vadd.f32 %v1800_v25, %v1032_v16 }
 0x17c   : > { %v1803_v44 = vadd.f32 %v1802_v37, %v1801_v45 }
 0x17d   : > { %v1037_v54 = vadd.f32 %v1723_v36, %v3165_v33  ;;  %v1724_v5 = vpop.f32.mrb[36].mxu0 }
 0x17e   : > { %v1804_v17 = vpop.f32.mrb[36].mxu1  ;;  %v1725_v26 = vpop.f32.mrb[37].mxu0 }
 0x17f   : > { %v1726_v28 = vadd.f32 %v1725_v26, %v1724_v5  ;;  %v1805_v59 = vpop.f32.mrb[37].mxu1  ;;  %v3213_v31 = vadd.f32 %v1803_v44, %v1037_v54 }
 0x180   : > { %v1806_v60 = vadd.f32 %v1805_v59, %v1804_v17 }
 0x181   : > { %v1042_v43 = vadd.f32 %v1726_v28, %v3168_v62  ;;  %v1727_v61 = vpop.f32.mrb[38].mxu0 }
 0x182   : > { %v1807_v7 = vpop.f32.mrb[38].mxu1  ;;  %v1728_v6 = vpop.f32.mrb[39].mxu0 }
 0x183   : > { %v1729_v4 = vadd.f32 %v1728_v6, %v1727_v61  ;;  %v1808_v10 = vpop.f32.mrb[39].mxu1  ;;  %v3216_v13 = vadd.f32 %v1806_v60, %v1042_v43 }
 0x184   : > { %v1809_v18 = vadd.f32 %v1808_v10, %v1807_v7 }
 0x185   : > { %v1047_v33 = vadd.f32 %v1729_v4, %v3171_v40  ;;  %v1730_v47 = vpop.f32.mrb[40].mxu0 }
 0x186   : > { %v1810_v48 = vpop.f32.mrb[40].mxu1  ;;  %v1731_v2 = vpop.f32.mrb[41].mxu0 }
 0x187   : > { %v1732_v34 = vadd.f32 %v1731_v2, %v1730_v47  ;;  %v1811_v52 = vpop.f32.mrb[41].mxu1  ;;  %v3219_v20 = vadd.f32 %v1809_v18, %v1047_v33 }
 0x188   : > { %v1812_v23 = vadd.f32 %v1811_v52, %v1810_v48 }
 0x189   : > { %v1052_v62 = vadd.f32 %v1732_v34, %v3174_v9  ;;  %v1733_v22 = vpop.f32.mrb[42].mxu0 }
 0x18a   : > { %v1813_v24 = vpop.f32.mrb[42].mxu1  ;;  %v1734_v12 = vpop.f32.mrb[43].mxu0 }
 0x18b   : > { %v1735_v53 = vadd.f32 %v1734_v12, %v1733_v22  ;;  %v1814_v32 = vpop.f32.mrb[43].mxu1  ;;  %v3222_v21 = vadd.f32 %v1812_v23, %v1052_v62 }
 0x18c   : > { %v1815_v50 = vadd.f32 %v1814_v32, %v1813_v24 }
 0x18d   : > { %v1057_v40 = vadd.f32 %v1735_v53, %v3177_v19  ;;  %v1736_v3 = vpop.f32.mrb[44].mxu0 }
 0x18e   : > { %v1816_v27 = vpop.f32.mrb[44].mxu1  ;;  %v1737_v29 = vpop.f32.mrb[45].mxu0 }
 0x18f   : > { %v1738_v30 = vadd.f32 %v1737_v29, %v1736_v3  ;;  %v1817_v35 = vpop.f32.mrb[45].mxu1  ;;  %v3225_v41 = vadd.f32 %v1815_v50, %v1057_v40 }
 0x190   : > { %v1818_v56 = vadd.f32 %v1817_v35, %v1816_v27 }
 0x191   : > { %v1062_v9 = vadd.f32 %v1738_v30, %v3180_v49  ;;  %v1739_v1 = vpop.f32.mrb[46].mxu0 }
 0x192   : > { %v1819_v15 = vpop.f32.mrb[46].mxu1  ;;  %v1740_v57 = vpop.f32.mrb[47].mxu0 }
 0x193   : > { %v1741_v25 = vadd.f32 %v1740_v57, %v1739_v1  ;;  %v1820_v16 = vpop.f32.mrb[47].mxu1  ;;  %v3228_v38 = vadd.f32 %v1818_v56, %v1062_v9 }
 0x194   : > { %v1821_v45 = vadd.f32 %v1820_v16, %v1819_v15 }
 0x195   : > { %v1067_v19 = vadd.f32 %v1741_v25, %v3183_v8  ;;  %v1742_v46 = vpop.f32.mrb[48].mxu0 }
 0x196   : > { %v1822_v36 = vpop.f32.mrb[48].mxu1  ;;  %v1743_v37 = vpop.f32.mrb[49].mxu0 }
 0x197   : > { %v1744_v44 = vadd.f32 %v1743_v37, %v1742_v46  ;;  %v1823_v54 = vpop.f32.mrb[49].mxu1  ;;  %v3231_v5 = vadd.f32 %v1821_v45, %v1067_v19 }
 0x198   : > { %v1824_v17 = vadd.f32 %v1823_v54, %v1822_v36 }
 0x199   : > { %v1072_v49 = vadd.f32 %v1744_v44, %v3186_v58  ;;  %v1745_v26 = vpop.f32.mrb[50].mxu0 }
 0x19a   : > { %v1825_v28 = vpop.f32.mrb[50].mxu1  ;;  %v1746_v59 = vpop.f32.mrb[51].mxu0 }
 0x19b   : > { %v1747_v60 = vadd.f32 %v1746_v59, %v1745_v26  ;;  %v1826_v43 = vpop.f32.mrb[51].mxu1  ;;  %v1217_v61 = vadd.f32 %v1824_v17, %v1072_v49 }
 0x19c   : > { %v1827_v7 = vadd.f32 %v1826_v43, %v1825_v28 }
 0x19d   : > { %v1077_v6 = vadd.f32 %v1747_v60, %v3189_v39  ;;  %v1748_v8 = vpop.f32.mrb[52].mxu0 }
 0x19e   : > { %v1828_v4 = vpop.f32.mrb[52].mxu1  ;;  %v1749_v10 = vpop.f32.mrb[53].mxu0 }
 0x19f   : > { %v1750_v18 = vadd.f32 %v1749_v10, %v1748_v8  ;;  %v1829_v33 = vpop.f32.mrb[53].mxu1  ;;  %v1222_v47 = vadd.f32 %v1827_v7, %v1077_v6 }
 0x1a0   : > { %v1830_v48 = vadd.f32 %v1829_v33, %v1828_v4 }
 0x1a1   : > { %v1082_v2 = vadd.f32 %v1750_v18, %v3192_v14  ;;  %v1751_v34 = vpop.f32.mrb[54].mxu0 }
 0x1a2   : > { %v1831_v58 = vpop.f32.mrb[54].mxu1  ;;  %v1752_v52 = vpop.f32.mrb[55].mxu0 }
 0x1a3   : > { %v1753_v23 = vadd.f32 %v1752_v52, %v1751_v34  ;;  %v1832_v62 = vpop.f32.mrb[55].mxu1  ;;  %v1227_v22 = vadd.f32 %v1830_v48, %v1082_v2 }
 0x1a4   : > { %v1833_v24 = vadd.f32 %v1832_v62, %v1831_v58 }
 0x1a5   : > { %v1087_v12 = vadd.f32 %v1753_v23, %v3195_v0  ;;  %v1754_v53 = vpop.f32.mrb[56].mxu0 }
 0x1a6   : > { %v1834_v39 = vpop.f32.mrb[56].mxu1  ;;  %v1755_v32 = vpop.f32.mrb[57].mxu0 }
 0x1a7   : > { %v1756_v50 = vadd.f32 %v1755_v32, %v1754_v53  ;;  %v1835_v40 = vpop.f32.mrb[57].mxu1  ;;  %v1232_v3 = vadd.f32 %v1833_v24, %v1087_v12 }
 0x1a8   : > { %v1836_v27 = vadd.f32 %v1835_v40, %v1834_v39 }
 0x1a9   : > { %v1092_v29 = vadd.f32 %v1756_v50, %v3198_v51  ;;  %v1757_v30 = vpop.f32.mrb[58].mxu0 }
 0x1aa   : > { %v1837_v14 = vpop.f32.mrb[58].mxu1  ;;  %v1758_v35 = vpop.f32.mrb[59].mxu0 }
 0x1ab   : > { %v1759_v56 = vadd.f32 %v1758_v35, %v1757_v30  ;;  %v1838_v9 = vpop.f32.mrb[59].mxu1  ;;  %v1237_v1 = vadd.f32 %v1836_v27, %v1092_v29 }
 0x1ac   : > { %v1839_v15 = vadd.f32 %v1838_v9, %v1837_v14 }
 0x1ad   : > { %v1097_v57 = vadd.f32 %v1759_v56, %v3201_v42  ;;  %v1760_v25 = vpop.f32.mrb[60].mxu0 }
 0x1ae   : > { %v1840_v0 = vpop.f32.mrb[60].mxu1  ;;  %v1761_v16 = vpop.f32.mrb[61].mxu0 }
 0x1af   : > { %v1762_v45 = vadd.f32 %v1761_v16, %v1760_v25  ;;  %v1841_v19 = vpop.f32.mrb[61].mxu1  ;;  %v1242_v46 = vadd.f32 %v1839_v15, %v1097_v57 }
 0x1b0   : > { %v1842_v36 = vadd.f32 %v1841_v19, %v1840_v0 }
 0x1b1   : > { %v1102_v37 = vadd.f32 %v1762_v45, %v3204_v11  ;;  %v1763_v44 = vpop.f32.mrb[62].mxu0 }
 0x1b2   : > { %v1843_v51 = vpop.f32.mrb[62].mxu1  ;;  %v1764_v54 = vpop.f32.mrb[63].mxu0 }
 0x1b3   : > { %v1765_v17 = vadd.f32 %v1764_v54, %v1763_v44  ;;  %v1844_v49 = vpop.f32.mrb[63].mxu1  ;;  %v1247_v26 = vadd.f32 %v1842_v36, %v1102_v37 }
 0x1b4   : > { %v1845_v42 = vadd.f32 %v1844_v49, %v1843_v51 }
 0x1b5   : > { %v1107_v28 = vadd.f32 %v1765_v17, %v3207_v55  ;;  %v1912_v59 = vpop.f32.mrb[64].mxu0 }
 0x1b6   : > { %v1327_v60 = vadd.f32 %v1912_v59, %v3213_v31  ;;  %v1924_v43 = vpop.f32.mrb[64].mxu1  ;;  %v1321_v7 = vpop.f32.mrb[65].mxu0 }
 0x1b7   : > { %v1367_v6 = vadd.f32 %v1924_v43, %v1222_v47  ;;  %v1322_v11 = vadd.f32 %v1321_v7, %v3210_v63  ;;  %v1361_v8 = vpop.f32.mrb[65].mxu1  ;;  %v1252_v4 = vadd.f32 %v1845_v42, %v1107_v28 }
 0x1b8   : > { %1401 = vst [vmem:[%s2253_s30 + $0x8] sm:$0xff] %v1327_v60  ;;  %v1362_v10 = vadd.f32 %v1361_v8, %v1217_v61 }
 0x1b9   : > { %1409 = vst [vmem:[%s2253_s30 + $0x48] sm:$0xff] %v1367_v6  ;;  %1400 = vst [vmem:[%s2253_s30] sm:$0xff] %v1322_v11  ;;  %v1915_v18 = vpop.f32.mrb[66].mxu0 }
 0x1ba   : > { %1408 = vst [vmem:[%s2253_s30 + $0x40] sm:$0xff] %v1362_v10  ;;  %v1337_v55 = vadd.f32 %v1915_v18, %v3219_v20  ;;  %v1927_v31 = vpop.f32.mrb[66].mxu1  ;;  %v1331_v33 = vpop.f32.mrb[67].mxu0 }
 0x1bb   : > { %v1377_v47 = vadd.f32 %v1927_v31, %v1232_v3  ;;  %v1332_v48 = vadd.f32 %v1331_v33, %v3216_v13  ;;  %v1371_v63 = vpop.f32.mrb[67].mxu1 }
 0x1bc   : > { %1403 = vst [vmem:[%s2253_s30 + $0x18] sm:$0xff] %v1337_v55  ;;  %v1372_v2 = vadd.f32 %v1371_v63, %v1227_v22 }
 0x1bd   : > { %1411 = vst [vmem:[%s2253_s30 + $0x58] sm:$0xff] %v1377_v47  ;;  %1402 = vst [vmem:[%s2253_s30 + $0x10] sm:$0xff] %v1332_v48  ;;  %v1918_v61 = vpop.f32.mrb[68].mxu0 }
 0x1be   : > { %1410 = vst [vmem:[%s2253_s30 + $0x50] sm:$0xff] %v1372_v2  ;;  %v1347_v34 = vadd.f32 %v1918_v61, %v3225_v41  ;;  %v1930_v58 = vpop.f32.mrb[68].mxu1  ;;  %v1341_v20 = vpop.f32.mrb[69].mxu0 }
 0x1bf   : > { %v1387_v52 = vadd.f32 %v1930_v58, %v1242_v46  ;;  %v1342_v23 = vadd.f32 %v1341_v20, %v3222_v21  ;;  %v1381_v13 = vpop.f32.mrb[69].mxu1 }
 0x1c0   : > { %1405 = vst [vmem:[%s2253_s30 + $0x28] sm:$0xff] %v1347_v34  ;;  %v1382_v62 = vadd.f32 %v1381_v13, %v1237_v1 }
 0x1c1   : > { %1413 = vst [vmem:[%s2253_s30 + $0x68] sm:$0xff] %v1387_v52  ;;  %1404 = vst [vmem:[%s2253_s30 + $0x20] sm:$0xff] %v1342_v23  ;;  %v1921_v22 = vpop.f32.mrb[70].mxu0 }
 0x1c2   : > { %1412 = vst [vmem:[%s2253_s30 + $0x60] sm:$0xff] %v1382_v62  ;;  %v1357_v24 = vadd.f32 %v1921_v22, %v3231_v5  ;;  %v1933_v12 = vpop.f32.mrb[70].mxu1  ;;  %v1351_v41 = vpop.f32.mrb[71].mxu0 }
 0x1c3   : > { %v1397_v53 = vadd.f32 %v1933_v12, %v1252_v4  ;;  %v1352_v39 = vadd.f32 %v1351_v41, %v3228_v38  ;;  %v1391_v32 = vpop.f32.mrb[71].mxu1 }
 0x1c4   : > { %1407 = vst [vmem:[%s2253_s30 + $0x38] sm:$0xff] %v1357_v24  ;;  %v1392_v21 = vadd.f32 %v1391_v32, %v1247_v26 }
 0x1c5   : > { %1415 = vst [vmem:[%s2253_s30 + $0x78] sm:$0xff] %v1397_v53  ;;  %1406 = vst [vmem:[%s2253_s30 + $0x30] sm:$0xff] %v1352_v39 }
 0x1c6   : > { %1414 = vst [vmem:[%s2253_s30 + $0x70] sm:$0xff] %v1392_v21 }
 0x1c7 PF: > { %s13_s16 = sadd.s32 1, %s2189_s16   ;;  %s3284_s12 = smov %s2181_s14 }
 0x1c8   : > { %p10_p8 = scmp.ge.s32.totalorder %s13_s16, 6   ;;  %s3285_s13 = smov %s2185_s15 }
 0x1c9   : > { %s3286_s14 = smov %s3289_s17  ;;  %s3287_s15 = smov %s3293_s18 }
 0x1ca   :  { %12 = sbr.rel (!%p10_p8) target bundleno = 3 (0x3), region = 68 }

// kernel: _lambda_.7
= control target key start
LH: loop header
LB: loop body
LE: loop exit
PB: predicated region body
PF: predicated region fallthrough
CT: control target
= control target key end

     0   :  { %s525_s12 = smov 0   ;;  %s527_s13 = smov 0   ;;  %s654_s0 = inlined_call_operand.vmem [shape: f32[2,16,16,128], index: 0, kind: input, shape index: {}]   ;;  %s655_s1 = inlined_call_operand.vmem [shape: f32[1,128], index: 1, kind: input, shape index: {}]   ;;  %s656_s2 = inlined_call_operand.vmem [shape: f32[1,128], index: 2, kind: input, shape index: {}]   ;;  %s657_s3 = inlined_call_operand.vmem [shape: f32[2,16,16,128], index: 3, kind: output, shape index: {}]  }
   0x1   :  { %s529_s14 = smov 0   ;;  %s531_s15 = smov 0  }
   0x2   :  { %s533_s16 = smov 0  }
   0x3 LB: > { %s22_s17 = sadd.s32 1, %s495_s14  ;;  %s25_s18 = sadd.s32 1, %s499_s15  ;;  %s503_s16 = sphi %s533_s16, %s13_s16   ;;  %s499_s15 = sphi %s531_s15, %s661_s15   ;;  %s495_s14 = sphi %s529_s14, %s660_s14   ;;  %s491_s13 = sphi %s527_s13, %s659_s13   ;;  %s487_s12 = sphi %s525_s12, %s658_s12  }
   0x4   : > { %p23_p0 = scmp.ge.s32.totalorder %s22_s17, 2  ;;  %p412_p1 = scmp.ge.s32.totalorder %s503_s16, 1 }
   0x5   : > { %p159_p2 = scmp.lt.s32.totalorder %s503_s16, 5 }
   0x6   : > { %s663_s17 = smov (%p23_p0, %s22_s17), 0  ;;  %s665_s18 = smov (!%p23_p0, %s25_s18), %s499_s15 }
   0x7   : > { %p160_p3 = pnand %p412_p1, %p159_p2  ;;  %p27_p4 = scmp.ge.s32.totalorder %s665_s18, 2 }
   0x8   : > { %s413_s19 = sshll.u32 (!%p160_p3), %s487_s12, 3  ;;  %p194_p5 = scmp.lt.s32.totalorder (!%p160_p3), %s491_s13, 1  ;;  %v558_v0 = vld [vmem:[%s655_s1] ss:$0 sm:$0xff] (!%p160_p3) }
   0x9   : > { %s667_s18 = smov (%p27_p4, %s665_s18), 0  ;;  %163 = sbr.rel (%p160_p3) target bundleno = 39 (0x27), region = 32 }
   0xa   : > { %p196_p6 = scmp.lt.s32.totalorder (!%p160_p3), %s413_s19, 15  ;;  %v568_v1 = vld [vmem:[%s656_s2] ss:$0 sm:$0xff] (!%p160_p3) }
  0x10   : > { %s669_s13 = smov (!%p194_p5, %s491_s13), 1  ;;  %s671_s19 = smov (!%p196_p6, %s413_s19), 15 }
  0x11   : > { %s415_s20 = sshll.u32 %s669_s13, 5  ;;  %s414_s21 = sshll.u32 %s671_s19, 1 }
  0x12   : > { %s200_s22 = sadd.s32 %s415_s20, %s414_s21 }
  0x13   : > { %s416_s23 = sshll.u32 %s200_s22, 3 }
  0x14   : > { %s563_s28 = scalar_lea.vmem %s654_s0, %s416_s23  ;;  %s591_s6 = scalar_lea.vmem %s657_s3, %s416_s23 }
  0x15   : > { %v215_v2 = vld [vmem:[%s563_s28] sm:$0xff]  ;;  %v216_v3 = vld [vmem:[%s563_s28 + $0x8] sm:$0xff]  ;;  %v217_v4 = vld [vmem:[%s563_s28 + $0x10] sm:$0xff] }
  0x16   : > { %v238_v5 = vmul.f32 %v558_v0, %v215_v2  ;;  %v239_v6 = vmul.f32 %v558_v0, %v216_v3  ;;  %v240_v7 = vmul.f32 %v558_v0, %v217_v4  ;;  %v218_v8 = vld [vmem:[%s563_s28 + $0x18] sm:$0xff]  ;;  %v219_v9 = vld [vmem:[%s563_s28 + $0x20] sm:$0xff]  ;;  %v220_v10 = vld [vmem:[%s563_s28 + $0x28] sm:$0xff] }
  0x17   : > { %v241_v11 = vmul.f32 %v558_v0, %v218_v8  ;;  %v242_v12 = vmul.f32 %v558_v0, %v219_v9  ;;  %v243_v13 = vmul.f32 %v558_v0, %v220_v10  ;;  %v221_v14 = vld [vmem:[%s563_s28 + $0x30] sm:$0xff]  ;;  %v222_v15 = vld [vmem:[%s563_s28 + $0x38] sm:$0xff]  ;;  %v223_v24 = vld [vmem:[%s563_s28 + $0x40] sm:$0xff] }
  0x18   : > { %v261_v16 = vadd.f32 %v568_v1, %v238_v5  ;;  %v262_v17 = vadd.f32 %v568_v1, %v239_v6  ;;  %v263_v18 = vadd.f32 %v568_v1, %v240_v7  ;;  %v244_v19 = vmul.f32 %v558_v0, %v221_v14  ;;  %v224_v25 = vld [vmem:[%s563_s28 + $0x48] sm:$0xff]  ;;  %v225_v26 = vld [vmem:[%s563_s28 + $0x50] sm:$0xff]  ;;  %v226_v31 = vld [vmem:[%s563_s28 + $0x58] sm:$0xff] }
  0x19   : > { %v264_v20 = vadd.f32 %v568_v1, %v241_v11  ;;  %v265_v21 = vadd.f32 %v568_v1, %v242_v12  ;;  %v266_v22 = vadd.f32 %v568_v1, %v243_v13  ;;  %v245_v23 = vmul.f32 %v558_v0, %v222_v15  ;;  %v227_v32 = vld [vmem:[%s563_s28 + $0x60] sm:$0xff]  ;;  %v228_v33 = vld [vmem:[%s563_s28 + $0x68] sm:$0xff]  ;;  %v229_v38 = vld [vmem:[%s563_s28 + $0x70] sm:$0xff] }
  0x1a   : > { %v277_v27 = vmax.f32 %v261_v16, 0.0  ;;  %v278_v28 = vmax.f32 %v262_v17, 0.0  ;;  %v279_v29 = vmax.f32 %v263_v18, 0.0  ;;  %v267_v30 = vadd.f32 %v568_v1, %v244_v19  ;;  %v230_v43 = vld [vmem:[%s563_s28 + $0x78] sm:$0xff] }
  0x1b   : > { %v280_v34 = vmax.f32 %v264_v20, 0.0  ;;  %v281_v35 = vmax.f32 %v265_v21, 0.0  ;;  %v282_v36 = vmax.f32 %v266_v22, 0.0  ;;  %v268_v37 = vadd.f32 %v568_v1, %v245_v23 }
  0x1c   : > { %293 = vst [vmem:[%s591_s6] sm:$0xff] %v277_v27  ;;  %294 = vst [vmem:[%s591_s6 + $0x8] sm:$0xff] %v278_v28  ;;  %v283_v39 = vmax.f32 %v267_v30, 0.0  ;;  %v246_v40 = vmul.f32 %v558_v0, %v223_v24  ;;  %v247_v41 = vmul.f32 %v558_v0, %v224_v25  ;;  %v248_v42 = vmul.f32 %v558_v0, %v225_v26 }
  0x1d   : > { %295 = vst [vmem:[%s591_s6 + $0x10] sm:$0xff] %v279_v29  ;;  %296 = vst [vmem:[%s591_s6 + $0x18] sm:$0xff] %v280_v34  ;;  %v284_v44 = vmax.f32 %v268_v37, 0.0  ;;  %v249_v45 = vmul.f32 %v558_v0, %v226_v31  ;;  %v250_v46 = vmul.f32 %v558_v0, %v227_v32  ;;  %v251_v47 = vmul.f32 %v558_v0, %v228_v33 }
  0x1e   : > { %297 = vst [vmem:[%s591_s6 + $0x20] sm:$0xff] %v281_v35  ;;  %298 = vst [vmem:[%s591_s6 + $0x28] sm:$0xff] %v282_v36  ;;  %v269_v48 = vadd.f32 %v568_v1, %v246_v40  ;;  %v270_v49 = vadd.f32 %v568_v1, %v247_v41  ;;  %v271_v50 = vadd.f32 %v568_v1, %v248_v42 }
  0x1f   : > { %299 = vst [vmem:[%s591_s6 + $0x30] sm:$0xff] %v283_v39  ;;  %v252_v51 = vmul.f32 %v558_v0, %v229_v38  ;;  %300 = vst [vmem:[%s591_s6 + $0x38] sm:$0xff] %v284_v44  ;;  %v272_v52 = vadd.f32 %v568_v1, %v249_v45  ;;  %v273_v53 = vadd.f32 %v568_v1, %v250_v46 }
  0x20   : > { %v274_v54 = vadd.f32 %v568_v1, %v251_v47  ;;  %v253_v55 = vmul.f32 %v558_v0, %v230_v43  ;;  %v285_v56 = vmax.f32 %v269_v48, 0.0  ;;  %v286_v57 = vmax.f32 %v270_v49, 0.0 }
  0x21   : > { %v287_v58 = vmax.f32 %v271_v50, 0.0  ;;  %v275_v59 = vadd.f32 %v568_v1, %v252_v51  ;;  %v288_v60 = vmax.f32 %v272_v52, 0.0  ;;  %v289_v61 = vmax.f32 %v273_v53, 0.0 }
  0x22   : > { %v290_v62 = vmax.f32 %v274_v54, 0.0  ;;  %v276_v63 = vadd.f32 %v568_v1, %v253_v55  ;;  %301 = vst [vmem:[%s591_s6 + $0x40] sm:$0xff] %v285_v56  ;;  %302 = vst [vmem:[%s591_s6 + $0x48] sm:$0xff] %v286_v57 }
  0x23   : > { %303 = vst [vmem:[%s591_s6 + $0x50] sm:$0xff] %v287_v58  ;;  %v291_v2 = vmax.f32 %v275_v59, 0.0  ;;  %304 = vst [vmem:[%s591_s6 + $0x58] sm:$0xff] %v288_v60 }
  0x24   : > { %305 = vst [vmem:[%s591_s6 + $0x60] sm:$0xff] %v289_v61  ;;  %306 = vst [vmem:[%s591_s6 + $0x68] sm:$0xff] %v290_v62  ;;  %v292_v0 = vmax.f32 %v276_v63, 0.0 }
  0x25   : > { %307 = vst [vmem:[%s591_s6 + $0x70] sm:$0xff] %v291_v2 }
  0x26   : > { %308 = vst [vmem:[%s591_s6 + $0x78] sm:$0xff] %v292_v0 }
  0x27 PF: > { %s13_s16 = sadd.s32 1, %s503_s16   ;;  %s658_s12 = smov %s495_s14 }
  0x28   : > { %p10_p7 = scmp.ge.s32.totalorder %s13_s16, 6   ;;  %s659_s13 = smov %s499_s15 }
  0x29   : > { %s660_s14 = smov %s663_s17  ;;  %s661_s15 = smov %s667_s18 }
  0x2a   :  { %12 = sbr.rel (!%p10_p7) target bundleno = 3 (0x3), region = 62 }

// kernel: _lambda_.6
= control target key start
LH: loop header
LB: loop body
LE: loop exit
PB: predicated region body
PF: predicated region fallthrough
CT: control target
= control target key end

     0   :  { %s2553_s21 = smov 0   ;;  %s2555_s22 = smov 0   ;;  %s3701_s0 = inlined_call_operand.vmem [shape: f32[2,16,16,128], index: 0, kind: input, shape index: {}]   ;;  %s3702_s1 = inlined_call_operand.vmem [shape: f32[1,128], index: 1, kind: input, shape index: {}]   ;;  %s3703_s2 = inlined_call_operand.vmem [shape: f32[1,128], index: 2, kind: input, shape index: {}]   ;;  %s3704_s3 = inlined_call_operand.vmem [shape: f32[1152,128], index: 3, kind: input, shape index: {}]   ;;  %s3705_s4 = inlined_call_operand.vmem [shape: f32[1,128], index: 4, kind: input, shape index: {}]   ;;  %s3706_s5 = inlined_call_operand.vmem [shape: f32[2,16,16,128], index: 5, kind: output, shape index: {0}]   ;;  %s3707_s6 = inlined_call_operand.vmem [shape: f32[2,2,8,128], index: 6, kind: output, shape index: {1}]  }
   0x1   :  { %s2557_s23 = smov 0   ;;  %s2559_s24 = smov 0  }
   0x2   :  { %s2561_s25 = smov 0  }
   0x3 LB: > { %s26_s26 = sadd.s32 1, %s2507_s23  ;;  %s29_s27 = sadd.s32 1, %s2511_s24  ;;  %s2515_s25 = sphi %s2561_s25, %s17_s25   ;;  %s2511_s24 = sphi %s2559_s24, %s3715_s24   ;;  %s2507_s23 = sphi %s2557_s23, %s3714_s23   ;;  %s2503_s22 = sphi %s2555_s22, %s3713_s22   ;;  %s2499_s21 = sphi %s2553_s21, %s3712_s21  }
   0x4   : > { %p27_p0 = scmp.ge.s32.totalorder %s26_s26, 2  ;;  %p1834_p1 = scmp.ge.s32.totalorder %s2515_s25, 1 }
   0x5   : > { %p231_p2 = scmp.lt.s32.totalorder %s2515_s25, 5 }
   0x6   : > { %s3717_s26 = smov (%p27_p0, %s26_s26), 0  ;;  %s3719_s27 = smov (!%p27_p0, %s29_s27), %s2511_s24 }
   0x7   : > { %3708 = sst [smem:[#allocation3_spill]] %s3717_s26  ;;  %p232_p3 = pnand %p1834_p1, %p231_p2 }
   0x8   : > { %p31_p4 = scmp.ge.s32.totalorder %s3719_s27, 2  ;;  %p274_p5 = scmp.lt.s32.totalorder (!%p232_p3), %s2503_s22, 1 }
   0x9   : > { %235 = sbr.rel (%p232_p3) target bundleno = 490 (0x1ea), region = 40  ;;  %s1837_s28 = sshll.u32 (!%p232_p3), %s2499_s21, 3 }
   0xa   : > { %s3721_s27 = smov (%p31_p4, %s3719_s27), 0  ;;  %p282_p6 = scmp.lt.s32.totalorder (!%p232_p3), %s1837_s28, 15 }
   0xb   : > { %3709 = sst [smem:[#allocation4_spill]] %s3721_s27  ;;  %p292_p7 = scmp.lt.s32.totalorder (!%p232_p3), %s2499_s21, 1 }
   0xc   : > { %p1843_p8 = scmp.ne.s32.totalorder (!%p232_p3), %s2499_s21, 0 }
  0x10   : > { %s3723_s22 = smov (!%p274_p5, %s2503_s22), 1  ;;  %s3725_s28 = smov (!%p282_p6, %s1837_s28), 15 }
  0x11   : > { %s1851_s29 = sshll.u32 %s3723_s22, 8  ;;  %s1839_s30 = sshll.u32 %s3723_s22, 5  ;;  %v2608_v1 = vld [vmem:[%s3702_s1] ss:$0 sm:$0xff] (!%p1843_p8)  ;;  %v2517_v3 = vmov (!%p1843_p8), 0.0  }
  0x12   : > { %s2590_s9 = scalar_lea.vmem %s3701_s0, %s1851_s29  ;;  %s1838_s10 = sshll.u32 %s3725_s28, 1  ;;  %v2613_v2 = vld [vmem:[%s3703_s2] ss:$0 sm:$0xff] (!%p1843_p8)  ;;  %447 = vst [vmem:[#allocation2 + $0x18] sm:$0xff] (!%p1843_p8), %v2517_v3  ;;  %444 = vst [vmem:[#allocation2] sm:$0xff] (!%p1843_p8), %v2517_v3 }
  0x13   : > { %s286_s11 = sadd.s32 %s1839_s30, %s1838_s10  ;;  %s1841_s16 = sshll.u32 %s3723_s22, 1  ;;  %v302_v0 = vld [vmem:[%s2590_s9] sm:$0xff] (!%p1843_p8)  ;;  %445 = vst [vmem:[#allocation2 + $0x8] sm:$0xff] (!%p1843_p8), %v2517_v3  ;;  %446 = vst [vmem:[#allocation2 + $0x10] sm:$0x3] (!%p1843_p8), %v2517_v3  ;;  %v303_v5 = vld [vmem:[%s2590_s9 + $0x8] sm:$0xff] (!%p1843_p8) }
  0x14   : > { %s1840_s12 = sshll.u32 %s286_s11, 3  ;;  %301 = sbr.rel (%p1843_p8) target bundleno = 62 (0x3e), region = 44  ;;  %448 = vst [vmem:[#allocation2 + $0x20] sm:$0xff] (!%p1843_p8), %v2517_v3  ;;  %449 = vst [vmem:[#allocation2 + $0x28] sm:$0x3] (!%p1843_p8), %v2517_v3  ;;  %v341_v4 = vmul.f32 (!%p1843_p8), %v2608_v1, %v302_v0  ;;  %v304_v6 = vld [vmem:[%s2590_s9 + $0x10] sm:$0xff] (!%p1843_p8)  ;;  %v342_v8 = vmul.f32 (!%p1843_p8), %v2608_v1, %v303_v5 }
  0x15   : > { %s2595_s15 = scalar_lea.vmem %s3706_s5, %s1840_s12  ;;  %450 = vst [vmem:[#allocation2 + $0x30] sm:$0xff] (!%p1843_p8), %v2517_v3  ;;  %451 = vst [vmem:[#allocation2 + $0x38] sm:$0xff] (!%p1843_p8), %v2517_v3  ;;  %v305_v7 = vld [vmem:[%s2590_s9 + $0x18] sm:$0xff] (!%p1843_p8)  ;;  %v343_v9 = vmul.f32 (!%p1843_p8), %v2608_v1, %v304_v6  ;;  %v306_v11 = vld [vmem:[%s2590_s9 + $0x20] sm:$0xff] (!%p1843_p8) }
  0x16   : > { %s293_s17 = scalar_select %p292_p7, %s2499_s21, 1 }
  0x17   : > { %452 = vst [vmem:[#allocation2 + $0x40] sm:$0x3] (!%p1843_p8), %v2517_v3  ;;  %453 = vst [vmem:[#allocation2 + $0x48] sm:$0xff] (!%p1843_p8), %v2517_v3  ;;  %v344_v10 = vmul.f32 (!%p1843_p8), %v2608_v1, %v305_v7  ;;  %v307_v12 = vld [vmem:[%s2590_s9 + $0x28] sm:$0xff] (!%p1843_p8)  ;;  %v308_v13 = vld [vmem:[%s2590_s9 + $0x30] sm:$0xff] (!%p1843_p8)  ;;  %v380_v14 = vadd.f32 (!%p1843_p8), %v2613_v2, %v341_v4  ;;  %v345_v15 = vmul.f32 (!%p1843_p8), %v2608_v1, %v306_v11 }
  0x18   : > { %s295_s18 = sadd.s32 %s1841_s16, %s293_s17  ;;  %454 = vst [vmem:[#allocation2 + $0x50] sm:$0xff] (!%p1843_p8), %v2517_v3  ;;  %455 = vst [vmem:[#allocation2 + $0x58] sm:$0x3] (!%p1843_p8), %v2517_v3  ;;  %v346_v16 = vmul.f32 (!%p1843_p8), %v2608_v1, %v307_v12  ;;  %v347_v17 = vmul.f32 (!%p1843_p8), %v2608_v1, %v308_v13  ;;  %v309_v18 = vld [vmem:[%s2590_s9 + $0x38] sm:$0xff] (!%p1843_p8)  ;;  %v381_v19 = vadd.f32 (!%p1843_p8), %v2613_v2, %v342_v8  ;;  %v310_v23 = vld [vmem:[%s2590_s9 + $0x40] sm:$0xff] (!%p1843_p8) }
  0x19   : > { %s1842_s19 = sshll.u32 %s295_s18, 3  ;;  %456 = vst [vmem:[#allocation2 + $0x60] sm:$0xff] (!%p1843_p8), %v2517_v3  ;;  %457 = vst [vmem:[#allocation2 + $0x68] sm:$0xff] (!%p1843_p8), %v2517_v3  ;;  %v382_v20 = vadd.f32 (!%p1843_p8), %v2613_v2, %v343_v9  ;;  %v383_v21 = vadd.f32 (!%p1843_p8), %v2613_v2, %v344_v10  ;;  %v348_v22 = vmul.f32 (!%p1843_p8), %v2608_v1, %v309_v18  ;;  %v412_v24 = vmax.f32 (!%p1843_p8), %v380_v14, 0.0  ;;  %v311_v28 = vld [vmem:[%s2590_s9 + $0x48] sm:$0xff] (!%p1843_p8)  ;;  %v312_v29 = vld [vmem:[%s2590_s9 + $0x50] sm:$0xff] (!%p1843_p8) }
  0x1a   : > { %s2601_s26 = scalar_lea.vmem %s3707_s6, %s1842_s19  ;;  %458 = vst [vmem:[#allocation2 + $0x70] sm:$0x3] (!%p1843_p8), %v2517_v3  ;;  %459 = vst [vmem:[#allocation2 + $0x78] sm:$0xff] (!%p1843_p8), %v2517_v3  ;;  %v384_v25 = vadd.f32 (!%p1843_p8), %v2613_v2, %v345_v15  ;;  %v385_v26 = vadd.f32 (!%p1843_p8), %v2613_v2, %v346_v16  ;;  %v386_v27 = vadd.f32 (!%p1843_p8), %v2613_v2, %v347_v17  ;;  %v313_v30 = vld [vmem:[%s2590_s9 + $0x58] sm:$0xff] (!%p1843_p8)  ;;  %v413_v31 = vmax.f32 (!%p1843_p8), %v381_v19, 0.0  ;;  %v314_v35 = vld [vmem:[%s2590_s9 + $0x60] sm:$0xff] (!%p1843_p8) }
  0x1b   : > { %460 = vst [vmem:[#allocation2 + $0x80] sm:$0xff] %v2517_v3  ;;  %461 = vst [vmem:[#allocation2 + $0x88] sm:$0x3] %v2517_v3  ;;  %v414_v32 = vmax.f32 %v382_v20, 0.0  ;;  %v415_v33 = vmax.f32 %v383_v21, 0.0  ;;  %v387_v34 = vadd.f32 %v2613_v2, %v348_v22  ;;  %v315_v36 = vld [vmem:[%s2590_s9 + $0x68] sm:$0xff]  ;;  %v349_v41 = vmul.f32 %v2608_v1, %v310_v23 }
  0x1c   : > { %462 = vst [vmem:[#allocation2 + $0x90] sm:$0xff] %v2517_v3  ;;  %463 = vst [vmem:[#allocation2 + $0x98] sm:$0xff] %v2517_v3  ;;  %v316_v37 = vld [vmem:[%s2590_s9 + $0x70] sm:$0xff]  ;;  %v416_v38 = vmax.f32 %v384_v25, 0.0  ;;  %v417_v39 = vmax.f32 %v385_v26, 0.0  ;;  %v418_v40 = vmax.f32 %v386_v27, 0.0  ;;  %v350_v44 = vmul.f32 %v2608_v1, %v311_v28 }
  0x1d   : > { %464 = vst [vmem:[#allocation2 + $0xa0] sm:$0x3] %v2517_v3  ;;  %465 = vst [vmem:[#allocation2 + $0xa8] sm:$0xff] %v2517_v3  ;;  %v317_v42 = vld [vmem:[%s2590_s9 + $0x78] sm:$0xff]  ;;  %v419_v43 = vmax.f32 %v387_v34, 0.0  ;;  %v351_v45 = vmul.f32 %v2608_v1, %v312_v29  ;;  %v352_v46 = vmul.f32 %v2608_v1, %v313_v30  ;;  %v388_v47 = vadd.f32 %v2613_v2, %v349_v41  ;;  %v318_v55 = vld [vmem:[%s2590_s9 + $0x80] sm:$0xff] }
  0x1e   : > { %466 = vst [vmem:[#allocation2 + $0xb0] sm:$0xff] %v2517_v3  ;;  %467 = vst [vmem:[#allocation2 + $0xb8] sm:$0x3] %v2517_v3  ;;  %v353_v48 = vmul.f32 %v2608_v1, %v314_v35  ;;  %v354_v49 = vmul.f32 %v2608_v1, %v315_v36  ;;  %v355_v50 = vmul.f32 %v2608_v1, %v316_v37  ;;  %v319_v60 = vld [vmem:[%s2590_s9 + $0x88] sm:$0xff]  ;;  %v320_v61 = vld [vmem:[%s2590_s9 + $0x90] sm:$0xff] }
  0x1f   : > { %468 = vst [vmem:[#allocation2 + $0xc0] sm:$0xff] %v2517_v3  ;;  %469 = vst [vmem:[#allocation2 + $0xc8] sm:$0xff] %v2517_v3  ;;  %v389_v51 = vadd.f32 %v2613_v2, %v350_v44  ;;  %v390_v52 = vadd.f32 %v2613_v2, %v351_v45  ;;  %v391_v53 = vadd.f32 %v2613_v2, %v352_v46  ;;  %v420_v56 = vmax.f32 %v388_v47, 0.0  ;;  %v321_v62 = vld [vmem:[%s2590_s9 + $0x98] sm:$0xff]  ;;  %v322_v5 = vld [vmem:[%s2590_s9 + $0xa0] sm:$0xff] }
  0x20   : > { %470 = vst [vmem:[#allocation2 + $0xd0] sm:$0x3] %v2517_v3  ;;  %471 = vst [vmem:[#allocation2 + $0xd8] sm:$0xff] %v2517_v3  ;;  %v356_v54 = vmul.f32 %v2608_v1, %v317_v42  ;;  %v392_v57 = vadd.f32 %v2613_v2, %v353_v48  ;;  %v393_v58 = vadd.f32 %v2613_v2, %v354_v49  ;;  %v323_v6 = vld [vmem:[%s2590_s9 + $0xa8] sm:$0xff]  ;;  %v324_v7 = vld [vmem:[%s2590_s9 + $0xb0] sm:$0xff] }
  0x21   : > { %472 = vst [vmem:[#allocation2 + $0xe0] sm:$0xff] %v2517_v3  ;;  %473 = vst [vmem:[#allocation2 + $0xe8] sm:$0x3] %v2517_v3  ;;  %v394_v59 = vadd.f32 %v2613_v2, %v355_v50  ;;  %v421_v63 = vmax.f32 %v389_v51, 0.0  ;;  %v422_v0 = vmax.f32 %v390_v52, 0.0  ;;  %v357_v11 = vmul.f32 %v2608_v1, %v318_v55  ;;  %v325_v12 = vld [vmem:[%s2590_s9 + $0xb8] sm:$0xff] }
  0x22   : > { %474 = vst [vmem:[#allocation2 + $0xf0] sm:$0xff] %v2517_v3  ;;  %475 = vst [vmem:[#allocation2 + $0xf8] sm:$0xff] %v2517_v3  ;;  %v395_v4 = vadd.f32 %v2613_v2, %v356_v54  ;;  %v424_v8 = vmax.f32 %v392_v57, 0.0  ;;  %v425_v9 = vmax.f32 %v393_v58, 0.0  ;;  %v358_v14 = vmul.f32 %v2608_v1, %v319_v60  ;;  %v326_v25 = vld [vmem:[%s2590_s9 + $0xc0] sm:$0xff]  ;;  %v327_v30 = vld [vmem:[%s2590_s9 + $0xc8] sm:$0xff] }
  0x23   : > { %476 = vst [vmem:[#allocation2 + $0x100] sm:$0x3] %v2517_v3  ;;  %477 = vst [vmem:[#allocation2 + $0x108] sm:$0xff] %v2517_v3  ;;  %v426_v10 = vmax.f32 %v394_v59, 0.0  ;;  %v359_v15 = vmul.f32 %v2608_v1, %v320_v61  ;;  %v360_v16 = vmul.f32 %v2608_v1, %v321_v62  ;;  %v396_v17 = vadd.f32 %v2613_v2, %v357_v11  ;;  %v330_v37 = vld [vmem:[%s2590_s9 + $0xe0] sm:$0xff]  ;;  %v333_v44 = vld [vmem:[%s2590_s9 + $0xf8] sm:$0xff] }
  0x24   : > { %478 = vst [vmem:[#allocation2 + $0x110] sm:$0xff] %v2517_v3  ;;  %479 = vst [vmem:[#allocation2 + $0x118] sm:$0x3] %v2517_v3  ;;  %v427_v13 = vmax.f32 %v395_v4, 0.0  ;;  %v361_v18 = vmul.f32 %v2608_v1, %v322_v5  ;;  %v362_v19 = vmul.f32 %v2608_v1, %v323_v6  ;;  %v363_v20 = vmul.f32 %v2608_v1, %v324_v7 }
  0x25   : > { %480 = vst [vmem:[#allocation2 + $0x120] sm:$0xff] %v2517_v3  ;;  %481 = vst [vmem:[#allocation2 + $0x128] sm:$0xff] %v2517_v3  ;;  %v397_v21 = vadd.f32 %v2613_v2, %v358_v14  ;;  %v398_v22 = vadd.f32 %v2613_v2, %v359_v15  ;;  %v399_v23 = vadd.f32 %v2613_v2, %v360_v16  ;;  %v428_v26 = vmax.f32 %v396_v17, 0.0 }
  0x26   : > { %482 = vst [vmem:[#allocation2 + $0x130] sm:$0x3] %v2517_v3  ;;  %483 = vst [vmem:[#allocation2 + $0x138] sm:$0xff] %v2517_v3  ;;  %v400_v27 = vadd.f32 %v2613_v2, %v361_v18  ;;  %v401_v28 = vadd.f32 %v2613_v2, %v362_v19  ;;  %v402_v29 = vadd.f32 %v2613_v2, %v363_v20 }
  0x27   : > { %484 = vst [vmem:[#allocation2 + $0x140] sm:$0xff] %v2517_v3  ;;  %485 = vst [vmem:[#allocation2 + $0x148] sm:$0x3] %v2517_v3  ;;  %v430_v34 = vmax.f32 %v398_v22, 0.0  ;;  %v431_v35 = vmax.f32 %v399_v23, 0.0  ;;  %v366_v46 = vmul.f32 %v2608_v1, %v327_v30  ;;  %v369_v50 = vmul.f32 %v2608_v1, %v330_v37 }
  0x28   : > { %486 = vst [vmem:[#allocation2 + $0x150] sm:$0xff] %v2517_v3  ;;  %487 = vst [vmem:[#allocation2 + $0x158] sm:$0xff] %v2517_v3  ;;  %v433_v41 = vmax.f32 %v401_v28, 0.0  ;;  %v434_v42 = vmax.f32 %v402_v29, 0.0 }
  0x29   : > { %488 = vst [vmem:[#allocation2 + $0x160] sm:$0x3] %v2517_v3  ;;  %489 = vst [vmem:[#allocation2 + $0x168] sm:$0xff] %v2517_v3  ;;  %v408_v58 = vadd.f32 %v2613_v2, %v369_v50 }
  0x2a   : > { %490 = vst [vmem:[#allocation2 + $0x170] sm:$0xff] %v2517_v3  ;;  %491 = vst [vmem:[#allocation2 + $0x178] sm:$0x3] %v2517_v3 }
  0x2b   : > { %492 = vst [vmem:[#allocation2 + $0x180] sm:$0xff] %v2517_v3  ;;  %493 = vst [vmem:[#allocation2 + $0x188] sm:$0xff] %v2517_v3 }
  0x2c   : > { %494 = vst [vmem:[#allocation2 + $0x190] sm:$0x3] %v2517_v3  ;;  %495 = vst [vmem:[#allocation2 + $0x198] sm:$0xff] %v2517_v3 }
  0x2d   : > { %496 = vst [vmem:[#allocation2 + $0x1a0] sm:$0xff] %v2517_v3  ;;  %497 = vst [vmem:[#allocation2 + $0x1a8] sm:$0x3] %v2517_v3  ;;  %v423_v3 = vmax.f32 %v391_v53, 0.0  ;;  %v405_v53 = vadd.f32 %v2613_v2, %v366_v46 }
  0x2e   : > { %499 = vst [vmem:[#allocation2 + $0x19] sm:$0xff] %v412_v24  ;;  %500 = vst [vmem:[#allocation2 + $0x21] sm:$0xff] %v413_v31  ;;  %v364_v24 = vmul.f32 %v2608_v1, %v325_v12  ;;  %v328_v31 = vld [vmem:[%s2590_s9 + $0xd0] sm:$0xff] }
  0x2f   : > { %501 = vst [vmem:[#allocation2 + $0x31] sm:$0xff] %v414_v32  ;;  %502 = vst [vmem:[#allocation2 + $0x39] sm:$0xff] %v415_v33  ;;  %v329_v32 = vld [vmem:[%s2590_s9 + $0xd8] sm:$0xff]  ;;  %v429_v33 = vmax.f32 %v397_v21, 0.0  ;;  %v367_v47 = vmul.f32 %v2608_v1, %v328_v31  ;;  %v437_v61 = vmax.f32 %v405_v53, 0.0 }
  0x30   : > { %503 = vst [vmem:[#allocation2 + $0x49] sm:$0xff] %v416_v38  ;;  %504 = vst [vmem:[#allocation2 + $0x51] sm:$0xff] %v417_v39  ;;  %v403_v36 = vadd.f32 %v2613_v2, %v364_v24  ;;  %v331_v38 = vld [vmem:[%s2590_s9 + $0xe8] sm:$0xff]  ;;  %v332_v39 = vld [vmem:[%s2590_s9 + $0xf0] sm:$0xff]  ;;  %v368_v48 = vmul.f32 %v2608_v1, %v329_v32 }
  0x31   : > { %505 = vst [vmem:[#allocation2 + $0x61] sm:$0xff] %v418_v40  ;;  %506 = vst [vmem:[#allocation2 + $0x69] sm:$0xff] %v419_v43  ;;  %v432_v40 = vmax.f32 %v400_v27, 0.0  ;;  %v365_v43 = vmul.f32 %v2608_v1, %v326_v25  ;;  %v370_v51 = vmul.f32 %v2608_v1, %v331_v38  ;;  %v371_v52 = vmul.f32 %v2608_v1, %v332_v39 }
  0x32   : > { %507 = vst [vmem:[#allocation2 + $0x79] sm:$0xff] %v420_v56  ;;  %508 = vst [vmem:[#allocation2 + $0x81] sm:$0xff] %v421_v63  ;;  %v435_v45 = vmax.f32 %v403_v36, 0.0  ;;  %v406_v54 = vadd.f32 %v2613_v2, %v367_v47  ;;  %v407_v55 = vadd.f32 %v2613_v2, %v368_v48  ;;  %v372_v56 = vmul.f32 %v2608_v1, %v333_v44 }
  0x33   : > { %509 = vst [vmem:[#allocation2 + $0x91] sm:$0xff] %v422_v0  ;;  %510 = vst [vmem:[#allocation2 + $0x99] sm:$0xff] %v423_v3  ;;  %v404_v49 = vadd.f32 %v2613_v2, %v365_v43  ;;  %v409_v59 = vadd.f32 %v2613_v2, %v370_v51  ;;  %v410_v60 = vadd.f32 %v2613_v2, %v371_v52  ;;  %v440_v3 = vmax.f32 %v408_v58, 0.0 }
  0x34   : > { %511 = vst [vmem:[#allocation2 + $0xa9] sm:$0xff] %v424_v8  ;;  %512 = vst [vmem:[#allocation2 + $0xb1] sm:$0xff] %v425_v9  ;;  %v438_v62 = vmax.f32 %v406_v54, 0.0  ;;  %v439_v63 = vmax.f32 %v407_v55, 0.0  ;;  %v411_v0 = vadd.f32 %v2613_v2, %v372_v56 }
  0x35   : > { %513 = vst [vmem:[#allocation2 + $0xc1] sm:$0xff] %v426_v10  ;;  %514 = vst [vmem:[#allocation2 + $0xc9] sm:$0xff] %v427_v13  ;;  %v436_v57 = vmax.f32 %v404_v49, 0.0  ;;  %v441_v4 = vmax.f32 %v409_v59, 0.0  ;;  %v442_v5 = vmax.f32 %v410_v60, 0.0 }
  0x36   : > { %515 = vst [vmem:[#allocation2 + $0xd9] sm:$0xff] %v428_v26  ;;  %516 = vst [vmem:[#allocation2 + $0xe1] sm:$0xff] %v429_v33  ;;  %v443_v1 = vmax.f32 %v411_v0, 0.0 }
  0x37   : > { %517 = vst [vmem:[#allocation2 + $0xf1] sm:$0xff] %v430_v34  ;;  %518 = vst [vmem:[#allocation2 + $0xf9] sm:$0xff] %v431_v35 }
  0x38   : > { %519 = vst [vmem:[#allocation2 + $0x109] sm:$0xff] %v432_v40  ;;  %520 = vst [vmem:[#allocation2 + $0x111] sm:$0xff] %v433_v41 }
  0x39   : > { %521 = vst [vmem:[#allocation2 + $0x121] sm:$0xff] %v434_v42  ;;  %522 = vst [vmem:[#allocation2 + $0x129] sm:$0xff] %v435_v45 }
  0x3a   : > { %523 = vst [vmem:[#allocation2 + $0x139] sm:$0xff] %v436_v57  ;;  %524 = vst [vmem:[#allocation2 + $0x141] sm:$0xff] %v437_v61 }
  0x3b   : > { %525 = vst [vmem:[#allocation2 + $0x151] sm:$0xff] %v438_v62  ;;  %526 = vst [vmem:[#allocation2 + $0x159] sm:$0xff] %v439_v63 }
  0x3c   : > { %527 = vst [vmem:[#allocation2 + $0x169] sm:$0xff] %v440_v3  ;;  %528 = vst [vmem:[#allocation2 + $0x171] sm:$0xff] %v441_v4 }
  0x3d   : > { %529 = vst [vmem:[#allocation2 + $0x181] sm:$0xff] %v442_v5  ;;  %530 = vst [vmem:[#allocation2 + $0x189] sm:$0xff] %v443_v1 }
  0x3e PF: > { %v752_v6 = vld [vmem:[%s3704_s3 + $0x80] sm:$0xff]  ;;  %v753_v2 = vld [vmem:[%s3704_s3 + $0x88] sm:$0xff]  ;;  %v754_v16 = vld [vmem:[%s3704_s3 + $0x90] sm:$0xff]  ;;  %s1847_s19 = smul.u32 192, %s2499_s21  ;;  %vm588_vm0 = vcmask 1046528   ;;  %vm645_vm1 = vcmask 1045504  }
  0x3f   : > { %v784_v7 = vld [vmem:[%s3704_s3 + $0x180] sm:$0xff]  ;;  %v2260_v8 = vpack.c.bf16 %v753_v2, %v752_v6  ;;  %v785_v9 = vld [vmem:[%s3704_s3 + $0x188] sm:$0xff]  ;;  %v755_v18 = vld [vmem:[%s3704_s3 + $0x98] sm:$0xff]  ;;  %vm1686_vm2 = vcmask 1040384   ;;  %vm1688_vm3 = vcmask 1041408  }
  0x40   : > { %v736_v10 = vld [vmem:[%s3704_s3] sm:$0xff]  ;;  %v737_v11 = vld [vmem:[%s3704_s3 + $0x8] sm:$0xff]  ;;  %v2292_v12 = vpack.c.bf16 %v785_v9, %v784_v7  ;;  %v786_v19 = vld [vmem:[%s3704_s3 + $0x190] sm:$0xff]  ;;  %v2264_v21 = vpack.c.bf16 %v755_v18, %v754_v16  ;;  %s2879_s10 = scalar_lea.vmem [#allocation2], %s1847_s19 }
  0x41   : > { %v2262_v13 = vpack.c.bf16 %v737_v11, %v736_v10  ;;  %v768_v14 = vld [vmem:[%s3704_s3 + $0x100] sm:$0xff]  ;;  %v769_v15 = vld [vmem:[%s3704_s3 + $0x108] sm:$0xff]  ;;  %2261 = vmatprep.subr.bf16.mxu0 %v2260_v8  ;;  %v787_v20 = vld [vmem:[%s3704_s3 + $0x198] sm:$0xff] }
  0x42   : > { %v2294_v17 = vpack.c.bf16 %v769_v15, %v768_v14  ;;  %2293 = vmatprep.subr.bf16.mxu1 %v2292_v12  ;;  %v2296_v22 = vpack.c.bf16 %v787_v20, %v786_v19  ;;  %v738_v23 = vld [vmem:[%s3704_s3 + $0x10] sm:$0xff]  ;;  %v739_v24 = vld [vmem:[%s3704_s3 + $0x18] sm:$0xff]  ;;  %v756_v28 = vld [vmem:[%s3704_s3 + $0xa0] sm:$0xff] }
  0x43   : > { %2263 = vmatpush3.bf16.msra.mxu0 %v2262_v13  ;;  %v770_v25 = vld [vmem:[%s3704_s3 + $0x110] sm:$0xff]  ;;  %v2266_v26 = vpack.c.bf16 %v739_v24, %v738_v23  ;;  %v771_v27 = vld [vmem:[%s3704_s3 + $0x118] sm:$0xff]  ;;  %v757_v29 = vld [vmem:[%s3704_s3 + $0xa8] sm:$0xff] }
  0x44   : > { %2295 = vmatpush3.bf16.msra.mxu1 %v2294_v17  ;;  %2265 = vmatprep.subr.bf16.mxu0 %v2264_v21  ;;  %v2298_v30 = vpack.c.bf16 %v771_v27, %v770_v25  ;;  %v2268_v31 = vpack.c.bf16 %v757_v29, %v756_v28  ;;  %v788_v32 = vld [vmem:[%s3704_s3 + $0x1a0] sm:$0xff]  ;;  %v789_v33 = vld [vmem:[%s3704_s3 + $0x1a8] sm:$0xff]  ;;  %v758_v40 = vld [vmem:[%s3704_s3 + $0xb0] sm:$0xff] }
  0x45   : > { %2297 = vmatprep.subr.bf16.mxu1 %v2296_v22  ;;  %v740_v34 = vld [vmem:[%s3704_s3 + $0x20] sm:$0xff]  ;;  %v2300_v35 = vpack.c.bf16 %v789_v33, %v788_v32  ;;  %v741_v36 = vld [vmem:[%s3704_s3 + $0x28] sm:$0xff]  ;;  %v759_v41 = vld [vmem:[%s3704_s3 + $0xb8] sm:$0xff] }
  0x46   : > { %v772_v37 = vld [vmem:[%s3704_s3 + $0x120] sm:$0xff]  ;;  %v773_v38 = vld [vmem:[%s3704_s3 + $0x128] sm:$0xff]  ;;  %v2270_v39 = vpack.c.bf16 %v741_v36, %v740_v34  ;;  %v790_v42 = vld [vmem:[%s3704_s3 + $0x1b0] sm:$0xff]  ;;  %v2272_v44 = vpack.c.bf16 %v759_v41, %v758_v40 }
  0x47   : > { %2267 = vmatpush3.bf16.msra.mxu0 %v2266_v26  ;;  %v2302_v43 = vpack.c.bf16 %v773_v38, %v772_v37  ;;  %v791_v45 = vld [vmem:[%s3704_s3 + $0x1b8] sm:$0xff]  ;;  %v742_v46 = vld [vmem:[%s3704_s3 + $0x30] sm:$0xff]  ;;  %v760_v51 = vld [vmem:[%s3704_s3 + $0xc0] sm:$0xff] }
  0x48   : > { %2299 = vmatpush3.bf16.msra.mxu1 %v2298_v30  ;;  %2269 = vmatprep.subr.bf16.mxu0 %v2268_v31  ;;  %v743_v47 = vld [vmem:[%s3704_s3 + $0x38] sm:$0xff]  ;;  %v2304_v48 = vpack.c.bf16 %v791_v45, %v790_v42  ;;  %v774_v49 = vld [vmem:[%s3704_s3 + $0x130] sm:$0xff]  ;;  %v761_v52 = vld [vmem:[%s3704_s3 + $0xc8] sm:$0xff] }
  0x49   : > { %2301 = vmatprep.subr.bf16.mxu1 %v2300_v35  ;;  %v775_v50 = vld [vmem:[%s3704_s3 + $0x138] sm:$0xff]  ;;  %v792_v53 = vld [vmem:[%s3704_s3 + $0x1c0] sm:$0xff]  ;;  %v793_v54 = vld [vmem:[%s3704_s3 + $0x1c8] sm:$0xff]  ;;  %v2274_v55 = vpack.c.bf16 %v743_v47, %v742_v46  ;;  %v2276_v57 = vpack.c.bf16 %v761_v52, %v760_v51 }
  0x4a   : > { %v2306_v56 = vpack.c.bf16 %v775_v50, %v774_v49  ;;  %v744_v58 = vld [vmem:[%s3704_s3 + $0x40] sm:$0xff]  ;;  %v745_v59 = vld [vmem:[%s3704_s3 + $0x48] sm:$0xff]  ;;  %v2308_v61 = vpack.c.bf16 %v793_v54, %v792_v53  ;;  %v762_v63 = vld [vmem:[%s3704_s3 + $0xd0] sm:$0xff] }
  0x4b   : > { %2271 = vmatpush3.bf16.msra.mxu0 %v2270_v39  ;;  %v776_v60 = vld [vmem:[%s3704_s3 + $0x140] sm:$0xff]  ;;  %v777_v62 = vld [vmem:[%s3704_s3 + $0x148] sm:$0xff]  ;;  %v763_v0 = vld [vmem:[%s3704_s3 + $0xd8] sm:$0xff]  ;;  %v2278_v5 = vpack.c.bf16 %v745_v59, %v744_v58 }
  0x4c   : > { %2303 = vmatpush3.bf16.msra.mxu1 %v2302_v43  ;;  %2273 = vmatprep.subr.bf16.mxu0 %v2272_v44  ;;  %v794_v3 = vld [vmem:[%s3704_s3 + $0x1d0] sm:$0xff]  ;;  %v795_v4 = vld [vmem:[%s3704_s3 + $0x1d8] sm:$0xff]  ;;  %v2310_v1 = vpack.c.bf16 %v777_v62, %v776_v60  ;;  %v2280_v6 = vpack.c.bf16 %v763_v0, %v762_v63  ;;  %v764_v11 = vld [vmem:[%s3704_s3 + $0xe0] sm:$0xff] }
  0x4d   : > { %2305 = vmatprep.subr.bf16.mxu1 %v2304_v48  ;;  %v746_v2 = vld [vmem:[%s3704_s3 + $0x50] sm:$0xff]  ;;  %v747_v7 = vld [vmem:[%s3704_s3 + $0x58] sm:$0xff]  ;;  %v2312_v9 = vpack.c.bf16 %v795_v4, %v794_v3  ;;  %v765_v12 = vld [vmem:[%s3704_s3 + $0xe8] sm:$0xff] }
  0x4e   : > { %v778_v8 = vld [vmem:[%s3704_s3 + $0x150] sm:$0xff]  ;;  %v779_v10 = vld [vmem:[%s3704_s3 + $0x158] sm:$0xff]  ;;  %v796_v13 = vld [vmem:[%s3704_s3 + $0x1e0] sm:$0xff]  ;;  %v2282_v15 = vpack.c.bf16 %v747_v7, %v746_v2  ;;  %v2284_v20 = vpack.c.bf16 %v765_v12, %v764_v11 }
  0x4f   : > { %2275 = vmatpush3.bf16.msra.mxu0 %v2274_v55  ;;  %v797_v14 = vld [vmem:[%s3704_s3 + $0x1e8] sm:$0xff]  ;;  %v748_v16 = vld [vmem:[%s3704_s3 + $0x60] sm:$0xff]  ;;  %v2314_v19 = vpack.c.bf16 %v779_v10, %v778_v8  ;;  %v766_v25 = vld [vmem:[%s3704_s3 + $0xf0] sm:$0xff] }
  0x50   : > { %2307 = vmatpush3.bf16.msra.mxu1 %v2306_v56  ;;  %2277 = vmatprep.subr.bf16.mxu0 %v2276_v57  ;;  %v749_v17 = vld [vmem:[%s3704_s3 + $0x68] sm:$0xff]  ;;  %v780_v18 = vld [vmem:[%s3704_s3 + $0x160] sm:$0xff]  ;;  %v2316_v24 = vpack.c.bf16 %v797_v14, %v796_v13  ;;  %v767_v26 = vld [vmem:[%s3704_s3 + $0xf8] sm:$0xff] }
  0x51   : > { %2309 = vmatprep.subr.bf16.mxu1 %v2308_v61  ;;  %v781_v21 = vld [vmem:[%s3704_s3 + $0x168] sm:$0xff]  ;;  %v2882_v22 = vld [vmem:[%s2879_s10] sm:$0xff]  ;;  %v2896_v29 = vld [vmem:[%s2879_s10 + $0x18] sm:$0xff]  ;;  %v2286_v32 = vpack.c.bf16 %v749_v17, %v748_v16  ;;  %v2288_v35 = vpack.c.bf16 %v767_v26, %v766_v25 }
  0x52   : > { %v2885_v23 = vld [vmem:[%s2879_s10 + $0x8] sm:$0xff]  ;;  %v589_v27 = vrot.slane %v2882_v22, 1  ;;  %v798_v30 = vld [vmem:[%s3704_s3 + $0x1f0] sm:$0xff]  ;;  %v799_v31 = vld [vmem:[%s3704_s3 + $0x1f8] sm:$0xff]  ;;  %1096 = vmatprep.mubr.f32.mxu1 %v2896_v29  ;;  %v2318_v34 = vpack.c.bf16 %v781_v21, %v780_v18  ;;  %v646_v48 = vrot.slane %v2882_v22, 2  ;;  %v594_v3 = vrot.slane %v2896_v29, 1 }
  0x53   : > { %2279 = vmatpush3.bf16.msra.mxu0 %v2278_v5  ;;  %v590_v28 = vrot.slane %v2885_v23, 1  ;;  %v750_v36 = vld [vmem:[%s3704_s3 + $0x70] sm:$0xff]  ;;  %v751_v37 = vld [vmem:[%s3704_s3 + $0x78] sm:$0xff]  ;;  %v2320_v39 = vpack.c.bf16 %v799_v31, %v798_v30  ;;  %v816_v41 = vld [vmem:[%s3704_s3 + $0x280] sm:$0xff]  ;;  %v647_v49 = vrot.slane %v2885_v23, 2  ;;  %v651_v14 = vrot.slane %v2896_v29, 2 }
  0x54   : > { %2311 = vmatpush3.bf16.msra.mxu1 %v2310_v1  ;;  %2281 = vmatprep.subr.bf16.mxu0 %v2280_v6  ;;  %v782_v38 = vld [vmem:[%s3704_s3 + $0x170] sm:$0xff]  ;;  %v783_v40 = vld [vmem:[%s3704_s3 + $0x178] sm:$0xff]  ;;  %v817_v42 = vld [vmem:[%s3704_s3 + $0x288] sm:$0xff]  ;;  %v2290_v45 = vpack.c.bf16 %v751_v37, %v750_v36 }
  0x55   : > { %2313 = vmatprep.subr.bf16.mxu1 %v2312_v9  ;;  %v591_v33 = vsel %vm588_vm0, %v589_v27, %v590_v28  ;;  %v536_v43 = vld [vmem:[%s2879_s10 + $0x10] sm:$0x3]  ;;  %v848_v44 = vld [vmem:[%s3704_s3 + $0x380] sm:$0xff]  ;;  %v849_v46 = vld [vmem:[%s3704_s3 + $0x388] sm:$0xff]  ;;  %v2322_v47 = vpack.c.bf16 %v783_v40, %v782_v38  ;;  %v2324_v50 = vpack.c.bf16 %v817_v42, %v816_v41  ;;  %v648_v63 = vsel %vm645_vm1, %v646_v48, %v647_v49 }
  0x56   : > { %951 = vmatprep.mubr.f32.mxu0 %v591_v33  ;;  %v800_v51 = vld [vmem:[%s3704_s3 + $0x200] sm:$0xff]  ;;  %v801_v52 = vld [vmem:[%s3704_s3 + $0x208] sm:$0xff]  ;;  %v592_v53 = vrot.slane %v536_v43, 1  ;;  %v818_v55 = vld [vmem:[%s3704_s3 + $0x290] sm:$0xff]  ;;  %v2356_v56 = vpack.c.bf16 %v849_v46, %v848_v44  ;;  %v649_v0 = vrot.slane %v536_v43, 2 }
  0x57   : > { %2283 = vmatpush3.bf16.msra.mxu0 %v2282_v15  ;;  %v2940_v54 = vld [vmem:[%s2879_s10 + $0x20] sm:$0xff]  ;;  %v819_v57 = vld [vmem:[%s3704_s3 + $0x298] sm:$0xff]  ;;  %v833_v59 = vld [vmem:[%s3704_s3 + $0x308] sm:$0xff]  ;;  %v2326_v60 = vpack.c.bf16 %v801_v52, %v800_v51 }
  0x58   : > { %2315 = vmatpush3.bf16.msra.mxu1 %v2314_v19  ;;  %2285 = vmatprep.subr.bf16.mxu0 %v2284_v20  ;;  %v832_v58 = vld [vmem:[%s3704_s3 + $0x300] sm:$0xff]  ;;  %v850_v61 = vld [vmem:[%s3704_s3 + $0x390] sm:$0xff]  ;;  %v851_v62 = vld [vmem:[%s3704_s3 + $0x398] sm:$0xff]  ;;  %v595_v4 = vrot.slane %v2940_v54, 1  ;;  %v593_v1 = vsel %vm588_vm0, %v590_v28, %v592_v53  ;;  %v2328_v6 = vpack.c.bf16 %v819_v57, %v818_v55  ;;  %v652_v15 = vrot.slane %v2940_v54, 2 }
  0x59   : > { %2317 = vmatprep.subr.bf16.mxu1 %v2316_v24  ;;  %v802_v5 = vld [vmem:[%s3704_s3 + $0x210] sm:$0xff]  ;;  %v803_v2 = vld [vmem:[%s3704_s3 + $0x218] sm:$0xff]  ;;  %v2971_v7 = vld [vmem:[%s2879_s10 + $0x28] sm:$0x3]  ;;  %v2358_v9 = vpack.c.bf16 %v833_v59, %v832_v58  ;;  %v2360_v11 = vpack.c.bf16 %v851_v62, %v850_v61  ;;  %v650_v18 = vsel %vm645_vm1, %v647_v49, %v649_v0 }
  0x5a   : > { %v820_v8 = vld [vmem:[%s3704_s3 + $0x2a0] sm:$0xff]  ;;  %v821_v10 = vld [vmem:[%s3704_s3 + $0x2a8] sm:$0xff]  ;;  %v834_v12 = vld [vmem:[%s3704_s3 + $0x310] sm:$0xff]  ;;  %v2997_v19 = vsel %vm588_vm0, %v594_v3, %v595_v4  ;;  %v2330_v21 = vpack.c.bf16 %v803_v2, %v802_v5 }
  0x5b   : > { %2287 = vmatpush3.bf16.msra.mxu0 %v2286_v32  ;;  %v835_v13 = vld [vmem:[%s3704_s3 + $0x318] sm:$0xff]  ;;  %v852_v16 = vld [vmem:[%s3704_s3 + $0x3a0] sm:$0xff]  ;;  %v853_v17 = vld [vmem:[%s3704_s3 + $0x3a8] sm:$0xff]  ;;  %v2332_v25 = vpack.c.bf16 %v821_v10, %v820_v8 }
  0x5c   : > { %2319 = vmatpush3.bf16.msra.mxu1 %v2318_v34  ;;  %2289 = vmatprep.subr.bf16.mxu0 %v2288_v35  ;;  %v3000_v20 = vld [vmem:[%s2879_s10 + $0x30] sm:$0xff]  ;;  %v3004_v24 = vld [vmem:[%s2879_s10 + $0x38] sm:$0xff]  ;;  %v804_v26 = vld [vmem:[%s3704_s3 + $0x220] sm:$0xff]  ;;  %v2362_v30 = vpack.c.bf16 %v835_v13, %v834_v12  ;;  %v2364_v32 = vpack.c.bf16 %v853_v17, %v852_v16 }
  0x5d   : > { %2321 = vmatprep.subr.bf16.mxu1 %v2320_v39  ;;  %v805_v27 = vld [vmem:[%s3704_s3 + $0x228] sm:$0xff]  ;;  %v822_v28 = vld [vmem:[%s3704_s3 + $0x2b0] sm:$0xff]  ;;  %v823_v31 = vld [vmem:[%s3704_s3 + $0x2b8] sm:$0xff]  ;;  %v599_v35 = vrot.slane %v3000_v20, 1  ;;  %v654_v39 = vrot.slane %v2971_v7, 2  ;;  %v600_v40 = vrot.slane %v3004_v24, 1 }
  0x5e   : > { %v836_v33 = vld [vmem:[%s3704_s3 + $0x320] sm:$0xff]  ;;  %v837_v34 = vld [vmem:[%s3704_s3 + $0x328] sm:$0xff]  ;;  %v854_v36 = vld [vmem:[%s3704_s3 + $0x3b0] sm:$0xff]  ;;  %v2334_v41 = vpack.c.bf16 %v805_v27, %v804_v26  ;;  %v2336_v43 = vpack.c.bf16 %v823_v31, %v822_v28  ;;  %v657_v52 = vrot.slane %v3004_v24, 2 }
  0x5f   : > { %2291 = vmatpush3.bf16.msra.mxu0 %v2290_v45  ;;  %v855_v37 = vld [vmem:[%s3704_s3 + $0x3b8] sm:$0xff]  ;;  %v3043_v42 = vld [vmem:[%s2879_s10 + $0x40] sm:$0x3]  ;;  %v806_v44 = vld [vmem:[%s3704_s3 + $0x230] sm:$0xff]  ;;  %v3079_v57 = vsel %vm588_vm0, %v599_v35, %v600_v40 }
  0x60   : > { %2323 = vmatpush3.bf16.msra.mxu1 %v2322_v47  ;;  %2325 = vmatprep.subr.bf16.mxu0 %v2324_v50  ;;  %v807_v45 = vld [vmem:[%s3704_s3 + $0x238] sm:$0xff]  ;;  %v824_v46 = vld [vmem:[%s3704_s3 + $0x2c0] sm:$0xff]  ;;  %v2366_v47 = vpack.c.bf16 %v837_v34, %v836_v33  ;;  %v825_v48 = vld [vmem:[%s3704_s3 + $0x2c8] sm:$0xff]  ;;  %v2368_v49 = vpack.c.bf16 %v855_v37, %v854_v36  ;;  %v602_v59 = vrot.slane %v3043_v42, 1 }
  0x61   : > { %2357 = vmatprep.subr.bf16.mxu1 %v2356_v56  ;;  %v838_v50 = vld [vmem:[%s3704_s3 + $0x330] sm:$0xff]  ;;  %v839_v51 = vld [vmem:[%s3704_s3 + $0x338] sm:$0xff]  ;;  %v856_v53 = vld [vmem:[%s3704_s3 + $0x3c0] sm:$0xff]  ;;  %v3076_v56 = vsel %vm645_vm1, %v652_v15, %v654_v39  ;;  %v2338_v61 = vpack.c.bf16 %v807_v45, %v806_v44 }
  0x62   : > { %952 = vmatmul.mubr.f32.vlgmr.msra.gmra.mrb[0].mxu0 %v2882_v22  ;;  %v597_v22 = vrot.slane %v2971_v7, 1  ;;  %v857_v55 = vld [vmem:[%s3704_s3 + $0x3c8] sm:$0xff]  ;;  %v808_v62 = vld [vmem:[%s3704_s3 + $0x240] sm:$0xff]  ;;  %v826_v3 = vld [vmem:[%s3704_s3 + $0x2d0] sm:$0xff]  ;;  %v2370_v5 = vpack.c.bf16 %v839_v51, %v838_v50 }
  0x63   : > { %1097 = vmatmul.mubr.f32.vlgmr.msra.gmra.mrb[0].mxu1 %v648_v63  ;;  %2327 = vmatpush3.bf16.msra.mxu0 %v2326_v60  ;;  %v3082_v58 = vld [vmem:[%s2879_s10 + $0x48] sm:$0xff]  ;;  %v3086_v60 = vld [vmem:[%s2879_s10 + $0x50] sm:$0xff]  ;;  %v2340_v63 = vpack.c.bf16 %v825_v48, %v824_v46  ;;  %v840_v2 = vld [vmem:[%s3704_s3 + $0x340] sm:$0xff] }
  0x64   : > { %956 = vmatprep.mubr.f32.mxu0 %v593_v1  ;;  %1101 = vmatprep.mubr.f32.mxu1 %v2940_v54  ;;  %v3038_v38 = vsel %vm588_vm0, %v595_v4, %v597_v22  ;;  %v809_v0 = vld [vmem:[%s3704_s3 + $0x248] sm:$0xff]  ;;  %v827_v4 = vld [vmem:[%s3704_s3 + $0x2d8] sm:$0xff]  ;;  %v604_v1 = vrot.slane %v3082_v58, 1  ;;  %v3109_v8 = vld [vmem:[%s2879_s10 + $0xb0] sm:$0xff]  ;;  %v605_v10 = vrot.slane %v3086_v60, 1  ;;  %v662_v16 = vrot.slane %v3086_v60, 2 }
  0x65   : > { %2329 = vmatprep.subr.bf16.mxu0 %v2328_v6  ;;  %2359 = vmatpush3.bf16.msra.mxu1 %v2358_v9  ;;  %v2372_v6 = vpack.c.bf16 %v857_v55, %v856_v53  ;;  %v841_v7 = vld [vmem:[%s3704_s3 + $0x348] sm:$0xff]  ;;  %v659_v9 = vrot.slane %v3043_v42, 2  ;;  %v858_v12 = vld [vmem:[%s3704_s3 + $0x3d0] sm:$0xff]  ;;  %v859_v13 = vld [vmem:[%s3704_s3 + $0x3d8] sm:$0xff]  ;;  %v2342_v17 = vpack.c.bf16 %v809_v0, %v808_v62  ;;  %v625_v28 = vrot.slane %v3109_v8, 1 }
  0x66   : > { %957 = vmatmul.mubr.f32.gmra.mrb[2].mxu0 %v2885_v23  ;;  %2361 = vmatprep.subr.bf16.mxu1 %v2360_v11  ;;  %v3027_v23 = vsel %vm645_vm1, %v651_v14, %v652_v15  ;;  %v3121_v11 = vld [vmem:[%s2879_s10 + $0x58] sm:$0x3]  ;;  %v3131_v14 = vsel %vm588_vm0, %v600_v40, %v602_v59  ;;  %v661_v15 = vrot.slane %v3082_v58, 2  ;;  %v3146_v22 = vld [vmem:[%s2879_s10 + $0xc0] sm:$0xff]  ;;  %v2374_v27 = vpack.c.bf16 %v841_v7, %v840_v2  ;;  %v3158_v31 = vld [vmem:[%s2879_s10 + $0xc8] sm:$0xff] }
  0x67   : > { %1102 = vmatmul.mubr.f32.gmra.mrb[2].mxu1 %v650_v18  ;;  %961 = vmatprep.mubr.f32.mxu0 %v2997_v19  ;;  %v3138_v18 = vld [vmem:[%s3704_s3 + $0x250] sm:$0xff]  ;;  %v3151_v26 = vld [vmem:[%s3704_s3 + $0x2e0] sm:$0xff]  ;;  %v829_v33 = vld [vmem:[%s3704_s3 + $0x2e8] sm:$0xff]  ;;  %v2376_v34 = vpack.c.bf16 %v859_v13, %v858_v12  ;;  %v706_v39 = vrot.slane %v3158_v31, 1  ;;  %v712_v40 = vrot.slane %v3146_v22, 2  ;;  %v607_v42 = vrot.slane %v3121_v11, 1 }
  0x68   : > { %1106 = vmatprep.mubr.f32.mxu1 %v3000_v20  ;;  %2331 = vmatpush3.bf16.msra.mxu0 %v2330_v21  ;;  %v3143_v21 = vld [vmem:[%s3704_s3 + $0x258] sm:$0xff]  ;;  %v842_v35 = vld [vmem:[%s3704_s3 + $0x350] sm:$0xff]  ;;  %v860_v44 = vld [vmem:[%s3704_s3 + $0x3e0] sm:$0xff]  ;;  %v713_v46 = vrot.slane %v3158_v31, 2  ;;  %v2348_v53 = vpack.c.bf16 %v829_v33, %v3151_v26  ;;  %v3232_v0 = vsel %vm645_vm1, %v661_v15, %v662_v16 }
  0x69   : > { %2333 = vmatprep.subr.bf16.mxu0 %v2332_v25  ;;  %2363 = vmatpush3.bf16.msra.mxu1 %v2362_v30  ;;  %v2344_v25 = vpack.c.bf16 %v827_v4, %v826_v3  ;;  %v3155_v30 = vld [vmem:[%s2879_s10 + $0xb8] sm:$0x3]  ;;  %v861_v45 = vld [vmem:[%s3704_s3 + $0x3e8] sm:$0xff]  ;;  %v3197_v48 = vld [vmem:[%s2879_s10 + $0x60] sm:$0xff]  ;;  %v2346_v50 = vpack.c.bf16 %v3143_v21, %v3138_v18  ;;  %v3249_v2 = vsel %vm588_vm0, %v605_v10, %v607_v42 }
  0x6a   : > { %962 = vmatmul.mubr.f32.gmra.mrb[4].mxu0 %v2896_v29  ;;  %2365 = vmatprep.subr.bf16.mxu1 %v2364_v32  ;;  %v656_v29 = vrot.slane %v3000_v20, 2  ;;  %v705_v32 = vrot.slane %v3146_v22, 1  ;;  %v843_v36 = vld [vmem:[%s3704_s3 + $0x358] sm:$0xff]  ;;  %v627_v37 = vrot.slane %v3155_v30, 1  ;;  %v3207_v51 = vld [vmem:[%s3704_s3 + $0x260] sm:$0xff]  ;;  %v813_v55 = vld [vmem:[%s3704_s3 + $0x268] sm:$0xff]  ;;  %v2380_v4 = vpack.c.bf16 %v861_v45, %v860_v44 }
  0x6b   : > { %1107 = vmatmul.mubr.f32.gmra.mrb[4].mxu1 %v3027_v23  ;;  %966 = vmatprep.mubr.f32.mxu0 %v3038_v38  ;;  %v2378_v59 = vpack.c.bf16 %v843_v36, %v842_v35  ;;  %v831_v62 = vld [vmem:[%s3704_s3 + $0x2f8] sm:$0xff]  ;;  %v666_v3 = vrot.slane %v3197_v48, 2  ;;  %v3257_v12 = vld [vmem:[%s2879_s10 + $0x70] sm:$0x3]  ;;  %v2350_v18 = vpack.c.bf16 %v813_v55, %v3207_v51  ;;  %v864_v44 = vld [vmem:[%s3704_s3 + $0x400] sm:$0xff] }
  0x6c   : > { %1111 = vmatprep.mubr.f32.mxu1 %v3004_v24  ;;  %2335 = vmatpush3.bf16.msra.mxu0 %v2334_v41  ;;  %v3179_v41 = vsel %vm645_vm1, %v657_v52, %v659_v9  ;;  %v814_v13 = vld [vmem:[%s3704_s3 + $0x270] sm:$0xff]  ;;  %v847_v35 = vld [vmem:[%s3704_s3 + $0x378] sm:$0xff]  ;;  %v865_v45 = vld [vmem:[%s3704_s3 + $0x408] sm:$0xff] }
  0x6d   : > { %2337 = vmatprep.subr.bf16.mxu0 %v2336_v43  ;;  %2367 = vmatpush3.bf16.msra.mxu1 %v2366_v47  ;;  %v664_v43 = vrot.slane %v3121_v11, 2  ;;  %v3194_v47 = vsel %vm588_vm0, %v604_v1, %v605_v10  ;;  %v845_v1 = vld [vmem:[%s3704_s3 + $0x368] sm:$0xff]  ;;  %v815_v10 = vld [vmem:[%s3704_s3 + $0x278] sm:$0xff]  ;;  %v862_v15 = vld [vmem:[%s3704_s3 + $0x3f0] sm:$0xff] }
  0x6e   : > { %967 = vmatmul.mubr.f32.gmra.mrb[6].mxu0 %v2940_v54  ;;  %2369 = vmatprep.subr.bf16.mxu1 %v2368_v49  ;;  %v3116_v54 = vsel %vm645_vm1, %v656_v29, %v657_v52  ;;  %v3200_v49 = vld [vmem:[%s2879_s10 + $0x68] sm:$0xff]  ;;  %v3212_v29 = vsel %vm588_vm0, %v625_v28, %v627_v37  ;;  %v609_v52 = vrot.slane %v3197_v48, 1 }
  0x6f   : > { %1112 = vmatmul.mubr.f32.gmra.mrb[6].mxu1 %v3076_v56  ;;  %971 = vmatprep.mubr.f32.mxu0 %v3079_v57  ;;  %v3252_v7 = vsel %vm645_vm1, %v662_v16, %v664_v43  ;;  %v610_v9 = vrot.slane %v3200_v49, 1  ;;  %v667_v11 = vrot.slane %v3200_v49, 2  ;;  %v863_v16 = vld [vmem:[%s3704_s3 + $0x3f8] sm:$0xff] }
  0x70   : > { %1116 = vmatprep.mubr.f32.mxu1 %v3082_v58  ;;  %2339 = vmatpush3.bf16.msra.mxu0 %v2338_v61  ;;  %v830_v61 = vld [vmem:[%s3704_s3 + $0x2f0] sm:$0xff]  ;;  %v2384_v43 = vpack.c.bf16 %v863_v16, %v862_v15  ;;  %v3325_v15 = vpack.c.bf16 %v865_v45, %v864_v44  ;;  %v554_v44 = vld [vmem:[%s2879_s10 + $0xa0] sm:$0x3] }
  0x71   : > { %2341 = vmatprep.subr.bf16.mxu0 %v2340_v63  ;;  %2371 = vmatpush3.bf16.msra.mxu1 %v2370_v5  ;;  %v3228_v63 = vsel %vm588_vm0, %v705_v32, %v706_v39  ;;  %v844_v5 = vld [vmem:[%s3704_s3 + $0x360] sm:$0xff]  ;;  %v2352_v21 = vpack.c.bf16 %v831_v62, %v830_v61  ;;  %v3308_v55 = vsel %vm588_vm0, %v609_v52, %v610_v9 }
  0x72   : > { %972 = vmatmul.mubr.f32.gmra.mrb[8].mxu0 %v3000_v20  ;;  %2373 = vmatprep.subr.bf16.mxu1 %v2372_v6  ;;  %v3242_v6 = vsel %vm645_vm1, %v712_v40, %v713_v46  ;;  %v3281_v32 = vld [vmem:[%s2879_s10 + $0xe0] sm:$0xff]  ;;  %v563_v40 = vld [vmem:[%s2879_s10 + $0xe8] sm:$0x3] }
  0x73   : > { %1117 = vmatmul.mubr.f32.gmra.mrb[8].mxu1 %v3116_v54  ;;  %976 = vmatprep.mubr.f32.mxu0 %v3131_v14  ;;  %v723_v37 = vrot.slane %v3281_v32, 1  ;;  %v730_v61 = vrot.slane %v3281_v32, 2  ;;  %v732_v62 = vrot.slane %v563_v40, 2  ;;  %v3323_v52 = vld [vmem:[%s2879_s10 + $0x80] sm:$0xff] }
  0x74   : > { %1121 = vmatprep.mubr.f32.mxu1 %v3086_v60  ;;  %2343 = vmatpush3.bf16.msra.mxu0 %v2342_v17  ;;  %v560_v17 = vld [vmem:[%s2879_s10 + $0xd0] sm:$0x3] }
  0x75   : > { %2345 = vmatprep.subr.bf16.mxu0 %v2344_v25  ;;  %2375 = vmatpush3.bf16.msra.mxu1 %v2374_v27  ;;  %v846_v25 = vld [vmem:[%s3704_s3 + $0x370] sm:$0xff]  ;;  %v708_v26 = vrot.slane %v560_v17, 1  ;;  %v3278_v27 = vld [vmem:[%s2879_s10 + $0xd8] sm:$0xff]  ;;  %v715_v33 = vrot.slane %v560_v17, 2  ;;  %v3331_v17 = vsel %vm645_vm1, %v730_v61, %v732_v62 }
  0x76   : > { %977 = vmatmul.mubr.f32.gmra.mrb[10].mxu0 %v3004_v24  ;;  %2377 = vmatprep.subr.bf16.mxu1 %v2376_v34  ;;  %v2382_v34 = vpack.c.bf16 %v845_v1, %v844_v5  ;;  %v722_v36 = vrot.slane %v3278_v27, 1  ;;  %v729_v42 = vrot.slane %v3278_v27, 2  ;;  %v3320_v1 = vld [vmem:[%s2879_s10 + $0x78] sm:$0xff] }
  0x77   : > { %1122 = vmatmul.mubr.f32.gmra.mrb[10].mxu1 %v3179_v41  ;;  %981 = vmatprep.mubr.f32.mxu0 %v3194_v47  ;;  %v3303_v51 = vsel %vm645_vm1, %v713_v46, %v715_v33  ;;  %v2354_v46 = vpack.c.bf16 %v815_v10, %v814_v13  ;;  %v614_v13 = vrot.slane %v3320_v1, 1  ;;  %v3343_v10 = vsel %vm645_vm1, %v666_v3, %v667_v11 }
  0x78   : > { %1126 = vmatprep.mubr.f32.mxu1 %v3197_v48  ;;  %2347 = vmatpush3.bf16.msra.mxu0 %v2346_v50  ;;  %v3300_v50 = vsel %vm588_vm0, %v706_v39, %v708_v26  ;;  %v612_v39 = vrot.slane %v3257_v12, 1  ;;  %v3328_v16 = vsel %vm645_vm1, %v729_v42, %v730_v61  ;;  %v551_v26 = vld [vmem:[%s2879_s10 + $0x88] sm:$0x3]  ;;  %v671_v3 = vrot.slane %v3320_v1, 2 }
  0x79   : > { %2349 = vmatprep.subr.bf16.mxu0 %v2348_v53  ;;  %2379 = vmatpush3.bf16.msra.mxu1 %v2378_v59  ;;  %v725_v53 = vrot.slane %v563_v40, 1  ;;  %v3311_v59 = vsel %vm588_vm0, %v722_v36, %v723_v37  ;;  %v672_v33 = vrot.slane %v3323_v52, 2  ;;  %v3371_v36 = vld [vmem:[%s2879_s10 + $0x98] sm:$0xff]  ;;  %v674_v42 = vrot.slane %v551_v26, 2 }
  0x7a   : > { %982 = vmatmul.mubr.f32.gmra.mrb[12].mxu0 %v3082_v58  ;;  %2381 = vmatprep.subr.bf16.mxu1 %v2380_v4  ;;  %v2386_v4 = vpack.c.bf16 %v847_v35, %v846_v25  ;;  %v615_v25 = vrot.slane %v3323_v52, 1  ;;  %v3368_v35 = vld [vmem:[%s2879_s10 + $0x90] sm:$0xff]  ;;  %v677_v62 = vrot.slane %v3371_v36, 2 }
  0x7b   : > { %1127 = vmatmul.mubr.f32.gmra.mrb[12].mxu1 %v3232_v0  ;;  %986 = vmatprep.mubr.f32.mxu0 %v3249_v2  ;;  %v3317_v5 = vsel %vm588_vm0, %v723_v37, %v725_v53  ;;  %v619_v37 = vrot.slane %v3368_v35, 1  ;;  %v676_v45 = vrot.slane %v3368_v35, 2  ;;  %v3392_v53 = vsel %vm645_vm1, %v672_v33, %v674_v42 }
  0x7c   : > { %1131 = vmatprep.mubr.f32.mxu1 %v3200_v49  ;;  %2351 = vmatpush3.bf16.msra.mxu0 %v2350_v18  ;;  %v3346_v18 = vsel %vm588_vm0, %v610_v9, %v612_v39  ;;  %v622_v39 = vrot.slane %v554_v44, 1  ;;  %v684_v42 = vrot.slane %v3155_v30, 2  ;;  %v867_v30 = vld [vmem:[%s3704_s3 + $0x418] sm:$0xff] }
  0x7d   : > { %2353 = vmatprep.subr.bf16.mxu0 %v2352_v21  ;;  %2383 = vmatpush3.bf16.msra.mxu1 %v2382_v34  ;;  %v669_v21 = vrot.slane %v3257_v12, 2  ;;  %v3364_v12 = vsel %vm588_vm0, %v614_v13, %v615_v25  ;;  %v617_v34 = vrot.slane %v551_v26, 1 }
  0x7e   : > { %987 = vmatmul.mubr.f32.gmra.mrb[14].mxu0 %v3086_v60  ;;  %2385 = vmatprep.subr.bf16.mxu1 %v2384_v43  ;;  %v620_v43 = vrot.slane %v3371_v36, 1 }
  0x7f   : > { %1132 = vmatmul.mubr.f32.gmra.mrb[14].mxu1 %v3252_v7  ;;  %991 = vmatprep.mubr.f32.mxu0 %v3308_v55  ;;  %v3361_v9 = vsel %vm645_vm1, %v667_v11, %v669_v21  ;;  %v3379_v11 = vsel %vm645_vm1, %v671_v3, %v672_v33  ;;  %v3382_v40 = vsel %vm588_vm0, %v615_v25, %v617_v34  ;;  %v679_v21 = vrot.slane %v554_v44, 2 }
  0x80   : > { %1136 = vmatprep.mubr.f32.mxu1 %v3320_v1  ;;  %2355 = vmatpush3.bf16.msra.mxu0 %v2354_v46  ;;  %v3395_v61 = vsel %vm588_vm0, %v619_v37, %v620_v43  ;;  %v3399_v46 = vld [vmem:[%s2879_s10 + $0xa8] sm:$0xff]  ;;  %v3409_v13 = vsel %vm588_vm0, %v620_v43, %v622_v39  ;;  %v682_v34 = vrot.slane %v3109_v8, 2  ;;  %v866_v43 = vld [vmem:[%s3704_s3 + $0x410] sm:$0xff]  ;;  %v875_v39 = vld [vmem:[%s3704_s3 + $0x458] sm:$0xff] }
  0x81   : > { %2387 = vmatpush3.bf16.msra.mxu1 %v2386_v4  ;;  %2389 = vmatprep.subr.bf16.mxu0 %v3325_v15  ;;  %v3406_v4 = vsel %vm645_vm1, %v676_v45, %v677_v62  ;;  %v624_v25 = vrot.slane %v3399_v46, 1  ;;  %v3417_v26 = vsel %vm645_vm1, %v677_v62, %v679_v21  ;;  %v681_v33 = vrot.slane %v3399_v46, 2  ;;  %v868_v45 = vld [vmem:[%s3704_s3 + $0x420] sm:$0xff]  ;;  %v869_v62 = vld [vmem:[%s3704_s3 + $0x428] sm:$0xff] }
  0x82   : > { %992 = vmatmul.mubr.f32.gmra.mrb[16].mxu0 %v3197_v48  ;;  %2420 = vmatprep.subr.bf16.mxu1 %v3325_v15  ;;  %v2392_v44 = vpack.c.bf16 %v867_v30, %v866_v43  ;;  %v877_v21 = vld [vmem:[%s3704_s3 + $0x468] sm:$0xff] }
  0x83   : > { %1137 = vmatmul.mubr.f32.gmra.mrb[16].mxu1 %v3343_v10  ;;  %996 = vmatprep.mubr.f32.mxu0 %v3346_v18  ;;  %v3422_v3 = vsel %vm588_vm0, %v624_v25, %v625_v28  ;;  %v3431_v37 = vsel %vm645_vm1, %v681_v33, %v682_v34  ;;  %v3439_v28 = vsel %vm645_vm1, %v682_v34, %v684_v42  ;;  %v879_v25 = vld [vmem:[%s3704_s3 + $0x478] sm:$0xff] }
  0x84   : > { %1141 = vmatprep.mubr.f32.mxu1 %v3323_v52 }
  0x86   : > { %997 = vmatmul.mubr.f32.gmra.mrb[18].mxu0 %v3200_v49 }
  0x87   : > { %1142 = vmatmul.mubr.f32.gmra.mrb[18].mxu1 %v3361_v9  ;;  %1001 = vmatprep.mubr.f32.mxu0 %v3364_v12 }
  0x88   : > { %1146 = vmatprep.mubr.f32.mxu1 %v3368_v35 }
  0x8a   : > { %1002 = vmatmul.mubr.f32.gmra.mrb[20].mxu0 %v3320_v1 }
  0x8b   : > { %1147 = vmatmul.mubr.f32.gmra.mrb[20].mxu1 %v3379_v11  ;;  %1006 = vmatprep.mubr.f32.mxu0 %v3382_v40 }
  0x8c   : > { %1151 = vmatprep.mubr.f32.mxu1 %v3371_v36 }
  0x8e   : > { %1007 = vmatmul.mubr.f32.gmra.mrb[22].mxu0 %v3323_v52 }
  0x8f   : > { %1152 = vmatmul.mubr.f32.gmra.mrb[22].mxu1 %v3392_v53  ;;  %1011 = vmatprep.mubr.f32.mxu0 %v3395_v61 }
  0x90   : > { %1156 = vmatprep.mubr.f32.mxu1 %v3399_v46 }
  0x92   : > { %1012 = vmatmul.mubr.f32.gmra.mrb[24].mxu0 %v3368_v35 }
  0x93   : > { %1157 = vmatmul.mubr.f32.gmra.mrb[24].mxu1 %v3406_v4  ;;  %1016 = vmatprep.mubr.f32.mxu0 %v3409_v13 }
  0x94   : > { %1161 = vmatprep.mubr.f32.mxu1 %v3109_v8 }
  0x96   : > { %1017 = vmatmul.mubr.f32.gmra.mrb[26].mxu0 %v3371_v36 }
  0x97   : > { %1162 = vmatmul.mubr.f32.gmra.mrb[26].mxu1 %v3417_v26  ;;  %1021 = vmatprep.mubr.f32.mxu0 %v3422_v3 }
  0x98   : > { %1166 = vmatprep.mubr.f32.mxu1 %v3146_v22 }
  0x9a   : > { %1022 = vmatmul.mubr.f32.gmra.mrb[28].mxu0 %v3399_v46 }
  0x9b   : > { %1167 = vmatmul.mubr.f32.gmra.mrb[28].mxu1 %v3431_v37  ;;  %1026 = vmatprep.mubr.f32.mxu0 %v3212_v29 }
  0x9c   : > { %1171 = vmatprep.mubr.f32.mxu1 %v3158_v31 }
  0x9e   : > { %1027 = vmatmul.mubr.f32.gmra.mrb[30].mxu0 %v3109_v8 }
  0x9f   : > { %1172 = vmatmul.mubr.f32.gmra.mrb[30].mxu1 %v3439_v28  ;;  %1241 = vmatprep.mubr.f32.mxu0 %v3027_v23  ;;  %v2396_v23 = vpack.c.bf16 %v869_v62, %v868_v45 }
  0xa0   : > { %1386 = vmatprep.mubr.f32.mxu1 %v3079_v57 }
  0xa2   : > { %1242 = vmatmul.mubr.f32.vlgmr.msra.gmra.mrb[32].mxu0 %v2997_v19  ;;  %v870_v19 = vld [vmem:[%s3704_s3 + $0x430] sm:$0xff] }
  0xa3   : > { %1387 = vmatmul.mubr.f32.vlgmr.msra.gmra.mrb[32].mxu1 %v3000_v20  ;;  %2391 = vmatpush3.bf16.msra.mxu0 %v3325_v15  ;;  %v871_v20 = vld [vmem:[%s3704_s3 + $0x438] sm:$0xff] }
  0xa4   : > { %1246 = vmatprep.mubr.f32.mxu0 %v3076_v56  ;;  %1391 = vmatprep.mubr.f32.mxu1 %v3131_v14  ;;  %v2400_v56 = vpack.c.bf16 %v871_v20, %v870_v19 }
  0xa5   : > { %2393 = vmatprep.subr.bf16.mxu0 %v2392_v44  ;;  %2428 = vmatpush3.bf16.msra.mxu1 %v3325_v15  ;;  %v873_v15 = vld [vmem:[%s3704_s3 + $0x448] sm:$0xff] }
  0xa6   : > { %1247 = vmatmul.mubr.f32.gmra.mrb[34].mxu0 %v3038_v38  ;;  %2421 = vmatprep.subr.bf16.mxu1 %v2392_v44  ;;  %v872_v38 = vld [vmem:[%s3704_s3 + $0x440] sm:$0xff] }
  0xa7   : > { %1392 = vmatmul.mubr.f32.gmra.mrb[34].mxu1 %v3004_v24  ;;  %1251 = vmatprep.mubr.f32.mxu0 %v3116_v54  ;;  %v2404_v24 = vpack.c.bf16 %v873_v15, %v872_v38 }
  0xa8   : > { %1396 = vmatprep.mubr.f32.mxu1 %v3194_v47  ;;  %2395 = vmatpush3.bf16.msra.mxu0 %v2392_v44 }
  0xa9   : > { %2397 = vmatprep.subr.bf16.mxu0 %v2396_v23  ;;  %2429 = vmatpush3.bf16.msra.mxu1 %v2392_v44 }
  0xaa   : > { %1252 = vmatmul.mubr.f32.gmra.mrb[36].mxu0 %v3079_v57  ;;  %2422 = vmatprep.subr.bf16.mxu1 %v2396_v23  ;;  %v874_v57 = vld [vmem:[%s3704_s3 + $0x450] sm:$0xff] }
  0xab   : > { %1397 = vmatmul.mubr.f32.gmra.mrb[36].mxu1 %v3082_v58  ;;  %1256 = vmatprep.mubr.f32.mxu0 %v3179_v41  ;;  %v2408_v58 = vpack.c.bf16 %v875_v39, %v874_v57 }
  0xac   : > { %1401 = vmatprep.mubr.f32.mxu1 %v3249_v2  ;;  %2399 = vmatpush3.bf16.msra.mxu0 %v2396_v23 }
  0xad   : > { %2401 = vmatprep.subr.bf16.mxu0 %v2400_v56  ;;  %2430 = vmatpush3.bf16.msra.mxu1 %v2396_v23 }
  0xae   : > { %1257 = vmatmul.mubr.f32.gmra.mrb[38].mxu0 %v3131_v14  ;;  %2423 = vmatprep.subr.bf16.mxu1 %v2400_v56  ;;  %v876_v14 = vld [vmem:[%s3704_s3 + $0x460] sm:$0xff] }
  0xaf   : > { %1402 = vmatmul.mubr.f32.gmra.mrb[38].mxu1 %v3086_v60  ;;  %1261 = vmatprep.mubr.f32.mxu0 %v3232_v0  ;;  %v2412_v60 = vpack.c.bf16 %v877_v21, %v876_v14 }
  0xb0   : > { %1406 = vmatprep.mubr.f32.mxu1 %v3308_v55  ;;  %2403 = vmatpush3.bf16.msra.mxu0 %v2400_v56 }
  0xb1   : > { %2405 = vmatprep.subr.bf16.mxu0 %v2404_v24  ;;  %2431 = vmatpush3.bf16.msra.mxu1 %v2400_v56 }
  0xb2   : > { %1262 = vmatmul.mubr.f32.gmra.mrb[40].mxu0 %v3194_v47  ;;  %2424 = vmatprep.subr.bf16.mxu1 %v2404_v24  ;;  %v878_v47 = vld [vmem:[%s3704_s3 + $0x470] sm:$0xff] }
  0xb3   : > { %1407 = vmatmul.mubr.f32.gmra.mrb[40].mxu1 %v3197_v48  ;;  %1266 = vmatprep.mubr.f32.mxu0 %v3252_v7  ;;  %v2416_v48 = vpack.c.bf16 %v879_v25, %v878_v47 }
  0xb4   : > { %1411 = vmatprep.mubr.f32.mxu1 %v3346_v18  ;;  %2407 = vmatpush3.bf16.msra.mxu0 %v2404_v24 }
  0xb5   : > { %2409 = vmatprep.subr.bf16.mxu0 %v2408_v58  ;;  %2432 = vmatpush3.bf16.msra.mxu1 %v2404_v24 }
  0xb6   : > { %1267 = vmatmul.mubr.f32.gmra.mrb[42].mxu0 %v3249_v2  ;;  %2425 = vmatprep.subr.bf16.mxu1 %v2408_v58 }
  0xb7   : > { %1412 = vmatmul.mubr.f32.gmra.mrb[42].mxu1 %v3200_v49  ;;  %1271 = vmatprep.mubr.f32.mxu0 %v3343_v10 }
  0xb8   : > { %1416 = vmatprep.mubr.f32.mxu1 %v3364_v12  ;;  %2411 = vmatpush3.bf16.msra.mxu0 %v2408_v58 }
  0xb9   : > { %2413 = vmatprep.subr.bf16.mxu0 %v2412_v60  ;;  %2433 = vmatpush3.bf16.msra.mxu1 %v2408_v58 }
  0xba   : > { %1272 = vmatmul.mubr.f32.gmra.mrb[44].mxu0 %v3308_v55  ;;  %2426 = vmatprep.subr.bf16.mxu1 %v2412_v60 }
  0xbb   : > { %1417 = vmatmul.mubr.f32.gmra.mrb[44].mxu1 %v3320_v1  ;;  %1276 = vmatprep.mubr.f32.mxu0 %v3361_v9 }
  0xbc   : > { %1421 = vmatprep.mubr.f32.mxu1 %v3382_v40  ;;  %2415 = vmatpush3.bf16.msra.mxu0 %v2412_v60 }
  0xbd   : > { %2417 = vmatprep.subr.bf16.mxu0 %v2416_v48  ;;  %2434 = vmatpush3.bf16.msra.mxu1 %v2412_v60 }
  0xbe   : > { %1277 = vmatmul.mubr.f32.gmra.mrb[46].mxu0 %v3346_v18  ;;  %2427 = vmatprep.subr.bf16.mxu1 %v2416_v48 }
  0xbf   : > { %1422 = vmatmul.mubr.f32.gmra.mrb[46].mxu1 %v3323_v52  ;;  %1281 = vmatprep.mubr.f32.mxu0 %v3379_v11 }
  0xc0   : > { %1426 = vmatprep.mubr.f32.mxu1 %v3395_v61  ;;  %2419 = vmatpush3.bf16.msra.mxu0 %v2416_v48 }
  0xc1   : > { %2435 = vmatpush3.bf16.msra.mxu1 %v2416_v48 }
  0xc2   : > { %1282 = vmatmul.mubr.f32.gmra.mrb[48].mxu0 %v3364_v12 }
  0xc3   : > { %1427 = vmatmul.mubr.f32.gmra.mrb[48].mxu1 %v3368_v35  ;;  %1286 = vmatprep.mubr.f32.mxu0 %v3392_v53 }
  0xc4   : > { %1431 = vmatprep.mubr.f32.mxu1 %v3409_v13 }
  0xc6   : > { %1287 = vmatmul.mubr.f32.gmra.mrb[50].mxu0 %v3382_v40 }
  0xc7   : > { %1432 = vmatmul.mubr.f32.gmra.mrb[50].mxu1 %v3371_v36  ;;  %1291 = vmatprep.mubr.f32.mxu0 %v3406_v4 }
  0xc8   : > { %1436 = vmatprep.mubr.f32.mxu1 %v3422_v3 }
  0xca   : > { %1292 = vmatmul.mubr.f32.gmra.mrb[52].mxu0 %v3395_v61 }
  0xcb   : > { %1437 = vmatmul.mubr.f32.gmra.mrb[52].mxu1 %v3399_v46  ;;  %1296 = vmatprep.mubr.f32.mxu0 %v3417_v26 }
  0xcc   : > { %1441 = vmatprep.mubr.f32.mxu1 %v3212_v29 }
  0xce   : > { %1297 = vmatmul.mubr.f32.gmra.mrb[54].mxu0 %v3409_v13 }
  0xcf   : > { %1442 = vmatmul.mubr.f32.gmra.mrb[54].mxu1 %v3109_v8  ;;  %1301 = vmatprep.mubr.f32.mxu0 %v3431_v37 }
  0xd0   : > { %1446 = vmatprep.mubr.f32.mxu1 %v3228_v63 }
  0xd2   : > { %1302 = vmatmul.mubr.f32.gmra.mrb[56].mxu0 %v3422_v3 }
  0xd3   : > { %1447 = vmatmul.mubr.f32.gmra.mrb[56].mxu1 %v3146_v22  ;;  %1306 = vmatprep.mubr.f32.mxu0 %v3439_v28 }
  0xd4   : > { %1451 = vmatprep.mubr.f32.mxu1 %v3300_v50 }
  0xd6   : > { %1307 = vmatmul.mubr.f32.gmra.mrb[58].mxu0 %v3212_v29 }
  0xd7   : > { %1452 = vmatmul.mubr.f32.gmra.mrb[58].mxu1 %v3158_v31  ;;  %1311 = vmatprep.mubr.f32.mxu0 %v3242_v6 }
  0xd8   : > { %1456 = vmatprep.mubr.f32.mxu1 %v3311_v59 }
  0xda   : > { %1312 = vmatmul.mubr.f32.gmra.mrb[60].mxu0 %v3228_v63 }
  0xdb   : > { %1457 = vmatmul.mubr.f32.gmra.mrb[60].mxu1 %v3278_v27  ;;  %1316 = vmatprep.mubr.f32.mxu0 %v3303_v51 }
  0xdc   : > { %1461 = vmatprep.mubr.f32.mxu1 %v3317_v5 }
  0xde   : > { %1317 = vmatmul.mubr.f32.gmra.mrb[62].mxu0 %v3300_v50 }
  0xdf   : > { %1462 = vmatmul.mubr.f32.gmra.mrb[62].mxu1 %v3281_v32  ;;  %2236 = vmatprep.mubr.f32.mxu0 %v3116_v54  ;;  %v3570_v54 = vld [vmem:[%s3705_s4] ss:$0 sm:$0xff] }
  0xe0   : > { %2248 = vmatprep.mubr.f32.mxu1 %v3406_v4 }
  0xe2   : > { %2237 = vmatmul.mubr.f32.vlgmr.msra.gmra.mrb[64].mxu0 %v3179_v41 }
  0xe3   : > { %2249 = vmatmul.mubr.f32.vlgmr.msra.gmra.mrb[64].mxu1 %v3417_v26  ;;  %2239 = vmatprep.mubr.f32.mxu0 %v3232_v0 }
  0xe4   : > { %2251 = vmatprep.mubr.f32.mxu1 %v3431_v37 }
  0xe6   : > { %2240 = vmatmul.mubr.f32.gmra.mrb[66].mxu0 %v3252_v7 }
  0xe7   : > { %2252 = vmatmul.mubr.f32.gmra.mrb[66].mxu1 %v3439_v28  ;;  %2242 = vmatprep.mubr.f32.mxu0 %v3343_v10 }
  0xe8   : > { %2254 = vmatprep.mubr.f32.mxu1 %v3242_v6 }
  0xea   : > { %2243 = vmatmul.mubr.f32.gmra.mrb[68].mxu0 %v3361_v9 }
  0xeb   : > { %2255 = vmatmul.mubr.f32.gmra.mrb[68].mxu1 %v3303_v51  ;;  %2245 = vmatprep.mubr.f32.mxu0 %v3379_v11 }
  0xec   : > { %2257 = vmatprep.mubr.f32.mxu1 %v3328_v16 }
  0xee   : > { %2246 = vmatmul.mubr.f32.gmra.mrb[70].mxu0 %v3392_v53 }
  0xef   : > { %2258 = vmatmul.mubr.f32.gmra.mrb[70].mxu1 %v3331_v17 }
 0x135   : > { %v1884_v8 = vpop.f32.mrb[0].mxu0 }
 0x136   : > { %v1885_v22 = vpop.f32.mrb[1].mxu0  ;;  %v1964_v31 = vpop.f32.mrb[0].mxu1 }
 0x137   : > { %v1886_v41 = vadd.f32 %v1885_v22, %v1884_v8  ;;  %v1965_v49 = vpop.f32.mrb[1].mxu1 }
 0x138   : > { %v1966_v29 = vadd.f32 %v1965_v49, %v1964_v31 }
 0x139   : > { %v954_v63 = vadd.f32 %v1886_v41, %v3570_v54  ;;  %v1887_v0 = vpop.f32.mrb[2].mxu0 }
 0x13a   : > { %v1888_v6 = vpop.f32.mrb[3].mxu0  ;;  %v1967_v2 = vpop.f32.mrb[2].mxu1 }
 0x13b   : > { %v3573_v7 = vadd.f32 %v1966_v29, %v954_v63  ;;  %v1889_v27 = vadd.f32 %v1888_v6, %v1887_v0  ;;  %v1968_v32 = vpop.f32.mrb[3].mxu1 }
 0x13c   : > { %v1969_v50 = vadd.f32 %v1968_v32, %v1967_v2 }
 0x13d   : > { %v959_v51 = vadd.f32 %v1889_v27, %v3570_v54  ;;  %v1890_v55 = vpop.f32.mrb[4].mxu0 }
 0x13e   : > { %v1891_v59 = vpop.f32.mrb[5].mxu0  ;;  %v1970_v5 = vpop.f32.mrb[4].mxu1 }
 0x13f   : > { %v3576_v1 = vadd.f32 %v1969_v50, %v959_v51  ;;  %v1892_v52 = vadd.f32 %v1891_v59, %v1890_v55  ;;  %v1971_v16 = vpop.f32.mrb[5].mxu1 }
 0x140   : > { %v1972_v17 = vadd.f32 %v1971_v16, %v1970_v5 }
 0x141   : > { %v964_v10 = vadd.f32 %v1892_v52, %v3570_v54  ;;  %v1893_v18 = vpop.f32.mrb[6].mxu0 }
 0x142   : > { %v1894_v9 = vpop.f32.mrb[7].mxu0  ;;  %v1973_v12 = vpop.f32.mrb[6].mxu1 }
 0x143   : > { %v3579_v35 = vadd.f32 %v1972_v17, %v964_v10  ;;  %v1895_v36 = vadd.f32 %v1894_v9, %v1893_v18  ;;  %v1974_v11 = vpop.f32.mrb[7].mxu1 }
 0x144   : > { %v1975_v40 = vadd.f32 %v1974_v11, %v1973_v12 }
 0x145   : > { %v969_v53 = vadd.f32 %v1895_v36, %v3570_v54  ;;  %v1896_v61 = vpop.f32.mrb[8].mxu0 }
 0x146   : > { %v1897_v46 = vpop.f32.mrb[9].mxu0  ;;  %v1976_v4 = vpop.f32.mrb[8].mxu1 }
 0x147   : > { %v3582_v13 = vadd.f32 %v1975_v40, %v969_v53  ;;  %v1898_v26 = vadd.f32 %v1897_v46, %v1896_v61  ;;  %v1977_v3 = vpop.f32.mrb[9].mxu1 }
 0x148   : > { %v1978_v33 = vadd.f32 %v1977_v3, %v1976_v4 }
 0x149   : > { %v974_v34 = vadd.f32 %v1898_v26, %v3570_v54  ;;  %v1899_v37 = vpop.f32.mrb[10].mxu0 }
 0x14a   : > { %v1900_v42 = vpop.f32.mrb[11].mxu0  ;;  %v1979_v28 = vpop.f32.mrb[10].mxu1 }
 0x14b   : > { %v3585_v43 = vadd.f32 %v1978_v33, %v974_v34  ;;  %v1901_v30 = vadd.f32 %v1900_v42, %v1899_v37  ;;  %v1980_v44 = vpop.f32.mrb[11].mxu1 }
 0x14c   : > { %v1981_v45 = vadd.f32 %v1980_v44, %v1979_v28 }
 0x14d   : > { %v979_v62 = vadd.f32 %v1901_v30, %v3570_v54  ;;  %v1902_v23 = vpop.f32.mrb[12].mxu0 }
 0x14e   : > { %v1903_v19 = vpop.f32.mrb[13].mxu0  ;;  %v1982_v20 = vpop.f32.mrb[12].mxu1 }
 0x14f   : > { %v3588_v56 = vadd.f32 %v1981_v45, %v979_v62  ;;  %v1904_v38 = vadd.f32 %v1903_v19, %v1902_v23  ;;  %v1983_v15 = vpop.f32.mrb[13].mxu1 }
 0x150   : > { %v1984_v24 = vadd.f32 %v1983_v15, %v1982_v20 }
 0x151   : > { %v984_v57 = vadd.f32 %v1904_v38, %v3570_v54  ;;  %v1905_v39 = vpop.f32.mrb[14].mxu0 }
 0x152   : > { %v1906_v58 = vpop.f32.mrb[15].mxu0  ;;  %v1985_v14 = vpop.f32.mrb[14].mxu1 }
 0x153   : > { %v3591_v21 = vadd.f32 %v1984_v24, %v984_v57  ;;  %v1907_v60 = vadd.f32 %v1906_v58, %v1905_v39  ;;  %v1986_v47 = vpop.f32.mrb[15].mxu1 }
 0x154   : > { %v1987_v25 = vadd.f32 %v1986_v47, %v1985_v14 }
 0x155   : > { %v989_v48 = vadd.f32 %v1907_v60, %v3570_v54  ;;  %v1908_v8 = vpop.f32.mrb[16].mxu0 }
 0x156   : > { %v1909_v22 = vpop.f32.mrb[17].mxu0  ;;  %v1988_v31 = vpop.f32.mrb[16].mxu1 }
 0x157   : > { %v3594_v41 = vadd.f32 %v1987_v25, %v989_v48  ;;  %v1910_v49 = vadd.f32 %v1909_v22, %v1908_v8  ;;  %v1989_v29 = vpop.f32.mrb[17].mxu1 }
 0x158   : > { %v1990_v63 = vadd.f32 %v1989_v29, %v1988_v31 }
 0x159   : > { %v994_v0 = vadd.f32 %v1910_v49, %v3570_v54  ;;  %v1911_v6 = vpop.f32.mrb[18].mxu0 }
 0x15a   : > { %v1912_v2 = vpop.f32.mrb[19].mxu0  ;;  %v1991_v27 = vpop.f32.mrb[18].mxu1 }
 0x15b   : > { %v3597_v32 = vadd.f32 %v1990_v63, %v994_v0  ;;  %v1913_v50 = vadd.f32 %v1912_v2, %v1911_v6  ;;  %v1992_v51 = vpop.f32.mrb[19].mxu1 }
 0x15c   : > { %v1993_v55 = vadd.f32 %v1992_v51, %v1991_v27 }
 0x15d   : > { %v999_v59 = vadd.f32 %v1913_v50, %v3570_v54  ;;  %v1914_v5 = vpop.f32.mrb[20].mxu0 }
 0x15e   : > { %v1915_v52 = vpop.f32.mrb[21].mxu0  ;;  %v1994_v16 = vpop.f32.mrb[20].mxu1 }
 0x15f   : > { %v3600_v17 = vadd.f32 %v1993_v55, %v999_v59  ;;  %v1916_v10 = vadd.f32 %v1915_v52, %v1914_v5  ;;  %v1995_v18 = vpop.f32.mrb[21].mxu1 }
 0x160   : > { %v1996_v9 = vadd.f32 %v1995_v18, %v1994_v16 }
 0x161   : > { %v1004_v12 = vadd.f32 %v1916_v10, %v3570_v54  ;;  %v1917_v36 = vpop.f32.mrb[22].mxu0 }
 0x162   : > { %v1918_v11 = vpop.f32.mrb[23].mxu0  ;;  %v1997_v40 = vpop.f32.mrb[22].mxu1 }
 0x163   : > { %v3603_v53 = vadd.f32 %v1996_v9, %v1004_v12  ;;  %v1919_v61 = vadd.f32 %v1918_v11, %v1917_v36  ;;  %v1998_v46 = vpop.f32.mrb[23].mxu1 }
 0x164   : > { %v1999_v4 = vadd.f32 %v1998_v46, %v1997_v40 }
 0x165   : > { %v1009_v26 = vadd.f32 %v1919_v61, %v3570_v54  ;;  %v1920_v3 = vpop.f32.mrb[24].mxu0 }
 0x166   : > { %v1921_v33 = vpop.f32.mrb[25].mxu0  ;;  %v2000_v34 = vpop.f32.mrb[24].mxu1 }
 0x167   : > { %v3606_v37 = vadd.f32 %v1999_v4, %v1009_v26  ;;  %v1922_v42 = vadd.f32 %v1921_v33, %v1920_v3  ;;  %v2001_v28 = vpop.f32.mrb[25].mxu1 }
 0x168   : > { %v2002_v30 = vadd.f32 %v2001_v28, %v2000_v34 }
 0x169   : > { %v1014_v44 = vadd.f32 %v1922_v42, %v3570_v54  ;;  %v1923_v45 = vpop.f32.mrb[26].mxu0 }
 0x16a   : > { %v1924_v62 = vpop.f32.mrb[27].mxu0  ;;  %v2003_v23 = vpop.f32.mrb[26].mxu1 }
 0x16b   : > { %v3609_v19 = vadd.f32 %v2002_v30, %v1014_v44  ;;  %v1925_v20 = vadd.f32 %v1924_v62, %v1923_v45  ;;  %v2004_v38 = vpop.f32.mrb[27].mxu1 }
 0x16c   : > { %v2005_v15 = vadd.f32 %v2004_v38, %v2003_v23 }
 0x16d   : > { %v1019_v24 = vadd.f32 %v1925_v20, %v3570_v54  ;;  %v1926_v57 = vpop.f32.mrb[28].mxu0 }
 0x16e   : > { %v1927_v39 = vpop.f32.mrb[29].mxu0  ;;  %v2006_v58 = vpop.f32.mrb[28].mxu1 }
 0x16f   : > { %v3612_v14 = vadd.f32 %v2005_v15, %v1019_v24  ;;  %v1928_v60 = vadd.f32 %v1927_v39, %v1926_v57  ;;  %v2007_v47 = vpop.f32.mrb[29].mxu1 }
 0x170   : > { %v2008_v25 = vadd.f32 %v2007_v47, %v2006_v58 }
 0x171   : > { %v1024_v48 = vadd.f32 %v1928_v60, %v3570_v54  ;;  %v1929_v8 = vpop.f32.mrb[30].mxu0 }
 0x172   : > { %v1930_v22 = vpop.f32.mrb[31].mxu0  ;;  %v2009_v31 = vpop.f32.mrb[30].mxu1 }
 0x173   : > { %v3615_v49 = vadd.f32 %v2008_v25, %v1024_v48  ;;  %v1931_v29 = vadd.f32 %v1930_v22, %v1929_v8  ;;  %v2010_v63 = vpop.f32.mrb[31].mxu1 }
 0x174   : > { %v2011_v0 = vadd.f32 %v2010_v63, %v2009_v31 }
 0x175   : > { %v1029_v6 = vadd.f32 %v1931_v29, %v3570_v54  ;;  %v2044_v2 = vpop.f32.mrb[32].mxu0 }
 0x176   : > { %v2045_v27 = vpop.f32.mrb[33].mxu0  ;;  %v2124_v50 = vpop.f32.mrb[32].mxu1 }
 0x177   : > { %v3618_v51 = vadd.f32 %v2011_v0, %v1029_v6  ;;  %v2046_v55 = vadd.f32 %v2045_v27, %v2044_v2  ;;  %v2125_v59 = vpop.f32.mrb[33].mxu1 }
 0x178   : > { %v2126_v5 = vadd.f32 %v2125_v59, %v2124_v50 }
 0x179   : > { %v1244_v52 = vadd.f32 %v2046_v55, %v3573_v7  ;;  %v2047_v16 = vpop.f32.mrb[34].mxu0 }
 0x17a   : > { %v2048_v10 = vpop.f32.mrb[35].mxu0  ;;  %v2127_v18 = vpop.f32.mrb[34].mxu1 }
 0x17b   : > { %v2049_v9 = vadd.f32 %v2048_v10, %v2047_v16  ;;  %v2128_v12 = vpop.f32.mrb[35].mxu1  ;;  %v3621_v36 = vadd.f32 %v2126_v5, %v1244_v52 }
 0x17c   : > { %v2129_v11 = vadd.f32 %v2128_v12, %v2127_v18 }
 0x17d   : > { %v1249_v54 = vadd.f32 %v2049_v9, %v3576_v1  ;;  %v2050_v40 = vpop.f32.mrb[36].mxu0 }
 0x17e   : > { %v2051_v61 = vpop.f32.mrb[37].mxu0  ;;  %v2130_v46 = vpop.f32.mrb[36].mxu1 }
 0x17f   : > { %v2052_v4 = vadd.f32 %v2051_v61, %v2050_v40  ;;  %v2131_v26 = vpop.f32.mrb[37].mxu1  ;;  %v3624_v3 = vadd.f32 %v2129_v11, %v1249_v54 }
 0x180   : > { %v2132_v33 = vadd.f32 %v2131_v26, %v2130_v46 }
 0x181   : > { %v1254_v7 = vadd.f32 %v2052_v4, %v3579_v35  ;;  %v2053_v34 = vpop.f32.mrb[38].mxu0 }
 0x182   : > { %v2054_v42 = vpop.f32.mrb[39].mxu0  ;;  %v2133_v28 = vpop.f32.mrb[38].mxu1 }
 0x183   : > { %v2055_v30 = vadd.f32 %v2054_v42, %v2053_v34  ;;  %v2134_v44 = vpop.f32.mrb[39].mxu1  ;;  %v3627_v45 = vadd.f32 %v2132_v33, %v1254_v7 }
 0x184   : > { %v2135_v62 = vadd.f32 %v2134_v44, %v2133_v28 }
 0x185   : > { %v1259_v1 = vadd.f32 %v2055_v30, %v3582_v13  ;;  %v2056_v23 = vpop.f32.mrb[40].mxu0 }
 0x186   : > { %v2057_v20 = vpop.f32.mrb[41].mxu0  ;;  %v2136_v38 = vpop.f32.mrb[40].mxu1 }
 0x187   : > { %v2058_v15 = vadd.f32 %v2057_v20, %v2056_v23  ;;  %v2137_v24 = vpop.f32.mrb[41].mxu1  ;;  %v3630_v57 = vadd.f32 %v2135_v62, %v1259_v1 }
 0x188   : > { %v2138_v39 = vadd.f32 %v2137_v24, %v2136_v38 }
 0x189   : > { %v1264_v35 = vadd.f32 %v2058_v15, %v3585_v43  ;;  %v2059_v58 = vpop.f32.mrb[42].mxu0 }
 0x18a   : > { %v2060_v60 = vpop.f32.mrb[43].mxu0  ;;  %v2139_v47 = vpop.f32.mrb[42].mxu1 }
 0x18b   : > { %v2061_v25 = vadd.f32 %v2060_v60, %v2059_v58  ;;  %v2140_v48 = vpop.f32.mrb[43].mxu1  ;;  %v3633_v8 = vadd.f32 %v2138_v39, %v1264_v35 }
 0x18c   : > { %v2141_v22 = vadd.f32 %v2140_v48, %v2139_v47 }
 0x18d   : > { %v1269_v13 = vadd.f32 %v2061_v25, %v3588_v56  ;;  %v2062_v31 = vpop.f32.mrb[44].mxu0 }
 0x18e   : > { %v2063_v29 = vpop.f32.mrb[45].mxu0  ;;  %v2142_v63 = vpop.f32.mrb[44].mxu1 }
 0x18f   : > { %v2064_v0 = vadd.f32 %v2063_v29, %v2062_v31  ;;  %v2143_v6 = vpop.f32.mrb[45].mxu1  ;;  %v3636_v2 = vadd.f32 %v2141_v22, %v1269_v13 }
 0x190   : > { %v2144_v27 = vadd.f32 %v2143_v6, %v2142_v63 }
 0x191   : > { %v1274_v43 = vadd.f32 %v2064_v0, %v3591_v21  ;;  %v2065_v50 = vpop.f32.mrb[46].mxu0 }
 0x192   : > { %v2066_v55 = vpop.f32.mrb[47].mxu0  ;;  %v2145_v59 = vpop.f32.mrb[46].mxu1 }
 0x193   : > { %v2067_v5 = vadd.f32 %v2066_v55, %v2065_v50  ;;  %v2146_v52 = vpop.f32.mrb[47].mxu1  ;;  %v3639_v16 = vadd.f32 %v2144_v27, %v1274_v43 }
 0x194   : > { %v2147_v10 = vadd.f32 %v2146_v52, %v2145_v59 }
 0x195   : > { %v1279_v56 = vadd.f32 %v2067_v5, %v3594_v41  ;;  %v2068_v18 = vpop.f32.mrb[48].mxu0 }
 0x196   : > { %v2069_v9 = vpop.f32.mrb[49].mxu0  ;;  %v2148_v12 = vpop.f32.mrb[48].mxu1 }
 0x197   : > { %v2070_v11 = vadd.f32 %v2069_v9, %v2068_v18  ;;  %v2149_v54 = vpop.f32.mrb[49].mxu1  ;;  %v3642_v40 = vadd.f32 %v2147_v10, %v1279_v56 }
 0x198   : > { %v2150_v61 = vadd.f32 %v2149_v54, %v2148_v12 }
 0x199   : > { %v1284_v21 = vadd.f32 %v2070_v11, %v3597_v32  ;;  %v2071_v46 = vpop.f32.mrb[50].mxu0 }
 0x19a   : > { %v2072_v4 = vpop.f32.mrb[51].mxu0  ;;  %v2151_v26 = vpop.f32.mrb[50].mxu1 }
 0x19b   : > { %v2073_v33 = vadd.f32 %v2072_v4, %v2071_v46  ;;  %v2152_v7 = vpop.f32.mrb[51].mxu1  ;;  %v1429_v34 = vadd.f32 %v2150_v61, %v1284_v21 }
 0x19c   : > { %v2153_v42 = vadd.f32 %v2152_v7, %v2151_v26 }
 0x19d   : > { %v1289_v28 = vadd.f32 %v2073_v33, %v3600_v17  ;;  %v2074_v41 = vpop.f32.mrb[52].mxu0 }
 0x19e   : > { %v2075_v30 = vpop.f32.mrb[53].mxu0  ;;  %v2154_v44 = vpop.f32.mrb[52].mxu1 }
 0x19f   : > { %v2076_v62 = vadd.f32 %v2075_v30, %v2074_v41  ;;  %v2155_v1 = vpop.f32.mrb[53].mxu1  ;;  %v1434_v23 = vadd.f32 %v2153_v42, %v1289_v28 }
 0x1a0   : > { %v2156_v20 = vadd.f32 %v2155_v1, %v2154_v44 }
 0x1a1   : > { %v1294_v38 = vadd.f32 %v2076_v62, %v3603_v53  ;;  %v2077_v15 = vpop.f32.mrb[54].mxu0 }
 0x1a2   : > { %v2078_v32 = vpop.f32.mrb[55].mxu0  ;;  %v2157_v24 = vpop.f32.mrb[54].mxu1 }
 0x1a3   : > { %v2079_v39 = vadd.f32 %v2078_v32, %v2077_v15  ;;  %v2158_v35 = vpop.f32.mrb[55].mxu1  ;;  %v1439_v58 = vadd.f32 %v2156_v20, %v1294_v38 }
 0x1a4   : > { %v2159_v60 = vadd.f32 %v2158_v35, %v2157_v24 }
 0x1a5   : > { %v1299_v47 = vadd.f32 %v2079_v39, %v3606_v37  ;;  %v2080_v25 = vpop.f32.mrb[56].mxu0 }
 0x1a6   : > { %v2081_v17 = vpop.f32.mrb[57].mxu0  ;;  %v2160_v48 = vpop.f32.mrb[56].mxu1 }
 0x1a7   : > { %v2082_v22 = vadd.f32 %v2081_v17, %v2080_v25  ;;  %v2161_v13 = vpop.f32.mrb[57].mxu1  ;;  %v1444_v31 = vadd.f32 %v2159_v60, %v1299_v47 }
 0x1a8   : > { %v2162_v29 = vadd.f32 %v2161_v13, %v2160_v48 }
 0x1a9   : > { %v1304_v63 = vadd.f32 %v2082_v22, %v3609_v19  ;;  %v2083_v0 = vpop.f32.mrb[58].mxu0 }
 0x1aa   : > { %v2084_v53 = vpop.f32.mrb[59].mxu0  ;;  %v2163_v6 = vpop.f32.mrb[58].mxu1 }
 0x1ab   : > { %v2085_v27 = vadd.f32 %v2084_v53, %v2083_v0  ;;  %v2164_v43 = vpop.f32.mrb[59].mxu1  ;;  %v1449_v50 = vadd.f32 %v2162_v29, %v1304_v63 }
 0x1ac   : > { %v2165_v55 = vadd.f32 %v2164_v43, %v2163_v6 }
 0x1ad   : > { %v1309_v59 = vadd.f32 %v2085_v27, %v3612_v14  ;;  %v2086_v5 = vpop.f32.mrb[60].mxu0 }
 0x1ae   : > { %v2087_v37 = vpop.f32.mrb[61].mxu0  ;;  %v2166_v52 = vpop.f32.mrb[60].mxu1 }
 0x1af   : > { %v2088_v10 = vadd.f32 %v2087_v37, %v2086_v5  ;;  %v2167_v56 = vpop.f32.mrb[61].mxu1  ;;  %v1454_v18 = vadd.f32 %v2165_v55, %v1309_v59 }
 0x1b0   : > { %v2168_v9 = vadd.f32 %v2167_v56, %v2166_v52 }
 0x1b1   : > { %v1314_v12 = vadd.f32 %v2088_v10, %v3615_v49  ;;  %v2089_v11 = vpop.f32.mrb[62].mxu0 }
 0x1b2   : > { %v2090_v19 = vpop.f32.mrb[63].mxu0  ;;  %v2169_v54 = vpop.f32.mrb[62].mxu1 }
 0x1b3   : > { %v2091_v61 = vadd.f32 %v2090_v19, %v2089_v11  ;;  %v2170_v21 = vpop.f32.mrb[63].mxu1  ;;  %v3651_v46 = vadd.f32 %v2168_v9, %v1314_v12 }
 0x1b4   : > { %v2171_v14 = vadd.f32 %v2170_v21, %v2169_v54 }
 0x1b5   : > { %v1319_v4 = vadd.f32 %v2091_v61, %v3618_v51  ;;  %v2238_v26 = vpop.f32.mrb[64].mxu0 }
 0x1b6   : > { %v1539_v33 = vadd.f32 %v2238_v26, %v3624_v3  ;;  %v2250_v7 = vpop.f32.mrb[64].mxu1  ;;  %v1533_v42 = vpop.f32.mrb[65].mxu0 }
 0x1b7   : > { %v3655_v49 = vadd.f32 %v2250_v7, %v1434_v23  ;;  %v1534_v28 = vadd.f32 %v1533_v42, %v3621_v36  ;;  %v1573_v41 = vpop.f32.mrb[65].mxu1  ;;  %v1464_v30 = vadd.f32 %v2171_v14, %v1319_v4 }
 0x1b8   : > { %1613 = vst [vmem:[%s2595_s15 + $0x8] sm:$0xff] %v1539_v33  ;;  %v1650_v44 = vmul.f32 %v1539_v33, %v1539_v33  ;;  %v1574_v62 = vadd.f32 %v1573_v41, %v1429_v34 }
 0x1b9   : > { %1621 = vst [vmem:[%s2595_s15 + $0x48] sm:$0xff] %v3655_v49  ;;  %1612 = vst [vmem:[%s2595_s15] sm:$0xff] %v1534_v28  ;;  %v1628_v51 = vadd.f32 %v1539_v33, %v1534_v28  ;;  %v1649_v1 = vmul.f32 %v1534_v28, %v1534_v28  ;;  %v2241_v3 = vpop.f32.mrb[66].mxu0 }
 0x1ba   : > { %1620 = vst [vmem:[%s2595_s15 + $0x40] sm:$0xff] %v1574_v62  ;;  %v1549_v23 = vadd.f32 %v2241_v3, %v3630_v57  ;;  %v2253_v20 = vpop.f32.mrb[66].mxu1  ;;  %v1543_v36 = vpop.f32.mrb[67].mxu0  ;;  %v1657_v12 = vmul.f32 %v1574_v62, %v1574_v62 }
 0x1bb   : > { %v1665_v38 = vadd.f32 %v1650_v44, %v1649_v1  ;;  %v1589_v15 = vadd.f32 %v2253_v20, %v1444_v31  ;;  %v1544_v32 = vadd.f32 %v1543_v36, %v3627_v45  ;;  %v1583_v24 = vpop.f32.mrb[67].mxu1 }
 0x1bc   : > { %1615 = vst [vmem:[%s2595_s15 + $0x18] sm:$0xff] %v1549_v23  ;;  %v1584_v34 = vadd.f32 %v1583_v24, %v1439_v58  ;;  %v1652_v47 = vmul.f32 %v1549_v23, %v1549_v23 }
 0x1bd   : > { %1623 = vst [vmem:[%s2595_s15 + $0x58] sm:$0xff] %v1589_v15  ;;  %1614 = vst [vmem:[%s2595_s15 + $0x10] sm:$0xff] %v1544_v32  ;;  %v1629_v39 = vadd.f32 %v1628_v51, %v1544_v32  ;;  %v1651_v35 = vmul.f32 %v1544_v32, %v1544_v32  ;;  %v2244_v60 = vpop.f32.mrb[68].mxu0  ;;  %v1660_v4 = vmul.f32 %v1589_v15, %v1589_v15 }
 0x1be   : > { %1622 = vst [vmem:[%s2595_s15 + $0x50] sm:$0xff] %v1584_v34  ;;  %v1559_v57 = vadd.f32 %v2244_v60, %v3636_v2  ;;  %v2256_v25 = vpop.f32.mrb[68].mxu1  ;;  %v1553_v17 = vpop.f32.mrb[69].mxu0  ;;  %v1659_v21 = vmul.f32 %v1584_v34, %v1584_v34 }
 0x1bf   : > { %v1666_v48 = vadd.f32 %v1665_v38, %v1651_v35  ;;  %v1599_v45 = vadd.f32 %v2256_v25, %v1454_v18  ;;  %v1554_v22 = vadd.f32 %v1553_v17, %v3633_v8  ;;  %v1630_v58 = vadd.f32 %v1629_v39, %v1549_v23  ;;  %v1593_v13 = vpop.f32.mrb[69].mxu1 }
 0x1c0   : > { %1617 = vst [vmem:[%s2595_s15 + $0x28] sm:$0xff] %v1559_v57  ;;  %v1594_v31 = vadd.f32 %v1593_v13, %v1449_v50  ;;  %v1654_v53 = vmul.f32 %v1559_v57, %v1559_v57 }
 0x1c1   : > { %1625 = vst [vmem:[%s2595_s15 + $0x68] sm:$0xff] %v1599_v45  ;;  %1616 = vst [vmem:[%s2595_s15 + $0x20] sm:$0xff] %v1554_v22  ;;  %v1631_v29 = vadd.f32 %v1630_v58, %v1554_v22  ;;  %v1653_v63 = vmul.f32 %v1554_v22, %v1554_v22  ;;  %v1667_v0 = vadd.f32 %v1666_v48, %v1652_v47  ;;  %v2247_v2 = vpop.f32.mrb[70].mxu0 }
 0x1c2   : > { %1624 = vst [vmem:[%s2595_s15 + $0x60] sm:$0xff] %v1594_v31  ;;  %v1569_v6 = vadd.f32 %v2247_v2, %v3642_v40  ;;  %v2259_v27 = vpop.f32.mrb[70].mxu1  ;;  %v1563_v8 = vpop.f32.mrb[71].mxu0  ;;  %v1661_v7 = vmul.f32 %v1594_v31, %v1594_v31  ;;  %v1662_v41 = vmul.f32 %v1599_v45, %v1599_v45 }
 0x1c3   : > { %v1668_v43 = vadd.f32 %v1667_v0, %v1653_v63  ;;  %v1609_v55 = vadd.f32 %v2259_v27, %v1464_v30  ;;  %v1564_v50 = vadd.f32 %v1563_v8, %v3639_v16  ;;  %v1632_v59 = vadd.f32 %v1631_v29, %v1559_v57  ;;  %v1603_v5 = vpop.f32.mrb[71].mxu1 }
 0x1c4   : > { %1619 = vst [vmem:[%s2595_s15 + $0x38] sm:$0xff] %v1569_v6  ;;  %v1604_v37 = vadd.f32 %v1603_v5, %v3651_v46  ;;  %v1656_v18 = vmul.f32 %v1569_v6, %v1569_v6  ;;  %v1658_v16 = vmul.f32 %v3655_v49, %v3655_v49 }
 0x1c5   : > { %1627 = vst [vmem:[%s2595_s15 + $0x78] sm:$0xff] %v1609_v55  ;;  %1618 = vst [vmem:[%s2595_s15 + $0x30] sm:$0xff] %v1564_v50  ;;  %v1633_v52 = vadd.f32 %v1632_v59, %v1564_v50  ;;  %v1655_v10 = vmul.f32 %v1564_v50, %v1564_v50  ;;  %v1669_v56 = vadd.f32 %v1668_v43, %v1654_v53 }
 0x1c6   : > { %1626 = vst [vmem:[%s2595_s15 + $0x70] sm:$0xff] %v1604_v37  ;;  %v1663_v51 = vmul.f32 %v1604_v37, %v1604_v37  ;;  %v1664_v3 = vmul.f32 %v1609_v55, %v1609_v55 }
 0x1c7   : > { %v1634_v9 = vadd.f32 %v1633_v52, %v1569_v6  ;;  %v1670_v40 = vadd.f32 %v1669_v56, %v1655_v10 }
 0x1c9   : > { %v1635_v11 = vadd.f32 %v1634_v9, %v1574_v62  ;;  %v1671_v19 = vadd.f32 %v1670_v40, %v1656_v18 }
 0x1cb   : > { %v1636_v54 = vadd.f32 %v1635_v11, %v3655_v49  ;;  %v1672_v61 = vadd.f32 %v1671_v19, %v1657_v12 }
 0x1cd   : > { %v1673_v46 = vadd.f32 %v1672_v61, %v1658_v16  ;;  %v1637_v14 = vadd.f32 %v1636_v54, %v1584_v34 }
 0x1cf   : > { %v1638_v26 = vadd.f32 %v1637_v14, %v1589_v15  ;;  %v1674_v33 = vadd.f32 %v1673_v46, %v1659_v21 }
 0x1d1   : > { %v1639_v42 = vadd.f32 %v1638_v26, %v1594_v31  ;;  %v1675_v28 = vadd.f32 %v1674_v33, %v1660_v4 }
 0x1d3   : > { %v1640_v30 = vadd.f32 %v1639_v42, %v1599_v45  ;;  %v1676_v44 = vadd.f32 %v1675_v28, %v1661_v7 }
 0x1d5   : > { %v1641_v62 = vadd.f32 %v1640_v30, %v1604_v37  ;;  %v1677_v1 = vadd.f32 %v1676_v44, %v1662_v41 }
 0x1d7   : > { %v1642_v23 = vadd.f32 %v1641_v62, %v1609_v55  ;;  %v1678_v20 = vadd.f32 %v1677_v1, %v1663_v51 }
 0x1d9   : > { %v1643_v49 = vrot.slane %v1642_v23, 4  ;;  %v1679_v36 = vadd.f32 %v1678_v20, %v1664_v3 }
 0x1db   : > { %v1644_v38 = vadd.f32 %v1643_v49, %v1642_v23  ;;  %v1680_v32 = vrot.slane %v1679_v36, 4 }
 0x1dd   : > { %v1645_v24 = vrot.slane %v1644_v38, 2  ;;  %v1681_v15 = vadd.f32 %v1680_v32, %v1679_v36 }
 0x1df   : > { %v1646_v34 = vadd.f32 %v1645_v24, %v1644_v38  ;;  %v1682_v39 = vrot.slane %v1681_v15, 2 }
 0x1e1   : > { %v1647_v35 = vrot.slane %v1646_v34, 1  ;;  %v1683_v60 = vadd.f32 %v1682_v39, %v1681_v15 }
 0x1e3   : > { %v1684_v47 = vrot.slane %v1683_v60, 1  ;;  %v1648_v57 = vadd.f32 %v1647_v35, %v1646_v34 }
 0x1e5   : > { %v1685_v25 = vadd.f32 %v1684_v47, %v1683_v60 }
 0x1e7   : > { %v1687_v17 = vsel %vm1686_vm2, %v1648_v57, %v1685_v25 }
 0x1e8   : > { %v1689_v48 = vsel %vm1688_vm3, %v1687_v17, 0.0 }
 0x1e9   : > { %1690 = vst [vmem:[%s2601_s26] sm:$0xff] %v1689_v48 }
 0x1ea PF: > { %s17_s25 = sadd.s32 1, %s2515_s25   ;;  %s3710_s15 = sld [smem:[#allocation3_spill]] }
 0x1eb   : > { %p14_p9 = scmp.ge.s32.totalorder %s17_s25, 6   ;;  %s3711_s7 = sld [smem:[#allocation4_spill]] }
 0x1ec   : > { %s3712_s21 = smov %s2507_s23  ;;  %s3713_s22 = smov %s2511_s24 }
 0x1ed   :  { %16 = sbr.rel (!%p14_p9) target bundleno = 3 (0x3), region = 88 }
 0x1f0   : > { %s3714_s23 = smov %s3710_s15 }
 0x1f1   : > { %s3715_s24 = smov %s3711_s7 }

// kernel: _lambda_.5
= control target key start
LH: loop header
LB: loop body
LE: loop exit
PB: predicated region body
PF: predicated region fallthrough
CT: control target
= control target key end

     0   :  { %s4355_s21 = smov 0   ;;  %s4357_s22 = smov 0   ;;  %s6586_s0 = inlined_call_operand.vmem [shape: f32[2,16,16,128], index: 0, kind: input, shape index: {}]   ;;  %s6587_s1 = inlined_call_operand.vmem [shape: f32[2,16,16,128], index: 1, kind: input, shape index: {}]   ;;  %s6588_s2 = inlined_call_operand.vmem [shape: f32[1152,128], index: 2, kind: input, shape index: {}]   ;;  %s6589_s3 = inlined_call_operand.vmem [shape: f32[1152,128], index: 3, kind: input, shape index: {}]   ;;  %s6590_s4 = inlined_call_operand.vmem [shape: f32[1,128], index: 4, kind: input, shape index: {}]   ;;  %s6591_s5 = inlined_call_operand.vmem [shape: f32[2,16,16,128], index: 5, kind: output, shape index: {0}]   ;;  %s6592_s6 = inlined_call_operand.vmem [shape: f32[2,2,8,128], index: 6, kind: output, shape index: {1}]  }
   0x1   :  { %6593 = sst [smem:[#allocation6_spill]] %s6586_s0  ;;  %s4359_s23 = smov 0  }
   0x2   :  { %s4361_s24 = smov 0   ;;  %s4363_s25 = smov 0  }
   0x3 LB: > { %s26_s26 = sadd.s32 1, %s4309_s23  ;;  %s29_s27 = sadd.s32 1, %s4313_s24  ;;  %s4317_s25 = sphi %s4363_s25, %s17_s25   ;;  %s4313_s24 = sphi %s4361_s24, %s6602_s24   ;;  %s4309_s23 = sphi %s4359_s23, %s6601_s23   ;;  %s4305_s22 = sphi %s4357_s22, %s6600_s22   ;;  %s4301_s21 = sphi %s4355_s21, %s6599_s21  }
   0x4   : > { %p27_p0 = scmp.ge.s32.totalorder %s26_s26, 2  ;;  %p2963_p1 = scmp.ge.s32.totalorder %s4317_s25, 1 }
   0x5   : > { %p241_p2 = scmp.lt.s32.totalorder %s4317_s25, 5 }
   0x6   : > { %s6604_s26 = smov (%p27_p0, %s26_s26), 0  ;;  %s6606_s27 = smov (!%p27_p0, %s29_s27), %s4313_s24 }
   0x7   : > { %6594 = sst [smem:[#allocation4_spill]] %s6604_s26  ;;  %p242_p3 = pnand %p2963_p1, %p241_p2 }
   0x8   : > { %p31_p4 = scmp.ge.s32.totalorder %s6606_s27, 2  ;;  %p289_p5 = scmp.lt.s32.totalorder (!%p242_p3), %s4305_s22, 1 }
   0x9   : > { %245 = sbr.rel (%p242_p3) target bundleno = 667 (0x29b), region = 40  ;;  %s2968_s28 = sshll.u32 (!%p242_p3), %s4301_s21, 3 }
   0xa   : > { %s6608_s27 = smov (%p31_p4, %s6606_s27), 0  ;;  %p302_p6 = scmp.lt.s32.totalorder (!%p242_p3), %s2968_s28, 15 }
   0xb   : > { %6595 = sst [smem:[#allocation5_spill]] %s6608_s27  ;;  %s6596_s0 = sld [smem:[#allocation6_spill]] (!%p242_p3) }
   0xc   : > { %p312_p7 = scmp.lt.s32.totalorder (!%p242_p3), %s4301_s21, 1  ;;  %p2974_p8 = scmp.ne.s32.totalorder (!%p242_p3), %s4301_s21, 0 }
  0x10   : > { %s6610_s22 = smov (!%p289_p5, %s4305_s22), 1  ;;  %s6612_s28 = smov (!%p302_p6, %s2968_s28), 15 }
  0x11   : > { %s2980_s29 = sshll.u32 %s6610_s22, 8  ;;  %s2970_s30 = sshll.u32 %s6610_s22, 5  ;;  %v4319_v3 = vmov (!%p2974_p8), 0.0  }
  0x12   : > { %s4391_s9 = scalar_lea.vmem %s6596_s0, %s2980_s29  ;;  %s4396_s12 = scalar_lea.vmem %s6587_s1, %s2980_s29  ;;  %357 = vst [vmem:[#allocation2 + $0x18] sm:$0xff] (!%p2974_p8), %v4319_v3  ;;  %354 = vst [vmem:[#allocation2] sm:$0xff] (!%p2974_p8), %v4319_v3 }
  0x13   : > { %s2969_s13 = sshll.u32 %s6612_s28, 1  ;;  %s2972_s19 = sshll.u32 %s6610_s22, 1  ;;  %v4412_v0 = vld [vmem:[%s4391_s9] sm:$0xff] (!%p2974_p8)  ;;  %v4415_v1 = vld [vmem:[%s4391_s9 + $0x8] sm:$0xff] (!%p2974_p8)  ;;  %v4418_v2 = vld [vmem:[%s4391_s9 + $0x10] sm:$0xff] (!%p2974_p8)  ;;  %355 = vst [vmem:[#allocation2 + $0x8] sm:$0xff] (!%p2974_p8), %v4319_v3 }
  0x14   : > { %s306_s14 = sadd.s32 %s2970_s30, %s2969_s13  ;;  %356 = vst [vmem:[#allocation2 + $0x10] sm:$0x3] (!%p2974_p8), %v4319_v3  ;;  %358 = vst [vmem:[#allocation2 + $0x20] sm:$0xff] (!%p2974_p8), %v4319_v3  ;;  %v325_v4 = vld [vmem:[%s4391_s9 + $0x18] sm:$0xff] (!%p2974_p8)  ;;  %v326_v5 = vld [vmem:[%s4391_s9 + $0x20] sm:$0xff] (!%p2974_p8) }
  0x15   : > { %s2971_s15 = sshll.u32 %s306_s14, 3  ;;  %321 = sbr.rel (%p2974_p8) target bundleno = 106 (0x6a), region = 44  ;;  %359 = vst [vmem:[#allocation2 + $0x28] sm:$0x3] (!%p2974_p8), %v4319_v3  ;;  %360 = vst [vmem:[#allocation2 + $0x30] sm:$0xff] (!%p2974_p8), %v4319_v3  ;;  %v327_v6 = vld [vmem:[%s4391_s9 + $0x28] sm:$0xff] (!%p2974_p8) }
  0x16   : > { %s4402_s18 = scalar_lea.vmem %s6591_s5, %s2971_s15  ;;  %361 = vst [vmem:[#allocation2 + $0x38] sm:$0xff] (!%p2974_p8), %v4319_v3  ;;  %362 = vst [vmem:[#allocation2 + $0x40] sm:$0x3] (!%p2974_p8), %v4319_v3  ;;  %v328_v7 = vld [vmem:[%s4391_s9 + $0x30] sm:$0xff] (!%p2974_p8)  ;;  %v329_v8 = vld [vmem:[%s4391_s9 + $0x38] sm:$0xff] (!%p2974_p8) }
  0x17   : > { %s313_s20 = scalar_select %p312_p7, %s4301_s21, 1 }
  0x18   : > { %363 = vst [vmem:[#allocation2 + $0x48] sm:$0xff] (!%p2974_p8), %v4319_v3  ;;  %364 = vst [vmem:[#allocation2 + $0x50] sm:$0xff] (!%p2974_p8), %v4319_v3  ;;  %v330_v9 = vld [vmem:[%s4391_s9 + $0x40] sm:$0xff] (!%p2974_p8)  ;;  %v331_v10 = vld [vmem:[%s4391_s9 + $0x48] sm:$0xff] (!%p2974_p8) }
  0x19   : > { %s315_s27 = sadd.s32 %s2972_s19, %s313_s20  ;;  %365 = vst [vmem:[#allocation2 + $0x58] sm:$0x3] (!%p2974_p8), %v4319_v3  ;;  %366 = vst [vmem:[#allocation2 + $0x60] sm:$0xff] (!%p2974_p8), %v4319_v3  ;;  %v332_v11 = vld [vmem:[%s4391_s9 + $0x50] sm:$0xff] (!%p2974_p8)  ;;  %v333_v12 = vld [vmem:[%s4391_s9 + $0x58] sm:$0xff] (!%p2974_p8) }
  0x1a   : > { %s2973_s7 = sshll.u32 %s315_s27, 3  ;;  %367 = vst [vmem:[#allocation2 + $0x68] sm:$0xff] (!%p2974_p8), %v4319_v3  ;;  %368 = vst [vmem:[#allocation2 + $0x70] sm:$0x3] (!%p2974_p8), %v4319_v3  ;;  %v334_v13 = vld [vmem:[%s4391_s9 + $0x60] sm:$0xff] (!%p2974_p8)  ;;  %v335_v14 = vld [vmem:[%s4391_s9 + $0x68] sm:$0xff] (!%p2974_p8) }
  0x1b   : > { %s4408_s26 = scalar_lea.vmem %s6592_s6, %s2973_s7  ;;  %369 = vst [vmem:[#allocation2 + $0x78] sm:$0xff] (!%p2974_p8), %v4319_v3  ;;  %370 = vst [vmem:[#allocation2 + $0x80] sm:$0xff] (!%p2974_p8), %v4319_v3  ;;  %v336_v15 = vld [vmem:[%s4391_s9 + $0x70] sm:$0xff] (!%p2974_p8)  ;;  %v337_v16 = vld [vmem:[%s4391_s9 + $0x78] sm:$0xff] (!%p2974_p8) }
  0x1c   : > { %371 = vst [vmem:[#allocation2 + $0x88] sm:$0x3] %v4319_v3  ;;  %372 = vst [vmem:[#allocation2 + $0x90] sm:$0xff] %v4319_v3  ;;  %v338_v17 = vld [vmem:[%s4391_s9 + $0x80] sm:$0xff]  ;;  %v339_v18 = vld [vmem:[%s4391_s9 + $0x88] sm:$0xff] }
  0x1d   : > { %373 = vst [vmem:[#allocation2 + $0x98] sm:$0xff] %v4319_v3  ;;  %374 = vst [vmem:[#allocation2 + $0xa0] sm:$0x3] %v4319_v3  ;;  %v340_v19 = vld [vmem:[%s4391_s9 + $0x90] sm:$0xff]  ;;  %v341_v20 = vld [vmem:[%s4391_s9 + $0x98] sm:$0xff] }
  0x1e   : > { %375 = vst [vmem:[#allocation2 + $0xa8] sm:$0xff] %v4319_v3  ;;  %376 = vst [vmem:[#allocation2 + $0xb0] sm:$0xff] %v4319_v3  ;;  %v342_v21 = vld [vmem:[%s4391_s9 + $0xa0] sm:$0xff]  ;;  %v343_v22 = vld [vmem:[%s4391_s9 + $0xa8] sm:$0xff] }
  0x1f   : > { %377 = vst [vmem:[#allocation2 + $0xb8] sm:$0x3] %v4319_v3  ;;  %378 = vst [vmem:[#allocation2 + $0xc0] sm:$0xff] %v4319_v3  ;;  %v344_v23 = vld [vmem:[%s4391_s9 + $0xb0] sm:$0xff]  ;;  %v345_v24 = vld [vmem:[%s4391_s9 + $0xb8] sm:$0xff] }
  0x20   : > { %379 = vst [vmem:[#allocation2 + $0xc8] sm:$0xff] %v4319_v3  ;;  %380 = vst [vmem:[#allocation2 + $0xd0] sm:$0x3] %v4319_v3  ;;  %v346_v25 = vld [vmem:[%s4391_s9 + $0xc0] sm:$0xff]  ;;  %v347_v26 = vld [vmem:[%s4391_s9 + $0xc8] sm:$0xff] }
  0x21   : > { %381 = vst [vmem:[#allocation2 + $0xd8] sm:$0xff] %v4319_v3  ;;  %382 = vst [vmem:[#allocation2 + $0xe0] sm:$0xff] %v4319_v3  ;;  %v348_v27 = vld [vmem:[%s4391_s9 + $0xd0] sm:$0xff]  ;;  %v349_v28 = vld [vmem:[%s4391_s9 + $0xd8] sm:$0xff] }
  0x22   : > { %383 = vst [vmem:[#allocation2 + $0xe8] sm:$0x3] %v4319_v3  ;;  %384 = vst [vmem:[#allocation2 + $0xf0] sm:$0xff] %v4319_v3  ;;  %v350_v29 = vld [vmem:[%s4391_s9 + $0xe0] sm:$0xff]  ;;  %v351_v30 = vld [vmem:[%s4391_s9 + $0xe8] sm:$0xff] }
  0x23   : > { %385 = vst [vmem:[#allocation2 + $0xf8] sm:$0xff] %v4319_v3  ;;  %386 = vst [vmem:[#allocation2 + $0x100] sm:$0x3] %v4319_v3  ;;  %v352_v31 = vld [vmem:[%s4391_s9 + $0xf0] sm:$0xff]  ;;  %v353_v32 = vld [vmem:[%s4391_s9 + $0xf8] sm:$0xff] }
  0x24   : > { %387 = vst [vmem:[#allocation2 + $0x108] sm:$0xff] %v4319_v3  ;;  %388 = vst [vmem:[#allocation2 + $0x110] sm:$0xff] %v4319_v3  ;;  %v441_v33 = vld [vmem:[%s4396_s12] sm:$0xff]  ;;  %v442_v34 = vld [vmem:[%s4396_s12 + $0x8] sm:$0xff] }
  0x25   : > { %389 = vst [vmem:[#allocation2 + $0x118] sm:$0x3] %v4319_v3  ;;  %390 = vst [vmem:[#allocation2 + $0x120] sm:$0xff] %v4319_v3  ;;  %v443_v35 = vld [vmem:[%s4396_s12 + $0x10] sm:$0xff]  ;;  %v444_v36 = vld [vmem:[%s4396_s12 + $0x18] sm:$0xff] }
  0x26   : > { %391 = vst [vmem:[#allocation2 + $0x128] sm:$0xff] %v4319_v3  ;;  %392 = vst [vmem:[#allocation2 + $0x130] sm:$0x3] %v4319_v3  ;;  %v445_v37 = vld [vmem:[%s4396_s12 + $0x20] sm:$0xff]  ;;  %v446_v38 = vld [vmem:[%s4396_s12 + $0x28] sm:$0xff] }
  0x27   : > { %393 = vst [vmem:[#allocation2 + $0x138] sm:$0xff] %v4319_v3  ;;  %394 = vst [vmem:[#allocation2 + $0x140] sm:$0xff] %v4319_v3  ;;  %v447_v39 = vld [vmem:[%s4396_s12 + $0x30] sm:$0xff]  ;;  %v448_v40 = vld [vmem:[%s4396_s12 + $0x38] sm:$0xff] }
  0x28   : > { %395 = vst [vmem:[#allocation2 + $0x148] sm:$0x3] %v4319_v3  ;;  %396 = vst [vmem:[#allocation2 + $0x150] sm:$0xff] %v4319_v3  ;;  %v449_v41 = vld [vmem:[%s4396_s12 + $0x40] sm:$0xff]  ;;  %v450_v42 = vld [vmem:[%s4396_s12 + $0x48] sm:$0xff] }
  0x29   : > { %397 = vst [vmem:[#allocation2 + $0x158] sm:$0xff] %v4319_v3  ;;  %398 = vst [vmem:[#allocation2 + $0x160] sm:$0x3] %v4319_v3  ;;  %v451_v43 = vld [vmem:[%s4396_s12 + $0x50] sm:$0xff]  ;;  %v452_v44 = vld [vmem:[%s4396_s12 + $0x58] sm:$0xff] }
  0x2a   : > { %399 = vst [vmem:[#allocation2 + $0x168] sm:$0xff] %v4319_v3  ;;  %400 = vst [vmem:[#allocation2 + $0x170] sm:$0xff] %v4319_v3  ;;  %v453_v45 = vld [vmem:[%s4396_s12 + $0x60] sm:$0xff]  ;;  %v454_v46 = vld [vmem:[%s4396_s12 + $0x68] sm:$0xff] }
  0x2b   : > { %401 = vst [vmem:[#allocation2 + $0x178] sm:$0x3] %v4319_v3  ;;  %402 = vst [vmem:[#allocation2 + $0x180] sm:$0xff] %v4319_v3  ;;  %v455_v47 = vld [vmem:[%s4396_s12 + $0x70] sm:$0xff]  ;;  %v456_v48 = vld [vmem:[%s4396_s12 + $0x78] sm:$0xff] }
  0x2c   : > { %403 = vst [vmem:[#allocation2 + $0x188] sm:$0xff] %v4319_v3  ;;  %404 = vst [vmem:[#allocation2 + $0x190] sm:$0x3] %v4319_v3  ;;  %v457_v49 = vld [vmem:[%s4396_s12 + $0x80] sm:$0xff]  ;;  %v458_v50 = vld [vmem:[%s4396_s12 + $0x88] sm:$0xff] }
  0x2d   : > { %405 = vst [vmem:[#allocation2 + $0x198] sm:$0xff] %v4319_v3  ;;  %406 = vst [vmem:[#allocation2 + $0x1a0] sm:$0xff] %v4319_v3  ;;  %v459_v51 = vld [vmem:[%s4396_s12 + $0x90] sm:$0xff]  ;;  %v460_v52 = vld [vmem:[%s4396_s12 + $0x98] sm:$0xff] }
  0x2e   : > { %407 = vst [vmem:[#allocation2 + $0x1a8] sm:$0x3] %v4319_v3  ;;  %473 = vst [vmem:[#allocation3] sm:$0xff] %v4319_v3  ;;  %v461_v53 = vld [vmem:[%s4396_s12 + $0xa0] sm:$0xff]  ;;  %v462_v54 = vld [vmem:[%s4396_s12 + $0xa8] sm:$0xff] }
  0x2f   : > { %474 = vst [vmem:[#allocation3 + $0x8] sm:$0xff] %v4319_v3  ;;  %475 = vst [vmem:[#allocation3 + $0x10] sm:$0x3] %v4319_v3  ;;  %v463_v55 = vld [vmem:[%s4396_s12 + $0xb0] sm:$0xff]  ;;  %v464_v56 = vld [vmem:[%s4396_s12 + $0xb8] sm:$0xff] }
  0x30   : > { %476 = vst [vmem:[#allocation3 + $0x18] sm:$0xff] %v4319_v3  ;;  %477 = vst [vmem:[#allocation3 + $0x20] sm:$0xff] %v4319_v3  ;;  %v465_v57 = vld [vmem:[%s4396_s12 + $0xc0] sm:$0xff]  ;;  %v466_v58 = vld [vmem:[%s4396_s12 + $0xc8] sm:$0xff] }
  0x31   : > { %478 = vst [vmem:[#allocation3 + $0x28] sm:$0x3] %v4319_v3  ;;  %479 = vst [vmem:[#allocation3 + $0x30] sm:$0xff] %v4319_v3  ;;  %v467_v59 = vld [vmem:[%s4396_s12 + $0xd0] sm:$0xff]  ;;  %v468_v60 = vld [vmem:[%s4396_s12 + $0xd8] sm:$0xff] }
  0x32   : > { %480 = vst [vmem:[#allocation3 + $0x38] sm:$0xff] %v4319_v3  ;;  %481 = vst [vmem:[#allocation3 + $0x40] sm:$0x3] %v4319_v3  ;;  %v469_v61 = vld [vmem:[%s4396_s12 + $0xe0] sm:$0xff]  ;;  %v470_v62 = vld [vmem:[%s4396_s12 + $0xe8] sm:$0xff] }
  0x33   : > { %482 = vst [vmem:[#allocation3 + $0x48] sm:$0xff] %v4319_v3  ;;  %483 = vst [vmem:[#allocation3 + $0x50] sm:$0xff] %v4319_v3  ;;  %v471_v63 = vld [vmem:[%s4396_s12 + $0xf0] sm:$0xff] }
  0x34   : > { %484 = vst [vmem:[#allocation3 + $0x58] sm:$0x3] %v4319_v3  ;;  %485 = vst [vmem:[#allocation3 + $0x60] sm:$0xff] %v4319_v3 }
  0x35   : > { %486 = vst [vmem:[#allocation3 + $0x68] sm:$0xff] %v4319_v3  ;;  %487 = vst [vmem:[#allocation3 + $0x70] sm:$0x3] %v4319_v3 }
  0x36   : > { %488 = vst [vmem:[#allocation3 + $0x78] sm:$0xff] %v4319_v3  ;;  %489 = vst [vmem:[#allocation3 + $0x80] sm:$0xff] %v4319_v3 }
  0x37   : > { %490 = vst [vmem:[#allocation3 + $0x88] sm:$0x3] %v4319_v3  ;;  %491 = vst [vmem:[#allocation3 + $0x90] sm:$0xff] %v4319_v3 }
  0x38   : > { %492 = vst [vmem:[#allocation3 + $0x98] sm:$0xff] %v4319_v3  ;;  %493 = vst [vmem:[#allocation3 + $0xa0] sm:$0x3] %v4319_v3 }
  0x39   : > { %494 = vst [vmem:[#allocation3 + $0xa8] sm:$0xff] %v4319_v3  ;;  %495 = vst [vmem:[#allocation3 + $0xb0] sm:$0xff] %v4319_v3 }
  0x3a   : > { %496 = vst [vmem:[#allocation3 + $0xb8] sm:$0x3] %v4319_v3  ;;  %497 = vst [vmem:[#allocation3 + $0xc0] sm:$0xff] %v4319_v3 }
  0x3b   : > { %498 = vst [vmem:[#allocation3 + $0xc8] sm:$0xff] %v4319_v3  ;;  %499 = vst [vmem:[#allocation3 + $0xd0] sm:$0x3] %v4319_v3 }
  0x3c   : > { %500 = vst [vmem:[#allocation3 + $0xd8] sm:$0xff] %v4319_v3  ;;  %501 = vst [vmem:[#allocation3 + $0xe0] sm:$0xff] %v4319_v3 }
  0x3d   : > { %502 = vst [vmem:[#allocation3 + $0xe8] sm:$0x3] %v4319_v3  ;;  %503 = vst [vmem:[#allocation3 + $0xf0] sm:$0xff] %v4319_v3 }
  0x3e   : > { %504 = vst [vmem:[#allocation3 + $0xf8] sm:$0xff] %v4319_v3  ;;  %505 = vst [vmem:[#allocation3 + $0x100] sm:$0x3] %v4319_v3 }
  0x3f   : > { %506 = vst [vmem:[#allocation3 + $0x108] sm:$0xff] %v4319_v3  ;;  %507 = vst [vmem:[#allocation3 + $0x110] sm:$0xff] %v4319_v3 }
  0x40   : > { %508 = vst [vmem:[#allocation3 + $0x118] sm:$0x3] %v4319_v3  ;;  %509 = vst [vmem:[#allocation3 + $0x120] sm:$0xff] %v4319_v3 }
  0x41   : > { %510 = vst [vmem:[#allocation3 + $0x128] sm:$0xff] %v4319_v3  ;;  %511 = vst [vmem:[#allocation3 + $0x130] sm:$0x3] %v4319_v3 }
  0x42   : > { %512 = vst [vmem:[#allocation3 + $0x138] sm:$0xff] %v4319_v3  ;;  %513 = vst [vmem:[#allocation3 + $0x140] sm:$0xff] %v4319_v3 }
  0x43   : > { %514 = vst [vmem:[#allocation3 + $0x148] sm:$0x3] %v4319_v3  ;;  %515 = vst [vmem:[#allocation3 + $0x150] sm:$0xff] %v4319_v3 }
  0x44   : > { %516 = vst [vmem:[#allocation3 + $0x158] sm:$0xff] %v4319_v3  ;;  %517 = vst [vmem:[#allocation3 + $0x160] sm:$0x3] %v4319_v3 }
  0x45   : > { %518 = vst [vmem:[#allocation3 + $0x168] sm:$0xff] %v4319_v3  ;;  %519 = vst [vmem:[#allocation3 + $0x170] sm:$0xff] %v4319_v3 }
  0x46   : > { %520 = vst [vmem:[#allocation3 + $0x178] sm:$0x3] %v4319_v3  ;;  %521 = vst [vmem:[#allocation3 + $0x180] sm:$0xff] %v4319_v3 }
  0x47   : > { %522 = vst [vmem:[#allocation3 + $0x188] sm:$0xff] %v4319_v3  ;;  %523 = vst [vmem:[#allocation3 + $0x190] sm:$0x3] %v4319_v3 }
  0x48   : > { %524 = vst [vmem:[#allocation3 + $0x198] sm:$0xff] %v4319_v3  ;;  %525 = vst [vmem:[#allocation3 + $0x1a0] sm:$0xff] %v4319_v3 }
  0x49   : > { %526 = vst [vmem:[#allocation3 + $0x1a8] sm:$0x3] %v4319_v3  ;;  %409 = vst [vmem:[#allocation2 + $0x19] sm:$0xff] %v4412_v0  ;;  %v472_v0 = vld [vmem:[%s4396_s12 + $0xf8] sm:$0xff] }
  0x4a   : > { %410 = vst [vmem:[#allocation2 + $0x21] sm:$0xff] %v4415_v1  ;;  %411 = vst [vmem:[#allocation2 + $0x31] sm:$0xff] %v4418_v2 }
  0x4b   : > { %412 = vst [vmem:[#allocation2 + $0x39] sm:$0xff] %v325_v4  ;;  %413 = vst [vmem:[#allocation2 + $0x49] sm:$0xff] %v326_v5 }
  0x4c   : > { %414 = vst [vmem:[#allocation2 + $0x51] sm:$0xff] %v327_v6  ;;  %415 = vst [vmem:[#allocation2 + $0x61] sm:$0xff] %v328_v7 }
  0x4d   : > { %416 = vst [vmem:[#allocation2 + $0x69] sm:$0xff] %v329_v8  ;;  %417 = vst [vmem:[#allocation2 + $0x79] sm:$0xff] %v330_v9 }
  0x4e   : > { %418 = vst [vmem:[#allocation2 + $0x81] sm:$0xff] %v331_v10  ;;  %419 = vst [vmem:[#allocation2 + $0x91] sm:$0xff] %v332_v11 }
  0x4f   : > { %420 = vst [vmem:[#allocation2 + $0x99] sm:$0xff] %v333_v12  ;;  %421 = vst [vmem:[#allocation2 + $0xa9] sm:$0xff] %v334_v13 }
  0x50   : > { %422 = vst [vmem:[#allocation2 + $0xb1] sm:$0xff] %v335_v14  ;;  %423 = vst [vmem:[#allocation2 + $0xc1] sm:$0xff] %v336_v15 }
  0x51   : > { %424 = vst [vmem:[#allocation2 + $0xc9] sm:$0xff] %v337_v16  ;;  %425 = vst [vmem:[#allocation2 + $0xd9] sm:$0xff] %v338_v17 }
  0x52   : > { %426 = vst [vmem:[#allocation2 + $0xe1] sm:$0xff] %v339_v18  ;;  %427 = vst [vmem:[#allocation2 + $0xf1] sm:$0xff] %v340_v19 }
  0x53   : > { %428 = vst [vmem:[#allocation2 + $0xf9] sm:$0xff] %v341_v20  ;;  %429 = vst [vmem:[#allocation2 + $0x109] sm:$0xff] %v342_v21 }
  0x54   : > { %430 = vst [vmem:[#allocation2 + $0x111] sm:$0xff] %v343_v22  ;;  %431 = vst [vmem:[#allocation2 + $0x121] sm:$0xff] %v344_v23 }
  0x55   : > { %432 = vst [vmem:[#allocation2 + $0x129] sm:$0xff] %v345_v24  ;;  %433 = vst [vmem:[#allocation2 + $0x139] sm:$0xff] %v346_v25 }
  0x56   : > { %434 = vst [vmem:[#allocation2 + $0x141] sm:$0xff] %v347_v26  ;;  %435 = vst [vmem:[#allocation2 + $0x151] sm:$0xff] %v348_v27 }
  0x57   : > { %436 = vst [vmem:[#allocation2 + $0x159] sm:$0xff] %v349_v28  ;;  %437 = vst [vmem:[#allocation2 + $0x169] sm:$0xff] %v350_v29 }
  0x58   : > { %438 = vst [vmem:[#allocation2 + $0x171] sm:$0xff] %v351_v30  ;;  %439 = vst [vmem:[#allocation2 + $0x181] sm:$0xff] %v352_v31 }
  0x59   : > { %440 = vst [vmem:[#allocation2 + $0x189] sm:$0xff] %v353_v32  ;;  %528 = vst [vmem:[#allocation3 + $0x19] sm:$0xff] %v441_v33 }
  0x5a   : > { %529 = vst [vmem:[#allocation3 + $0x21] sm:$0xff] %v442_v34  ;;  %530 = vst [vmem:[#allocation3 + $0x31] sm:$0xff] %v443_v35 }
  0x5b   : > { %531 = vst [vmem:[#allocation3 + $0x39] sm:$0xff] %v444_v36  ;;  %532 = vst [vmem:[#allocation3 + $0x49] sm:$0xff] %v445_v37 }
  0x5c   : > { %533 = vst [vmem:[#allocation3 + $0x51] sm:$0xff] %v446_v38  ;;  %534 = vst [vmem:[#allocation3 + $0x61] sm:$0xff] %v447_v39 }
  0x5d   : > { %535 = vst [vmem:[#allocation3 + $0x69] sm:$0xff] %v448_v40  ;;  %536 = vst [vmem:[#allocation3 + $0x79] sm:$0xff] %v449_v41 }
  0x5e   : > { %537 = vst [vmem:[#allocation3 + $0x81] sm:$0xff] %v450_v42  ;;  %538 = vst [vmem:[#allocation3 + $0x91] sm:$0xff] %v451_v43 }
  0x5f   : > { %539 = vst [vmem:[#allocation3 + $0x99] sm:$0xff] %v452_v44  ;;  %540 = vst [vmem:[#allocation3 + $0xa9] sm:$0xff] %v453_v45 }
  0x60   : > { %541 = vst [vmem:[#allocation3 + $0xb1] sm:$0xff] %v454_v46  ;;  %542 = vst [vmem:[#allocation3 + $0xc1] sm:$0xff] %v455_v47 }
  0x61   : > { %543 = vst [vmem:[#allocation3 + $0xc9] sm:$0xff] %v456_v48  ;;  %544 = vst [vmem:[#allocation3 + $0xd9] sm:$0xff] %v457_v49 }
  0x62   : > { %545 = vst [vmem:[#allocation3 + $0xe1] sm:$0xff] %v458_v50  ;;  %546 = vst [vmem:[#allocation3 + $0xf1] sm:$0xff] %v459_v51 }
  0x63   : > { %547 = vst [vmem:[#allocation3 + $0xf9] sm:$0xff] %v460_v52  ;;  %548 = vst [vmem:[#allocation3 + $0x109] sm:$0xff] %v461_v53 }
  0x64   : > { %549 = vst [vmem:[#allocation3 + $0x111] sm:$0xff] %v462_v54  ;;  %550 = vst [vmem:[#allocation3 + $0x121] sm:$0xff] %v463_v55 }
  0x65   : > { %551 = vst [vmem:[#allocation3 + $0x129] sm:$0xff] %v464_v56  ;;  %552 = vst [vmem:[#allocation3 + $0x139] sm:$0xff] %v465_v57 }
  0x66   : > { %553 = vst [vmem:[#allocation3 + $0x141] sm:$0xff] %v466_v58  ;;  %554 = vst [vmem:[#allocation3 + $0x151] sm:$0xff] %v467_v59 }
  0x67   : > { %555 = vst [vmem:[#allocation3 + $0x159] sm:$0xff] %v468_v60  ;;  %556 = vst [vmem:[#allocation3 + $0x169] sm:$0xff] %v469_v61 }
  0x68   : > { %557 = vst [vmem:[#allocation3 + $0x171] sm:$0xff] %v470_v62  ;;  %558 = vst [vmem:[#allocation3 + $0x181] sm:$0xff] %v471_v63 }
  0x69   : > { %559 = vst [vmem:[#allocation3 + $0x189] sm:$0xff] %v472_v0 }
  0x6a PF: > { %v1126_v1 = vld [vmem:[%s6589_s3 + $0x80] sm:$0xff]  ;;  %v1127_v2 = vld [vmem:[%s6589_s3 + $0x88] sm:$0xff]  ;;  %v1128_v6 = vld [vmem:[%s6589_s3 + $0x90] sm:$0xff]  ;;  %s2976_s22 = smul.u32 192, %s4301_s21  ;;  %vm617_vm0 = vcmask 1046528   ;;  %vm674_vm1 = vcmask 1045504  }
  0x6b   : > { %v1110_v3 = vld [vmem:[%s6589_s3] sm:$0xff]  ;;  %v3798_v4 = vpack.c.bf16 %v1127_v2, %v1126_v1  ;;  %v1111_v5 = vld [vmem:[%s6589_s3 + $0x8] sm:$0xff]  ;;  %v1129_v7 = vld [vmem:[%s6589_s3 + $0x98] sm:$0xff]  ;;  %vm2801_vm2 = vcmask 1040384   ;;  %vm2803_vm3 = vcmask 1041408  }
  0x6c   : > { %v3800_v8 = vpack.c.bf16 %v1111_v5, %v1110_v3  ;;  %v3802_v9 = vpack.c.bf16 %v1129_v7, %v1128_v6  ;;  %v1112_v10 = vld [vmem:[%s6589_s3 + $0x10] sm:$0xff]  ;;  %v1113_v11 = vld [vmem:[%s6589_s3 + $0x18] sm:$0xff]  ;;  %v1130_v12 = vld [vmem:[%s6589_s3 + $0xa0] sm:$0xff]  ;;  %s4649_s8 = scalar_lea.vmem [#allocation3], %s2976_s22  ;;  %s5550_s16 = scalar_lea.vmem [#allocation2], %s2976_s22 }
  0x6d   : > { %3799 = vmatprep.subr.bf16.mxu0 %v3798_v4  ;;  %4118 = vmatprep.subr.bf16.mxu1 %v3798_v4  ;;  %v1131_v13 = vld [vmem:[%s6589_s3 + $0xa8] sm:$0xff]  ;;  %v3804_v14 = vpack.c.bf16 %v1113_v11, %v1112_v10  ;;  %v1114_v16 = vld [vmem:[%s6589_s3 + $0x20] sm:$0xff]  ;;  %v1132_v18 = vld [vmem:[%s6589_s3 + $0xb0] sm:$0xff] }
  0x6e   : > { %3801 = vmatpush3.bf16.msra.mxu0 %v3800_v8  ;;  %4126 = vmatpush3.bf16.msra.mxu1 %v3800_v8  ;;  %v3806_v15 = vpack.c.bf16 %v1131_v13, %v1130_v12  ;;  %v1115_v17 = vld [vmem:[%s6589_s3 + $0x28] sm:$0xff]  ;;  %v1133_v19 = vld [vmem:[%s6589_s3 + $0xb8] sm:$0xff]  ;;  %v1116_v22 = vld [vmem:[%s6589_s3 + $0x30] sm:$0xff] }
  0x6f   : > { %3803 = vmatprep.subr.bf16.mxu0 %v3802_v9  ;;  %4119 = vmatprep.subr.bf16.mxu1 %v3802_v9  ;;  %v3808_v20 = vpack.c.bf16 %v1115_v17, %v1114_v16  ;;  %v3810_v21 = vpack.c.bf16 %v1133_v19, %v1132_v18  ;;  %v1117_v23 = vld [vmem:[%s6589_s3 + $0x38] sm:$0xff]  ;;  %v1134_v24 = vld [vmem:[%s6589_s3 + $0xc0] sm:$0xff]  ;;  %v1135_v25 = vld [vmem:[%s6589_s3 + $0xc8] sm:$0xff] }
  0x70   : > { %v4652_v26 = vld [vmem:[%s4649_s8] sm:$0xff]  ;;  %v4655_v27 = vld [vmem:[%s4649_s8 + $0x8] sm:$0xff]  ;;  %v3812_v31 = vpack.c.bf16 %v1117_v23, %v1116_v22  ;;  %v3814_v35 = vpack.c.bf16 %v1135_v25, %v1134_v24  ;;  %v1136_v38 = vld [vmem:[%s6589_s3 + $0xd0] sm:$0xff] }
  0x71   : > { %v964_v28 = vrot.slane %v4652_v26, 1  ;;  %v4659_v29 = vld [vmem:[%s4649_s8 + $0x60] sm:$0xff]  ;;  %v4662_v30 = vld [vmem:[%s4649_s8 + $0x68] sm:$0xff]  ;;  %v965_v32 = vrot.slane %v4655_v27, 1  ;;  %v1137_v39 = vld [vmem:[%s6589_s3 + $0xd8] sm:$0xff] }
  0x72   : > { %3805 = vmatpush3.bf16.msra.mxu0 %v3804_v14  ;;  %4127 = vmatpush3.bf16.msra.mxu1 %v3804_v14  ;;  %v984_v33 = vrot.slane %v4659_v29, 1  ;;  %v985_v34 = vrot.slane %v4662_v30, 1  ;;  %v1118_v36 = vld [vmem:[%s6589_s3 + $0x40] sm:$0xff]  ;;  %v1119_v37 = vld [vmem:[%s6589_s3 + $0x48] sm:$0xff]  ;;  %v3818_v43 = vpack.c.bf16 %v1137_v39, %v1136_v38  ;;  %v1120_v44 = vld [vmem:[%s6589_s3 + $0x50] sm:$0xff] }
  0x73   : > { %3807 = vmatprep.subr.bf16.mxu0 %v3806_v15  ;;  %4120 = vmatprep.subr.bf16.mxu1 %v3806_v15  ;;  %v966_v40 = vsel %vm617_vm0, %v964_v28, %v965_v32  ;;  %v3816_v42 = vpack.c.bf16 %v1119_v37, %v1118_v36  ;;  %v1121_v45 = vld [vmem:[%s6589_s3 + $0x58] sm:$0xff]  ;;  %v1138_v46 = vld [vmem:[%s6589_s3 + $0xe0] sm:$0xff]  ;;  %v1139_v47 = vld [vmem:[%s6589_s3 + $0xe8] sm:$0xff] }
  0x74   : > { %v4685_v41 = vsel %vm617_vm0, %v984_v33, %v985_v34  ;;  %1318 = vmatprep.mubr.f32.mxu0 %v966_v40  ;;  %v3820_v48 = vpack.c.bf16 %v1121_v45, %v1120_v44  ;;  %v3822_v49 = vpack.c.bf16 %v1139_v47, %v1138_v46  ;;  %v1122_v50 = vld [vmem:[%s6589_s3 + $0x60] sm:$0xff]  ;;  %v1123_v51 = vld [vmem:[%s6589_s3 + $0x68] sm:$0xff]  ;;  %v1140_v52 = vld [vmem:[%s6589_s3 + $0xf0] sm:$0xff] }
  0x75   : > { %1358 = vmatprep.mubr.f32.mxu1 %v4685_v41  ;;  %v1141_v53 = vld [vmem:[%s6589_s3 + $0xf8] sm:$0xff]  ;;  %v3824_v54 = vpack.c.bf16 %v1123_v51, %v1122_v50  ;;  %v1124_v56 = vld [vmem:[%s6589_s3 + $0x70] sm:$0xff]  ;;  %v1158_v58 = vld [vmem:[%s6589_s3 + $0x180] sm:$0xff] }
  0x76   : > { %3809 = vmatpush3.bf16.msra.mxu0 %v3808_v20  ;;  %4128 = vmatpush3.bf16.msra.mxu1 %v3808_v20  ;;  %v3826_v55 = vpack.c.bf16 %v1141_v53, %v1140_v52  ;;  %v1125_v57 = vld [vmem:[%s6589_s3 + $0x78] sm:$0xff]  ;;  %v1159_v59 = vld [vmem:[%s6589_s3 + $0x188] sm:$0xff]  ;;  %v1190_v60 = vld [vmem:[%s6589_s3 + $0x280] sm:$0xff] }
  0x77   : > { %3811 = vmatprep.subr.bf16.mxu0 %v3810_v21  ;;  %4121 = vmatprep.subr.bf16.mxu1 %v3810_v21  ;;  %v1191_v61 = vld [vmem:[%s6589_s3 + $0x288] sm:$0xff]  ;;  %v1142_v62 = vld [vmem:[%s6589_s3 + $0x100] sm:$0xff]  ;;  %v4734_v63 = vld [vmem:[%s4649_s8 + $0x10] sm:$0x3]  ;;  %v3828_v1 = vpack.c.bf16 %v1125_v57, %v1124_v56  ;;  %v3830_v5 = vpack.c.bf16 %v1159_v59, %v1158_v58 }
  0x78   : > { %v4737_v0 = vld [vmem:[%s4649_s8 + $0x70] sm:$0x3]  ;;  %v1143_v2 = vld [vmem:[%s6589_s3 + $0x108] sm:$0xff]  ;;  %v1174_v3 = vld [vmem:[%s6589_s3 + $0x200] sm:$0xff]  ;;  %v3862_v6 = vpack.c.bf16 %v1191_v61, %v1190_v60  ;;  %v967_v10 = vrot.slane %v4734_v63, 1 }
  0x79   : > { %v1175_v4 = vld [vmem:[%s6589_s3 + $0x208] sm:$0xff]  ;;  %v1160_v7 = vld [vmem:[%s6589_s3 + $0x190] sm:$0xff]  ;;  %v1161_v8 = vld [vmem:[%s6589_s3 + $0x198] sm:$0xff]  ;;  %v987_v11 = vrot.slane %v4737_v0, 1  ;;  %v3832_v17 = vpack.c.bf16 %v1143_v2, %v1142_v62 }
  0x7a   : > { %3813 = vmatpush3.bf16.msra.mxu0 %v3812_v31  ;;  %4129 = vmatpush3.bf16.msra.mxu1 %v3812_v31  ;;  %v1192_v9 = vld [vmem:[%s6589_s3 + $0x290] sm:$0xff]  ;;  %v1193_v12 = vld [vmem:[%s6589_s3 + $0x298] sm:$0xff]  ;;  %v4766_v14 = vld [vmem:[%s4649_s8 + $0x20] sm:$0xff]  ;;  %v3864_v18 = vpack.c.bf16 %v1175_v4, %v1174_v3  ;;  %v3834_v20 = vpack.c.bf16 %v1161_v8, %v1160_v7  ;;  %v968_v31 = vsel %vm617_vm0, %v965_v32, %v967_v10 }
  0x7b   : > { %3815 = vmatprep.subr.bf16.mxu0 %v3814_v35  ;;  %4122 = vmatprep.subr.bf16.mxu1 %v3814_v35  ;;  %v4763_v13 = vld [vmem:[%s4649_s8 + $0x18] sm:$0xff]  ;;  %v4772_v16 = vld [vmem:[%s4649_s8 + $0x80] sm:$0xff]  ;;  %v1144_v19 = vld [vmem:[%s6589_s3 + $0x110] sm:$0xff]  ;;  %v3866_v21 = vpack.c.bf16 %v1193_v12, %v1192_v9  ;;  %v970_v28 = vrot.slane %v4766_v14, 1  ;;  %v4794_v33 = vsel %vm617_vm0, %v985_v34, %v987_v11 }
  0x7c   : > { %v4769_v15 = vld [vmem:[%s4649_s8 + $0x78] sm:$0xff]  ;;  %v1176_v23 = vld [vmem:[%s6589_s3 + $0x210] sm:$0xff]  ;;  %v969_v25 = vrot.slane %v4763_v13, 1  ;;  %v990_v36 = vrot.slane %v4772_v16, 1  ;;  %v1162_v37 = vld [vmem:[%s6589_s3 + $0x1a0] sm:$0xff] }
  0x7d   : > { %v1145_v22 = vld [vmem:[%s6589_s3 + $0x118] sm:$0xff]  ;;  %v989_v35 = vrot.slane %v4769_v15, 1  ;;  %v1163_v38 = vld [vmem:[%s6589_s3 + $0x1a8] sm:$0xff]  ;;  %v1194_v32 = vld [vmem:[%s6589_s3 + $0x2a0] sm:$0xff] }
  0x7e   : > { %3817 = vmatpush3.bf16.msra.mxu0 %v3816_v42  ;;  %4130 = vmatpush3.bf16.msra.mxu1 %v3816_v42  ;;  %v1177_v24 = vld [vmem:[%s6589_s3 + $0x218] sm:$0xff]  ;;  %v4805_v39 = vld [vmem:[%s4649_s8 + $0x28] sm:$0x3]  ;;  %v3836_v42 = vpack.c.bf16 %v1145_v22, %v1144_v19  ;;  %v1146_v44 = vld [vmem:[%s6589_s3 + $0x120] sm:$0xff]  ;;  %v4829_v47 = vsel %vm617_vm0, %v969_v25, %v970_v28  ;;  %v3838_v53 = vpack.c.bf16 %v1163_v38, %v1162_v37 }
  0x7f   : > { %3819 = vmatprep.subr.bf16.mxu0 %v3818_v43  ;;  %4123 = vmatprep.subr.bf16.mxu1 %v3818_v43  ;;  %v1195_v34 = vld [vmem:[%s6589_s3 + $0x2a8] sm:$0xff]  ;;  %v3868_v43 = vpack.c.bf16 %v1177_v24, %v1176_v23  ;;  %v1178_v46 = vld [vmem:[%s6589_s3 + $0x220] sm:$0xff]  ;;  %v1164_v50 = vld [vmem:[%s6589_s3 + $0x1b0] sm:$0xff]  ;;  %v4842_v52 = vsel %vm617_vm0, %v989_v35, %v990_v36 }
  0x80   : > { %v4816_v40 = vld [vmem:[%s4649_s8 + $0x88] sm:$0x3]  ;;  %v1165_v51 = vld [vmem:[%s6589_s3 + $0x1b8] sm:$0xff]  ;;  %v1196_v56 = vld [vmem:[%s6589_s3 + $0x2b0] sm:$0xff] }
  0x81   : > { %v1147_v45 = vld [vmem:[%s6589_s3 + $0x128] sm:$0xff]  ;;  %v4849_v57 = vld [vmem:[%s4649_s8 + $0x30] sm:$0xff]  ;;  %v4852_v58 = vld [vmem:[%s4649_s8 + $0x38] sm:$0xff]  ;;  %v3842_v4 = vpack.c.bf16 %v1165_v51, %v1164_v50 }
  0x82   : > { %3821 = vmatpush3.bf16.msra.mxu0 %v3820_v48  ;;  %4131 = vmatpush3.bf16.msra.mxu1 %v3820_v48  ;;  %v1179_v48 = vld [vmem:[%s6589_s3 + $0x228] sm:$0xff]  ;;  %v1197_v59 = vld [vmem:[%s6589_s3 + $0x2b8] sm:$0xff]  ;;  %v4860_v60 = vld [vmem:[%s4649_s8 + $0x90] sm:$0xff]  ;;  %v3840_v62 = vpack.c.bf16 %v1147_v45, %v1146_v44  ;;  %v974_v8 = vrot.slane %v4849_v57, 1  ;;  %v975_v9 = vrot.slane %v4852_v58, 1 }
  0x83   : > { %3823 = vmatprep.subr.bf16.mxu0 %v3822_v49  ;;  %4124 = vmatprep.subr.bf16.mxu1 %v3822_v49  ;;  %v972_v49 = vrot.slane %v4805_v39, 1  ;;  %v4863_v61 = vld [vmem:[%s4649_s8 + $0x98] sm:$0xff]  ;;  %v1148_v2 = vld [vmem:[%s6589_s3 + $0x130] sm:$0xff]  ;;  %v3874_v11 = vpack.c.bf16 %v1197_v59, %v1196_v56  ;;  %v994_v12 = vrot.slane %v4860_v60, 1  ;;  %v1167_v19 = vld [vmem:[%s6589_s3 + $0x1c8] sm:$0xff] }
  0x84   : > { %v1181_v7 = vld [vmem:[%s6589_s3 + $0x238] sm:$0xff]  ;;  %v1199_v22 = vld [vmem:[%s6589_s3 + $0x2c8] sm:$0xff]  ;;  %v4907_v23 = vld [vmem:[%s4649_s8 + $0xa0] sm:$0x3] }
  0x85   : > { %v4871_v3 = vsel %vm617_vm0, %v970_v28, %v972_v49  ;;  %v1150_v28 = vld [vmem:[%s6589_s3 + $0x140] sm:$0xff]  ;;  %v1183_v37 = vld [vmem:[%s6589_s3 + $0x248] sm:$0xff]  ;;  %v997_v45 = vrot.slane %v4907_v23, 1  ;;  %v4944_v49 = vld [vmem:[%s4649_s8 + $0x50] sm:$0xff] }
  0x86   : > { %3825 = vmatpush3.bf16.msra.mxu0 %v3824_v54  ;;  %4132 = vmatpush3.bf16.msra.mxu1 %v3824_v54  ;;  %v3870_v54 = vpack.c.bf16 %v1195_v34, %v1194_v32  ;;  %v1182_v35 = vld [vmem:[%s6589_s3 + $0x240] sm:$0xff]  ;;  %v1168_v32 = vld [vmem:[%s6589_s3 + $0x1d0] sm:$0xff]  ;;  %v1169_v34 = vld [vmem:[%s6589_s3 + $0x1d8] sm:$0xff] }
  0x87   : > { %3827 = vmatprep.subr.bf16.mxu0 %v3826_v55  ;;  %4125 = vmatprep.subr.bf16.mxu1 %v3826_v55  ;;  %v992_v55 = vrot.slane %v4816_v40, 1  ;;  %v1201_v50 = vld [vmem:[%s6589_s3 + $0x2d8] sm:$0xff]  ;;  %v4952_v51 = vld [vmem:[%s4649_s8 + $0xa8] sm:$0xff]  ;;  %v1152_v56 = vld [vmem:[%s6589_s3 + $0x150] sm:$0xff] }
  0x89   : > { %v4885_v10 = vsel %vm617_vm0, %v990_v36, %v992_v55  ;;  %v3880_v55 = vpack.c.bf16 %v1183_v37, %v1182_v35  ;;  %v1186_v37 = vld [vmem:[%s6589_s3 + $0x260] sm:$0xff] }
  0x8a   : > { %3829 = vmatpush3.bf16.msra.mxu0 %v3828_v1  ;;  %4133 = vmatpush3.bf16.msra.mxu1 %v3828_v1  ;;  %v3872_v1 = vpack.c.bf16 %v1179_v48, %v1178_v46  ;;  %v1200_v46 = vld [vmem:[%s6589_s3 + $0x2d0] sm:$0xff]  ;;  %v4941_v48 = vld [vmem:[%s4649_s8 + $0x48] sm:$0xff] }
  0x8b   : > { %3831 = vmatprep.subr.bf16.mxu1 %v3830_v5  ;;  %3863 = vmatprep.subr.bf16.mxu0 %v3862_v6  ;;  %v1149_v5 = vld [vmem:[%s6589_s3 + $0x138] sm:$0xff]  ;;  %v1180_v6 = vld [vmem:[%s6589_s3 + $0x230] sm:$0xff] }
  0x8c   : > { %v3844_v24 = vpack.c.bf16 %v1149_v5, %v1148_v2  ;;  %v3876_v25 = vpack.c.bf16 %v1181_v7, %v1180_v6  ;;  %v1184_v2 = vld [vmem:[%s6589_s3 + $0x250] sm:$0xff]  ;;  %v979_v5 = vrot.slane %v4941_v48, 1  ;;  %v980_v6 = vrot.slane %v4944_v49, 1 }
  0x8d   : > { %1319 = vmatmul.mubr.f32.vlgmr.msra.gmra.mrb[0].mxu0 %v4652_v26  ;;  %1359 = vmatmul.mubr.f32.vlgmr.msra.gmra.mrb[0].mxu1 %v4659_v29 }
  0x8e   : > { %3833 = vmatpush3.bf16.msra.mxu1 %v3832_v17  ;;  %3865 = vmatpush3.bf16.msra.mxu0 %v3864_v18  ;;  %v995_v17 = vrot.slane %v4863_v61, 1  ;;  %v1166_v18 = vld [vmem:[%s6589_s3 + $0x1c0] sm:$0xff] }
  0x8f   : > { %1323 = vmatprep.mubr.f32.mxu0 %v968_v31  ;;  %1363 = vmatprep.mubr.f32.mxu1 %v4794_v33  ;;  %v1151_v31 = vld [vmem:[%s6589_s3 + $0x148] sm:$0xff]  ;;  %v3846_v36 = vpack.c.bf16 %v1167_v19, %v1166_v18  ;;  %v1202_v19 = vld [vmem:[%s6589_s3 + $0x2e0] sm:$0xff] }
  0x90   : > { %3835 = vmatprep.subr.bf16.mxu1 %v3834_v20  ;;  %3867 = vmatprep.subr.bf16.mxu0 %v3866_v21  ;;  %v4896_v20 = vld [vmem:[%s4649_s8 + $0x40] sm:$0x3]  ;;  %v4977_v7 = vsel %vm617_vm0, %v995_v17, %v997_v45  ;;  %v1171_v18 = vld [vmem:[%s6589_s3 + $0x1e8] sm:$0xff] }
  0x91   : > { %1324 = vmatmul.mubr.f32.gmra.mrb[2].mxu0 %v4655_v27  ;;  %1364 = vmatmul.mubr.f32.gmra.mrb[2].mxu1 %v4662_v30  ;;  %v1198_v21 = vld [vmem:[%s6589_s3 + $0x2c0] sm:$0xff]  ;;  %v977_v38 = vrot.slane %v4896_v20, 1 }
  0x92   : > { %3837 = vmatpush3.bf16.msra.mxu1 %v3836_v42  ;;  %3869 = vmatpush3.bf16.msra.mxu0 %v3868_v43  ;;  %v4931_v42 = vsel %vm617_vm0, %v974_v8, %v975_v9  ;;  %v4934_v43 = vsel %vm617_vm0, %v994_v12, %v995_v17  ;;  %v3878_v44 = vpack.c.bf16 %v1199_v22, %v1198_v21  ;;  %v1170_v12 = vld [vmem:[%s6589_s3 + $0x1e0] sm:$0xff]  ;;  %v1203_v17 = vld [vmem:[%s6589_s3 + $0x2e8] sm:$0xff]  ;;  %v4996_v21 = vld [vmem:[%s4649_s8 + $0x58] sm:$0x3] }
  0x93   : > { %1328 = vmatprep.mubr.f32.mxu0 %v4829_v47  ;;  %1368 = vmatprep.mubr.f32.mxu1 %v4842_v52  ;;  %v4963_v59 = vsel %vm617_vm0, %v975_v9, %v977_v38  ;;  %v3882_v8 = vpack.c.bf16 %v1201_v50, %v1200_v46  ;;  %v999_v9 = vrot.slane %v4952_v51, 1  ;;  %v4999_v22 = vld [vmem:[%s4649_s8 + $0xb8] sm:$0x3]  ;;  %v3854_v35 = vpack.c.bf16 %v1171_v18, %v1170_v12  ;;  %v1187_v38 = vld [vmem:[%s6589_s3 + $0x268] sm:$0xff]  ;;  %v1172_v46 = vld [vmem:[%s6589_s3 + $0x1f0] sm:$0xff] }
  0x94   : > { %3839 = vmatprep.subr.bf16.mxu1 %v3838_v53  ;;  %3871 = vmatprep.subr.bf16.mxu0 %v3870_v54  ;;  %v4955_v53 = vld [vmem:[%s4649_s8 + $0xb0] sm:$0xff]  ;;  %v3848_v54 = vpack.c.bf16 %v1151_v31, %v1150_v28  ;;  %v1154_v28 = vld [vmem:[%s6589_s3 + $0x160] sm:$0xff]  ;;  %v5007_v31 = vsel %vm617_vm0, %v979_v5, %v980_v6  ;;  %v1002_v45 = vrot.slane %v4999_v22, 1  ;;  %v1173_v50 = vld [vmem:[%s6589_s3 + $0x1f8] sm:$0xff] }
  0x95   : > { %1329 = vmatmul.mubr.f32.gmra.mrb[4].mxu0 %v4763_v13  ;;  %1369 = vmatmul.mubr.f32.gmra.mrb[4].mxu1 %v4769_v15  ;;  %v1188_v5 = vld [vmem:[%s6589_s3 + $0x270] sm:$0xff] }
  0x96   : > { %3841 = vmatpush3.bf16.msra.mxu1 %v3840_v62  ;;  %3873 = vmatpush3.bf16.msra.mxu0 %v3872_v1  ;;  %v3850_v62 = vpack.c.bf16 %v1169_v34, %v1168_v32  ;;  %v1153_v1 = vld [vmem:[%s6589_s3 + $0x158] sm:$0xff]  ;;  %v3886_v34 = vpack.c.bf16 %v1203_v17, %v1202_v19  ;;  %v1026_v17 = vrot.slane %v4766_v14, 2 }
  0x97   : > { %1333 = vmatprep.mubr.f32.mxu0 %v4871_v3  ;;  %1373 = vmatprep.mubr.f32.mxu1 %v4885_v10 }
  0x98   : > { %3843 = vmatprep.subr.bf16.mxu1 %v3842_v4  ;;  %3875 = vmatprep.subr.bf16.mxu0 %v3874_v11  ;;  %v1185_v4 = vld [vmem:[%s6589_s3 + $0x258] sm:$0xff]  ;;  %v1000_v11 = vrot.slane %v4955_v53, 1 }
  0x99   : > { %1334 = vmatmul.mubr.f32.gmra.mrb[6].mxu0 %v4766_v14  ;;  %1374 = vmatmul.mubr.f32.gmra.mrb[6].mxu1 %v4772_v16 }
  0x9a   : > { %3845 = vmatpush3.bf16.msra.mxu1 %v3844_v24  ;;  %3877 = vmatpush3.bf16.msra.mxu0 %v3876_v25  ;;  %v3852_v24 = vpack.c.bf16 %v1153_v1, %v1152_v56  ;;  %v3884_v25 = vpack.c.bf16 %v1185_v4, %v1184_v2  ;;  %v5019_v32 = vsel %vm617_vm0, %v999_v9, %v1000_v11  ;;  %v1156_v1 = vld [vmem:[%s6589_s3 + $0x170] sm:$0xff]  ;;  %v1157_v4 = vld [vmem:[%s6589_s3 + $0x178] sm:$0xff]  ;;  %v1025_v9 = vrot.slane %v4763_v13, 2 }
  0x9b   : > { %1338 = vmatprep.mubr.f32.mxu0 %v4931_v42  ;;  %1378 = vmatprep.mubr.f32.mxu1 %v4934_v43  ;;  %v3858_v2 = vpack.c.bf16 %v1173_v50, %v1172_v46  ;;  %v5056_v18 = vsel %vm617_vm0, %v1000_v11, %v1002_v45  ;;  %v1238_v11 = vld [vmem:[%s6589_s3 + $0x400] sm:$0xff]  ;;  %v1224_v46 = vld [vmem:[%s6589_s3 + $0x390] sm:$0xff]  ;;  %v1225_v50 = vld [vmem:[%s6589_s3 + $0x398] sm:$0xff] }
  0x9c   : > { %3847 = vmatprep.subr.bf16.mxu1 %v3846_v36  ;;  %3879 = vmatprep.subr.bf16.mxu0 %v3878_v44  ;;  %v1155_v36 = vld [vmem:[%s6589_s3 + $0x168] sm:$0xff]  ;;  %v982_v44 = vrot.slane %v4996_v21, 1 }
  0x9d   : > { %1339 = vmatmul.mubr.f32.gmra.mrb[8].mxu0 %v4849_v57  ;;  %1379 = vmatmul.mubr.f32.gmra.mrb[8].mxu1 %v4860_v60  ;;  %v3856_v56 = vpack.c.bf16 %v1155_v36, %v1154_v28  ;;  %v1020_v28 = vrot.slane %v4652_v26, 2  ;;  %v3860_v36 = vpack.c.bf16 %v1157_v4, %v1156_v1  ;;  %v5084_v26 = vsel %vm674_vm1, %v1025_v9, %v1026_v17  ;;  %v1226_v9 = vld [vmem:[%s6589_s3 + $0x3a0] sm:$0xff] }
  0x9e   : > { %3849 = vmatpush3.bf16.msra.mxu1 %v3848_v54  ;;  %3881 = vmatpush3.bf16.msra.mxu0 %v3880_v55  ;;  %v1204_v54 = vld [vmem:[%s6589_s3 + $0x2f0] sm:$0xff]  ;;  %v1205_v55 = vld [vmem:[%s6589_s3 + $0x2f8] sm:$0xff]  ;;  %v5053_v12 = vsel %vm617_vm0, %v980_v6, %v982_v44  ;;  %v1223_v6 = vld [vmem:[%s6589_s3 + $0x388] sm:$0xff]  ;;  %v1028_v44 = vrot.slane %v4805_v39, 2  ;;  %v1030_v1 = vrot.slane %v4849_v57, 2 }
  0x9f   : > { %1343 = vmatprep.mubr.f32.mxu0 %v4963_v59  ;;  %1383 = vmatprep.mubr.f32.mxu1 %v4977_v7  ;;  %v3890_v19 = vpack.c.bf16 %v1205_v55, %v1204_v54  ;;  %v1240_v54 = vld [vmem:[%s6589_s3 + $0x410] sm:$0xff]  ;;  %v1241_v39 = vld [vmem:[%s6589_s3 + $0x418] sm:$0xff] }
  0xa0   : > { %3851 = vmatprep.subr.bf16.mxu1 %v3850_v62  ;;  %3883 = vmatprep.subr.bf16.mxu0 %v3882_v8  ;;  %v3888_v62 = vpack.c.bf16 %v1187_v38, %v1186_v37  ;;  %v1189_v8 = vld [vmem:[%s6589_s3 + $0x278] sm:$0xff]  ;;  %v1206_v38 = vld [vmem:[%s6589_s3 + $0x300] sm:$0xff]  ;;  %v5108_v4 = vsel %vm674_vm1, %v1026_v17, %v1028_v44  ;;  %v1036_v44 = vrot.slane %v4944_v49, 2 }
  0xa1   : > { %1344 = vmatmul.mubr.f32.gmra.mrb[10].mxu0 %v4852_v58  ;;  %1384 = vmatmul.mubr.f32.gmra.mrb[10].mxu1 %v4863_v61  ;;  %v3892_v37 = vpack.c.bf16 %v1189_v8, %v1188_v5  ;;  %v3898_v5 = vpack.c.bf16 %v1225_v50, %v1224_v46  ;;  %v1208_v8 = vld [vmem:[%s6589_s3 + $0x310] sm:$0xff]  ;;  %v1242_v17 = vld [vmem:[%s6589_s3 + $0x420] sm:$0xff] }
  0xa2   : > { %3853 = vmatpush3.bf16.msra.mxu1 %v3852_v24  ;;  %3885 = vmatpush3.bf16.msra.mxu0 %v3884_v25  ;;  %v1222_v24 = vld [vmem:[%s6589_s3 + $0x380] sm:$0xff]  ;;  %v1239_v25 = vld [vmem:[%s6589_s3 + $0x408] sm:$0xff]  ;;  %v1212_v50 = vld [vmem:[%s6589_s3 + $0x330] sm:$0xff] }
  0xa3   : > { %1348 = vmatprep.mubr.f32.mxu0 %v5007_v31  ;;  %1388 = vmatprep.mubr.f32.mxu1 %v5019_v32  ;;  %v3926_v45 = vpack.c.bf16 %v1239_v25, %v1238_v11  ;;  %v1033_v25 = vrot.slane %v4896_v20, 2  ;;  %v1229_v20 = vld [vmem:[%s6589_s3 + $0x3b8] sm:$0xff] }
  0xa4   : > { %3855 = vmatprep.subr.bf16.mxu1 %v3854_v35  ;;  %3887 = vmatprep.subr.bf16.mxu0 %v3886_v34  ;;  %v1021_v35 = vrot.slane %v4655_v27, 2  ;;  %v1207_v34 = vld [vmem:[%s6589_s3 + $0x308] sm:$0xff]  ;;  %v3894_v27 = vpack.c.bf16 %v1223_v6, %v1222_v24 }
  0xa5   : > { %1349 = vmatmul.mubr.f32.gmra.mrb[12].mxu0 %v4941_v48  ;;  %1389 = vmatmul.mubr.f32.gmra.mrb[12].mxu1 %v4952_v51  ;;  %v1243_v24 = vld [vmem:[%s6589_s3 + $0x428] sm:$0xff] }
  0xa6   : > { %3857 = vmatpush3.bf16.msra.mxu1 %v3856_v56  ;;  %3889 = vmatpush3.bf16.msra.mxu0 %v3888_v62  ;;  %v1022_v55 = vsel %vm674_vm1, %v1020_v28, %v1021_v35  ;;  %v3896_v56 = vpack.c.bf16 %v1207_v34, %v1206_v38  ;;  %v1023_v62 = vrot.slane %v4734_v63, 2  ;;  %v1209_v63 = vld [vmem:[%s6589_s3 + $0x318] sm:$0xff]  ;;  %v1244_v38 = vld [vmem:[%s6589_s3 + $0x430] sm:$0xff] }
  0xa7   : > { %1353 = vmatprep.mubr.f32.mxu0 %v5053_v12  ;;  %1393 = vmatprep.mubr.f32.mxu1 %v5056_v18  ;;  %v3900_v11 = vpack.c.bf16 %v1209_v63, %v1208_v8  ;;  %v1245_v34 = vld [vmem:[%s6589_s3 + $0x438] sm:$0xff]  ;;  %v1214_v63 = vld [vmem:[%s6589_s3 + $0x340] sm:$0xff] }
  0xa8   : > { %3859 = vmatprep.subr.bf16.mxu1 %v3858_v2  ;;  %3891 = vmatprep.subr.bf16.mxu0 %v3890_v19  ;;  %v1031_v2 = vrot.slane %v4852_v58, 2  ;;  %v1227_v19 = vld [vmem:[%s6589_s3 + $0x3a8] sm:$0xff]  ;;  %v1024_v6 = vsel %vm674_vm1, %v1021_v35, %v1023_v62  ;;  %v3934_v35 = vpack.c.bf16 %v1243_v24, %v1242_v17  ;;  %v1246_v62 = vld [vmem:[%s6589_s3 + $0x440] sm:$0xff]  ;;  %v1248_v17 = vld [vmem:[%s6589_s3 + $0x450] sm:$0xff] }
  0xa9   : > { %1354 = vmatmul.mubr.f32.gmra.mrb[14].mxu0 %v4944_v49  ;;  %1394 = vmatmul.mubr.f32.gmra.mrb[14].mxu1 %v4955_v53  ;;  %v3902_v28 = vpack.c.bf16 %v1227_v19, %v1226_v9  ;;  %v1232_v19 = vld [vmem:[%s6589_s3 + $0x3d0] sm:$0xff]  ;;  %v1249_v24 = vld [vmem:[%s6589_s3 + $0x458] sm:$0xff] }
  0xaa   : > { %3861 = vmatpush3.bf16.msra.mxu1 %v3860_v36  ;;  %3893 = vmatpush3.bf16.msra.mxu0 %v3892_v37  ;;  %v1210_v36 = vld [vmem:[%s6589_s3 + $0x320] sm:$0xff]  ;;  %v1228_v37 = vld [vmem:[%s6589_s3 + $0x3b0] sm:$0xff] }
  0xab   : > { %1463 = vmatprep.mubr.f32.mxu1 %v4763_v13  ;;  %1608 = vmatprep.mubr.f32.mxu0 %v5084_v26  ;;  %v3930_v13 = vpack.c.bf16 %v1241_v39, %v1240_v54  ;;  %v3906_v46 = vpack.c.bf16 %v1229_v20, %v1228_v37  ;;  %v1213_v54 = vld [vmem:[%s6589_s3 + $0x338] sm:$0xff]  ;;  %v3938_v39 = vpack.c.bf16 %v1245_v34, %v1244_v38  ;;  %v1234_v37 = vld [vmem:[%s6589_s3 + $0x3e0] sm:$0xff]  ;;  %v1235_v20 = vld [vmem:[%s6589_s3 + $0x3e8] sm:$0xff] }
  0xac   : > { %3895 = vmatprep.subr.bf16.mxu1 %v3894_v27  ;;  %3927 = vmatprep.subr.bf16.mxu0 %v3926_v45  ;;  %v5158_v27 = vsel %vm674_vm1, %v1031_v2, %v1033_v25  ;;  %v1250_v38 = vld [vmem:[%s6589_s3 + $0x460] sm:$0xff]  ;;  %v1251_v34 = vld [vmem:[%s6589_s3 + $0x468] sm:$0xff] }
  0xad   : > { %1464 = vmatmul.mubr.f32.vlgmr.msra.gmra.mrb[16].mxu1 %v1022_v55  ;;  %1609 = vmatmul.mubr.f32.vlgmr.msra.gmra.mrb[16].mxu0 %v4829_v47  ;;  %v5133_v47 = vsel %vm674_vm1, %v1030_v1, %v1031_v2  ;;  %v1230_v55 = vld [vmem:[%s6589_s3 + $0x3c0] sm:$0xff]  ;;  %v1247_v1 = vld [vmem:[%s6589_s3 + $0x448] sm:$0xff]  ;;  %v1038_v2 = vrot.slane %v4996_v21, 2  ;;  %v1233_v21 = vld [vmem:[%s6589_s3 + $0x3d8] sm:$0xff] }
  0xae   : > { %3897 = vmatpush3.bf16.msra.mxu1 %v3896_v56  ;;  %1468 = vmatprep.mubr.f32.mxu1 %v4766_v14  ;;  %v1211_v14 = vld [vmem:[%s6589_s3 + $0x328] sm:$0xff]  ;;  %v3942_v9 = vpack.c.bf16 %v1247_v1, %v1246_v62  ;;  %v1253_v62 = vld [vmem:[%s6589_s3 + $0x478] sm:$0xff] }
  0xaf   : > { %1613 = vmatprep.mubr.f32.mxu0 %v5108_v4  ;;  %3929 = vmatpush3.bf16.msra.mxu0 %v3926_v45  ;;  %v3904_v45 = vpack.c.bf16 %v1211_v14, %v1210_v36  ;;  %v1231_v56 = vld [vmem:[%s6589_s3 + $0x3c8] sm:$0xff]  ;;  %v1216_v36 = vld [vmem:[%s6589_s3 + $0x350] sm:$0xff]  ;;  %v1217_v14 = vld [vmem:[%s6589_s3 + $0x358] sm:$0xff] }
  0xb0   : > { %3899 = vmatprep.subr.bf16.mxu1 %v3898_v5  ;;  %3931 = vmatprep.subr.bf16.mxu0 %v3930_v13  ;;  %v3908_v5 = vpack.c.bf16 %v1213_v54, %v1212_v50  ;;  %v3910_v8 = vpack.c.bf16 %v1231_v56, %v1230_v55  ;;  %v1218_v50 = vld [vmem:[%s6589_s3 + $0x360] sm:$0xff]  ;;  %v1219_v54 = vld [vmem:[%s6589_s3 + $0x368] sm:$0xff]  ;;  %v1236_v55 = vld [vmem:[%s6589_s3 + $0x3f0] sm:$0xff] }
  0xb1   : > { %1469 = vmatmul.mubr.f32.gmra.mrb[18].mxu1 %v1024_v6  ;;  %1614 = vmatmul.mubr.f32.gmra.mrb[18].mxu0 %v4871_v3  ;;  %v1035_v3 = vrot.slane %v4941_v48, 2  ;;  %v1040_v6 = vrot.slane %v4659_v29, 2  ;;  %v1252_v56 = vld [vmem:[%s6589_s3 + $0x470] sm:$0xff] }
  0xb2   : > { %1473 = vmatprep.mubr.f32.mxu1 %v4849_v57  ;;  %1618 = vmatprep.mubr.f32.mxu0 %v5133_v47 }
  0xb3   : > { %3901 = vmatpush3.bf16.msra.mxu1 %v3900_v11  ;;  %3933 = vmatpush3.bf16.msra.mxu0 %v3930_v13  ;;  %v1215_v13 = vld [vmem:[%s6589_s3 + $0x348] sm:$0xff]  ;;  %v1041_v11 = vrot.slane %v4662_v30, 2 }
  0xb4   : > { %3903 = vmatprep.subr.bf16.mxu1 %v3902_v28  ;;  %3935 = vmatprep.subr.bf16.mxu0 %v3934_v35  ;;  %v3912_v25 = vpack.c.bf16 %v1215_v13, %v1214_v63  ;;  %v3914_v28 = vpack.c.bf16 %v1233_v21, %v1232_v19  ;;  %v1220_v13 = vld [vmem:[%s6589_s3 + $0x370] sm:$0xff]  ;;  %v781_v19 = vld [vmem:[%s6588_s2 + $0x80] sm:$0xff]  ;;  %v782_v21 = vld [vmem:[%s6588_s2 + $0x88] sm:$0xff] }
  0xb5   : > { %1474 = vmatmul.mubr.f32.gmra.mrb[20].mxu1 %v5084_v26  ;;  %1619 = vmatmul.mubr.f32.gmra.mrb[20].mxu0 %v4931_v42  ;;  %v5185_v26 = vsel %vm674_vm1, %v1035_v3, %v1036_v44  ;;  %v5238_v3 = vsel %vm674_vm1, %v1040_v6, %v1041_v11 }
  0xb6   : > { %1478 = vmatprep.mubr.f32.mxu1 %v4852_v58  ;;  %1623 = vmatprep.mubr.f32.mxu0 %v5158_v27 }
  0xb7   : > { %3905 = vmatpush3.bf16.msra.mxu1 %v3904_v45  ;;  %3937 = vmatpush3.bf16.msra.mxu0 %v3934_v35  ;;  %v3946_v35 = vpack.c.bf16 %v1249_v24, %v1248_v17  ;;  %v3916_v45 = vpack.c.bf16 %v1217_v14, %v1216_v36  ;;  %v813_v17 = vld [vmem:[%s6588_s2 + $0x180] sm:$0xff]  ;;  %v814_v24 = vld [vmem:[%s6588_s2 + $0x188] sm:$0xff]  ;;  %v1051_v14 = vrot.slane %v4863_v61, 2 }
  0xb8   : > { %3907 = vmatprep.subr.bf16.mxu1 %v3906_v46  ;;  %3939 = vmatprep.subr.bf16.mxu0 %v3938_v39  ;;  %v3918_v46 = vpack.c.bf16 %v1235_v20, %v1234_v37  ;;  %v3990_v36 = vpack.c.bf16 %v814_v24, %v813_v17  ;;  %v1056_v20 = vrot.slane %v4955_v53, 2  ;;  %v800_v17 = vld [vmem:[%s6588_s2 + $0x118] sm:$0xff] }
  0xb9   : > { %1479 = vmatmul.mubr.f32.gmra.mrb[22].mxu1 %v5108_v4  ;;  %1624 = vmatmul.mubr.f32.gmra.mrb[22].mxu0 %v4963_v59  ;;  %v5211_v4 = vsel %vm674_vm1, %v1036_v44, %v1038_v2  ;;  %v1043_v44 = vrot.slane %v4737_v0, 2  ;;  %v1237_v0 = vld [vmem:[%s6589_s3 + $0x3f8] sm:$0xff]  ;;  %v1045_v2 = vrot.slane %v4769_v15, 2 }
  0xba   : > { %1483 = vmatprep.mubr.f32.mxu1 %v4941_v48  ;;  %1628 = vmatprep.mubr.f32.mxu0 %v5185_v26  ;;  %v3922_v63 = vpack.c.bf16 %v1237_v0, %v1236_v55 }
  0xbb   : > { %3909 = vmatpush3.bf16.msra.mxu1 %v3908_v5  ;;  %3941 = vmatpush3.bf16.msra.mxu0 %v3938_v39  ;;  %v3950_v39 = vpack.c.bf16 %v1251_v34, %v1250_v38  ;;  %v5264_v1 = vsel %vm674_vm1, %v1041_v11, %v1043_v44  ;;  %v1046_v5 = vrot.slane %v4772_v16, 2  ;;  %v1048_v11 = vrot.slane %v4816_v40, 2  ;;  %v5329_v38 = vld [vmem:[%s4649_s8 + $0xc0] sm:$0xff]  ;;  %v5332_v34 = vld [vmem:[%s4649_s8 + $0xc8] sm:$0xff] }
  0xbc   : > { %3911 = vmatprep.subr.bf16.mxu1 %v3910_v8  ;;  %3943 = vmatprep.subr.bf16.mxu0 %v3942_v9  ;;  %v3920_v8 = vpack.c.bf16 %v1219_v54, %v1218_v50  ;;  %v1050_v40 = vrot.slane %v4860_v60, 2  ;;  %v1086_v44 = vrot.slane %v5329_v38, 2 }
  0xbd   : > { %1484 = vmatmul.mubr.f32.gmra.mrb[24].mxu1 %v5133_v47  ;;  %1629 = vmatmul.mubr.f32.gmra.mrb[24].mxu0 %v5007_v31  ;;  %v5291_v6 = vsel %vm674_vm1, %v1045_v2, %v1046_v5  ;;  %v797_v2 = vld [vmem:[%s6588_s2 + $0x100] sm:$0xff] }
  0xbe   : > { %1488 = vmatprep.mubr.f32.mxu1 %v4944_v49  ;;  %1633 = vmatprep.mubr.f32.mxu0 %v5211_v4 }
  0xbf   : > { %3913 = vmatpush3.bf16.msra.mxu1 %v3912_v25  ;;  %3945 = vmatpush3.bf16.msra.mxu0 %v3942_v9  ;;  %v3954_v9 = vpack.c.bf16 %v1253_v62, %v1252_v56  ;;  %v765_v56 = vld [vmem:[%s6588_s2] sm:$0xff]  ;;  %v766_v62 = vld [vmem:[%s6588_s2 + $0x8] sm:$0xff] }
  0xc0   : > { %3915 = vmatprep.subr.bf16.mxu1 %v3914_v28  ;;  %3947 = vmatprep.subr.bf16.mxu0 %v3946_v35  ;;  %v3958_v28 = vpack.c.bf16 %v782_v21, %v781_v19  ;;  %v799_v21 = vld [vmem:[%s6588_s2 + $0x110] sm:$0xff] }
  0xc1   : > { %1489 = vmatmul.mubr.f32.gmra.mrb[26].mxu1 %v5158_v27  ;;  %1634 = vmatmul.mubr.f32.gmra.mrb[26].mxu0 %v5053_v12 }
  0xc2   : > { %1493 = vmatprep.mubr.f32.mxu1 %v4659_v29  ;;  %1638 = vmatprep.mubr.f32.mxu0 %v5238_v3  ;;  %v1221_v29 = vld [vmem:[%s6589_s3 + $0x378] sm:$0xff] }
  0xc3   : > { %3917 = vmatpush3.bf16.msra.mxu1 %v3916_v45  ;;  %3949 = vmatpush3.bf16.msra.mxu0 %v3946_v35  ;;  %v3924_v25 = vpack.c.bf16 %v1221_v29, %v1220_v13  ;;  %v1053_v35 = vrot.slane %v4907_v23, 2  ;;  %v1058_v23 = vrot.slane %v4999_v22, 2  ;;  %v1087_v45 = vrot.slane %v5332_v34, 2  ;;  %v936_v22 = vld [vmem:[%s4649_s8 + $0xd0] sm:$0x3]  ;;  %v784_v29 = vld [vmem:[%s6588_s2 + $0x98] sm:$0xff] }
  0xc4   : > { %3919 = vmatprep.subr.bf16.mxu1 %v3918_v46  ;;  %3951 = vmatprep.subr.bf16.mxu0 %v3950_v39  ;;  %v1080_v46 = vrot.slane %v5332_v34, 1  ;;  %v1089_v54 = vrot.slane %v936_v22, 2  ;;  %v783_v13 = vld [vmem:[%s6588_s2 + $0x90] sm:$0xff] }
  0xc5   : > { %1494 = vmatmul.mubr.f32.gmra.mrb[28].mxu1 %v5185_v26  ;;  %1639 = vmatmul.mubr.f32.gmra.mrb[28].mxu0 %v4685_v41  ;;  %v5316_v37 = vsel %vm674_vm1, %v1051_v14, %v1053_v35  ;;  %v5351_v50 = vsel %vm674_vm1, %v1086_v44, %v1087_v45  ;;  %v819_v35 = vld [vmem:[%s6588_s2 + $0x1b0] sm:$0xff] }
  0xc6   : > { %1498 = vmatprep.mubr.f32.mxu1 %v4662_v30  ;;  %1643 = vmatprep.mubr.f32.mxu0 %v5264_v1  ;;  %v5299_v30 = vsel %vm674_vm1, %v1046_v5, %v1048_v11  ;;  %v5361_v55 = vsel %vm674_vm1, %v1087_v45, %v1089_v54  ;;  %v798_v5 = vld [vmem:[%s6588_s2 + $0x108] sm:$0xff]  ;;  %v3962_v11 = vpack.c.bf16 %v784_v29, %v783_v13  ;;  %v821_v45 = vld [vmem:[%s6588_s2 + $0x1c0] sm:$0xff]  ;;  %v772_v13 = vld [vmem:[%s6588_s2 + $0x38] sm:$0xff] }
  0xc7   : > { %3921 = vmatpush3.bf16.msra.mxu1 %v3920_v8  ;;  %3953 = vmatpush3.bf16.msra.mxu0 %v3950_v39  ;;  %v1082_v39 = vrot.slane %v936_v22, 1  ;;  %v815_v8 = vld [vmem:[%s6588_s2 + $0x190] sm:$0xff]  ;;  %v3992_v19 = vpack.c.bf16 %v798_v5, %v797_v2  ;;  %v770_v22 = vld [vmem:[%s6588_s2 + $0x28] sm:$0xff]  ;;  %v808_v2 = vld [vmem:[%s6588_s2 + $0x158] sm:$0xff] }
  0xc8   : > { %3923 = vmatprep.subr.bf16.mxu1 %v3922_v63  ;;  %3955 = vmatprep.subr.bf16.mxu0 %v3954_v9  ;;  %v816_v63 = vld [vmem:[%s6588_s2 + $0x198] sm:$0xff] }
  0xc9   : > { %1499 = vmatmul.mubr.f32.gmra.mrb[30].mxu1 %v5211_v4  ;;  %1644 = vmatmul.mubr.f32.gmra.mrb[30].mxu0 %v4794_v33  ;;  %v5368_v0 = vsel %vm617_vm0, %v1080_v46, %v1082_v39  ;;  %v3994_v24 = vpack.c.bf16 %v816_v63, %v815_v8  ;;  %v823_v39 = vld [vmem:[%s6588_s2 + $0x1d0] sm:$0xff]  ;;  %v4271_v63 = vld [vmem:[%s4649_s8 + $0x60] sm:$0xff]  ;;  %v5507_v29 = vld [vmem:[%s4649_s8 + $0xd8] sm:$0xff] }
  0xca   : > { %1503 = vmatprep.mubr.f32.mxu1 %v4769_v15  ;;  %1648 = vmatprep.mubr.f32.mxu0 %v5291_v6  ;;  %v5308_v15 = vsel %vm674_vm1, %v1050_v40, %v1051_v14  ;;  %v771_v8 = vld [vmem:[%s6588_s2 + $0x30] sm:$0xff] }
  0xcb   : > { %3925 = vmatpush3.bf16.msra.mxu1 %v3924_v25  ;;  %3957 = vmatpush3.bf16.msra.mxu0 %v3954_v9  ;;  %v3960_v9 = vpack.c.bf16 %v766_v62, %v765_v56  ;;  %v817_v25 = vld [vmem:[%s6588_s2 + $0x1a0] sm:$0xff]  ;;  %v788_v56 = vld [vmem:[%s6588_s2 + $0xb8] sm:$0xff] }
  0xcc   : > { %3959 = vmatprep.subr.bf16.mxu1 %v3958_v28  ;;  %3991 = vmatprep.subr.bf16.mxu0 %v3990_v36  ;;  %v768_v28 = vld [vmem:[%s6588_s2 + $0x18] sm:$0xff]  ;;  %v3996_v36 = vpack.c.bf16 %v800_v17, %v799_v21  ;;  %v810_v17 = vld [vmem:[%s6588_s2 + $0x168] sm:$0xff] }
  0xcd   : > { %1504 = vmatmul.mubr.f32.gmra.mrb[32].mxu1 %v5238_v3  ;;  %1649 = vmatmul.mubr.f32.gmra.mrb[32].mxu0 %v4842_v52 }
  0xce   : > { %1508 = vmatprep.mubr.f32.mxu1 %v4772_v16  ;;  %1653 = vmatprep.mubr.f32.mxu0 %v5299_v30  ;;  %v1055_v16 = vrot.slane %v4952_v51, 2 }
  0xd1   : > { %1509 = vmatmul.mubr.f32.gmra.mrb[34].mxu1 %v5264_v1  ;;  %1654 = vmatmul.mubr.f32.gmra.mrb[34].mxu0 %v4885_v10 }
  0xd2   : > { %1513 = vmatprep.mubr.f32.mxu1 %v4860_v60  ;;  %1658 = vmatprep.mubr.f32.mxu0 %v5308_v15  ;;  %v5325_v60 = vsel %vm674_vm1, %v1055_v16, %v1056_v20  ;;  %v786_v16 = vld [vmem:[%s6588_s2 + $0xa8] sm:$0xff] }
  0xd5   : > { %1514 = vmatmul.mubr.f32.gmra.mrb[36].mxu1 %v5291_v6  ;;  %1659 = vmatmul.mubr.f32.gmra.mrb[36].mxu0 %v4934_v43 }
  0xd6   : > { %1518 = vmatprep.mubr.f32.mxu1 %v4863_v61  ;;  %1663 = vmatprep.mubr.f32.mxu0 %v5316_v37  ;;  %v5339_v61 = vsel %vm674_vm1, %v1056_v20, %v1058_v23 }
  0xd9   : > { %1519 = vmatmul.mubr.f32.gmra.mrb[38].mxu1 %v5299_v30  ;;  %1664 = vmatmul.mubr.f32.gmra.mrb[38].mxu0 %v4977_v7 }
  0xda   : > { %1523 = vmatprep.mubr.f32.mxu1 %v4952_v51  ;;  %1668 = vmatprep.mubr.f32.mxu0 %v5325_v60  ;;  %v1079_v51 = vrot.slane %v5329_v38, 1 }
  0xdd   : > { %1524 = vmatmul.mubr.f32.gmra.mrb[40].mxu1 %v5308_v15  ;;  %1669 = vmatmul.mubr.f32.gmra.mrb[40].mxu0 %v5019_v32 }
  0xde   : > { %1528 = vmatprep.mubr.f32.mxu1 %v4955_v53  ;;  %1673 = vmatprep.mubr.f32.mxu0 %v5339_v61  ;;  %v5358_v53 = vsel %vm617_vm0, %v1079_v51, %v1080_v46 }
  0xe1   : > { %1529 = vmatmul.mubr.f32.gmra.mrb[42].mxu1 %v5316_v37  ;;  %1674 = vmatmul.mubr.f32.gmra.mrb[42].mxu0 %v5056_v18 }
  0xe2   : > { %1533 = vmatprep.mubr.f32.mxu1 %v5329_v38  ;;  %1678 = vmatprep.mubr.f32.mxu0 %v5351_v50 }
  0xe5   : > { %1534 = vmatmul.mubr.f32.gmra.mrb[44].mxu1 %v5325_v60  ;;  %1679 = vmatmul.mubr.f32.gmra.mrb[44].mxu0 %v5358_v53 }
  0xe6   : > { %1538 = vmatprep.mubr.f32.mxu1 %v5332_v34  ;;  %1683 = vmatprep.mubr.f32.mxu0 %v5361_v55 }
  0xe9   : > { %1539 = vmatmul.mubr.f32.gmra.mrb[46].mxu1 %v5339_v61  ;;  %1684 = vmatmul.mubr.f32.gmra.mrb[46].mxu0 %v5368_v0 }
  0xea   : > { %1753 = vmatprep.mubr.f32.mxu1 %v4931_v42  ;;  %3718 = vmatprep.mubr.f32.mxu0 %v5133_v47  ;;  %v818_v42 = vld [vmem:[%s6588_s2 + $0x1a8] sm:$0xff]  ;;  %v767_v47 = vld [vmem:[%s6588_s2 + $0x10] sm:$0xff] }
  0xeb   : > { %v3998_v40 = vpack.c.bf16 %v818_v42, %v817_v25  ;;  %v3964_v14 = vpack.c.bf16 %v768_v28, %v767_v47  ;;  %v1103_v25 = vrot.slane %v5507_v29, 2  ;;  %v828_v42 = vld [vmem:[%s6588_s2 + $0x1f8] sm:$0xff]  ;;  %v4272_v47 = vld [vmem:[%s4649_s8 + $0x68] sm:$0xff]  ;;  %v789_v28 = vld [vmem:[%s6588_s2 + $0xc0] sm:$0xff] }
  0xed   : > { %1754 = vmatmul.mubr.f32.vlgmr.msra.gmra.mrb[48].mxu1 %v4849_v57  ;;  %3719 = vmatmul.mubr.f32.vlgmr.msra.gmra.mrb[48].mxu0 %v5158_v27  ;;  %v801_v57 = vld [vmem:[%s6588_s2 + $0x120] sm:$0xff]  ;;  %v802_v27 = vld [vmem:[%s6588_s2 + $0x128] sm:$0xff] }
  0xee   : > { %3961 = vmatpush3.bf16.msra.mxu1 %v3960_v9  ;;  %3993 = vmatpush3.bf16.msra.mxu0 %v3992_v19  ;;  %v4000_v20 = vpack.c.bf16 %v802_v27, %v801_v57  ;;  %v5510_v9 = vld [vmem:[%s4649_s8 + $0xe0] sm:$0xff]  ;;  %v811_v27 = vld [vmem:[%s6588_s2 + $0x170] sm:$0xff] }
  0xef   : > { %1758 = vmatprep.mubr.f32.mxu1 %v4963_v59  ;;  %3721 = vmatprep.mubr.f32.mxu0 %v5185_v26  ;;  %v820_v59 = vld [vmem:[%s6588_s2 + $0x1b8] sm:$0xff]  ;;  %v785_v26 = vld [vmem:[%s6588_s2 + $0xa0] sm:$0xff] }
  0xf0   : > { %3995 = vmatprep.subr.bf16.mxu0 %v3994_v24  ;;  %3963 = vmatprep.subr.bf16.mxu1 %v3962_v11  ;;  %v4002_v23 = vpack.c.bf16 %v820_v59, %v819_v35  ;;  %v3966_v44 = vpack.c.bf16 %v786_v16, %v785_v26  ;;  %v5521_v24 = vld [vmem:[%s4649_s8 + $0xe8] sm:$0x3]  ;;  %v3972_v11 = vpack.c.bf16 %v772_v13, %v771_v8  ;;  %v773_v26 = vld [vmem:[%s6588_s2 + $0x40] sm:$0xff] }
  0xf1   : > { %1759 = vmatmul.mubr.f32.gmra.mrb[50].mxu1 %v4852_v58  ;;  %3722 = vmatmul.mubr.f32.gmra.mrb[50].mxu0 %v5211_v4  ;;  %v803_v58 = vld [vmem:[%s6588_s2 + $0x130] sm:$0xff]  ;;  %v804_v4 = vld [vmem:[%s6588_s2 + $0x138] sm:$0xff]  ;;  %v1106_v57 = vrot.slane %v5521_v24, 2  ;;  %v5556_v35 = vld [vmem:[%s5550_s16 + $0x8] sm:$0xff] }
  0xf2   : > { %3997 = vmatpush3.bf16.msra.mxu0 %v3996_v36  ;;  %1763 = vmatprep.mubr.f32.mxu1 %v5007_v31  ;;  %v822_v31 = vld [vmem:[%s6588_s2 + $0x1c8] sm:$0xff]  ;;  %v4004_v51 = vpack.c.bf16 %v804_v4, %v803_v58  ;;  %v791_v4 = vld [vmem:[%s6588_s2 + $0xd0] sm:$0xff] }
  0xf3   : > { %3724 = vmatprep.mubr.f32.mxu0 %v5238_v3  ;;  %3999 = vmatprep.subr.bf16.mxu0 %v3998_v40  ;;  %v769_v3 = vld [vmem:[%s6588_s2 + $0x20] sm:$0xff]  ;;  %v4006_v46 = vpack.c.bf16 %v822_v31, %v821_v45  ;;  %v790_v36 = vld [vmem:[%s6588_s2 + $0xc8] sm:$0xff] }
  0xf4   : > { %3965 = vmatpush3.bf16.msra.mxu1 %v3964_v14  ;;  %v3968_v54 = vpack.c.bf16 %v770_v22, %v769_v3  ;;  %v812_v14 = vld [vmem:[%s6588_s2 + $0x178] sm:$0xff]  ;;  %v774_v16 = vld [vmem:[%s6588_s2 + $0x48] sm:$0xff]  ;;  %v676_v22 = vrot.slane %v5556_v35, 2 }
  0xf5   : > { %1764 = vmatmul.mubr.f32.gmra.mrb[52].mxu1 %v4941_v48  ;;  %3725 = vmatmul.mubr.f32.gmra.mrb[52].mxu0 %v5264_v1  ;;  %v805_v48 = vld [vmem:[%s6588_s2 + $0x140] sm:$0xff]  ;;  %v806_v1 = vld [vmem:[%s6588_s2 + $0x148] sm:$0xff]  ;;  %v4020_v31 = vpack.c.bf16 %v812_v14, %v811_v27 }
  0xf6   : > { %4001 = vmatpush3.bf16.msra.mxu0 %v4000_v20  ;;  %1768 = vmatprep.mubr.f32.mxu1 %v5053_v12  ;;  %v824_v12 = vld [vmem:[%s6588_s2 + $0x1d8] sm:$0xff]  ;;  %v4008_v62 = vpack.c.bf16 %v806_v1, %v805_v48  ;;  %v877_v20 = vld [vmem:[%s6588_s2 + $0x380] sm:$0xff]  ;;  %v878_v58 = vld [vmem:[%s6588_s2 + $0x388] sm:$0xff] }
  0xf7   : > { %3727 = vmatprep.mubr.f32.mxu0 %v5291_v6  ;;  %4003 = vmatprep.subr.bf16.mxu0 %v4002_v23  ;;  %v787_v6 = vld [vmem:[%s6588_s2 + $0xb0] sm:$0xff]  ;;  %v4273_v23 = vld [vmem:[%s4649_s8 + $0x78] sm:$0xff]  ;;  %v861_v48 = vld [vmem:[%s6588_s2 + $0x300] sm:$0xff]  ;;  %v4054_v1 = vpack.c.bf16 %v878_v58, %v877_v20 }
  0xf8   : > { %3967 = vmatprep.subr.bf16.mxu1 %v3966_v44  ;;  %v3970_v5 = vpack.c.bf16 %v788_v56, %v787_v6  ;;  %v792_v44 = vld [vmem:[%s6588_s2 + $0xd8] sm:$0xff]  ;;  %v879_v6 = vld [vmem:[%s6588_s2 + $0x390] sm:$0xff]  ;;  %v4274_v56 = vld [vmem:[%s4649_s8 + $0x80] sm:$0xff] }
  0xf9   : > { %1769 = vmatmul.mubr.f32.gmra.mrb[54].mxu1 %v4944_v49  ;;  %3728 = vmatmul.mubr.f32.gmra.mrb[54].mxu0 %v5299_v30  ;;  %v4010_v49 = vpack.c.bf16 %v824_v12, %v823_v39  ;;  %v807_v30 = vld [vmem:[%s6588_s2 + $0x150] sm:$0xff]  ;;  %v776_v12 = vld [vmem:[%s6588_s2 + $0x58] sm:$0xff]  ;;  %v845_v58 = vld [vmem:[%s6588_s2 + $0x280] sm:$0xff] }
  0xfa   : > { %4005 = vmatpush3.bf16.msra.mxu0 %v4004_v51  ;;  %1773 = vmatprep.mubr.f32.mxu1 %v4685_v41  ;;  %v825_v41 = vld [vmem:[%s6588_s2 + $0x1e0] sm:$0xff]  ;;  %v4012_v19 = vpack.c.bf16 %v808_v2, %v807_v30  ;;  %v3976_v51 = vpack.c.bf16 %v774_v16, %v773_v26  ;;  %v775_v39 = vld [vmem:[%s6588_s2 + $0x50] sm:$0xff]  ;;  %v794_v30 = vld [vmem:[%s6588_s2 + $0xe8] sm:$0xff] }
  0xfb   : > { %3730 = vmatprep.mubr.f32.mxu0 %v5308_v15  ;;  %4007 = vmatprep.subr.bf16.mxu0 %v4006_v46  ;;  %v826_v15 = vld [vmem:[%s6588_s2 + $0x1e8] sm:$0xff]  ;;  %v5587_v46 = vld [vmem:[%s5550_s16 + $0x10] sm:$0x3]  ;;  %v3980_v8 = vpack.c.bf16 %v776_v12, %v775_v39  ;;  %v780_v26 = vld [vmem:[%s6588_s2 + $0x78] sm:$0xff] }
  0xfc   : > { %3969 = vmatpush3.bf16.msra.mxu1 %v3968_v54  ;;  %v4014_v21 = vpack.c.bf16 %v826_v15, %v825_v41  ;;  %v3978_v54 = vpack.c.bf16 %v792_v44, %v791_v4  ;;  %v5619_v41 = vld [vmem:[%s5550_s16 + $0x20] sm:$0xff]  ;;  %v883_v16 = vld [vmem:[%s6588_s2 + $0x3b0] sm:$0xff]  ;;  %v4276_v20 = vld [vmem:[%s4649_s8 + $0x98] sm:$0xff] }
  0xfd   : > { %1774 = vmatmul.mubr.f32.gmra.mrb[56].mxu1 %v4271_v63  ;;  %3731 = vmatmul.mubr.f32.gmra.mrb[56].mxu0 %v5316_v37  ;;  %v809_v37 = vld [vmem:[%s6588_s2 + $0x160] sm:$0xff]  ;;  %v863_v63 = vld [vmem:[%s6588_s2 + $0x310] sm:$0xff]  ;;  %v846_v4 = vld [vmem:[%s6588_s2 + $0x288] sm:$0xff] }
  0xfe   : > { %4009 = vmatpush3.bf16.msra.mxu0 %v4008_v62  ;;  %1778 = vmatprep.mubr.f32.mxu1 %v4794_v33  ;;  %v1104_v33 = vrot.slane %v5510_v9, 2  ;;  %v4016_v40 = vpack.c.bf16 %v810_v17, %v809_v37  ;;  %v880_v62 = vld [vmem:[%s6588_s2 + $0x398] sm:$0xff]  ;;  %v778_v37 = vld [vmem:[%s6588_s2 + $0x68] sm:$0xff]  ;;  %v881_v17 = vld [vmem:[%s6588_s2 + $0x3a0] sm:$0xff] }
  0xff   : > { %3733 = vmatprep.mubr.f32.mxu0 %v5325_v60  ;;  %4011 = vmatprep.subr.bf16.mxu0 %v4010_v49  ;;  %v827_v60 = vld [vmem:[%s6588_s2 + $0x1f0] sm:$0xff]  ;;  %v793_v49 = vld [vmem:[%s6588_s2 + $0xe0] sm:$0xff]  ;;  %v4058_v13 = vpack.c.bf16 %v880_v62, %v879_v6  ;;  %v886_v39 = vld [vmem:[%s6588_s2 + $0x3c8] sm:$0xff] }
 0x100   : > { %3971 = vmatprep.subr.bf16.mxu1 %v3970_v5  ;;  %v1105_v59 = vsel %vm674_vm1, %v1103_v25, %v1104_v33  ;;  %v1107_v45 = vsel %vm674_vm1, %v1104_v33, %v1106_v57  ;;  %v678_v5 = vrot.slane %v5587_v46, 2  ;;  %v882_v25 = vld [vmem:[%s6588_s2 + $0x3a8] sm:$0xff]  ;;  %v795_v33 = vld [vmem:[%s6588_s2 + $0xf0] sm:$0xff] }
 0x101   : > { %1779 = vmatmul.mubr.f32.gmra.mrb[58].mxu1 %v4272_v47  ;;  %3734 = vmatmul.mubr.f32.gmra.mrb[58].mxu0 %v5339_v61  ;;  %v4018_v61 = vpack.c.bf16 %v828_v42, %v827_v60  ;;  %v796_v60 = vld [vmem:[%s6588_s2 + $0xf8] sm:$0xff]  ;;  %v5650_v47 = vld [vmem:[%s5550_s16 + $0x30] sm:$0xff]  ;;  %v4062_v14 = vpack.c.bf16 %v882_v25, %v881_v17  ;;  %v5713_v62 = vld [vmem:[%s5550_s16 + $0x48] sm:$0xff] }
 0x102   : > { %4013 = vmatpush3.bf16.msra.mxu0 %v4012_v19  ;;  %1783 = vmatprep.mubr.f32.mxu1 %v4842_v52  ;;  %v5553_v52 = vld [vmem:[%s5550_s16] sm:$0xff]  ;;  %v3982_v19 = vpack.c.bf16 %v794_v30, %v793_v49  ;;  %v679_v42 = vsel %vm674_vm1, %v676_v22, %v678_v5  ;;  %v685_v6 = vrot.slane %v5650_v47, 2  ;;  %v870_v5 = vld [vmem:[%s6588_s2 + $0x348] sm:$0xff]  ;;  %v872_v25 = vld [vmem:[%s6588_s2 + $0x358] sm:$0xff] }
 0x103   : > { %3736 = vmatprep.mubr.f32.mxu0 %v5351_v50  ;;  %4015 = vmatprep.subr.bf16.mxu0 %v4014_v21  ;;  %v3974_v50 = vpack.c.bf16 %v790_v36, %v789_v28  ;;  %v675_v3 = vrot.slane %v5553_v52, 2  ;;  %v777_v21 = vld [vmem:[%s6588_s2 + $0x60] sm:$0xff]  ;;  %v681_v36 = vrot.slane %v5619_v41, 2 }
 0x104   : > { %3973 = vmatpush3.bf16.msra.mxu1 %v3972_v11  ;;  %v4275_v11 = vld [vmem:[%s4649_s8 + $0x90] sm:$0xff]  ;;  %v3984_v27 = vpack.c.bf16 %v778_v37, %v777_v21  ;;  %v5716_v49 = vld [vmem:[%s5550_s16 + $0x40] sm:$0x3]  ;;  %v1096_v21 = vrot.slane %v5507_v29, 1  ;;  %v1097_v37 = vrot.slane %v5510_v9, 1 }
 0x105   : > { %1784 = vmatmul.mubr.f32.gmra.mrb[60].mxu1 %v4273_v23  ;;  %3737 = vmatmul.mubr.f32.gmra.mrb[60].mxu0 %v5361_v55  ;;  %v5582_v55 = vld [vmem:[%s5550_s16 + $0x18] sm:$0xff]  ;;  %v677_v2 = vsel %vm674_vm1, %v675_v3, %v676_v22 }
 0x106   : > { %4017 = vmatpush3.bf16.msra.mxu0 %v4016_v40  ;;  %1788 = vmatprep.mubr.f32.mxu1 %v4885_v10  ;;  %v862_v10 = vld [vmem:[%s6588_s2 + $0x308] sm:$0xff]  ;;  %v680_v28 = vrot.slane %v5582_v55, 2  ;;  %v884_v23 = vld [vmem:[%s6588_s2 + $0x3b8] sm:$0xff] }
 0x107   : > { %3739 = vmatprep.mubr.f32.mxu0 %v1105_v59  ;;  %4019 = vmatprep.subr.bf16.mxu0 %v4018_v61  ;;  %v4056_v15 = vpack.c.bf16 %v862_v10, %v861_v48  ;;  %v5655_v40 = vld [vmem:[%s5550_s16 + $0x28] sm:$0x3]  ;;  %v3986_v59 = vpack.c.bf16 %v796_v60, %v795_v33  ;;  %v868_v48 = vld [vmem:[%s6588_s2 + $0x338] sm:$0xff]  ;;  %v4022_v10 = vpack.c.bf16 %v846_v4, %v845_v58  ;;  %v889_v33 = vld [vmem:[%s6588_s2 + $0x3e0] sm:$0xff]  ;;  %v619_v58 = vrot.slane %v5556_v35, 1 }
 0x108   : > { %3975 = vmatprep.subr.bf16.mxu1 %v3974_v50  ;;  %v866_v61 = vld [vmem:[%s6588_s2 + $0x328] sm:$0xff]  ;;  %v779_v50 = vld [vmem:[%s6588_s2 + $0x70] sm:$0xff]  ;;  %v5685_v44 = vsel %vm674_vm1, %v680_v28, %v681_v36  ;;  %v690_v28 = vrot.slane %v5713_v62, 2 }
 0x109   : > { %1789 = vmatmul.mubr.f32.gmra.mrb[62].mxu1 %v4274_v56  ;;  %3740 = vmatmul.mubr.f32.gmra.mrb[62].mxu0 %v1107_v45  ;;  %v683_v45 = vrot.slane %v5655_v40, 2  ;;  %v3988_v22 = vpack.c.bf16 %v780_v26, %v779_v50  ;;  %v890_v60 = vld [vmem:[%s6588_s2 + $0x3e8] sm:$0xff]  ;;  %v892_v50 = vld [vmem:[%s6588_s2 + $0x3f8] sm:$0xff] }
 0x10a   : > { %4021 = vmatpush3.bf16.msra.mxu0 %v4020_v31  ;;  %1793 = vmatprep.mubr.f32.mxu1 %v4934_v43  ;;  %v864_v43 = vld [vmem:[%s6588_s2 + $0x318] sm:$0xff] }
 0x10b   : > { %2188 = vmatprep.mubr.f32.mxu0 %v5582_v55  ;;  %3977 = vmatpush3.bf16.msra.mxu1 %v3976_v51  ;;  %v4060_v57 = vpack.c.bf16 %v864_v43, %v863_v63  ;;  %v5689_v31 = vld [vmem:[%s5550_s16 + $0x38] sm:$0xff]  ;;  %v4066_v51 = vpack.c.bf16 %v884_v23, %v883_v16  ;;  %v5708_v12 = vsel %vm674_vm1, %v681_v36, %v683_v45  ;;  %v618_v23 = vrot.slane %v5553_v52, 1 }
 0x10c   : > { %4055 = vmatprep.subr.bf16.mxu0 %v4054_v1  ;;  %3979 = vmatprep.subr.bf16.mxu1 %v3978_v54  ;;  %v4277_v1 = vld [vmem:[%s4649_s8 + $0xa8] sm:$0xff]  ;;  %v885_v54 = vld [vmem:[%s6588_s2 + $0x3c0] sm:$0xff]  ;;  %v686_v56 = vrot.slane %v5689_v31, 2  ;;  %v888_v63 = vld [vmem:[%s6588_s2 + $0x3d8] sm:$0xff]  ;;  %v1098_v36 = vsel %vm617_vm0, %v1096_v21, %v1097_v37  ;;  %v623_v21 = vrot.slane %v5582_v55, 1 }
 0x10d   : > { %1794 = vmatmul.mubr.f32.gmra.mrb[64].mxu1 %v4275_v11  ;;  %2189 = vmatmul.mubr.f32.vlgmr.msra.gmra.mrb[64].mxu0 %v677_v2  ;;  %v869_v2 = vld [vmem:[%s6588_s2 + $0x340] sm:$0xff] }
 0x10e   : > { %1798 = vmatprep.mubr.f32.mxu1 %v4977_v7  ;;  %2193 = vmatprep.mubr.f32.mxu0 %v5619_v41  ;;  %v865_v7 = vld [vmem:[%s6588_s2 + $0x320] sm:$0xff]  ;;  %v5735_v43 = vsel %vm674_vm1, %v685_v6, %v686_v56  ;;  %v4072_v17 = vpack.c.bf16 %v870_v5, %v869_v2  ;;  %v830_v6 = vld [vmem:[%s6588_s2 + $0x208] sm:$0xff]  ;;  %v847_v2 = vld [vmem:[%s6588_s2 + $0x290] sm:$0xff] }
 0x10f   : > { %4057 = vmatpush3.bf16.msra.mxu0 %v4056_v15  ;;  %3981 = vmatpush3.bf16.msra.mxu1 %v3980_v8  ;;  %v4064_v3 = vpack.c.bf16 %v866_v61, %v865_v7  ;;  %v4278_v15 = vld [vmem:[%s4649_s8 + $0xb0] sm:$0xff]  ;;  %v5770_v7 = vld [vmem:[%s5550_s16 + $0x58] sm:$0x3]  ;;  %v4078_v61 = vpack.c.bf16 %v890_v60, %v889_v33  ;;  %v850_v33 = vld [vmem:[%s6588_s2 + $0x2a8] sm:$0xff] }
 0x110   : > { %4059 = vmatprep.subr.bf16.mxu0 %v4058_v13  ;;  %3983 = vmatprep.subr.bf16.mxu1 %v3982_v19  ;;  %v887_v8 = vld [vmem:[%s6588_s2 + $0x3d0] sm:$0xff]  ;;  %v688_v13 = vrot.slane %v5716_v49, 2  ;;  %v693_v16 = vrot.slane %v5770_v7, 2  ;;  %v848_v5 = vld [vmem:[%s6588_s2 + $0x298] sm:$0xff] }
 0x111   : > { %1799 = vmatmul.mubr.f32.gmra.mrb[66].mxu1 %v4276_v20  ;;  %2194 = vmatmul.mubr.f32.gmra.mrb[66].mxu0 %v679_v42  ;;  %v5739_v19 = vld [vmem:[%s5550_s16 + $0x50] sm:$0xff]  ;;  %v4074_v11 = vpack.c.bf16 %v888_v63, %v887_v8  ;;  %v5793_v20 = vld [vmem:[%s5550_s16 + $0x68] sm:$0xff] }
 0x112   : > { %1803 = vmatprep.mubr.f32.mxu1 %v5019_v32  ;;  %2198 = vmatprep.mubr.f32.mxu0 %v5650_v47  ;;  %v867_v32 = vld [vmem:[%s6588_s2 + $0x330] sm:$0xff]  ;;  %v5760_v42 = vsel %vm674_vm1, %v686_v56, %v688_v13  ;;  %v621_v56 = vrot.slane %v5587_v46, 1 }
 0x113   : > { %4061 = vmatpush3.bf16.msra.mxu0 %v4060_v57  ;;  %3985 = vmatpush3.bf16.msra.mxu1 %v3984_v27  ;;  %v4068_v30 = vpack.c.bf16 %v868_v48, %v867_v32  ;;  %v5766_v57 = vld [vmem:[%s5550_s16 + $0x60] sm:$0xff]  ;;  %v1099_v27 = vrot.slane %v5521_v24, 1  ;;  %v891_v24 = vld [vmem:[%s6588_s2 + $0x3f0] sm:$0xff]  ;;  %v894_v32 = vld [vmem:[%s6588_s2 + $0x408] sm:$0xff] }
 0x114   : > { %4063 = vmatprep.subr.bf16.mxu0 %v4062_v14  ;;  %3987 = vmatprep.subr.bf16.mxu1 %v3986_v59  ;;  %v873_v14 = vld [vmem:[%s6588_s2 + $0x360] sm:$0xff]  ;;  %v874_v59 = vld [vmem:[%s6588_s2 + $0x368] sm:$0xff]  ;;  %v4082_v45 = vpack.c.bf16 %v892_v50, %v891_v24  ;;  %v622_v13 = vsel %vm617_vm0, %v619_v58, %v621_v56  ;;  %v851_v50 = vld [vmem:[%s6588_s2 + $0x2b0] sm:$0xff]  ;;  %v631_v56 = vrot.slane %v5716_v49, 1 }
 0x115   : > { %1804 = vmatmul.mubr.f32.gmra.mrb[68].mxu1 %v4277_v1  ;;  %2199 = vmatmul.mubr.f32.gmra.mrb[68].mxu0 %v5685_v44  ;;  %v4080_v4 = vpack.c.bf16 %v874_v59, %v873_v14  ;;  %v696_v1 = vrot.slane %v5793_v20, 2  ;;  %v833_v59 = vld [vmem:[%s6588_s2 + $0x220] sm:$0xff]  ;;  %v834_v24 = vld [vmem:[%s6588_s2 + $0x228] sm:$0xff]  ;;  %v855_v49 = vld [vmem:[%s6588_s2 + $0x2d0] sm:$0xff] }
 0x116   : > { %1808 = vmatprep.mubr.f32.mxu1 %v5056_v18  ;;  %2203 = vmatprep.mubr.f32.mxu0 %v5689_v31  ;;  %v4070_v18 = vpack.c.bf16 %v886_v39, %v885_v54  ;;  %v620_v54 = vsel %vm617_vm0, %v618_v23, %v619_v58  ;;  %v829_v39 = vld [vmem:[%s6588_s2 + $0x200] sm:$0xff]  ;;  %v5907_v23 = vld [vmem:[%s5550_s16 + $0x98] sm:$0xff]  ;;  %v628_v58 = vrot.slane %v5650_v47, 1 }
 0x117   : > { %4065 = vmatpush3.bf16.msra.mxu0 %v4064_v3  ;;  %3989 = vmatpush3.bf16.msra.mxu1 %v3988_v22  ;;  %v875_v3 = vld [vmem:[%s6588_s2 + $0x370] sm:$0xff]  ;;  %v876_v22 = vld [vmem:[%s6588_s2 + $0x378] sm:$0xff]  ;;  %v4024_v8 = vpack.c.bf16 %v830_v6, %v829_v39  ;;  %v5936_v6 = vld [vmem:[%s5550_s16 + $0xa8] sm:$0xff] }
 0x118   : > { %4067 = vmatprep.subr.bf16.mxu0 %v4066_v51  ;;  %4023 = vmatprep.subr.bf16.mxu1 %v4022_v10  ;;  %v893_v51 = vld [vmem:[%s6588_s2 + $0x400] sm:$0xff]  ;;  %v5816_v10 = vld [vmem:[%s5550_s16 + $0x78] sm:$0xff] }
 0x119   : > { %1809 = vmatmul.mubr.f32.gmra.mrb[70].mxu1 %v4278_v15  ;;  %2204 = vmatmul.mubr.f32.gmra.mrb[70].mxu0 %v5708_v12  ;;  %v5837_v15 = vpack.c.bf16 %v894_v32, %v893_v51  ;;  %v836_v51 = vld [vmem:[%s6588_s2 + $0x238] sm:$0xff]  ;;  %v853_v32 = vld [vmem:[%s6588_s2 + $0x2c0] sm:$0xff] }
 0x11a   : > { %1813 = vmatprep.mubr.f32.mxu1 %v5358_v53  ;;  %2208 = vmatprep.mubr.f32.mxu0 %v5713_v62  ;;  %v871_v53 = vld [vmem:[%s6588_s2 + $0x350] sm:$0xff] }
 0x11b   : > { %4069 = vmatpush3.bf16.msra.mxu0 %v4068_v30  ;;  %v5829_v30 = vld [vmem:[%s5550_s16 + $0x70] sm:$0x3] }
 0x11c   : > { %4071 = vmatprep.subr.bf16.mxu0 %v4070_v18  ;;  %v4084_v18 = vpack.c.bf16 %v876_v22, %v875_v3  ;;  %v698_v63 = vrot.slane %v5829_v30, 2  ;;  %v835_v22 = vld [vmem:[%s6588_s2 + $0x230] sm:$0xff] }
 0x11d   : > { %1814 = vmatmul.mubr.f32.gmra.mrb[72].mxu1 %v5329_v38  ;;  %2209 = vmatmul.mubr.f32.gmra.mrb[72].mxu0 %v5735_v43  ;;  %v691_v38 = vrot.slane %v5739_v19, 2 }
 0x11e   : > { %1818 = vmatprep.mubr.f32.mxu1 %v5368_v0  ;;  %2213 = vmatprep.mubr.f32.mxu0 %v5739_v19  ;;  %v4076_v0 = vpack.c.bf16 %v872_v25, %v871_v53  ;;  %v832_v53 = vld [vmem:[%s6588_s2 + $0x218] sm:$0xff]  ;;  %v849_v25 = vld [vmem:[%s6588_s2 + $0x2a0] sm:$0xff]  ;;  %v5868_v60 = vsel %vm674_vm1, %v696_v1, %v698_v63  ;;  %v838_v63 = vld [vmem:[%s6588_s2 + $0x248] sm:$0xff] }
 0x11f   : > { %4073 = vmatpush3.bf16.msra.mxu0 %v4072_v17  ;;  %v5788_v26 = vsel %vm674_vm1, %v690_v28, %v691_v38  ;;  %v5813_v48 = vsel %vm674_vm1, %v691_v38, %v693_v16  ;;  %v4026_v17 = vpack.c.bf16 %v848_v5, %v847_v2  ;;  %v700_v28 = vrot.slane %v5816_v10, 2 }
 0x120   : > { %4075 = vmatprep.subr.bf16.mxu0 %v4074_v11  ;;  %v831_v11 = vld [vmem:[%s6588_s2 + $0x210] sm:$0xff]  ;;  %v4030_v14 = vpack.c.bf16 %v850_v33, %v849_v25  ;;  %v4036_v2 = vpack.c.bf16 %v836_v51, %v835_v22  ;;  %v842_v22 = vld [vmem:[%s6588_s2 + $0x268] sm:$0xff]  ;;  %v860_v51 = vld [vmem:[%s6588_s2 + $0x2f8] sm:$0xff] }
 0x121   : > { %1819 = vmatmul.mubr.f32.gmra.mrb[74].mxu1 %v5332_v34  ;;  %2214 = vmatmul.mubr.f32.gmra.mrb[74].mxu0 %v5760_v42  ;;  %v1100_v34 = vsel %vm617_vm0, %v1097_v37, %v1099_v27  ;;  %v624_v37 = vrot.slane %v5619_v41, 1  ;;  %v4028_v27 = vpack.c.bf16 %v832_v53, %v831_v11  ;;  %v633_v11 = vrot.slane %v5713_v62, 1 }
 0x122   : > { %1823 = vmatprep.mubr.f32.mxu1 %v1098_v36  ;;  %2218 = vmatprep.mubr.f32.mxu0 %v5766_v57  ;;  %v5877_v36 = vld [vmem:[%s5550_s16 + $0x90] sm:$0xff]  ;;  %v634_v53 = vrot.slane %v5739_v19, 1 }
 0x123   : > { %4077 = vmatpush3.bf16.msra.mxu0 %v4076_v0  ;;  %v626_v0 = vrot.slane %v5655_v40, 1  ;;  %v852_v40 = vld [vmem:[%s6588_s2 + $0x2b8] sm:$0xff] }
 0x124   : > { %4079 = vmatprep.subr.bf16.mxu0 %v4078_v61  ;;  %v5881_v61 = vld [vmem:[%s5550_s16 + $0x88] sm:$0x3]  ;;  %v4034_v3 = vpack.c.bf16 %v852_v40, %v851_v50  ;;  %v5992_v50 = vsel %vm617_vm0, %v633_v11, %v634_v53  ;;  %v5995_v40 = vld [vmem:[%s5550_s16 + $0xc0] sm:$0xff]  ;;  %v641_v11 = vrot.slane %v5829_v30, 1 }
 0x125   : > { %1824 = vmatmul.mubr.f32.gmra.mrb[76].mxu1 %v5507_v29  ;;  %2219 = vmatmul.mubr.f32.gmra.mrb[76].mxu0 %v5788_v26  ;;  %v695_v29 = vrot.slane %v5766_v57, 2 }
 0x126   : > { %1828 = vmatprep.mubr.f32.mxu1 %v1100_v34  ;;  %2223 = vmatprep.mubr.f32.mxu0 %v5793_v20  ;;  %v703_v34 = vrot.slane %v5881_v61, 2 }
 0x127   : > { %4081 = vmatpush3.bf16.msra.mxu0 %v4080_v4  ;;  %v5843_v46 = vsel %vm674_vm1, %v695_v29, %v696_v1  ;;  %v629_v4 = vrot.slane %v5689_v31, 1  ;;  %v854_v29 = vld [vmem:[%s6588_s2 + $0x2c8] sm:$0xff] }
 0x128   : > { %4083 = vmatprep.subr.bf16.mxu0 %v4082_v45  ;;  %v4032_v45 = vpack.c.bf16 %v834_v24, %v833_v59  ;;  %v4038_v5 = vpack.c.bf16 %v854_v29, %v853_v32  ;;  %v710_v59 = vrot.slane %v5936_v6, 2 }
 0x129   : > { %1829 = vmatmul.mubr.f32.gmra.mrb[78].mxu1 %v5510_v9  ;;  %2224 = vmatmul.mubr.f32.gmra.mrb[78].mxu0 %v5813_v48  ;;  %v5850_v9 = vld [vmem:[%s5550_s16 + $0x80] sm:$0xff]  ;;  %v5933_v39 = vsel %vm617_vm0, %v628_v58, %v629_v4  ;;  %v5999_v58 = vld [vmem:[%s5550_s16 + $0xb8] sm:$0x3] }
 0x12a   : > { %2043 = vmatprep.mubr.f32.mxu1 %v620_v54  ;;  %2228 = vmatprep.mubr.f32.mxu0 %v5816_v10  ;;  %v701_v38 = vrot.slane %v5850_v9, 2  ;;  %v705_v54 = vrot.slane %v5877_v36, 2  ;;  %v713_v29 = vrot.slane %v5999_v58, 2 }
 0x12b   : > { %4085 = vmatpush3.bf16.msra.mxu0 %v4084_v18  ;;  %v5940_v18 = vld [vmem:[%s5550_s16 + $0xa0] sm:$0x3] }
 0x12c   : > { %4087 = vmatprep.subr.bf16.mxu0 %v5837_v15  ;;  %v5900_v16 = vsel %vm674_vm1, %v700_v28, %v701_v38  ;;  %v5928_v1 = vsel %vm674_vm1, %v701_v38, %v703_v34  ;;  %v839_v28 = vld [vmem:[%s6588_s2 + $0x250] sm:$0xff]  ;;  %v840_v38 = vld [vmem:[%s6588_s2 + $0x258] sm:$0xff]  ;;  %v636_v34 = vrot.slane %v5770_v7, 1 }
 0x12d   : > { %2044 = vmatmul.mubr.f32.vlgmr.msra.gmra.mrb[80].mxu1 %v5553_v52  ;;  %2229 = vmatmul.mubr.f32.gmra.mrb[80].mxu0 %v5843_v46  ;;  %v5874_v52 = vsel %vm617_vm0, %v623_v21, %v624_v37  ;;  %v859_v7 = vld [vmem:[%s6588_s2 + $0x2f0] sm:$0xff] }
 0x12e   : > { %4025 = vmatpush3.bf16.msra.mxu1 %v4024_v8  ;;  %2048 = vmatprep.mubr.f32.mxu1 %v622_v13  ;;  %v837_v8 = vld [vmem:[%s6588_s2 + $0x240] sm:$0xff]  ;;  %v856_v13 = vld [vmem:[%s6588_s2 + $0x2d8] sm:$0xff] }
 0x12f   : > { %2233 = vmatprep.mubr.f32.mxu0 %v5850_v9  ;;  %4027 = vmatprep.subr.bf16.mxu1 %v4026_v17  ;;  %v5966_v17 = vld [vmem:[%s5550_s16 + $0xb0] sm:$0xff]  ;;  %v4040_v25 = vpack.c.bf16 %v838_v63, %v837_v8  ;;  %v4042_v33 = vpack.c.bf16 %v856_v13, %v855_v49  ;;  %v4050_v8 = vpack.c.bf16 %v860_v51, %v859_v7  ;;  %v844_v49 = vld [vmem:[%s6588_s2 + $0x278] sm:$0xff]  ;;  %v902_v7 = vld [vmem:[%s6588_s2 + $0x448] sm:$0xff] }
 0x130   : > { %v711_v24 = vrot.slane %v5966_v17, 2  ;;  %v843_v63 = vld [vmem:[%s6588_s2 + $0x270] sm:$0xff] }
 0x131   : > { %2049 = vmatmul.mubr.f32.gmra.mrb[82].mxu1 %v5556_v35  ;;  %2234 = vmatmul.mubr.f32.gmra.mrb[82].mxu0 %v5868_v60  ;;  %v5904_v35 = vsel %vm617_vm0, %v624_v37, %v626_v0  ;;  %v708_v37 = vrot.slane %v5940_v18, 2  ;;  %v858_v0 = vld [vmem:[%s6588_s2 + $0x2e8] sm:$0xff] }
 0x132   : > { %2053 = vmatprep.mubr.f32.mxu1 %v5874_v52  ;;  %2238 = vmatprep.mubr.f32.mxu0 %v5877_v36  ;;  %v6018_v32 = vsel %vm674_vm1, %v710_v59, %v711_v24  ;;  %v6040_v13 = vsel %vm674_vm1, %v711_v24, %v713_v29  ;;  %v898_v59 = vld [vmem:[%s6588_s2 + $0x428] sm:$0xff]  ;;  %v651_v29 = vrot.slane %v5940_v18, 1 }
 0x133   : > { %4029 = vmatpush3.bf16.msra.mxu1 %v4028_v27  ;;  %v857_v27 = vld [vmem:[%s6588_s2 + $0x2e0] sm:$0xff] }
 0x134   : > { %4031 = vmatprep.subr.bf16.mxu1 %v4030_v14 }
 0x135   : > { %2054 = vmatmul.mubr.f32.gmra.mrb[84].mxu1 %v5582_v55  ;;  %2239 = vmatmul.mubr.f32.gmra.mrb[84].mxu0 %v5900_v16  ;;  %v706_v55 = vrot.slane %v5907_v23, 2 }
 0x136   : > { %2058 = vmatprep.mubr.f32.mxu1 %v5904_v35  ;;  %2243 = vmatprep.mubr.f32.mxu0 %v5907_v23 }
 0x137   : > { %4033 = vmatpush3.bf16.msra.mxu1 %v4032_v45  ;;  %v5959_v21 = vsel %vm674_vm1, %v705_v54, %v706_v55  ;;  %v5987_v14 = vsel %vm674_vm1, %v706_v55, %v708_v37  ;;  %v4046_v45 = vpack.c.bf16 %v858_v0, %v857_v27  ;;  %v6022_v54 = vsel %vm617_vm0, %v634_v53, %v636_v34  ;;  %v6025_v55 = vld [vmem:[%s5550_s16 + $0xc8] sm:$0xff]  ;;  %v897_v0 = vld [vmem:[%s6588_s2 + $0x420] sm:$0xff] }
 0x138   : > { %4035 = vmatprep.subr.bf16.mxu1 %v4034_v3  ;;  %v841_v3 = vld [vmem:[%s6588_s2 + $0x260] sm:$0xff]  ;;  %v4052_v53 = vpack.c.bf16 %v844_v49, %v843_v63  ;;  %v646_v34 = vrot.slane %v5881_v61, 1  ;;  %v648_v61 = vrot.slane %v5877_v36, 1  ;;  %v906_v49 = vld [vmem:[%s6588_s2 + $0x468] sm:$0xff] }
 0x139   : > { %2059 = vmatmul.mubr.f32.gmra.mrb[86].mxu1 %v5619_v41  ;;  %2244 = vmatmul.mubr.f32.gmra.mrb[86].mxu0 %v5928_v1  ;;  %v5963_v41 = vsel %vm617_vm0, %v629_v4, %v631_v56  ;;  %v4044_v4 = vpack.c.bf16 %v840_v38, %v839_v28  ;;  %v638_v56 = vrot.slane %v5766_v57, 1  ;;  %v643_v28 = vrot.slane %v5816_v10, 1  ;;  %v905_v63 = vld [vmem:[%s6588_s2 + $0x460] sm:$0xff] }
 0x13a   : > { %2063 = vmatprep.mubr.f32.mxu1 %v5933_v39  ;;  %2248 = vmatprep.mubr.f32.mxu0 %v5936_v6  ;;  %v644_v38 = vrot.slane %v5850_v9, 1 }
 0x13b   : > { %4037 = vmatpush3.bf16.msra.mxu1 %v4036_v2  ;;  %v639_v2 = vrot.slane %v5793_v20, 1 }
 0x13c   : > { %4039 = vmatprep.subr.bf16.mxu1 %v4038_v5  ;;  %v4048_v5 = vpack.c.bf16 %v842_v22, %v841_v3  ;;  %v6073_v24 = vsel %vm617_vm0, %v643_v28, %v644_v38  ;;  %v901_v22 = vld [vmem:[%s6588_s2 + $0x440] sm:$0xff] }
 0x13d   : > { %2064 = vmatmul.mubr.f32.gmra.mrb[88].mxu1 %v5650_v47  ;;  %2249 = vmatmul.mubr.f32.gmra.mrb[88].mxu0 %v5959_v21  ;;  %v6043_v37 = vsel %vm617_vm0, %v638_v56, %v639_v2  ;;  %v6057_v30 = vsel %vm617_vm0, %v639_v2, %v641_v11  ;;  %v903_v56 = vld [vmem:[%s6588_s2 + $0x450] sm:$0xff]  ;;  %v904_v2 = vld [vmem:[%s6588_s2 + $0x458] sm:$0xff] }
 0x13e   : > { %2068 = vmatprep.mubr.f32.mxu1 %v5963_v41  ;;  %2253 = vmatprep.mubr.f32.mxu0 %v5966_v17 }
 0x13f   : > { %4041 = vmatpush3.bf16.msra.mxu1 %v4040_v25  ;;  %v895_v25 = vld [vmem:[%s6588_s2 + $0x410] sm:$0xff] }
 0x140   : > { %4043 = vmatprep.subr.bf16.mxu1 %v4042_v33  ;;  %v896_v33 = vld [vmem:[%s6588_s2 + $0x418] sm:$0xff] }
 0x141   : > { %2069 = vmatmul.mubr.f32.gmra.mrb[90].mxu1 %v5689_v31  ;;  %2254 = vmatmul.mubr.f32.gmra.mrb[90].mxu0 %v5987_v14  ;;  %v4090_v27 = vpack.c.bf16 %v896_v33, %v895_v25  ;;  %v4110_v33 = vpack.c.bf16 %v906_v49, %v905_v63 }
 0x142   : > { %2073 = vmatprep.mubr.f32.mxu1 %v5992_v50  ;;  %2258 = vmatprep.mubr.f32.mxu0 %v5995_v40 }
 0x143   : > { %4045 = vmatpush3.bf16.msra.mxu1 %v4044_v4  ;;  %v899_v4 = vld [vmem:[%s6588_s2 + $0x430] sm:$0xff] }
 0x144   : > { %4047 = vmatprep.subr.bf16.mxu1 %v4046_v45  ;;  %v900_v45 = vld [vmem:[%s6588_s2 + $0x438] sm:$0xff] }
 0x145   : > { %2074 = vmatmul.mubr.f32.gmra.mrb[92].mxu1 %v5713_v62  ;;  %2259 = vmatmul.mubr.f32.gmra.mrb[92].mxu0 %v6018_v32  ;;  %v4098_v3 = vpack.c.bf16 %v900_v45, %v899_v4 }
 0x146   : > { %2078 = vmatprep.mubr.f32.mxu1 %v6022_v54  ;;  %2263 = vmatprep.mubr.f32.mxu0 %v6025_v55 }
 0x147   : > { %4049 = vmatpush3.bf16.msra.mxu1 %v4048_v5  ;;  %v653_v5 = vrot.slane %v5936_v6, 1 }
 0x148   : > { %4051 = vmatprep.subr.bf16.mxu1 %v4050_v8  ;;  %v654_v8 = vrot.slane %v5966_v17, 1 }
 0x149   : > { %2079 = vmatmul.mubr.f32.gmra.mrb[94].mxu1 %v5739_v19  ;;  %2264 = vmatmul.mubr.f32.gmra.mrb[94].mxu0 %v6040_v13 }
 0x14a   : > { %2083 = vmatprep.mubr.f32.mxu1 %v6043_v37  ;;  %2478 = vmatprep.mubr.f32.mxu0 %v5933_v39  ;;  %v6131_v11 = vsel %vm617_vm0, %v653_v5, %v654_v8 }
 0x14b   : > { %4053 = vmatpush3.bf16.msra.mxu1 %v4052_v53  ;;  %v656_v53 = vrot.slane %v5999_v58, 1 }
 0x14d   : > { %2084 = vmatmul.mubr.f32.gmra.mrb[96].mxu1 %v5766_v57  ;;  %2479 = vmatmul.mubr.f32.vlgmr.msra.gmra.mrb[96].mxu0 %v5650_v47  ;;  %v4094_v47 = vpack.c.bf16 %v898_v59, %v897_v0  ;;  %v908_v0 = vld [vmem:[%s6588_s2 + $0x478] sm:$0xff] }
 0x14e   : > { %2088 = vmatprep.mubr.f32.mxu1 %v6057_v30  ;;  %2483 = vmatprep.mubr.f32.mxu0 %v5963_v41 }
 0x14f   : > { %4089 = vmatpush3.bf16.msra.mxu0 %v5837_v15  ;;  %v6087_v15 = vsel %vm617_vm0, %v644_v38, %v646_v34  ;;  %v6149_v34 = vsel %vm617_vm0, %v654_v8, %v656_v53 }
 0x150   : > { %4091 = vmatprep.subr.bf16.mxu0 %v4090_v27 }
 0x151   : > { %2089 = vmatmul.mubr.f32.gmra.mrb[98].mxu1 %v5793_v20  ;;  %2484 = vmatmul.mubr.f32.gmra.mrb[98].mxu0 %v5689_v31  ;;  %v649_v31 = vrot.slane %v5907_v23, 1 }
 0x152   : > { %2093 = vmatprep.mubr.f32.mxu1 %v6073_v24  ;;  %2488 = vmatprep.mubr.f32.mxu0 %v5992_v50 }
 0x153   : > { %4093 = vmatpush3.bf16.msra.mxu0 %v4090_v27  ;;  %v6102_v51 = vsel %vm617_vm0, %v648_v61, %v649_v31  ;;  %v6116_v18 = vsel %vm617_vm0, %v649_v31, %v651_v29  ;;  %v907_v27 = vld [vmem:[%s6588_s2 + $0x470] sm:$0xff] }
 0x154   : > { %4095 = vmatprep.subr.bf16.mxu0 %v4094_v47  ;;  %v4114_v4 = vpack.c.bf16 %v908_v0, %v907_v27 }
 0x155   : > { %2094 = vmatmul.mubr.f32.gmra.mrb[100].mxu1 %v5816_v10  ;;  %2489 = vmatmul.mubr.f32.gmra.mrb[100].mxu0 %v5713_v62  ;;  %v4102_v62 = vpack.c.bf16 %v902_v7, %v901_v22 }
 0x156   : > { %2098 = vmatprep.mubr.f32.mxu1 %v6087_v15  ;;  %2493 = vmatprep.mubr.f32.mxu0 %v6022_v54 }
 0x157   : > { %4097 = vmatpush3.bf16.msra.mxu0 %v4094_v47 }
 0x158   : > { %4099 = vmatprep.subr.bf16.mxu0 %v4098_v3 }
 0x159   : > { %2099 = vmatmul.mubr.f32.gmra.mrb[102].mxu1 %v5850_v9  ;;  %2494 = vmatmul.mubr.f32.gmra.mrb[102].mxu0 %v5739_v19  ;;  %v4106_v19 = vpack.c.bf16 %v904_v2, %v903_v56 }
 0x15a   : > { %2103 = vmatprep.mubr.f32.mxu1 %v6102_v51  ;;  %2498 = vmatprep.mubr.f32.mxu0 %v6043_v37 }
 0x15b   : > { %4101 = vmatpush3.bf16.msra.mxu0 %v4098_v3 }
 0x15c   : > { %4103 = vmatprep.subr.bf16.mxu0 %v4102_v62 }
 0x15d   : > { %2104 = vmatmul.mubr.f32.gmra.mrb[104].mxu1 %v5877_v36  ;;  %2499 = vmatmul.mubr.f32.gmra.mrb[104].mxu0 %v5766_v57 }
 0x15e   : > { %2108 = vmatprep.mubr.f32.mxu1 %v6116_v18  ;;  %2503 = vmatprep.mubr.f32.mxu0 %v6057_v30 }
 0x15f   : > { %4105 = vmatpush3.bf16.msra.mxu0 %v4102_v62 }
 0x160   : > { %v3038_v25 = vpop.f32.mrb[0].mxu1  ;;  %v3014_v57 = vpop.f32.mrb[0].mxu0  ;;  %4107 = vmatprep.subr.bf16.mxu0 %v4106_v19 }
 0x161   : > { %v3039_v28 = vpop.f32.mrb[1].mxu1  ;;  %2109 = vmatmul.mubr.f32.gmra.mrb[106].mxu1 %v5907_v23  ;;  %2504 = vmatmul.mubr.f32.gmra.mrb[106].mxu0 %v5793_v20  ;;  %v3015_v38 = vpop.f32.mrb[1].mxu0 }
 0x162   : > { %v6142_v58 = vadd.f32 %v3039_v28, %v3038_v25  ;;  %2113 = vmatprep.mubr.f32.mxu1 %v6131_v11  ;;  %2508 = vmatprep.mubr.f32.mxu0 %v6073_v24  ;;  %v6146_v59 = vadd.f32 %v3015_v38, %v3014_v57  ;;  %v735_v57 = vrot.slane %v6025_v55, 1 }
 0x163   : > { %4109 = vmatpush3.bf16.msra.mxu0 %v4106_v19 }
 0x164   : > { %v3041_v20 = vpop.f32.mrb[2].mxu1  ;;  %v3017_v47 = vpop.f32.mrb[2].mxu0  ;;  %4111 = vmatprep.subr.bf16.mxu0 %v4110_v33 }
 0x165   : > { %v3042_v45 = vpop.f32.mrb[3].mxu1  ;;  %2114 = vmatmul.mubr.f32.gmra.mrb[108].mxu1 %v5936_v6  ;;  %2509 = vmatmul.mubr.f32.gmra.mrb[108].mxu0 %v5816_v10  ;;  %v3018_v61 = vpop.f32.mrb[3].mxu0 }
 0x166   : > { %v6153_v31 = vadd.f32 %v3042_v45, %v3041_v20  ;;  %2118 = vmatprep.mubr.f32.mxu1 %v6149_v34  ;;  %2513 = vmatprep.mubr.f32.mxu0 %v6087_v15  ;;  %v6157_v3 = vadd.f32 %v3018_v61, %v3017_v47 }
 0x167   : > { %4113 = vmatpush3.bf16.msra.mxu0 %v4110_v33 }
 0x168   : > { %v3044_v22 = vpop.f32.mrb[4].mxu1  ;;  %v3020_v7 = vpop.f32.mrb[4].mxu0  ;;  %4115 = vmatprep.subr.bf16.mxu0 %v4114_v4 }
 0x169   : > { %v3045_v29 = vpop.f32.mrb[5].mxu1  ;;  %2119 = vmatmul.mubr.f32.gmra.mrb[110].mxu1 %v5966_v17  ;;  %2514 = vmatmul.mubr.f32.gmra.mrb[110].mxu0 %v5850_v9  ;;  %v3021_v62 = vpop.f32.mrb[5].mxu0 }
 0x16a   : > { %v6161_v10 = vadd.f32 %v3045_v29, %v3044_v22  ;;  %2333 = vmatprep.mubr.f32.mxu1 %v5685_v44  ;;  %2518 = vmatprep.mubr.f32.mxu0 %v6102_v51  ;;  %v6165_v56 = vadd.f32 %v3021_v62, %v3020_v7 }
 0x16b   : > { %4117 = vmatpush3.bf16.msra.mxu0 %v4114_v4 }
 0x16c   : > { %v3047_v2 = vpop.f32.mrb[6].mxu1  ;;  %v3023_v5 = vpop.f32.mrb[6].mxu0 }
 0x16d   : > { %v3048_v8 = vpop.f32.mrb[7].mxu1  ;;  %2334 = vmatmul.mubr.f32.vlgmr.msra.gmra.mrb[112].mxu1 %v5874_v52  ;;  %2519 = vmatmul.mubr.f32.gmra.mrb[112].mxu0 %v5877_v36  ;;  %v3024_v19 = vpop.f32.mrb[7].mxu0  ;;  %v734_v36 = vrot.slane %v5995_v40, 1 }
 0x16e   : > { %v6169_v63 = vadd.f32 %v3048_v8, %v3047_v2  ;;  %2338 = vmatprep.mubr.f32.mxu1 %v5708_v12  ;;  %2523 = vmatprep.mubr.f32.mxu0 %v6116_v18  ;;  %v6173_v44 = vadd.f32 %v3024_v19, %v3023_v5  ;;  %v6220_v19 = vld [vmem:[%s5550_s16 + $0xe8] sm:$0x3] }
 0x16f   : > { %v6197_v20 = vsel %vm617_vm0, %v734_v36, %v735_v57  ;;  %v754_v36 = vrot.slane %v6220_v19, 1 }
 0x170   : > { %v3050_v9 = vpop.f32.mrb[8].mxu1  ;;  %v3026_v49 = vpop.f32.mrb[8].mxu0 }
 0x171   : > { %v3051_v53 = vpop.f32.mrb[9].mxu1  ;;  %2339 = vmatmul.mubr.f32.gmra.mrb[114].mxu1 %v5904_v35  ;;  %2524 = vmatmul.mubr.f32.gmra.mrb[114].mxu0 %v5907_v23  ;;  %v3027_v52 = vpop.f32.mrb[9].mxu0  ;;  %v6186_v35 = vld [vmem:[%s5550_s16 + $0xd0] sm:$0x3] }
 0x172   : > { %v6177_v25 = vadd.f32 %v3051_v53, %v3050_v9  ;;  %2343 = vmatprep.mubr.f32.mxu1 %v5735_v43  ;;  %2528 = vmatprep.mubr.f32.mxu0 %v6131_v11  ;;  %v6181_v12 = vadd.f32 %v3027_v52, %v3026_v49  ;;  %v737_v47 = vrot.slane %v6186_v35, 1 }
 0x174   : > { %v3053_v33 = vpop.f32.mrb[10].mxu1  ;;  %v3029_v28 = vpop.f32.mrb[10].mxu0  ;;  %v6215_v62 = vsel %vm617_vm0, %v735_v57, %v737_v47 }
 0x175   : > { %v3054_v23 = vpop.f32.mrb[11].mxu1  ;;  %2344 = vmatmul.mubr.f32.gmra.mrb[116].mxu1 %v5933_v39  ;;  %2529 = vmatmul.mubr.f32.gmra.mrb[116].mxu0 %v5936_v6  ;;  %v3030_v38 = vpop.f32.mrb[11].mxu0  ;;  %v6201_v39 = vld [vmem:[%s5550_s16 + $0xd8] sm:$0xff]  ;;  %v6204_v6 = vld [vmem:[%s5550_s16 + $0xe0] sm:$0xff] }
 0x176   : > { %v6190_v27 = vadd.f32 %v3054_v23, %v3053_v33  ;;  %2348 = vmatprep.mubr.f32.mxu1 %v5760_v42  ;;  %2533 = vmatprep.mubr.f32.mxu0 %v6149_v34  ;;  %v6194_v0 = vadd.f32 %v3030_v38, %v3029_v28  ;;  %v751_v2 = vrot.slane %v6201_v39, 1  ;;  %v752_v5 = vrot.slane %v6204_v6, 1 }
 0x178   : > { %v3056_v4 = vpop.f32.mrb[12].mxu1  ;;  %v3032_v45 = vpop.f32.mrb[12].mxu0  ;;  %v753_v52 = vsel %vm617_vm0, %v751_v2, %v752_v5  ;;  %v755_v47 = vsel %vm617_vm0, %v752_v5, %v754_v36 }
 0x179   : > { %v3057_v61 = vpop.f32.mrb[13].mxu1  ;;  %2349 = vmatmul.mubr.f32.gmra.mrb[118].mxu1 %v5963_v41  ;;  %2534 = vmatmul.mubr.f32.gmra.mrb[118].mxu0 %v5966_v17  ;;  %v3033_v22 = vpop.f32.mrb[13].mxu0 }
 0x17a   : > { %v6208_v7 = vadd.f32 %v3057_v61, %v3056_v4  ;;  %2353 = vmatprep.mubr.f32.mxu1 %v5788_v26  ;;  %2538 = vmatprep.mubr.f32.mxu0 %v6197_v20  ;;  %v6212_v29 = vadd.f32 %v3033_v22, %v3032_v45 }
 0x17c   : > { %v3059_v8 = vpop.f32.mrb[14].mxu1  ;;  %v3035_v41 = vpop.f32.mrb[14].mxu0 }
 0x17d   : > { %v3060_v17 = vpop.f32.mrb[15].mxu1  ;;  %2354 = vmatmul.mubr.f32.gmra.mrb[120].mxu1 %v5992_v50  ;;  %2539 = vmatmul.mubr.f32.gmra.mrb[120].mxu0 %v5995_v40  ;;  %v3036_v9 = vpop.f32.mrb[15].mxu0 }
 0x17e   : > { %v6224_v49 = vadd.f32 %v3060_v17, %v3059_v8  ;;  %2358 = vmatprep.mubr.f32.mxu1 %v5813_v48  ;;  %2543 = vmatprep.mubr.f32.mxu0 %v6215_v62  ;;  %v6228_v53 = vadd.f32 %v3036_v9, %v3035_v41 }
 0x180   : > { %v3094_v57 = vpop.f32.mrb[16].mxu1  ;;  %v3174_v33 = vpop.f32.mrb[16].mxu0 }
 0x181   : > { %v3095_v28 = vpop.f32.mrb[17].mxu1  ;;  %2359 = vmatmul.mubr.f32.gmra.mrb[122].mxu1 %v6022_v54  ;;  %2544 = vmatmul.mubr.f32.gmra.mrb[122].mxu0 %v6025_v55  ;;  %v3175_v50 = vpop.f32.mrb[17].mxu0 }
 0x182   : > { %v3096_v23 = vadd.f32 %v3095_v28, %v3094_v57  ;;  %v3176_v38 = vadd.f32 %v3175_v50, %v3174_v33  ;;  %2363 = vmatprep.mubr.f32.mxu1 %v5843_v46  ;;  %2548 = vmatprep.mubr.f32.mxu0 %v753_v52 }
 0x184   : > { %v1466_v4 = vadd.f32 %v3096_v23, %v6146_v59  ;;  %v3097_v45 = vpop.f32.mrb[18].mxu1  ;;  %v3177_v61 = vpop.f32.mrb[18].mxu0 }
 0x185   : > { %v3098_v22 = vpop.f32.mrb[19].mxu1  ;;  %2364 = vmatmul.mubr.f32.gmra.mrb[124].mxu1 %v6043_v37  ;;  %2549 = vmatmul.mubr.f32.gmra.mrb[124].mxu0 %v6201_v39  ;;  %v3178_v54 = vpop.f32.mrb[19].mxu0 }
 0x186   : > { %v6239_v2 = vadd.f32 %v3176_v38, %v1466_v4  ;;  %v3099_v8 = vadd.f32 %v3098_v22, %v3097_v45  ;;  %v3179_v41 = vadd.f32 %v3178_v54, %v3177_v61  ;;  %2368 = vmatprep.mubr.f32.mxu1 %v5868_v60  ;;  %2553 = vmatprep.mubr.f32.mxu0 %v755_v47 }
 0x188   : > { %v1471_v17 = vadd.f32 %v3099_v8, %v6157_v3  ;;  %v3100_v5 = vpop.f32.mrb[20].mxu1  ;;  %v3180_v9 = vpop.f32.mrb[20].mxu0 }
 0x189   : > { %v3101_v59 = vpop.f32.mrb[21].mxu1  ;;  %2369 = vmatmul.mubr.f32.gmra.mrb[126].mxu1 %v6057_v30  ;;  %2554 = vmatmul.mubr.f32.gmra.mrb[126].mxu0 %v6204_v6  ;;  %v3181_v37 = vpop.f32.mrb[21].mxu0 }
 0x18a   : > { %v6245_v52 = vadd.f32 %v3179_v41, %v1471_v17  ;;  %v3102_v36 = vadd.f32 %v3101_v59, %v3100_v5  ;;  %v3182_v57 = vadd.f32 %v3181_v37, %v3180_v9  ;;  %2373 = vmatprep.mubr.f32.mxu1 %v5900_v16  ;;  %3774 = vmatprep.mubr.f32.mxu0 %v5735_v43 }
 0x18c   : > { %v1476_v33 = vadd.f32 %v3102_v36, %v6165_v56  ;;  %v3103_v28 = vpop.f32.mrb[22].mxu1  ;;  %v3183_v3 = vpop.f32.mrb[22].mxu0 }
 0x18d   : > { %v3104_v50 = vpop.f32.mrb[23].mxu1  ;;  %2374 = vmatmul.mubr.f32.gmra.mrb[128].mxu1 %v6073_v24  ;;  %3775 = vmatmul.mubr.f32.vlgmr.msra.gmra.mrb[48].mxu0 %v5760_v42  ;;  %v3184_v30 = vpop.f32.mrb[23].mxu0 }
 0x18e   : > { %v6252_v23 = vadd.f32 %v3182_v57, %v1476_v33  ;;  %v3105_v38 = vadd.f32 %v3104_v50, %v3103_v28  ;;  %v3185_v47 = vadd.f32 %v3184_v30, %v3183_v3  ;;  %2378 = vmatprep.mubr.f32.mxu1 %v5928_v1  ;;  %3777 = vmatprep.mubr.f32.mxu0 %v5788_v26  ;;  %v744_v28 = vrot.slane %v6186_v35, 2 }
 0x190   : > { %v1481_v43 = vadd.f32 %v3105_v38, %v6173_v44  ;;  %v3106_v4 = vpop.f32.mrb[24].mxu1  ;;  %v3186_v56 = vpop.f32.mrb[24].mxu0 }
 0x191   : > { %v3107_v45 = vpop.f32.mrb[25].mxu1  ;;  %2379 = vmatmul.mubr.f32.gmra.mrb[130].mxu1 %v6087_v15  ;;  %3778 = vmatmul.mubr.f32.gmra.mrb[50].mxu0 %v5813_v48  ;;  %v3187_v24 = vpop.f32.mrb[25].mxu0 }
 0x192   : > { %v6259_v42 = vadd.f32 %v3185_v47, %v1481_v43  ;;  %v3108_v61 = vadd.f32 %v3107_v45, %v3106_v4  ;;  %v3188_v22 = vadd.f32 %v3187_v24, %v3186_v56  ;;  %2383 = vmatprep.mubr.f32.mxu1 %v5959_v21  ;;  %3780 = vmatprep.mubr.f32.mxu0 %v5843_v46 }
 0x194   : > { %v1486_v26 = vadd.f32 %v3108_v61, %v6181_v12  ;;  %v3109_v54 = vpop.f32.mrb[26].mxu1  ;;  %v3189_v44 = vpop.f32.mrb[26].mxu0 }
 0x195   : > { %v3110_v8 = vpop.f32.mrb[27].mxu1  ;;  %2384 = vmatmul.mubr.f32.gmra.mrb[132].mxu1 %v6102_v51  ;;  %3781 = vmatmul.mubr.f32.gmra.mrb[52].mxu0 %v5868_v60  ;;  %v3190_v15 = vpop.f32.mrb[27].mxu0 }
 0x196   : > { %v6266_v48 = vadd.f32 %v3188_v22, %v1486_v26  ;;  %v3111_v41 = vadd.f32 %v3110_v8, %v3109_v54  ;;  %v3191_v17 = vadd.f32 %v3190_v15, %v3189_v44  ;;  %2388 = vmatprep.mubr.f32.mxu1 %v5987_v14  ;;  %3783 = vmatprep.mubr.f32.mxu0 %v5900_v16  ;;  %v741_v16 = vrot.slane %v5995_v40, 2 }
 0x198   : > { %v1491_v46 = vadd.f32 %v3111_v41, %v6194_v0  ;;  %v3112_v5 = vpop.f32.mrb[28].mxu1  ;;  %v3192_v12 = vpop.f32.mrb[28].mxu0  ;;  %v742_v0 = vrot.slane %v6025_v55, 2  ;;  %v758_v55 = vrot.slane %v6201_v39, 2 }
 0x199   : > { %v3113_v9 = vpop.f32.mrb[29].mxu1  ;;  %2389 = vmatmul.mubr.f32.gmra.mrb[134].mxu1 %v6116_v18  ;;  %3784 = vmatmul.mubr.f32.gmra.mrb[54].mxu0 %v5928_v1  ;;  %v3193_v51 = vpop.f32.mrb[29].mxu0 }
 0x19a   : > { %v6273_v60 = vadd.f32 %v3191_v17, %v1491_v46  ;;  %v3114_v59 = vadd.f32 %v3113_v9, %v3112_v5  ;;  %v3194_v37 = vadd.f32 %v3193_v51, %v3192_v12  ;;  %2393 = vmatprep.mubr.f32.mxu1 %v6018_v32  ;;  %3786 = vmatprep.mubr.f32.mxu0 %v5959_v21 }
 0x19b   : > { %v743_v40 = vsel %vm674_vm1, %v741_v16, %v742_v0  ;;  %v745_v47 = vsel %vm674_vm1, %v742_v0, %v744_v28 }
 0x19c   : > { %v1496_v36 = vadd.f32 %v3114_v59, %v6212_v29  ;;  %v3115_v57 = vpop.f32.mrb[30].mxu1  ;;  %v3195_v33 = vpop.f32.mrb[30].mxu0  ;;  %v759_v29 = vrot.slane %v6204_v6, 2 }
 0x19d   : > { %v3116_v18 = vpop.f32.mrb[31].mxu1  ;;  %2394 = vmatmul.mubr.f32.gmra.mrb[136].mxu1 %v6131_v11  ;;  %3787 = vmatmul.mubr.f32.gmra.mrb[56].mxu0 %v5987_v14  ;;  %v3196_v1 = vpop.f32.mrb[31].mxu0 }
 0x19e   : > { %v6283_v3 = vadd.f32 %v3194_v37, %v1496_v36  ;;  %v3117_v50 = vadd.f32 %v3116_v18, %v3115_v57  ;;  %v3197_v21 = vadd.f32 %v3196_v1, %v3195_v33  ;;  %2398 = vmatprep.mubr.f32.mxu1 %v6040_v13  ;;  %3789 = vmatprep.mubr.f32.mxu0 %v6018_v32  ;;  %v761_v32 = vrot.slane %v6220_v19, 2 }
 0x19f   : > { %v760_v6 = vsel %vm674_vm1, %v758_v55, %v759_v29 }
 0x1a0   : > { %v1501_v11 = vadd.f32 %v3117_v50, %v6228_v53  ;;  %v3118_v14 = vpop.f32.mrb[32].mxu1  ;;  %v3198_v30 = vpop.f32.mrb[32].mxu0  ;;  %v762_v24 = vsel %vm674_vm1, %v759_v29, %v761_v32 }
 0x1a1   : > { %v3119_v38 = vpop.f32.mrb[33].mxu1  ;;  %2399 = vmatmul.mubr.f32.gmra.mrb[138].mxu1 %v6149_v34  ;;  %3790 = vmatmul.mubr.f32.gmra.mrb[58].mxu0 %v6040_v13  ;;  %v3199_v35 = vpop.f32.mrb[33].mxu0 }
 0x1a2   : > { %v6295_v43 = vadd.f32 %v3197_v21, %v1501_v11  ;;  %v3120_v4 = vadd.f32 %v3119_v38, %v3118_v14  ;;  %v3200_v39 = vadd.f32 %v3199_v35, %v3198_v30  ;;  %2403 = vmatprep.mubr.f32.mxu1 %v743_v40  ;;  %3792 = vmatprep.mubr.f32.mxu0 %v743_v40 }
 0x1a4   : > { %v1506_v53 = vadd.f32 %v3120_v4, %v6142_v58  ;;  %v3121_v56 = vpop.f32.mrb[34].mxu1  ;;  %v3201_v45 = vpop.f32.mrb[34].mxu0 }
 0x1a5   : > { %v3122_v34 = vpop.f32.mrb[35].mxu1  ;;  %2404 = vmatmul.mubr.f32.gmra.mrb[140].mxu1 %v6197_v20  ;;  %3793 = vmatmul.mubr.f32.gmra.mrb[60].mxu0 %v745_v47  ;;  %v3202_v13 = vpop.f32.mrb[35].mxu0 }
 0x1a6   : > { %v6301_v19 = vadd.f32 %v3200_v39, %v1506_v53  ;;  %v3123_v61 = vadd.f32 %v3122_v34, %v3121_v56  ;;  %v3203_v22 = vadd.f32 %v3202_v13, %v3201_v45  ;;  %2408 = vmatprep.mubr.f32.mxu1 %v745_v47  ;;  %3795 = vmatprep.mubr.f32.mxu0 %v760_v6 }
 0x1a8   : > { %v1511_v26 = vadd.f32 %v3123_v61, %v6153_v31  ;;  %v3124_v54 = vpop.f32.mrb[36].mxu1  ;;  %v3204_v44 = vpop.f32.mrb[36].mxu0 }
 0x1a9   : > { %v3125_v58 = vpop.f32.mrb[37].mxu1  ;;  %2409 = vmatmul.mubr.f32.gmra.mrb[142].mxu1 %v6215_v62  ;;  %3796 = vmatmul.mubr.f32.gmra.mrb[62].mxu0 %v762_v24  ;;  %v3205_v8 = vpop.f32.mrb[37].mxu0 }
 0x1aa   : > { %v6305_v20 = vadd.f32 %v3203_v22, %v1511_v26  ;;  %v3126_v15 = vadd.f32 %v3125_v58, %v3124_v54  ;;  %v3206_v41 = vadd.f32 %v3205_v8, %v3204_v44 }
 0x1ac   : > { %v1516_v17 = vadd.f32 %v3126_v15, %v6161_v10  ;;  %v3127_v46 = vpop.f32.mrb[38].mxu1  ;;  %v3207_v5 = vpop.f32.mrb[38].mxu0 }
 0x1ad   : > { %v3128_v12 = vpop.f32.mrb[39].mxu1  ;;  %v3208_v9 = vpop.f32.mrb[39].mxu0 }
 0x1ae   : > { %v6308_v51 = vadd.f32 %v3206_v41, %v1516_v17  ;;  %v3129_v31 = vadd.f32 %v3128_v12, %v3127_v46  ;;  %v3209_v59 = vadd.f32 %v3208_v9, %v3207_v5 }
 0x1b0   : > { %v1521_v37 = vadd.f32 %v3129_v31, %v6169_v63  ;;  %v3130_v16 = vpop.f32.mrb[40].mxu1  ;;  %v3210_v62 = vpop.f32.mrb[40].mxu0 }
 0x1b1   : > { %v3131_v0 = vpop.f32.mrb[41].mxu1  ;;  %v3211_v36 = vpop.f32.mrb[41].mxu0 }
 0x1b2   : > { %v6311_v57 = vadd.f32 %v3209_v59, %v1521_v37  ;;  %v3132_v33 = vadd.f32 %v3131_v0, %v3130_v16  ;;  %v3212_v18 = vadd.f32 %v3211_v36, %v3210_v62 }
 0x1b4   : > { %v1526_v10 = vadd.f32 %v3132_v33, %v6177_v25  ;;  %v3133_v1 = vpop.f32.mrb[42].mxu1  ;;  %v3213_v28 = vpop.f32.mrb[42].mxu0 }
 0x1b5   : > { %v3134_v50 = vpop.f32.mrb[43].mxu1  ;;  %v3214_v21 = vpop.f32.mrb[43].mxu0 }
 0x1b6   : > { %v6314_v40 = vadd.f32 %v3212_v18, %v1526_v10  ;;  %v3135_v55 = vadd.f32 %v3134_v50, %v3133_v1  ;;  %v3215_v29 = vadd.f32 %v3214_v21, %v3213_v28 }
 0x1b8   : > { %v1531_v63 = vadd.f32 %v3135_v55, %v6190_v27  ;;  %v3136_v11 = vpop.f32.mrb[44].mxu1  ;;  %v3216_v14 = vpop.f32.mrb[44].mxu0 }
 0x1b9   : > { %v3137_v30 = vpop.f32.mrb[45].mxu1  ;;  %v3217_v38 = vpop.f32.mrb[45].mxu0 }
 0x1ba   : > { %v6317_v35 = vadd.f32 %v3215_v29, %v1531_v63  ;;  %v3138_v47 = vadd.f32 %v3137_v30, %v3136_v11  ;;  %v3218_v32 = vadd.f32 %v3217_v38, %v3216_v14 }
 0x1bc   : > { %v1536_v25 = vadd.f32 %v3138_v47, %v6208_v7  ;;  %v3139_v4 = vpop.f32.mrb[46].mxu1  ;;  %v3219_v39 = vpop.f32.mrb[46].mxu0 }
 0x1bd   : > { %v3140_v6 = vpop.f32.mrb[47].mxu1  ;;  %v3220_v53 = vpop.f32.mrb[47].mxu0 }
 0x1be   : > { %v6320_v56 = vadd.f32 %v3218_v32, %v1536_v25  ;;  %v3141_v45 = vadd.f32 %v3140_v6, %v3139_v4  ;;  %v3221_v34 = vadd.f32 %v3220_v53, %v3219_v39 }
 0x1c0   : > { %v1541_v27 = vadd.f32 %v3141_v45, %v6224_v49  ;;  %v3254_v13 = vpop.f32.mrb[48].mxu1 }
 0x1c1   : > { %v3255_v24 = vpop.f32.mrb[49].mxu1 }
 0x1c2   : > { %v6323_v61 = vadd.f32 %v3221_v34, %v1541_v27  ;;  %v3256_v22 = vadd.f32 %v3255_v24, %v3254_v13 }
 0x1c4   : > { %v6326_v26 = vadd.f32 %v3256_v22, %v6239_v2  ;;  %v3257_v54 = vpop.f32.mrb[50].mxu1 }
 0x1c5   : > { %v3258_v7 = vpop.f32.mrb[51].mxu1 }
 0x1c6   : > { %v3259_v44 = vadd.f32 %v3258_v7, %v3257_v54 }
 0x1c8   : > { %v6329_v58 = vadd.f32 %v3259_v44, %v6245_v52  ;;  %v3260_v8 = vpop.f32.mrb[52].mxu1 }
 0x1c9   : > { %v3261_v15 = vpop.f32.mrb[53].mxu1 }
 0x1ca   : > { %v3262_v41 = vadd.f32 %v3261_v15, %v3260_v8 }
 0x1cc   : > { %v6332_v17 = vadd.f32 %v3262_v41, %v6252_v23  ;;  %v3263_v49 = vpop.f32.mrb[54].mxu1 }
 0x1cd   : > { %v3264_v46 = vpop.f32.mrb[55].mxu1 }
 0x1ce   : > { %v3265_v5 = vadd.f32 %v3264_v46, %v3263_v49 }
 0x1d0   : > { %v6335_v12 = vadd.f32 %v3265_v5, %v6259_v42  ;;  %v3266_v2 = vpop.f32.mrb[56].mxu1 }
 0x1d1   : > { %v3267_v9 = vpop.f32.mrb[57].mxu1 }
 0x1d2   : > { %v3268_v31 = vadd.f32 %v3267_v9, %v3266_v2 }
 0x1d4   : > { %v6338_v59 = vadd.f32 %v3268_v31, %v6266_v48  ;;  %v3269_v52 = vpop.f32.mrb[58].mxu1 }
 0x1d5   : > { %v3270_v37 = vpop.f32.mrb[59].mxu1 }
 0x1d6   : > { %v3271_v16 = vadd.f32 %v3270_v37, %v3269_v52 }
 0x1d8   : > { %v6341_v62 = vadd.f32 %v3271_v16, %v6273_v60  ;;  %v3272_v23 = vpop.f32.mrb[60].mxu1 }
 0x1d9   : > { %v3273_v0 = vpop.f32.mrb[61].mxu1 }
 0x1da   : > { %v3274_v36 = vadd.f32 %v3273_v0, %v3272_v23 }
 0x1dc   : > { %v6344_v33 = vadd.f32 %v3274_v36, %v6283_v3  ;;  %v3275_v42 = vpop.f32.mrb[62].mxu1 }
 0x1dd   : > { %v3276_v18 = vpop.f32.mrb[63].mxu1 }
 0x1de   : > { %v3277_v10 = vadd.f32 %v3276_v18, %v3275_v42 }
 0x1e0   : > { %v6347_v1 = vadd.f32 %v3277_v10, %v6295_v43  ;;  %v3278_v48 = vpop.f32.mrb[64].mxu1  ;;  %v3446_v28 = vpop.f32.mrb[64].mxu0 }
 0x1e1   : > { %v3279_v50 = vpop.f32.mrb[65].mxu1  ;;  %v3447_v21 = vpop.f32.mrb[65].mxu0 }
 0x1e2   : > { %v3280_v55 = vadd.f32 %v3279_v50, %v3278_v48  ;;  %v6349_v29 = vadd.f32 %v3447_v21, %v3446_v28 }
 0x1e4   : > { %v6352_v60 = vadd.f32 %v3280_v55, %v6301_v19  ;;  %v3281_v63 = vpop.f32.mrb[66].mxu1  ;;  %v3449_v11 = vpop.f32.mrb[66].mxu0 }
 0x1e5   : > { %v3282_v3 = vpop.f32.mrb[67].mxu1  ;;  %v3450_v14 = vpop.f32.mrb[67].mxu0 }
 0x1e6   : > { %v3283_v30 = vadd.f32 %v3282_v3, %v3281_v63  ;;  %v6354_v38 = vadd.f32 %v3450_v14, %v3449_v11 }
 0x1e8   : > { %v6357_v43 = vadd.f32 %v3283_v30, %v6305_v20  ;;  %v3284_v47 = vpop.f32.mrb[68].mxu1  ;;  %v3452_v32 = vpop.f32.mrb[68].mxu0 }
 0x1e9   : > { %v3285_v25 = vpop.f32.mrb[69].mxu1  ;;  %v3453_v4 = vpop.f32.mrb[69].mxu0 }
 0x1ea   : > { %v3286_v39 = vadd.f32 %v3285_v25, %v3284_v47  ;;  %v6359_v6 = vadd.f32 %v3453_v4, %v3452_v32 }
 0x1ec   : > { %v6362_v19 = vadd.f32 %v3286_v39, %v6308_v51  ;;  %v3287_v53 = vpop.f32.mrb[70].mxu1  ;;  %v3455_v45 = vpop.f32.mrb[70].mxu0 }
 0x1ed   : > { %v3288_v34 = vpop.f32.mrb[71].mxu1  ;;  %v3456_v27 = vpop.f32.mrb[71].mxu0 }
 0x1ee   : > { %v3289_v13 = vadd.f32 %v3288_v34, %v3287_v53  ;;  %v6364_v24 = vadd.f32 %v3456_v27, %v3455_v45 }
 0x1f0   : > { %v6367_v20 = vadd.f32 %v3289_v13, %v6311_v57  ;;  %v3290_v22 = vpop.f32.mrb[72].mxu1  ;;  %v3458_v54 = vpop.f32.mrb[72].mxu0 }
 0x1f1   : > { %v3291_v7 = vpop.f32.mrb[73].mxu1  ;;  %v3459_v44 = vpop.f32.mrb[73].mxu0 }
 0x1f2   : > { %v3292_v8 = vadd.f32 %v3291_v7, %v3290_v22  ;;  %v6369_v15 = vadd.f32 %v3459_v44, %v3458_v54 }
 0x1f4   : > { %v6372_v51 = vadd.f32 %v3292_v8, %v6314_v40  ;;  %v3293_v41 = vpop.f32.mrb[74].mxu1  ;;  %v3461_v49 = vpop.f32.mrb[74].mxu0 }
 0x1f5   : > { %v3294_v46 = vpop.f32.mrb[75].mxu1  ;;  %v3462_v5 = vpop.f32.mrb[75].mxu0 }
 0x1f6   : > { %v3295_v2 = vadd.f32 %v3294_v46, %v3293_v41  ;;  %v6374_v9 = vadd.f32 %v3462_v5, %v3461_v49 }
 0x1f8   : > { %v6377_v57 = vadd.f32 %v3295_v2, %v6317_v35  ;;  %v3296_v31 = vpop.f32.mrb[76].mxu1  ;;  %v3464_v52 = vpop.f32.mrb[76].mxu0 }
 0x1f9   : > { %v3297_v37 = vpop.f32.mrb[77].mxu1  ;;  %v3465_v16 = vpop.f32.mrb[77].mxu0 }
 0x1fa   : > { %v3298_v23 = vadd.f32 %v3297_v37, %v3296_v31  ;;  %v6379_v0 = vadd.f32 %v3465_v16, %v3464_v52 }
 0x1fc   : > { %v6382_v40 = vadd.f32 %v3298_v23, %v6320_v56  ;;  %v3299_v36 = vpop.f32.mrb[78].mxu1  ;;  %v3467_v42 = vpop.f32.mrb[78].mxu0 }
 0x1fd   : > { %v3300_v18 = vpop.f32.mrb[79].mxu1  ;;  %v3468_v10 = vpop.f32.mrb[79].mxu0 }
 0x1fe   : > { %v3301_v48 = vadd.f32 %v3300_v18, %v3299_v36  ;;  %v6384_v28 = vadd.f32 %v3468_v10, %v3467_v42 }
 0x200   : > { %v6387_v35 = vadd.f32 %v3301_v48, %v6323_v61  ;;  %v3366_v50 = vpop.f32.mrb[80].mxu1  ;;  %v3470_v21 = vpop.f32.mrb[80].mxu0 }
 0x201   : > { %v3367_v55 = vpop.f32.mrb[81].mxu1  ;;  %v3471_v63 = vpop.f32.mrb[81].mxu0 }
 0x202   : > { %v3368_v11 = vadd.f32 %v3367_v55, %v3366_v50  ;;  %v6389_v3 = vadd.f32 %v3471_v63, %v3470_v21 }
 0x204   : > { %v4139_v56 = vadd.f32 %v3368_v11, %v6326_v26  ;;  %v3369_v14 = vpop.f32.mrb[82].mxu1  ;;  %v3473_v30 = vpop.f32.mrb[82].mxu0 }
 0x205   : > { %v3370_v47 = vpop.f32.mrb[83].mxu1  ;;  %v3474_v32 = vpop.f32.mrb[83].mxu0 }
 0x206   : > { %v3371_v25 = vadd.f32 %v3370_v47, %v3369_v14  ;;  %v6392_v4 = vadd.f32 %v3474_v32, %v3473_v30  ;;  %v6395_v39 = vadd.f32 %v4139_v56, %v6349_v29 }
 0x208   : > { %v4134_v61 = vadd.f32 %v3371_v25, %v6329_v58  ;;  %v3372_v53 = vpop.f32.mrb[84].mxu1  ;;  %v3476_v45 = vpop.f32.mrb[84].mxu0 }
 0x209   : > { %v3373_v34 = vpop.f32.mrb[85].mxu1  ;;  %v3477_v27 = vpop.f32.mrb[85].mxu0 }
 0x20a   : > { %v3374_v13 = vadd.f32 %v3373_v34, %v3372_v53  ;;  %v6398_v22 = vadd.f32 %v3477_v27, %v3476_v45  ;;  %v6401_v26 = vadd.f32 %v4134_v61, %v6354_v38 }
 0x20c   : > { %v4149_v54 = vadd.f32 %v3374_v13, %v6332_v17  ;;  %v3375_v7 = vpop.f32.mrb[86].mxu1  ;;  %v3479_v44 = vpop.f32.mrb[86].mxu0 }
 0x20d   : > { %v3376_v8 = vpop.f32.mrb[87].mxu1  ;;  %v3480_v41 = vpop.f32.mrb[87].mxu0 }
 0x20e   : > { %v3377_v29 = vadd.f32 %v3376_v8, %v3375_v7  ;;  %v6404_v49 = vadd.f32 %v3480_v41, %v3479_v44  ;;  %v6407_v58 = vadd.f32 %v4149_v54, %v6359_v6 }
 0x210   : > { %v4144_v46 = vadd.f32 %v3377_v29, %v6335_v12  ;;  %v3378_v5 = vpop.f32.mrb[88].mxu1  ;;  %v3482_v2 = vpop.f32.mrb[88].mxu0 }
 0x211   : > { %v3379_v31 = vpop.f32.mrb[89].mxu1  ;;  %v3483_v52 = vpop.f32.mrb[89].mxu0 }
 0x212   : > { %v3380_v38 = vadd.f32 %v3379_v31, %v3378_v5  ;;  %v6410_v37 = vadd.f32 %v3483_v52, %v3482_v2  ;;  %v6413_v17 = vadd.f32 %v4144_v46, %v6364_v24 }
 0x214   : > { %v4159_v16 = vadd.f32 %v3380_v38, %v6338_v59  ;;  %v3381_v23 = vpop.f32.mrb[90].mxu1  ;;  %v3485_v36 = vpop.f32.mrb[90].mxu0 }
 0x215   : > { %v3382_v42 = vpop.f32.mrb[91].mxu1  ;;  %v3486_v18 = vpop.f32.mrb[91].mxu0 }
 0x216   : > { %v3383_v6 = vadd.f32 %v3382_v42, %v3381_v23  ;;  %v6416_v10 = vadd.f32 %v3486_v18, %v3485_v36  ;;  %v6419_v12 = vadd.f32 %v4159_v16, %v6369_v15 }
 0x218   : > { %v4154_v48 = vadd.f32 %v3383_v6, %v6341_v62  ;;  %v3384_v50 = vpop.f32.mrb[92].mxu1  ;;  %v3488_v21 = vpop.f32.mrb[92].mxu0 }
 0x219   : > { %v3385_v55 = vpop.f32.mrb[93].mxu1  ;;  %v3489_v63 = vpop.f32.mrb[93].mxu0 }
 0x21a   : > { %v3386_v24 = vadd.f32 %v3385_v55, %v3384_v50  ;;  %v6422_v11 = vadd.f32 %v3489_v63, %v3488_v21  ;;  %v6425_v59 = vadd.f32 %v4154_v48, %v6374_v9 }
 0x21c   : > { %v4169_v56 = vadd.f32 %v3386_v24, %v6344_v33  ;;  %v3387_v14 = vpop.f32.mrb[94].mxu1  ;;  %v3491_v30 = vpop.f32.mrb[94].mxu0 }
 0x21d   : > { %v3388_v47 = vpop.f32.mrb[95].mxu1  ;;  %v3492_v32 = vpop.f32.mrb[95].mxu0 }
 0x21e   : > { %v3389_v15 = vadd.f32 %v3388_v47, %v3387_v14  ;;  %v6428_v25 = vadd.f32 %v3492_v32, %v3491_v30  ;;  %v6431_v62 = vadd.f32 %v4169_v56, %v6379_v0 }
 0x220   : > { %v4164_v61 = vadd.f32 %v3389_v15, %v6347_v1  ;;  %v3390_v53 = vpop.f32.mrb[96].mxu1  ;;  %v3606_v45 = vpop.f32.mrb[96].mxu0 }
 0x221   : > { %v3391_v34 = vpop.f32.mrb[97].mxu1  ;;  %v3607_v27 = vpop.f32.mrb[97].mxu0 }
 0x222   : > { %v3392_v9 = vadd.f32 %v3391_v34, %v3390_v53  ;;  %v6434_v13 = vadd.f32 %v3607_v27, %v3606_v45  ;;  %v6437_v33 = vadd.f32 %v4164_v61, %v6384_v28 }
 0x224   : > { %v4179_v54 = vadd.f32 %v3392_v9, %v6352_v60  ;;  %v3393_v7 = vpop.f32.mrb[98].mxu1  ;;  %v3609_v44 = vpop.f32.mrb[98].mxu0 }
 0x225   : > { %v3394_v8 = vpop.f32.mrb[99].mxu1  ;;  %v3610_v41 = vpop.f32.mrb[99].mxu0 }
 0x226   : > { %v3395_v0 = vadd.f32 %v3394_v8, %v3393_v7  ;;  %v6440_v29 = vadd.f32 %v3610_v41, %v3609_v44  ;;  %v6443_v1 = vadd.f32 %v4179_v54, %v6389_v3 }
 0x228   : > { %v4174_v46 = vadd.f32 %v3395_v0, %v6357_v43  ;;  %v3396_v5 = vpop.f32.mrb[100].mxu1  ;;  %v3612_v2 = vpop.f32.mrb[100].mxu0 }
 0x229   : > { %v3397_v31 = vpop.f32.mrb[101].mxu1  ;;  %v3613_v52 = vpop.f32.mrb[101].mxu0 }
 0x22a   : > { %v3398_v28 = vadd.f32 %v3397_v31, %v3396_v5  ;;  %v6446_v38 = vadd.f32 %v3613_v52, %v3612_v2  ;;  %v6449_v60 = vadd.f32 %v4174_v46, %v6392_v4 }
 0x22c   : > { %v4189_v16 = vadd.f32 %v3398_v28, %v6362_v19  ;;  %v3399_v23 = vpop.f32.mrb[102].mxu1  ;;  %v3615_v36 = vpop.f32.mrb[102].mxu0 }
 0x22d   : > { %v3400_v42 = vpop.f32.mrb[103].mxu1  ;;  %v3616_v18 = vpop.f32.mrb[103].mxu0 }
 0x22e   : > { %v3401_v3 = vadd.f32 %v3400_v42, %v3399_v23  ;;  %v6452_v6 = vadd.f32 %v3616_v18, %v3615_v36  ;;  %v6455_v43 = vadd.f32 %v4189_v16, %v6398_v22 }
 0x230   : > { %v4184_v48 = vadd.f32 %v3401_v3, %v6367_v20  ;;  %v3402_v50 = vpop.f32.mrb[104].mxu1  ;;  %v3618_v21 = vpop.f32.mrb[104].mxu0 }
 0x231   : > { %v3403_v55 = vpop.f32.mrb[105].mxu1  ;;  %v3619_v63 = vpop.f32.mrb[105].mxu0 }
 0x232   : > { %v3404_v4 = vadd.f32 %v3403_v55, %v3402_v50  ;;  %v6458_v24 = vadd.f32 %v3619_v63, %v3618_v21  ;;  %v6461_v19 = vadd.f32 %v4184_v48, %v6404_v49 }
 0x234   : > { %v4199_v56 = vadd.f32 %v3404_v4, %v6372_v51  ;;  %v3405_v14 = vpop.f32.mrb[106].mxu1  ;;  %v3621_v30 = vpop.f32.mrb[106].mxu0 }
 0x235   : > { %v3406_v47 = vpop.f32.mrb[107].mxu1  ;;  %v3622_v32 = vpop.f32.mrb[107].mxu0 }
 0x236   : > { %v3407_v22 = vadd.f32 %v3406_v47, %v3405_v14  ;;  %v6464_v15 = vadd.f32 %v3622_v32, %v3621_v30  ;;  %v6467_v20 = vadd.f32 %v4199_v56, %v6410_v37 }
 0x238   : > { %v4194_v61 = vadd.f32 %v3407_v22, %v6377_v57  ;;  %v3408_v53 = vpop.f32.mrb[108].mxu1  ;;  %v3624_v45 = vpop.f32.mrb[108].mxu0 }
 0x239   : > { %v3409_v34 = vpop.f32.mrb[109].mxu1  ;;  %v3625_v27 = vpop.f32.mrb[109].mxu0 }
 0x23a   : > { %v3410_v49 = vadd.f32 %v3409_v34, %v3408_v53  ;;  %v6470_v9 = vadd.f32 %v3625_v27, %v3624_v45  ;;  %v6473_v51 = vadd.f32 %v4194_v61, %v6416_v10 }
 0x23c   : > { %v4209_v54 = vadd.f32 %v3410_v49, %v6382_v40  ;;  %v3411_v7 = vpop.f32.mrb[110].mxu1  ;;  %v3627_v44 = vpop.f32.mrb[110].mxu0 }
 0x23d   : > { %v3412_v8 = vpop.f32.mrb[111].mxu1  ;;  %v3628_v41 = vpop.f32.mrb[111].mxu0 }
 0x23e   : > { %v3413_v37 = vadd.f32 %v3412_v8, %v3411_v7  ;;  %v6476_v0 = vadd.f32 %v3628_v41, %v3627_v44  ;;  %v6479_v57 = vadd.f32 %v4209_v54, %v6422_v11 }
 0x240   : > { %v4204_v46 = vadd.f32 %v3413_v37, %v6387_v35  ;;  %v3526_v5 = vpop.f32.mrb[112].mxu1  ;;  %v3630_v2 = vpop.f32.mrb[112].mxu0 }
 0x241   : > { %v3527_v31 = vpop.f32.mrb[113].mxu1  ;;  %v3631_v52 = vpop.f32.mrb[113].mxu0 }
 0x242   : > { %v3528_v10 = vadd.f32 %v3527_v31, %v3526_v5  ;;  %v6482_v28 = vadd.f32 %v3631_v52, %v3630_v2  ;;  %v6485_v40 = vadd.f32 %v4204_v46, %v6428_v25 }
 0x244   : > { %v4141_v16 = vadd.f32 %v6395_v39, %v3528_v10  ;;  %v3529_v23 = vpop.f32.mrb[114].mxu1  ;;  %v3633_v36 = vpop.f32.mrb[114].mxu0 }
 0x245   : > { %v3530_v42 = vpop.f32.mrb[115].mxu1  ;;  %v3634_v18 = vpop.f32.mrb[115].mxu0 }
 0x246   : > { %v3531_v11 = vadd.f32 %v3530_v42, %v3529_v23  ;;  %v6488_v3 = vadd.f32 %v3634_v18, %v3633_v36  ;;  %v4142_v35 = vadd.f32 %v4141_v16, %v6434_v13 }
 0x248   : > { %v4136_v48 = vadd.f32 %v6401_v26, %v3531_v11  ;;  %v3532_v50 = vpop.f32.mrb[116].mxu1  ;;  %v3636_v21 = vpop.f32.mrb[116].mxu0 }
 0x249   : > { %v3533_v55 = vpop.f32.mrb[117].mxu1  ;;  %v3637_v63 = vpop.f32.mrb[117].mxu0 }
 0x24a   : > { %v3534_v4 = vadd.f32 %v3533_v55, %v3532_v50  ;;  %v6492_v25 = vadd.f32 %v3637_v63, %v3636_v21  ;;  %v4137_v39 = vadd.f32 %v4136_v48, %v6440_v29 }
 0x24c   : > { %v4151_v56 = vadd.f32 %v6407_v58, %v3534_v4  ;;  %v3535_v14 = vpop.f32.mrb[118].mxu1  ;;  %v3639_v30 = vpop.f32.mrb[118].mxu0 }
 0x24d   : > { %v3536_v47 = vpop.f32.mrb[119].mxu1  ;;  %v3640_v32 = vpop.f32.mrb[119].mxu0 }
 0x24e   : > { %v3537_v22 = vadd.f32 %v3536_v47, %v3535_v14  ;;  %v6496_v61 = vadd.f32 %v3640_v32, %v3639_v30  ;;  %v4152_v26 = vadd.f32 %v4151_v56, %v6446_v38 }
 0x250   : > { %v4146_v13 = vadd.f32 %v6413_v17, %v3537_v22  ;;  %v3538_v53 = vpop.f32.mrb[120].mxu1  ;;  %v3642_v45 = vpop.f32.mrb[120].mxu0 }
 0x251   : > { %v3539_v34 = vpop.f32.mrb[121].mxu1  ;;  %v3643_v27 = vpop.f32.mrb[121].mxu0 }
 0x252   : > { %v3540_v49 = vadd.f32 %v3539_v34, %v3538_v53  ;;  %v6500_v54 = vadd.f32 %v3643_v27, %v3642_v45  ;;  %v4147_v58 = vadd.f32 %v4146_v13, %v6452_v6 }
 0x254   : > { %v4161_v29 = vadd.f32 %v6419_v12, %v3540_v49  ;;  %v3541_v7 = vpop.f32.mrb[122].mxu1  ;;  %v3645_v44 = vpop.f32.mrb[122].mxu0 }
 0x255   : > { %v3542_v8 = vpop.f32.mrb[123].mxu1  ;;  %v3646_v41 = vpop.f32.mrb[123].mxu0 }
 0x256   : > { %v3543_v37 = vadd.f32 %v3542_v8, %v3541_v7  ;;  %v6504_v46 = vadd.f32 %v3646_v41, %v3645_v44  ;;  %v4162_v17 = vadd.f32 %v4161_v29, %v6458_v24 }
 0x258   : > { %v4156_v38 = vadd.f32 %v6425_v59, %v3543_v37  ;;  %v3544_v5 = vpop.f32.mrb[124].mxu1  ;;  %v3648_v2 = vpop.f32.mrb[124].mxu0 }
 0x259   : > { %v3545_v31 = vpop.f32.mrb[125].mxu1  ;;  %v3649_v52 = vpop.f32.mrb[125].mxu0 }
 0x25a   : > { %v3546_v10 = vadd.f32 %v3545_v31, %v3544_v5  ;;  %v6508_v16 = vadd.f32 %v3649_v52, %v3648_v2  ;;  %v4157_v12 = vadd.f32 %v4156_v38, %v6464_v15  ;;  %v6519_v15 = vld [vmem:[%s6590_s4] ss:$0 sm:$0xff] }
 0x25c   : > { %v4171_v6 = vadd.f32 %v6431_v62, %v3546_v10  ;;  %v3547_v23 = vpop.f32.mrb[126].mxu1  ;;  %v3651_v36 = vpop.f32.mrb[126].mxu0 }
 0x25d   : > { %v3548_v42 = vpop.f32.mrb[127].mxu1  ;;  %v3652_v18 = vpop.f32.mrb[127].mxu0 }
 0x25e   : > { %v3549_v11 = vadd.f32 %v3548_v42, %v3547_v23  ;;  %v6512_v48 = vadd.f32 %v3652_v18, %v3651_v36  ;;  %v4172_v59 = vadd.f32 %v4171_v6, %v6470_v9 }
 0x260   : > { %v4166_v24 = vadd.f32 %v6437_v33, %v3549_v11  ;;  %v3550_v50 = vpop.f32.mrb[128].mxu1  ;;  %v3776_v21 = vpop.f32.mrb[48].mxu0 }
 0x261   : > { %v4138_v62 = vadd.f32 %v4137_v39, %v3776_v21  ;;  %v3551_v55 = vpop.f32.mrb[129].mxu1  ;;  %v2625_v63 = vpop.f32.mrb[49].mxu0 }
 0x262   : > { %v3552_v4 = vadd.f32 %v3551_v55, %v3550_v50  ;;  %v4143_v56 = vadd.f32 %v4142_v35, %v2625_v63  ;;  %v4167_v14 = vadd.f32 %v4166_v24, %v6476_v0 }
 0x263   : > { %v2712_v9 = vadd.f32 %v4138_v62, %v6519_v15 }
 0x264   : > { %v4181_v30 = vadd.f32 %v6443_v1, %v3552_v4  ;;  %v2711_v33 = vadd.f32 %v4143_v56, %v6519_v15  ;;  %v3553_v47 = vpop.f32.mrb[130].mxu1  ;;  %v3779_v32 = vpop.f32.mrb[50].mxu0 }
 0x265   : > { %2728 = vst [vmem:[%s4402_s18 + $0x8] sm:$0xff] %v2712_v9  ;;  %v2765_v22 = vmul.f32 %v2712_v9, %v2712_v9  ;;  %v4148_v13 = vadd.f32 %v4147_v58, %v3779_v32  ;;  %v3554_v39 = vpop.f32.mrb[131].mxu1  ;;  %v2635_v53 = vpop.f32.mrb[51].mxu0 }
 0x266   : > { %2727 = vst [vmem:[%s4402_s18] sm:$0xff] %v2711_v33  ;;  %v2743_v45 = vadd.f32 %v2712_v9, %v2711_v33  ;;  %v2764_v35 = vmul.f32 %v2711_v33, %v2711_v33  ;;  %v3555_v34 = vadd.f32 %v3554_v39, %v3553_v47  ;;  %v4153_v0 = vadd.f32 %v4152_v26, %v2635_v53 }
 0x267   : > { %v2714_v27 = vadd.f32 %v4148_v13, %v6519_v15  ;;  %v4182_v1 = vadd.f32 %v4181_v30, %v6482_v28 }
 0x268   : > { %v2780_v49 = vadd.f32 %v2765_v22, %v2764_v35  ;;  %v4176_v29 = vadd.f32 %v6449_v60, %v3555_v34  ;;  %v2713_v7 = vadd.f32 %v4153_v0, %v6519_v15  ;;  %v3556_v44 = vpop.f32.mrb[132].mxu1  ;;  %v3782_v8 = vpop.f32.mrb[52].mxu0 }
 0x269   : > { %2730 = vst [vmem:[%s4402_s18 + $0x18] sm:$0xff] %v2714_v27  ;;  %v4158_v58 = vadd.f32 %v4157_v12, %v3782_v8  ;;  %v3557_v41 = vpop.f32.mrb[133].mxu1  ;;  %v2645_v37 = vpop.f32.mrb[53].mxu0  ;;  %v2767_v31 = vmul.f32 %v2714_v27, %v2714_v27 }
 0x26a   : > { %2729 = vst [vmem:[%s4402_s18 + $0x10] sm:$0xff] %v2713_v7  ;;  %v2744_v38 = vadd.f32 %v2743_v45, %v2713_v7  ;;  %v2766_v5 = vmul.f32 %v2713_v7, %v2713_v7  ;;  %v3558_v26 = vadd.f32 %v3557_v41, %v3556_v44  ;;  %v4163_v2 = vadd.f32 %v4162_v17, %v2645_v37 }
 0x26b   : > { %v2716_v28 = vadd.f32 %v4158_v58, %v6519_v15  ;;  %v4177_v60 = vadd.f32 %v4176_v29, %v6488_v3 }
 0x26c   : > { %v2781_v52 = vadd.f32 %v2780_v49, %v2766_v5  ;;  %v4191_v10 = vadd.f32 %v6455_v43, %v3558_v26  ;;  %v2715_v6 = vadd.f32 %v4163_v2, %v6519_v15  ;;  %v2745_v12 = vadd.f32 %v2744_v38, %v2714_v27  ;;  %v3559_v23 = vpop.f32.mrb[134].mxu1  ;;  %v3785_v36 = vpop.f32.mrb[54].mxu0 }
 0x26d   : > { %2732 = vst [vmem:[%s4402_s18 + $0x28] sm:$0xff] %v2716_v28  ;;  %v4168_v42 = vadd.f32 %v4167_v14, %v3785_v36  ;;  %v3560_v18 = vpop.f32.mrb[135].mxu1  ;;  %v2655_v11 = vpop.f32.mrb[55].mxu0  ;;  %v2769_v55 = vmul.f32 %v2716_v28, %v2716_v28 }
 0x26e   : > { %2731 = vst [vmem:[%s4402_s18 + $0x20] sm:$0xff] %v2715_v6  ;;  %v2746_v17 = vadd.f32 %v2745_v12, %v2715_v6  ;;  %v2768_v24 = vmul.f32 %v2715_v6, %v2715_v6  ;;  %v2782_v50 = vadd.f32 %v2781_v52, %v2767_v31  ;;  %v3561_v21 = vadd.f32 %v3560_v18, %v3559_v23 }
 0x26f   : > { %v2718_v3 = vadd.f32 %v4168_v42, %v6519_v15  ;;  %v4173_v62 = vadd.f32 %v4172_v59, %v2655_v11  ;;  %v4192_v43 = vadd.f32 %v4191_v10, %v6492_v25 }
 0x270   : > { %v2783_v63 = vadd.f32 %v2782_v50, %v2768_v24  ;;  %v4186_v4 = vadd.f32 %v6461_v19, %v3561_v21  ;;  %v2747_v56 = vadd.f32 %v2746_v17, %v2716_v28  ;;  %v3562_v14 = vpop.f32.mrb[136].mxu1  ;;  %v3788_v9 = vpop.f32.mrb[56].mxu0 }
 0x271   : > { %2734 = vst [vmem:[%s4402_s18 + $0x38] sm:$0xff] %v2718_v3  ;;  %v2717_v30 = vadd.f32 %v4173_v62, %v6519_v15  ;;  %v4178_v33 = vadd.f32 %v4177_v60, %v3788_v9  ;;  %v3563_v47 = vpop.f32.mrb[137].mxu1  ;;  %v2665_v32 = vpop.f32.mrb[57].mxu0  ;;  %v2771_v27 = vmul.f32 %v2718_v3, %v2718_v3 }
 0x272   : > { %v2784_v22 = vadd.f32 %v2783_v63, %v2769_v55  ;;  %v3564_v13 = vadd.f32 %v3563_v47, %v3562_v14  ;;  %v4183_v59 = vadd.f32 %v4182_v1, %v2665_v32  ;;  %v4187_v25 = vadd.f32 %v4186_v4, %v6496_v61 }
 0x273   : > { %2733 = vst [vmem:[%s4402_s18 + $0x30] sm:$0xff] %v2717_v30  ;;  %v2748_v39 = vadd.f32 %v2747_v56, %v2717_v30  ;;  %v2770_v53 = vmul.f32 %v2717_v30, %v2717_v30  ;;  %v2720_v19 = vadd.f32 %v4178_v33, %v6519_v15 }
 0x274   : > { %v4201_v45 = vadd.f32 %v6467_v20, %v3564_v13  ;;  %v2719_v35 = vadd.f32 %v4183_v59, %v6519_v15  ;;  %v3565_v34 = vpop.f32.mrb[138].mxu1  ;;  %v3791_v0 = vpop.f32.mrb[58].mxu0 }
 0x275   : > { %v2785_v49 = vadd.f32 %v2784_v22, %v2770_v53  ;;  %2736 = vst [vmem:[%s4402_s18 + $0x48] sm:$0xff] %v2720_v19  ;;  %v2749_v29 = vadd.f32 %v2748_v39, %v2718_v3  ;;  %v4188_v7 = vadd.f32 %v4187_v25, %v3791_v0  ;;  %v3566_v1 = vpop.f32.mrb[139].mxu1  ;;  %v2675_v61 = vpop.f32.mrb[59].mxu0  ;;  %v2773_v28 = vmul.f32 %v2720_v19, %v2720_v19 }
 0x276   : > { %2735 = vst [vmem:[%s4402_s18 + $0x40] sm:$0xff] %v2719_v35  ;;  %v2772_v44 = vmul.f32 %v2719_v35, %v2719_v35  ;;  %v3567_v8 = vadd.f32 %v3566_v1, %v3565_v34  ;;  %v4193_v58 = vadd.f32 %v4192_v43, %v2675_v61  ;;  %v4202_v41 = vadd.f32 %v4201_v45, %v6500_v54 }
 0x277   : > { %v2750_v20 = vadd.f32 %v2749_v29, %v2719_v35  ;;  %v2786_v37 = vadd.f32 %v2785_v49, %v2771_v27  ;;  %v2722_v38 = vadd.f32 %v4188_v7, %v6519_v15 }
 0x278   : > { %v4196_v5 = vadd.f32 %v6473_v51, %v3567_v8  ;;  %v2721_v26 = vadd.f32 %v4193_v58, %v6519_v15  ;;  %v3568_v2 = vpop.f32.mrb[140].mxu1  ;;  %v3794_v31 = vpop.f32.mrb[60].mxu0 }
 0x279   : > { %v2787_v60 = vadd.f32 %v2786_v37, %v2772_v44  ;;  %2738 = vst [vmem:[%s4402_s18 + $0x58] sm:$0xff] %v2722_v38  ;;  %v2751_v52 = vadd.f32 %v2750_v20, %v2720_v19  ;;  %v3569_v10 = vpop.f32.mrb[141].mxu1  ;;  %v2685_v6 = vpop.f32.mrb[61].mxu0  ;;  %v2775_v21 = vmul.f32 %v2722_v38, %v2722_v38 }
 0x27a   : > { %2737 = vst [vmem:[%s4402_s18 + $0x50] sm:$0xff] %v2721_v26  ;;  %v2774_v12 = vmul.f32 %v2721_v26, %v2721_v26  ;;  %v4197_v54 = vadd.f32 %v4196_v5, %v6504_v46  ;;  %v3570_v23 = vadd.f32 %v3569_v10, %v3568_v2  ;;  %v4203_v36 = vadd.f32 %v4202_v41, %v2685_v6 }
 0x27b   : > { %v2752_v42 = vadd.f32 %v2751_v52, %v2721_v26  ;;  %v2788_v18 = vadd.f32 %v2787_v60, %v2773_v28 }
 0x27c   : > { %v4198_v51 = vadd.f32 %v4197_v54, %v3794_v31  ;;  %v4211_v11 = vadd.f32 %v6479_v57, %v3570_v23  ;;  %v2723_v17 = vadd.f32 %v4203_v36, %v6519_v15  ;;  %v3571_v24 = vpop.f32.mrb[142].mxu1  ;;  %v3797_v50 = vpop.f32.mrb[62].mxu0 }
 0x27d   : > { %v2789_v3 = vadd.f32 %v2788_v18, %v2774_v12  ;;  %v2753_v62 = vadd.f32 %v2752_v42, %v2722_v38  ;;  %v3572_v43 = vpop.f32.mrb[143].mxu1  ;;  %v2695_v55 = vpop.f32.mrb[63].mxu0 }
 0x27e   : > { %v2724_v46 = vadd.f32 %v4198_v51, %v6519_v15  ;;  %2739 = vst [vmem:[%s4402_s18 + $0x60] sm:$0xff] %v2723_v17  ;;  %v2776_v63 = vmul.f32 %v2723_v17, %v2723_v17  ;;  %v3573_v4 = vadd.f32 %v3572_v43, %v3571_v24  ;;  %v4212_v56 = vadd.f32 %v4211_v11, %v6508_v16 }
 0x27f   : > { %v2754_v14 = vadd.f32 %v2753_v62, %v2723_v17  ;;  %v2790_v57 = vadd.f32 %v2789_v3, %v2775_v21 }
 0x280   : > { %2740 = vst [vmem:[%s4402_s18 + $0x68] sm:$0xff] %v2724_v46  ;;  %v2777_v9 = vmul.f32 %v2724_v46, %v2724_v46  ;;  %v4206_v30 = vadd.f32 %v6485_v40, %v3573_v4  ;;  %v4213_v33 = vadd.f32 %v4212_v56, %v2695_v55 }
 0x281   : > { %v2791_v47 = vadd.f32 %v2790_v57, %v2776_v63  ;;  %v2755_v32 = vadd.f32 %v2754_v14, %v2724_v46 }
 0x282   : > { %v4207_v22 = vadd.f32 %v4206_v30, %v6512_v48  ;;  %v2725_v13 = vadd.f32 %v4213_v33, %v6519_v15 }
 0x283   : > { %v2792_v59 = vadd.f32 %v2791_v47, %v2777_v9 }
 0x284   : > { %v4208_v25 = vadd.f32 %v4207_v22, %v3797_v50  ;;  %2741 = vst [vmem:[%s4402_s18 + $0x70] sm:$0xff] %v2725_v13  ;;  %v2756_v39 = vadd.f32 %v2755_v32, %v2725_v13  ;;  %v2778_v53 = vmul.f32 %v2725_v13, %v2725_v13 }
 0x286   : > { %v2726_v16 = vadd.f32 %v4208_v25, %v6519_v15  ;;  %v2793_v19 = vadd.f32 %v2792_v59, %v2778_v53 }
 0x288   : > { %2742 = vst [vmem:[%s4402_s18 + $0x78] sm:$0xff] %v2726_v16  ;;  %v2757_v45 = vadd.f32 %v2756_v39, %v2726_v16  ;;  %v2779_v35 = vmul.f32 %v2726_v16, %v2726_v16 }
 0x28a   : > { %v2758_v34 = vrot.slane %v2757_v45, 4  ;;  %v2794_v40 = vadd.f32 %v2793_v19, %v2779_v35 }
 0x28c   : > { %v2759_v0 = vadd.f32 %v2758_v34, %v2757_v45  ;;  %v2795_v27 = vrot.slane %v2794_v40, 4 }
 0x28e   : > { %v2760_v49 = vrot.slane %v2759_v0, 2  ;;  %v2796_v48 = vadd.f32 %v2795_v27, %v2794_v40 }
 0x290   : > { %v2761_v29 = vadd.f32 %v2760_v49, %v2759_v0  ;;  %v2797_v7 = vrot.slane %v2796_v48, 2 }
 0x292   : > { %v2762_v1 = vrot.slane %v2761_v29, 1  ;;  %v2798_v61 = vadd.f32 %v2797_v7, %v2796_v48 }
 0x294   : > { %v2799_v44 = vrot.slane %v2798_v61, 1  ;;  %v2763_v8 = vadd.f32 %v2762_v1, %v2761_v29 }
 0x296   : > { %v2800_v58 = vadd.f32 %v2799_v44, %v2798_v61 }
 0x298   : > { %v2802_v15 = vsel %vm2801_vm2, %v2763_v8, %v2800_v58 }
 0x299   : > { %v2804_v41 = vsel %vm2803_vm3, %v2802_v15, 0.0 }
 0x29a   : > { %2805 = vst [vmem:[%s4408_s26] sm:$0xff] %v2804_v41 }
 0x29b PF: > { %s17_s25 = sadd.s32 1, %s4317_s25   ;;  %s6597_s18 = sld [smem:[#allocation4_spill]] }
 0x29c   : > { %p14_p9 = scmp.ge.s32.totalorder %s17_s25, 6   ;;  %s6598_s7 = sld [smem:[#allocation5_spill]] }
 0x29d   : > { %s6599_s21 = smov %s4309_s23  ;;  %s6600_s22 = smov %s4313_s24 }
 0x29e   :  { %16 = sbr.rel (!%p14_p9) target bundleno = 3 (0x3), region = 93 }
 0x2a1   : > { %s6601_s23 = smov %s6597_s18 }
 0x2a2   : > { %s6602_s24 = smov %s6598_s7 }

</bundles_post_ra>
